<compile_context>
chip_gen: v7x
topology: tpu7x:2x2x1
jax: 0.10.0
libtpu: 0.0.40
codegen_flags: <defaults>
</compile_context>

<pallas_src>
import math

import jax
import jax.numpy as jnp
from jax.experimental import pallas as pl
from jax.experimental.pallas import tpu as pltpu

SEQ_LEN = 50                  # FilterLayer.max_seq_len (fixed by complex_weight)
HIDDEN = 64                   # FilterLayer / Intermediate hidden size
FREQ = SEQ_LEN // 2 + 1
EPS = 1e-12
_HP = jax.lax.Precision.HIGHEST   # only used by the pure-JAX reference


def _layernorm(v, g, b):
    u = jnp.mean(v, axis=-1, keepdims=True)
    c = v - u
    s = jnp.mean(c * c, axis=-1, keepdims=True)
    return g * (c * jax.lax.rsqrt(s + EPS)) + b


def _layer_kernel(x_ref, fwdc_ref, fwds_ref, invc_ref, invs_ref,
                  wr_ref, wi_ref, g1_ref, be1_ref,
                  w1_ref, b1_ref, w2_ref, b2_ref,
                  g2_ref, be2_ref, out_ref):
    x = x_ref[...]                               # (Bt*N, H) f32, Bt seqs stacked
    xb = x.astype(jnp.bfloat16)                  # MXU operand only

    # --- FilterLayer: block-diag real rfft (ortho) -> complex filter -> irfft.
    # DEFAULT precision: single-pass bf16 MXU, f32 accumulation.
    xr = jnp.dot(fwdc_ref[...], xb, preferred_element_type=jnp.float32)  # (Bt*F, H)
    xi = jnp.dot(fwds_ref[...], xb, preferred_element_type=jnp.float32)  # (Bt*F, H)
    wr = wr_ref[...]
    wi = wi_ref[...]
    yr = (xr * wr - xi * wi).astype(jnp.bfloat16)    # filter multiply in f32
    yi = (xr * wi + xi * wr).astype(jnp.bfloat16)
    y = (jnp.dot(invc_ref[...], yr, preferred_element_type=jnp.float32)
         + jnp.dot(invs_ref[...], yi, preferred_element_type=jnp.float32))  # (Bt*N, H)
    # out_dropout(p=0.2) is identity in eval mode
    h = _layernorm(y + x, g1_ref[...], be1_ref[...])                        # (Bt*N, H)

    # --- Intermediate: Linear(H,4H) -> exact erf-GELU -> Linear(4H,H) -> LN ---
    t = jnp.dot(h.astype(jnp.bfloat16), w1_ref[...],
                preferred_element_type=jnp.float32) + b1_ref[...]           # (Bt*N, 4H)
    t = t * 0.5 * (1.0 + jax.lax.erf(t * (1.0 / math.sqrt(2.0))))           # f32 GELU
    o = jnp.dot(t.astype(jnp.bfloat16), w2_ref[...],
                preferred_element_type=jnp.float32) + b2_ref[...]           # (Bt*N, H)
    # dropout(p=0.2) is identity in eval mode
    out_ref[...] = _layernorm(o + h, g2_ref[...], be2_ref[...])


def make_dft_matrices(n):
    """Real matrices implementing rfft/irfft with norm='ortho' along an axis of size n."""
    f = n // 2 + 1
    t = jnp.arange(n, dtype=jnp.float32)
    k = jnp.arange(f, dtype=jnp.float32)
    ang = 2.0 * jnp.pi * k[:, None] * t[None, :] / n              # (F, N)
    inv_sqrt_n = 1.0 / jnp.sqrt(jnp.float32(n))
    c_fwd = jnp.cos(ang) * inv_sqrt_n                             # (F, N)
    s_fwd = -jnp.sin(ang) * inv_sqrt_n                            # (F, N)
    # reconstruction weights: 1 for DC and Nyquist, 2 otherwise
    cf = jnp.where((k == 0) | (k == n // 2), 1.0, 2.0)
    c_inv = (jnp.cos(ang) * cf[:, None]).T * inv_sqrt_n           # (N, F)
    s_inv = (-jnp.sin(ang) * cf[:, None]).T * inv_sqrt_n          # (N, F)
    return c_fwd, s_fwd, c_inv, s_inv


def _block_diag_dft(n, bt):
    """Split block-diagonal DFT matrices (cos/sin) for bt independent sequences."""
    c_fwd, s_fwd, c_inv, s_inv = make_dft_matrices(n)
    eye = jnp.eye(bt, dtype=jnp.float32)
    fwd_c = jnp.kron(eye, c_fwd)       # (bt*F, bt*N)
    fwd_s = jnp.kron(eye, s_fwd)       # (bt*F, bt*N)
    inv_c = jnp.kron(eye, c_inv)       # (bt*N, bt*F)
    inv_s = jnp.kron(eye, s_inv)       # (bt*N, bt*F)
    return fwd_c, fwd_s, inv_c, inv_s


def _pick_bt(batch):
    """Batch tile: multiple of 4 (so bt*50 % 8 == 0) dividing B.

    Preference order: (1) grid = B//bt even and >= 2 (keeps both v7x
    TensorCores busy under dimension_semantics=('parallel',)); (2) grid >= 2;
    (3) bt == 8 (M = 400 rows feeds the 256-wide MXU without blowing up the
    O(bt^2) zero padding of the block-diagonal DFT).
    """
    candidates = (8, 16, 4, 12)
    divisors = [bt for bt in candidates if batch % bt == 0]
    if not divisors:
        # Fallback: single full-array block (correct, but no grid parallelism).
        return batch

    def score(bt):
        g = batch // bt
        return (g >= 2 and g % 2 == 0, g >= 2, bt == 8, -bt)

    return max(divisors, key=score)


def init_params(key):
    ks = jax.random.split(key, 5)
    cw = jax.random.normal(ks[0], (FREQ, HIDDEN, 2), jnp.float32) * 0.02
    return dict(
        wr=cw[..., 0], wi=cw[..., 1],
        g1=jnp.ones((1, HIDDEN), jnp.float32),
        be1=jnp.zeros((1, HIDDEN), jnp.float32),
        w1=jax.random.normal(ks[1], (HIDDEN, 4 * HIDDEN), jnp.float32) * 0.02,
        b1=jax.random.normal(ks[2], (1, 4 * HIDDEN), jnp.float32) * 0.02,
        w2=jax.random.normal(ks[3], (4 * HIDDEN, HIDDEN), jnp.float32) * 0.02,
        b2=jax.random.normal(ks[4], (1, HIDDEN), jnp.float32) * 0.02,
        g2=jnp.ones((1, HIDDEN), jnp.float32),
        be2=jnp.zeros((1, HIDDEN), jnp.float32),
    )


@jax.jit
def fmlprec_layer(hidden_states, attention_mask, params):
    # attention_mask kept for API parity; Layer.forward never uses attention.
    del attention_mask
    B, N, H = hidden_states.shape
    assert N == SEQ_LEN and H == HIDDEN
    bt = _pick_bt(B)
    assert B % bt == 0
    grid = B // bt

    # Constants below are constant-folded under jit.
    fwd_c, fwd_s, inv_c, inv_s = _block_diag_dft(N, bt)
    # MXU-only operands -> bf16 (halves their DMA / VMEM footprint).
    fwd_c = fwd_c.astype(jnp.bfloat16)
    fwd_s = fwd_s.astype(jnp.bfloat16)
    inv_c = inv_c.astype(jnp.bfloat16)
    inv_s = inv_s.astype(jnp.bfloat16)
    w1 = params["w1"].astype(jnp.bfloat16)
    w2 = params["w2"].astype(jnp.bfloat16)
    # Filter weights stay f32 (elementwise multiply, tiny DMA).
    wr_t = jnp.tile(params["wr"], (bt, 1))           # (bt*F, H)
    wi_t = jnp.tile(params["wi"], (bt, 1))
    x2d = hidden_states.reshape(B * N, H)             # free reshape

    def full(a):
        return pl.BlockSpec(a.shape, lambda i: (0,) * a.ndim)

    ops = [fwd_c, fwd_s, inv_c, inv_s, wr_t, wi_t,
           params["g1"], params["be1"],
           w1, params["b1"], w2, params["b2"],
           params["g2"], params["be2"]]

    # TODO(synk): optional lane-dense output store (view output as (B*N/2, 128))
    # left out; kernel is MXU-bound at current sizes so 64-wide stores are fine.
    out2d = pl.pallas_call(
        _layer_kernel,
        out_shape=jax.ShapeDtypeStruct((B * N, H), jnp.float32),
        grid_spec=pltpu.PrefetchScalarGridSpec(
            num_scalar_prefetch=0,
            grid=(grid,),
            in_specs=[pl.BlockSpec((bt * N, H), lambda i: (i, 0))]
                     + [full(a) for a in ops],
            out_specs=pl.BlockSpec((bt * N, H), lambda i: (i, 0)),
        ),
        compiler_params=pltpu.CompilerParams(
            dimension_semantics=("parallel",)),        # shards grid over v7x's 2 TCs
    )(x2d, *ops)
    return out2d.reshape(B, N, H)


def reference(x, params):
    """Pure-JAX f32 reference matching the PyTorch forward (eval mode)."""
    w = params["wr"] + 1j * params["wi"]
    xf = jnp.fft.rfft(x, axis=1, norm="ortho") * w[None]
    y = jnp.fft.irfft(xf, n=x.shape[1], axis=1, norm="ortho")
    h = _layernorm(y + x, params["g1"], params["be1"])
    t = jnp.dot(h, params["w1"], precision=_HP) + params["b1"]
    t = t * 0.5 * (1.0 + jax.scipy.special.erf(t / jnp.sqrt(2.0)))
    o = jnp.dot(t, params["w2"], precision=_HP) + params["b2"]
    return _layernorm(o + h, params["g2"], params["be2"])


if __name__ == "__main__":
    key = jax.random.PRNGKey(0)
    k_x, k_p = jax.random.split(key)
    B = 16                                   # -> bt=8, grid=2 (even, both TCs busy)
    x = jax.random.normal(k_x, (B, SEQ_LEN, HIDDEN), jnp.float32)
    attention_mask = jnp.zeros((B, 1, SEQ_LEN, SEQ_LEN), jnp.float32)  # unused
    params = init_params(k_p)

    out = fmlprec_layer(x, attention_mask, params)
    out = jax.block_until_ready(out)

    ref = reference(x, params)
    assert out.shape == (B, SEQ_LEN, HIDDEN)
    max_err = float(jnp.max(jnp.abs(out - ref)))
    # All matmuls (DFT + MLP) now run single-pass bf16 on the MXU with f32
    # accumulation, so allow a slightly looser tolerance vs the pure-f32
    # reference than the previous (HIGHEST-precision DFT) version.
    assert jnp.allclose(out, ref, atol=3e-3, rtol=3e-3), max_err
    print("KERNEL_OK")
</pallas_src>

<mosaic_0001>
module attributes {stable_mosaic.version = 11 : i64} {
  func.func @_layer_kernel(%arg0: i32, %arg1: memref<400x64xf32, #tpu.memory_space<vmem>>, %arg2: memref<208x400xbf16, #tpu.memory_space<vmem>>, %arg3: memref<208x400xbf16, #tpu.memory_space<vmem>>, %arg4: memref<400x208xbf16, #tpu.memory_space<vmem>>, %arg5: memref<400x208xbf16, #tpu.memory_space<vmem>>, %arg6: memref<208x64xf32, #tpu.memory_space<vmem>>, %arg7: memref<208x64xf32, #tpu.memory_space<vmem>>, %arg8: memref<1x64xf32, #tpu.memory_space<vmem>>, %arg9: memref<1x64xf32, #tpu.memory_space<vmem>>, %arg10: memref<64x256xbf16, #tpu.memory_space<vmem>>, %arg11: memref<1x256xf32, #tpu.memory_space<vmem>>, %arg12: memref<256x64xbf16, #tpu.memory_space<vmem>>, %arg13: memref<1x64xf32, #tpu.memory_space<vmem>>, %arg14: memref<1x64xf32, #tpu.memory_space<vmem>>, %arg15: memref<1x64xf32, #tpu.memory_space<vmem>>, %arg16: memref<400x64xf32, #tpu.memory_space<vmem>>) attributes {dimension_semantics = [#tpu.dimension_semantics<parallel>], iteration_bounds = array<i64: 2>, scalar_prefetch = 0 : i64, scratch_operands = 0 : i64, tpu.core_type = #tpu.core_type<tc>, window_params = [{transform_indices = @transform_0, window_bounds = array<i64: 400, 64>}, {pipeline_mode = #tpu.pipeline_mode<synchronous>, transform_indices = @transform_1, window_bounds = array<i64: 208, 400>}, {pipeline_mode = #tpu.pipeline_mode<synchronous>, transform_indices = @transform_2, window_bounds = array<i64: 208, 400>}, {pipeline_mode = #tpu.pipeline_mode<synchronous>, transform_indices = @transform_3, window_bounds = array<i64: 400, 208>}, {pipeline_mode = #tpu.pipeline_mode<synchronous>, transform_indices = @transform_4, window_bounds = array<i64: 400, 208>}, {pipeline_mode = #tpu.pipeline_mode<synchronous>, transform_indices = @transform_5, window_bounds = array<i64: 208, 64>}, {pipeline_mode = #tpu.pipeline_mode<synchronous>, transform_indices = @transform_6, window_bounds = array<i64: 208, 64>}, {pipeline_mode = #tpu.pipeline_mode<synchronous>, transform_indices = @transform_7, window_bounds = array<i64: 1, 64>}, {pipeline_mode = #tpu.pipeline_mode<synchronous>, transform_indices = @transform_8, window_bounds = array<i64: 1, 64>}, {pipeline_mode = #tpu.pipeline_mode<synchronous>, transform_indices = @transform_9, window_bounds = array<i64: 64, 256>}, {pipeline_mode = #tpu.pipeline_mode<synchronous>, transform_indices = @transform_10, window_bounds = array<i64: 1, 256>}, {pipeline_mode = #tpu.pipeline_mode<synchronous>, transform_indices = @transform_11, window_bounds = array<i64: 256, 64>}, {pipeline_mode = #tpu.pipeline_mode<synchronous>, transform_indices = @transform_12, window_bounds = array<i64: 1, 64>}, {pipeline_mode = #tpu.pipeline_mode<synchronous>, transform_indices = @transform_13, window_bounds = array<i64: 1, 64>}, {pipeline_mode = #tpu.pipeline_mode<synchronous>, transform_indices = @transform_14, window_bounds = array<i64: 1, 64>}, {transform_indices = @transform_15, window_bounds = array<i64: 400, 64>}]} {
    %c0 = arith.constant 0 : index
    %c0_0 = arith.constant 0 : index
    %0 = vector.load %arg1[%c0, %c0_0] : memref<400x64xf32, #tpu.memory_space<vmem>>, vector<400x64xf32>
    %1 = arith.truncf %0 : vector<400x64xf32> to vector<400x64xbf16>
    %c0_1 = arith.constant 0 : index
    %c0_2 = arith.constant 0 : index
    %2 = vector.load %arg2[%c0_1, %c0_2] : memref<208x400xbf16, #tpu.memory_space<vmem>>, vector<208x400xbf16>
    %cst = arith.constant dense<0.000000e+00> : vector<208x64xf32>
    %3 = tpu.matmul %2, %1, %cst {dimension_numbers = #tpu.dot_dimension_numbers<[1], [0], [0], [1], [0, 0, 1, 1], [], []>} : vector<208x400xbf16>, vector<400x64xbf16>, vector<208x64xf32> -> vector<208x64xf32>
    %c0_3 = arith.constant 0 : index
    %c0_4 = arith.constant 0 : index
    %4 = vector.load %arg3[%c0_3, %c0_4] : memref<208x400xbf16, #tpu.memory_space<vmem>>, vector<208x400xbf16>
    %cst_5 = arith.constant dense<0.000000e+00> : vector<208x64xf32>
    %5 = tpu.matmul %4, %1, %cst_5 {dimension_numbers = #tpu.dot_dimension_numbers<[1], [0], [0], [1], [0, 0, 1, 1], [], []>} : vector<208x400xbf16>, vector<400x64xbf16>, vector<208x64xf32> -> vector<208x64xf32>
    %c0_6 = arith.constant 0 : index
    %c0_7 = arith.constant 0 : index
    %6 = vector.load %arg6[%c0_6, %c0_7] : memref<208x64xf32, #tpu.memory_space<vmem>>, vector<208x64xf32>
    %c0_8 = arith.constant 0 : index
    %c0_9 = arith.constant 0 : index
    %7 = vector.load %arg7[%c0_8, %c0_9] : memref<208x64xf32, #tpu.memory_space<vmem>>, vector<208x64xf32>
    %8 = arith.mulf %3, %6 : vector<208x64xf32>
    %9 = arith.mulf %5, %7 : vector<208x64xf32>
    %10 = arith.subf %8, %9 : vector<208x64xf32>
    %11 = arith.truncf %10 : vector<208x64xf32> to vector<208x64xbf16>
    %12 = arith.mulf %3, %7 : vector<208x64xf32>
    %13 = arith.mulf %5, %6 : vector<208x64xf32>
    %14 = arith.addf %12, %13 : vector<208x64xf32>
    %15 = arith.truncf %14 : vector<208x64xf32> to vector<208x64xbf16>
    %c0_10 = arith.constant 0 : index
    %c0_11 = arith.constant 0 : index
    %16 = vector.load %arg4[%c0_10, %c0_11] : memref<400x208xbf16, #tpu.memory_space<vmem>>, vector<400x208xbf16>
    %cst_12 = arith.constant dense<0.000000e+00> : vector<400x64xf32>
    %17 = tpu.matmul %16, %11, %cst_12 {dimension_numbers = #tpu.dot_dimension_numbers<[1], [0], [0], [1], [0, 0, 1, 1], [], []>} : vector<400x208xbf16>, vector<208x64xbf16>, vector<400x64xf32> -> vector<400x64xf32>
    %c0_13 = arith.constant 0 : index
    %c0_14 = arith.constant 0 : index
    %18 = vector.load %arg5[%c0_13, %c0_14] : memref<400x208xbf16, #tpu.memory_space<vmem>>, vector<400x208xbf16>
    %cst_15 = arith.constant dense<0.000000e+00> : vector<400x64xf32>
    %19 = tpu.matmul %18, %15, %cst_15 {dimension_numbers = #tpu.dot_dimension_numbers<[1], [0], [0], [1], [0, 0, 1, 1], [], []>} : vector<400x208xbf16>, vector<208x64xbf16>, vector<400x64xf32> -> vector<400x64xf32>
    %20 = arith.addf %17, %19 : vector<400x64xf32>
    %21 = arith.addf %20, %0 : vector<400x64xf32>
    %c0_16 = arith.constant 0 : index
    %c0_17 = arith.constant 0 : index
    %22 = vector.load %arg8[%c0_16, %c0_17] : memref<1x64xf32, #tpu.memory_space<vmem>>, vector<1x64xf32>
    %c0_18 = arith.constant 0 : index
    %c0_19 = arith.constant 0 : index
    %23 = vector.load %arg9[%c0_18, %c0_19] : memref<1x64xf32, #tpu.memory_space<vmem>>, vector<1x64xf32>
    %cst_20 = arith.constant dense<0.000000e+00> : vector<400xf32>
    %24 = vector.multi_reduction <add>, %21, %cst_20 [1] : vector<400x64xf32> to vector<400xf32>
    %25 = vector.shape_cast %24 : vector<400xf32> to vector<400x1xf32>
    %cst_21 = arith.constant 6.400000e+01 : f32
    %26 = vector.broadcast %cst_21 : f32 to vector<400x1xf32>
    %27 = arith.divf %25, %26 : vector<400x1xf32>
    %28 = vector.broadcast %27 : vector<400x1xf32> to vector<400x64xf32>
    %29 = arith.subf %21, %28 : vector<400x64xf32>
    %30 = arith.mulf %29, %29 : vector<400x64xf32>
    %cst_22 = arith.constant dense<0.000000e+00> : vector<400xf32>
    %31 = vector.multi_reduction <add>, %30, %cst_22 [1] : vector<400x64xf32> to vector<400xf32>
    %32 = vector.shape_cast %31 : vector<400xf32> to vector<400x1xf32>
    %cst_23 = arith.constant 6.400000e+01 : f32
    %33 = vector.broadcast %cst_23 : f32 to vector<400x1xf32>
    %34 = arith.divf %32, %33 : vector<400x1xf32>
    %cst_24 = arith.constant 9.99999996E-13 : f32
    %35 = vector.broadcast %cst_24 : f32 to vector<400x1xf32>
    %36 = arith.addf %34, %35 : vector<400x1xf32>
    %37 = math.rsqrt %36 : vector<400x1xf32>
    %38 = vector.broadcast %37 : vector<400x1xf32> to vector<400x64xf32>
    %39 = arith.mulf %29, %38 : vector<400x64xf32>
    %40 = vector.broadcast %22 : vector<1x64xf32> to vector<400x64xf32>
    %41 = arith.mulf %40, %39 : vector<400x64xf32>
    %42 = vector.broadcast %23 : vector<1x64xf32> to vector<400x64xf32>
    %43 = arith.addf %41, %42 : vector<400x64xf32>
    %44 = arith.truncf %43 : vector<400x64xf32> to vector<400x64xbf16>
    %c0_25 = arith.constant 0 : index
    %c0_26 = arith.constant 0 : index
    %45 = vector.load %arg10[%c0_25, %c0_26] : memref<64x256xbf16, #tpu.memory_space<vmem>>, vector<64x256xbf16>
    %cst_27 = arith.constant dense<0.000000e+00> : vector<400x256xf32>
    %46 = tpu.matmul %44, %45, %cst_27 {dimension_numbers = #tpu.dot_dimension_numbers<[1], [0], [0], [1], [0, 0, 1, 1], [], []>} : vector<400x64xbf16>, vector<64x256xbf16>, vector<400x256xf32> -> vector<400x256xf32>
    %c0_28 = arith.constant 0 : index
    %c0_29 = arith.constant 0 : index
    %47 = vector.load %arg11[%c0_28, %c0_29] : memref<1x256xf32, #tpu.memory_space<vmem>>, vector<1x256xf32>
    %48 = vector.broadcast %47 : vector<1x256xf32> to vector<400x256xf32>
    %49 = arith.addf %46, %48 : vector<400x256xf32>
    %cst_30 = arith.constant 5.000000e-01 : f32
    %50 = vector.broadcast %cst_30 : f32 to vector<400x256xf32>
    %51 = arith.mulf %49, %50 : vector<400x256xf32>
    %cst_31 = arith.constant 0.707106769 : f32
    %52 = vector.broadcast %cst_31 : f32 to vector<400x256xf32>
    %53 = arith.mulf %49, %52 : vector<400x256xf32>
    %54 = math.erf %53 : vector<400x256xf32>
    %cst_32 = arith.constant 1.000000e+00 : f32
    %55 = vector.broadcast %cst_32 : f32 to vector<400x256xf32>
    %56 = arith.addf %55, %54 : vector<400x256xf32>
    %57 = arith.mulf %51, %56 : vector<400x256xf32>
    %58 = arith.truncf %57 : vector<400x256xf32> to vector<400x256xbf16>
    %c0_33 = arith.constant 0 : index
    %c0_34 = arith.constant 0 : index
    %59 = vector.load %arg12[%c0_33, %c0_34] : memref<256x64xbf16, #tpu.memory_space<vmem>>, vector<256x64xbf16>
    %cst_35 = arith.constant dense<0.000000e+00> : vector<400x64xf32>
    %60 = tpu.matmul %58, %59, %cst_35 {dimension_numbers = #tpu.dot_dimension_numbers<[1], [0], [0], [1], [0, 0, 1, 1], [], []>} : vector<400x256xbf16>, vector<256x64xbf16>, vector<400x64xf32> -> vector<400x64xf32>
    %c0_36 = arith.constant 0 : index
    %c0_37 = arith.constant 0 : index
    %61 = vector.load %arg13[%c0_36, %c0_37] : memref<1x64xf32, #tpu.memory_space<vmem>>, vector<1x64xf32>
    %62 = vector.broadcast %61 : vector<1x64xf32> to vector<400x64xf32>
    %63 = arith.addf %60, %62 : vector<400x64xf32>
    %64 = arith.addf %63, %43 : vector<400x64xf32>
    %c0_38 = arith.constant 0 : index
    %c0_39 = arith.constant 0 : index
    %65 = vector.load %arg14[%c0_38, %c0_39] : memref<1x64xf32, #tpu.memory_space<vmem>>, vector<1x64xf32>
    %c0_40 = arith.constant 0 : index
    %c0_41 = arith.constant 0 : index
    %66 = vector.load %arg15[%c0_40, %c0_41] : memref<1x64xf32, #tpu.memory_space<vmem>>, vector<1x64xf32>
    %cst_42 = arith.constant dense<0.000000e+00> : vector<400xf32>
    %67 = vector.multi_reduction <add>, %64, %cst_42 [1] : vector<400x64xf32> to vector<400xf32>
    %68 = vector.shape_cast %67 : vector<400xf32> to vector<400x1xf32>
    %cst_43 = arith.constant 6.400000e+01 : f32
    %69 = vector.broadcast %cst_43 : f32 to vector<400x1xf32>
    %70 = arith.divf %68, %69 : vector<400x1xf32>
    %71 = vector.broadcast %70 : vector<400x1xf32> to vector<400x64xf32>
    %72 = arith.subf %64, %71 : vector<400x64xf32>
    %73 = arith.mulf %72, %72 : vector<400x64xf32>
    %cst_44 = arith.constant dense<0.000000e+00> : vector<400xf32>
    %74 = vector.multi_reduction <add>, %73, %cst_44 [1] : vector<400x64xf32> to vector<400xf32>
    %75 = vector.shape_cast %74 : vector<400xf32> to vector<400x1xf32>
    %cst_45 = arith.constant 6.400000e+01 : f32
    %76 = vector.broadcast %cst_45 : f32 to vector<400x1xf32>
    %77 = arith.divf %75, %76 : vector<400x1xf32>
    %cst_46 = arith.constant 9.99999996E-13 : f32
    %78 = vector.broadcast %cst_46 : f32 to vector<400x1xf32>
    %79 = arith.addf %77, %78 : vector<400x1xf32>
    %80 = math.rsqrt %79 : vector<400x1xf32>
    %81 = vector.broadcast %80 : vector<400x1xf32> to vector<400x64xf32>
    %82 = arith.mulf %72, %81 : vector<400x64xf32>
    %83 = vector.broadcast %65 : vector<1x64xf32> to vector<400x64xf32>
    %84 = arith.mulf %83, %82 : vector<400x64xf32>
    %85 = vector.broadcast %66 : vector<1x64xf32> to vector<400x64xf32>
    %86 = arith.addf %84, %85 : vector<400x64xf32>
    %c0_47 = arith.constant 0 : index
    %c0_48 = arith.constant 0 : index
    %87 = vector.load %arg16[%c0_47, %c0_48] : memref<400x64xf32, #tpu.memory_space<vmem>>, vector<400x64xf32>
    tpu.vector_store %arg16[%c0_47, %c0_48], %86 {strides = array<i32>} : memref<400x64xf32, #tpu.memory_space<vmem>>, vector<400x64xf32>,
    return
  }
  func.func @transform_0(%arg0: i32) -> (i32, i32) {
    %c0_i32 = arith.constant 0 : i32
    %c0_i32_0 = arith.constant 0 : i32
    return %arg0, %c0_i32 : i32, i32
  }
  func.func @transform_1(%arg0: i32) -> (i32, i32) {
    %c0_i32 = arith.constant 0 : i32
    %c0_i32_0 = arith.constant 0 : i32
    %c0_i32_1 = arith.constant 0 : i32
    return %c0_i32, %c0_i32_0 : i32, i32
  }
  func.func @transform_2(%arg0: i32) -> (i32, i32) {
    %c0_i32 = arith.constant 0 : i32
    %c0_i32_0 = arith.constant 0 : i32
    %c0_i32_1 = arith.constant 0 : i32
    return %c0_i32, %c0_i32_0 : i32, i32
  }
  func.func @transform_3(%arg0: i32) -> (i32, i32) {
    %c0_i32 = arith.constant 0 : i32
    %c0_i32_0 = arith.constant 0 : i32
    %c0_i32_1 = arith.constant 0 : i32
    return %c0_i32, %c0_i32_0 : i32, i32
  }
  func.func @transform_4(%arg0: i32) -> (i32, i32) {
    %c0_i32 = arith.constant 0 : i32
    %c0_i32_0 = arith.constant 0 : i32
    %c0_i32_1 = arith.constant 0 : i32
    return %c0_i32, %c0_i32_0 : i32, i32
  }
  func.func @transform_5(%arg0: i32) -> (i32, i32) {
    %c0_i32 = arith.constant 0 : i32
    %c0_i32_0 = arith.constant 0 : i32
    %c0_i32_1 = arith.constant 0 : i32
    return %c0_i32, %c0_i32_0 : i32, i32
  }
  func.func @transform_6(%arg0: i32) -> (i32, i32) {
    %c0_i32 = arith.constant 0 : i32
    %c0_i32_0 = arith.constant 0 : i32
    %c0_i32_1 = arith.constant 0 : i32
    return %c0_i32, %c0_i32_0 : i32, i32
  }
  func.func @transform_7(%arg0: i32) -> (i32, i32) {
    %c0_i32 = arith.constant 0 : i32
    %c0_i32_0 = arith.constant 0 : i32
    %c0_i32_1 = arith.constant 0 : i32
    return %c0_i32, %c0_i32_0 : i32, i32
  }
  func.func @transform_8(%arg0: i32) -> (i32, i32) {
    %c0_i32 = arith.constant 0 : i32
    %c0_i32_0 = arith.constant 0 : i32
    %c0_i32_1 = arith.constant 0 : i32
    return %c0_i32, %c0_i32_0 : i32, i32
  }
  func.func @transform_9(%arg0: i32) -> (i32, i32) {
    %c0_i32 = arith.constant 0 : i32
    %c0_i32_0 = arith.constant 0 : i32
    %c0_i32_1 = arith.constant 0 : i32
    return %c0_i32, %c0_i32_0 : i32, i32
  }
  func.func @transform_10(%arg0: i32) -> (i32, i32) {
    %c0_i32 = arith.constant 0 : i32
    %c0_i32_0 = arith.constant 0 : i32
    %c0_i32_1 = arith.constant 0 : i32
    return %c0_i32, %c0_i32_0 : i32, i32
  }
  func.func @transform_11(%arg0: i32) -> (i32, i32) {
    %c0_i32 = arith.constant 0 : i32
    %c0_i32_0 = arith.constant 0 : i32
    %c0_i32_1 = arith.constant 0 : i32
    return %c0_i32, %c0_i32_0 : i32, i32
  }
  func.func @transform_12(%arg0: i32) -> (i32, i32) {
    %c0_i32 = arith.constant 0 : i32
    %c0_i32_0 = arith.constant 0 : i32
    %c0_i32_1 = arith.constant 0 : i32
    return %c0_i32, %c0_i32_0 : i32, i32
  }
  func.func @transform_13(%arg0: i32) -> (i32, i32) {
    %c0_i32 = arith.constant 0 : i32
    %c0_i32_0 = arith.constant 0 : i32
    %c0_i32_1 = arith.constant 0 : i32
    return %c0_i32, %c0_i32_0 : i32, i32
  }
  func.func @transform_14(%arg0: i32) -> (i32, i32) {
    %c0_i32 = arith.constant 0 : i32
    %c0_i32_0 = arith.constant 0 : i32
    %c0_i32_1 = arith.constant 0 : i32
    return %c0_i32, %c0_i32_0 : i32, i32
  }
  func.func @transform_15(%arg0: i32) -> (i32, i32) {
    %c0_i32 = arith.constant 0 : i32
    %c0_i32_0 = arith.constant 0 : i32
    return %arg0, %c0_i32 : i32, i32
  }
}

</mosaic_0001>

<bundles_post_ra>
// kernel: tile.14
= control target key start
LH: loop header
LB: loop body
LE: loop exit
PB: predicated region body
PF: predicated region fallthrough
CT: control target
= control target key end

     0   :  { %vm3_vm0 = vcmask 523264   ;;  %s456_s0 = inlined_call_operand.vmem [shape: f32[8,26,64], index: 0, kind: input, shape index: {}]   ;;  %s457_s1 = inlined_call_operand.vmem [shape: f32[208,64], index: 1, kind: output, shape index: {}]  }
   0x1   :  { %v2_v0 = vld [vmem:[%s456_s0] sm:$0xff]   ;;  %v160_v1 = vld [vmem:[%s456_s0 + $0x8] sm:$0xff]   ;;  %v162_v2 = vld [vmem:[%s456_s0 + $0x10] sm:$0xff]  }
   0x2   :  { %4 = vst.msk [vmem:[%s457_s1] sm:$0xff] %vm3_vm0, %v2_v0   ;;  %161 = vst.msk [vmem:[%s457_s1 + $0x8] sm:$0xff] %vm3_vm0, %v160_v1   ;;  %v164_v3 = vld [vmem:[%s456_s0 + $0x18] sm:$0x3]   ;;  %v166_v4 = vld [vmem:[%s456_s0 + $0x20] sm:$0xff]  }
   0x3   :  { %163 = vst.msk [vmem:[%s457_s1 + $0x10] sm:$0xff] %vm3_vm0, %v162_v2   ;;  %v168_v5 = vld [vmem:[%s456_s0 + $0x28] sm:$0xff]   ;;  %165 = vst.msk [vmem:[%s457_s1 + $0x18] sm:$0x3] %vm3_vm0, %v164_v3   ;;  %v170_v6 = vld [vmem:[%s456_s0 + $0x30] sm:$0xff]  }
   0x4   :  { %167 = vst.msk [vmem:[%s457_s1 + $0x1a] sm:$0xff] %vm3_vm0, %v166_v4   ;;  %169 = vst.msk [vmem:[%s457_s1 + $0x22] sm:$0xff] %vm3_vm0, %v168_v5   ;;  %v172_v7 = vld [vmem:[%s456_s0 + $0x38] sm:$0x3]   ;;  %v174_v8 = vld [vmem:[%s456_s0 + $0x40] sm:$0xff]  }
   0x5   :  { %171 = vst.msk [vmem:[%s457_s1 + $0x2a] sm:$0xff] %vm3_vm0, %v170_v6   ;;  %173 = vst.msk [vmem:[%s457_s1 + $0x32] sm:$0x3] %vm3_vm0, %v172_v7   ;;  %v176_v9 = vld [vmem:[%s456_s0 + $0x48] sm:$0xff]   ;;  %v178_v10 = vld [vmem:[%s456_s0 + $0x50] sm:$0xff]  }
   0x6   :  { %175 = vst.msk [vmem:[%s457_s1 + $0x34] sm:$0xff] %vm3_vm0, %v174_v8   ;;  %v180_v11 = vld [vmem:[%s456_s0 + $0x58] sm:$0x3]   ;;  %177 = vst.msk [vmem:[%s457_s1 + $0x3c] sm:$0xff] %vm3_vm0, %v176_v9   ;;  %v182_v12 = vld [vmem:[%s456_s0 + $0x60] sm:$0xff]  }
   0x7   :  { %179 = vst.msk [vmem:[%s457_s1 + $0x44] sm:$0xff] %vm3_vm0, %v178_v10   ;;  %181 = vst.msk [vmem:[%s457_s1 + $0x4c] sm:$0x3] %vm3_vm0, %v180_v11   ;;  %v184_v13 = vld [vmem:[%s456_s0 + $0x68] sm:$0xff]   ;;  %v186_v14 = vld [vmem:[%s456_s0 + $0x70] sm:$0xff]  }
   0x8   :  { %183 = vst.msk [vmem:[%s457_s1 + $0x4e] sm:$0xff] %vm3_vm0, %v182_v12   ;;  %185 = vst.msk [vmem:[%s457_s1 + $0x56] sm:$0xff] %vm3_vm0, %v184_v13   ;;  %v188_v15 = vld [vmem:[%s456_s0 + $0x78] sm:$0x3]   ;;  %v190_v16 = vld [vmem:[%s456_s0 + $0x80] sm:$0xff]  }
   0x9   :  { %187 = vst.msk [vmem:[%s457_s1 + $0x5e] sm:$0xff] %vm3_vm0, %v186_v14   ;;  %v192_v17 = vld [vmem:[%s456_s0 + $0x88] sm:$0xff]   ;;  %189 = vst.msk [vmem:[%s457_s1 + $0x66] sm:$0x3] %vm3_vm0, %v188_v15   ;;  %v194_v18 = vld [vmem:[%s456_s0 + $0x90] sm:$0xff]  }
   0xa   :  { %191 = vst.msk [vmem:[%s457_s1 + $0x68] sm:$0xff] %vm3_vm0, %v190_v16   ;;  %193 = vst.msk [vmem:[%s457_s1 + $0x70] sm:$0xff] %vm3_vm0, %v192_v17   ;;  %v196_v19 = vld [vmem:[%s456_s0 + $0x98] sm:$0x3]   ;;  %v198_v20 = vld [vmem:[%s456_s0 + $0xa0] sm:$0xff]  }
   0xb   :  { %195 = vst.msk [vmem:[%s457_s1 + $0x78] sm:$0xff] %vm3_vm0, %v194_v18   ;;  %197 = vst.msk [vmem:[%s457_s1 + $0x80] sm:$0x3] %vm3_vm0, %v196_v19   ;;  %v200_v21 = vld [vmem:[%s456_s0 + $0xa8] sm:$0xff]   ;;  %v202_v22 = vld [vmem:[%s456_s0 + $0xb0] sm:$0xff]  }
   0xc   :  { %199 = vst.msk [vmem:[%s457_s1 + $0x82] sm:$0xff] %vm3_vm0, %v198_v20   ;;  %v204_v23 = vld [vmem:[%s456_s0 + $0xb8] sm:$0x3]   ;;  %201 = vst.msk [vmem:[%s457_s1 + $0x8a] sm:$0xff] %vm3_vm0, %v200_v21   ;;  %v206_v24 = vld [vmem:[%s456_s0 + $0xc0] sm:$0xff]  }
   0xd   :  { %203 = vst.msk [vmem:[%s457_s1 + $0x92] sm:$0xff] %vm3_vm0, %v202_v22   ;;  %205 = vst.msk [vmem:[%s457_s1 + $0x9a] sm:$0x3] %vm3_vm0, %v204_v23   ;;  %v208_v25 = vld [vmem:[%s456_s0 + $0xc8] sm:$0xff]   ;;  %v210_v26 = vld [vmem:[%s456_s0 + $0xd0] sm:$0xff]  }
   0xe   :  { %207 = vst.msk [vmem:[%s457_s1 + $0x9c] sm:$0xff] %vm3_vm0, %v206_v24   ;;  %209 = vst.msk [vmem:[%s457_s1 + $0xa4] sm:$0xff] %vm3_vm0, %v208_v25   ;;  %v212_v27 = vld [vmem:[%s456_s0 + $0xd8] sm:$0x3]   ;;  %v214_v28 = vld [vmem:[%s456_s0 + $0xe0] sm:$0xff]  }
   0xf   :  { %211 = vst.msk [vmem:[%s457_s1 + $0xac] sm:$0xff] %vm3_vm0, %v210_v26   ;;  %v216_v29 = vld [vmem:[%s456_s0 + $0xe8] sm:$0xff]   ;;  %213 = vst.msk [vmem:[%s457_s1 + $0xb4] sm:$0x3] %vm3_vm0, %v212_v27   ;;  %v218_v30 = vld [vmem:[%s456_s0 + $0xf0] sm:$0xff]  }
  0x10   :  { %215 = vst.msk [vmem:[%s457_s1 + $0xb6] sm:$0xff] %vm3_vm0, %v214_v28   ;;  %217 = vst.msk [vmem:[%s457_s1 + $0xbe] sm:$0xff] %vm3_vm0, %v216_v29   ;;  %v220_v31 = vld [vmem:[%s456_s0 + $0xf8] sm:$0x3]  }
  0x11   :  { %219 = vst.msk [vmem:[%s457_s1 + $0xc6] sm:$0xff] %vm3_vm0, %v218_v30   ;;  %221 = vst.msk [vmem:[%s457_s1 + $0xce] sm:$0x3] %vm3_vm0, %v220_v31  }

// kernel: fmlprec_layer.1
= control target key start
LH: loop header
LB: loop body
LE: loop exit
PB: predicated region body
PF: predicated region fallthrough
CT: control target
= control target key end

     0   :  { %s7717_s18 = smov 0   ;;  %s11265_s0 = inlined_call_operand.vmem [shape: f32[800,64], index: 0, kind: input, shape index: {}]   ;;  %s11266_s1 = inlined_call_operand.vmem [shape: bf16[208,400], index: 1, kind: input, shape index: {}]   ;;  %s11267_s2 = inlined_call_operand.vmem [shape: bf16[208,400], index: 2, kind: input, shape index: {}]   ;;  %s11268_s3 = inlined_call_operand.vmem [shape: bf16[400,208], index: 3, kind: input, shape index: {}]   ;;  %s11269_s4 = inlined_call_operand.vmem [shape: bf16[400,208], index: 4, kind: input, shape index: {}]   ;;  %s11270_s5 = inlined_call_operand.vmem [shape: f32[208,64], index: 5, kind: input, shape index: {}]   ;;  %s11271_s6 = inlined_call_operand.vmem [shape: f32[208,64], index: 6, kind: input, shape index: {}]   ;;  %s11272_s7 = inlined_call_operand.vmem [shape: f32[1,64], index: 7, kind: input, shape index: {}]   ;;  %s11273_s8 = inlined_call_operand.vmem [shape: f32[1,64], index: 8, kind: input, shape index: {}]   ;;  %s11274_s9 = inlined_call_operand.vmem [shape: bf16[64,256], index: 9, kind: input, shape index: {}]   ;;  %s11275_s10 = inlined_call_operand.vmem [shape: f32[1,256], index: 10, kind: input, shape index: {}]   ;;  %s11276_s11 = inlined_call_operand.vmem [shape: bf16[256,64], index: 11, kind: input, shape index: {}]   ;;  %s11277_s12 = inlined_call_operand.vmem [shape: f32[1,64], index: 12, kind: input, shape index: {}]   ;;  %s11278_s13 = inlined_call_operand.vmem [shape: f32[1,64], index: 13, kind: input, shape index: {}]   ;;  %s11279_s14 = inlined_call_operand.vmem [shape: f32[1,64], index: 14, kind: input, shape index: {}]   ;;  %s11280_s15 = inlined_call_operand.vmem [shape: f32[800,64], index: 15, kind: output, shape index: {}]  }
   0x1 LB: > { %s6297_s19 = sadd.s32 4294967295, %s7634_s18   ;;  %p6301_p0 = scmp.ge.s32.totalorder %s7634_s18, 1  ;;  %s7634_s18 = sphi %s7717_s18, %s25_s18  }
   0x2   : > { %p438_p1 = scmp.lt.s32.totalorder %s7634_s18, 3 }
   0x4   : > { %p439_p2 = pnand %p6301_p0, %p438_p1 }
   0x6   : > { %442 = sbr.rel (%p439_p2) target bundleno = 2126 (0x84e), region = 80 }
   0xd   : > { %s486_s20 = smul.u32 50, %s6297_s19  ;;  %v11282_v0 = vmov 0   ;;  %v6839_v1 = vld [vmem:[%s11266_s1 + $0x4] ss:$16 sps:$4 sm:$0xff]   ;;  %vm873_vm0 = vcmask 130048   ;;  %vm2358_vm1 = vcmask 654336  }
   0xe   : > { %1050 = vmatprep.subr.bf16.mxu1 %v11282_v0  ;;  %v6842_v2 = vld [vmem:[%s11266_s1 + $0xc] ss:$16 sps:$4 sm:$0xff]   ;;  %945 = vmatprep.mubr.bf16.mxu0 %v6839_v1  ;;  %vm3252_vm2 = vcmask 523264  }
   0xf   : > { %p487_p3 = scmp.lt.s32.totalorder %s486_s20, 99  ;;  %6356 = vmatprep.mubr.msk.bf16.mxu1 %vm873_vm0, %v6842_v2 }
  0x11   : > { %s11407_s20 = smov (!%p487_p3, %s486_s20), 99 }
  0x12   : > { %s11281_s25 = sshll.u32 %s11407_s20, 3  ;;  %s11393_s19 = sshll.u32 %s11407_s20, 3 }
  0x13   : > { %s7741_s28 = scalar_lea.vmem %s11265_s0, %s11281_s25  ;;  %s10913_s22 = scalar_lea.vmem %s11280_s15, %s11393_s19 }
  0x14   : > { %v515_v3 = vld [vmem:[%s7741_s28 + $0x80] sm:$0xff]  ;;  %v516_v4 = vld [vmem:[%s7741_s28 + $0x88] sm:$0xff]  ;;  %v517_v12 = vld [vmem:[%s7741_s28 + $0x90] sm:$0xff] }
  0x15   : > { %v531_v5 = vld [vmem:[%s7741_s28 + $0x100] sm:$0xff]  ;;  %v7746_v6 = vpack.c.bf16 %v516_v4, %v515_v3  ;;  %v532_v7 = vld [vmem:[%s7741_s28 + $0x108] sm:$0xff]  ;;  %v518_v13 = vld [vmem:[%s7741_s28 + $0x98] sm:$0xff] }
  0x16   : > { %v499_v8 = vld [vmem:[%s7741_s28] sm:$0xff]  ;;  %v500_v9 = vld [vmem:[%s7741_s28 + $0x8] sm:$0xff]  ;;  %v7751_v10 = vpack.c.bf16 %v532_v7, %v531_v5  ;;  %v533_v14 = vld [vmem:[%s7741_s28 + $0x110] sm:$0xff]  ;;  %v7759_v15 = vpack.c.bf16 %v518_v13, %v517_v12 }
  0x17   : > { %v7753_v11 = vpack.c.bf16 %v500_v9, %v499_v8  ;;  %6640 = vmatprep.subr.bf16.mxu0 %v7746_v6  ;;  %v534_v16 = vld [vmem:[%s7741_s28 + $0x118] sm:$0xff]  ;;  %v501_v17 = vld [vmem:[%s7741_s28 + $0x10] sm:$0xff]  ;;  %v519_v21 = vld [vmem:[%s7741_s28 + $0xa0] sm:$0xff] }
  0x18   : > { %v502_v18 = vld [vmem:[%s7741_s28 + $0x18] sm:$0xff]  ;;  %1051 = vmatpush1.bf16.msra.mxu1 %v7751_v10  ;;  %v7766_v19 = vpack.c.bf16 %v534_v16, %v533_v14  ;;  %v520_v22 = vld [vmem:[%s7741_s28 + $0xa8] sm:$0xff]  ;;  %v535_v23 = vld [vmem:[%s7741_s28 + $0x120] sm:$0xff] }
  0x19   : > { %6641 = vmatpush3.bf16.msra.mxu0 %v7753_v11  ;;  %v7768_v20 = vpack.c.bf16 %v502_v18, %v501_v17  ;;  %1052 = vmatprep.subr.bf16.mxu1 %v11282_v0  ;;  %v7775_v24 = vpack.c.bf16 %v520_v22, %v519_v21  ;;  %v536_v25 = vld [vmem:[%s7741_s28 + $0x128] sm:$0xff]  ;;  %v503_v26 = vld [vmem:[%s7741_s28 + $0x20] sm:$0xff]  ;;  %v521_v28 = vld [vmem:[%s7741_s28 + $0xb0] sm:$0xff] }
  0x1a   : > { %6642 = vmatprep.subr.bf16.mxu0 %v7759_v15  ;;  %v504_v27 = vld [vmem:[%s7741_s28 + $0x28] sm:$0xff]  ;;  %v522_v29 = vld [vmem:[%s7741_s28 + $0xb8] sm:$0xff]  ;;  %v7784_v30 = vpack.c.bf16 %v536_v25, %v535_v23  ;;  %v537_v32 = vld [vmem:[%s7741_s28 + $0x130] sm:$0xff] }
  0x1b   : > { %v7786_v31 = vpack.c.bf16 %v504_v27, %v503_v26  ;;  %v7791_v33 = vpack.c.bf16 %v522_v29, %v521_v28  ;;  %v538_v34 = vld [vmem:[%s7741_s28 + $0x138] sm:$0xff]  ;;  %v505_v35 = vld [vmem:[%s7741_s28 + $0x30] sm:$0xff]  ;;  %v523_v37 = vld [vmem:[%s7741_s28 + $0xc0] sm:$0xff] }
  0x1c   : > { %1053 = vmatpush1.bf16.msra.mxu1 %v7766_v19  ;;  %v506_v36 = vld [vmem:[%s7741_s28 + $0x38] sm:$0xff]  ;;  %v524_v38 = vld [vmem:[%s7741_s28 + $0xc8] sm:$0xff]  ;;  %v7800_v39 = vpack.c.bf16 %v538_v34, %v537_v32  ;;  %v539_v41 = vld [vmem:[%s7741_s28 + $0x140] sm:$0xff] }
  0x1d   : > { %6643 = vmatpush3.bf16.msra.mxu0 %v7768_v20  ;;  %1054 = vmatprep.subr.bf16.mxu1 %v11282_v0  ;;  %v7802_v40 = vpack.c.bf16 %v506_v36, %v505_v35  ;;  %v7807_v42 = vpack.c.bf16 %v524_v38, %v523_v37  ;;  %v540_v43 = vld [vmem:[%s7741_s28 + $0x148] sm:$0xff]  ;;  %v507_v44 = vld [vmem:[%s7741_s28 + $0x40] sm:$0xff]  ;;  %v525_v46 = vld [vmem:[%s7741_s28 + $0xd0] sm:$0xff] }
  0x1e   : > { %6644 = vmatprep.subr.bf16.mxu0 %v7775_v24  ;;  %v508_v45 = vld [vmem:[%s7741_s28 + $0x48] sm:$0xff]  ;;  %v526_v47 = vld [vmem:[%s7741_s28 + $0xd8] sm:$0xff]  ;;  %v541_v48 = vld [vmem:[%s7741_s28 + $0x150] sm:$0xff]  ;;  %v7817_v49 = vpack.c.bf16 %v540_v43, %v539_v41 }
  0x1f   : > { %v7819_v50 = vpack.c.bf16 %v508_v45, %v507_v44  ;;  %v542_v51 = vld [vmem:[%s7741_s28 + $0x158] sm:$0xff]  ;;  %v509_v52 = vld [vmem:[%s7741_s28 + $0x50] sm:$0xff]  ;;  %v7825_v53 = vpack.c.bf16 %v526_v47, %v525_v46  ;;  %v527_v55 = vld [vmem:[%s7741_s28 + $0xe0] sm:$0xff] }
  0x20   : > { %1055 = vmatpush1.bf16.msra.mxu1 %v7784_v30  ;;  %v510_v54 = vld [vmem:[%s7741_s28 + $0x58] sm:$0xff]  ;;  %v528_v56 = vld [vmem:[%s7741_s28 + $0xe8] sm:$0xff]  ;;  %v543_v57 = vld [vmem:[%s7741_s28 + $0x160] sm:$0xff]  ;;  %v7833_v58 = vpack.c.bf16 %v542_v51, %v541_v48 }
  0x21   : > { %6645 = vmatpush3.bf16.msra.mxu0 %v7786_v31  ;;  %1056 = vmatprep.subr.bf16.mxu1 %v11282_v0  ;;  %v7835_v59 = vpack.c.bf16 %v510_v54, %v509_v52  ;;  %v544_v60 = vld [vmem:[%s7741_s28 + $0x168] sm:$0xff]  ;;  %v511_v61 = vld [vmem:[%s7741_s28 + $0x60] sm:$0xff]  ;;  %v7841_v62 = vpack.c.bf16 %v528_v56, %v527_v55  ;;  %v529_v1 = vld [vmem:[%s7741_s28 + $0xf0] sm:$0xff] }
  0x22   : > { %6646 = vmatprep.subr.bf16.mxu0 %v7791_v33  ;;  %v512_v63 = vld [vmem:[%s7741_s28 + $0x68] sm:$0xff]  ;;  %v530_v2 = vld [vmem:[%s7741_s28 + $0xf8] sm:$0xff]  ;;  %v7848_v3 = vpack.c.bf16 %v544_v60, %v543_v57  ;;  %v545_v5 = vld [vmem:[%s7741_s28 + $0x170] sm:$0xff] }
  0x23   : > { %v7850_v4 = vpack.c.bf16 %v512_v63, %v511_v61  ;;  %v546_v7 = vld [vmem:[%s7741_s28 + $0x178] sm:$0xff]  ;;  %v7856_v8 = vpack.c.bf16 %v530_v2, %v529_v1  ;;  %v513_v9 = vld [vmem:[%s7741_s28 + $0x70] sm:$0xff]  ;;  %v547_v16 = vld [vmem:[%s7741_s28 + $0x180] sm:$0xff] }
  0x24   : > { %1057 = vmatpush1.bf16.msra.mxu1 %v7800_v39  ;;  %v514_v12 = vld [vmem:[%s7741_s28 + $0x78] sm:$0xff]  ;;  %v7862_v13 = vpack.c.bf16 %v546_v7, %v545_v5  ;;  %v548_v17 = vld [vmem:[%s7741_s28 + $0x188] sm:$0xff]  ;;  %v6837_v18 = vld [vmem:[%s11266_s1] ss:$16 sps:$4 sm:$0xff]  }
  0x25   : > { %6647 = vmatpush3.bf16.msra.mxu0 %v7802_v40  ;;  %1058 = vmatprep.subr.bf16.mxu1 %v11282_v0  ;;  %v7864_v14 = vpack.c.bf16 %v514_v12, %v513_v9  ;;  %v7875_v21 = vpack.c.bf16 %v548_v17, %v547_v16  ;;  %v6843_v22 = vld [vmem:[%s11266_s1 + $0x24] ss:$16 sps:$4 sm:$0xff]   ;;  %v6840_v23 = vld [vmem:[%s11266_s1 + $0x8] ss:$16 sps:$4 sm:$0xff]   ;;  %v6846_v25 = vld [vmem:[%s11266_s1 + $0x2c] ss:$16 sps:$4 sm:$0xff]  }
  0x26   : > { %6648 = vmatprep.subr.bf16.mxu0 %v7807_v42  ;;  %v6858_v26 = vld [vmem:[%s11266_s1 + $0x6c] ss:$16 sps:$4 sm:$0xff]   ;;  %v6857_v27 = vld [vmem:[%s11266_s1 + $0x60] ss:$16 sps:$4 sm:$0xff]   ;;  %v6861_v28 = vld [vmem:[%s11266_s1 + $0x84] ss:$16 sps:$4 sm:$0xff]  }
  0x27   : > { %v6860_v29 = vld [vmem:[%s11266_s1 + $0x68] ss:$16 sps:$4 sm:$0xff]   ;;  %v6867_v32 = vld [vmem:[%s11266_s1 + $0xa4] ss:$16 sps:$4 sm:$0xff]   ;;  %v6870_v34 = vld [vmem:[%s11266_s1 + $0xac] ss:$16 sps:$4 sm:$0xff]  }
  0x28   : > { %1059 = vmatpush1.bf16.msra.mxu1 %v7817_v49  ;;  %v6869_v35 = vld [vmem:[%s11266_s1 + $0xa0] ss:$16 sps:$4 sm:$0xff]   ;;  %v6873_v36 = vld [vmem:[%s11266_s1 + $0xc4] ss:$16 sps:$4 sm:$0xff]   ;;  %v6872_v37 = vld [vmem:[%s11266_s1 + $0xa8] ss:$16 sps:$4 sm:$0xff]  }
  0x29   : > { %6649 = vmatpush3.bf16.msra.mxu0 %v7819_v50  ;;  %1060 = vmatprep.subr.bf16.mxu1 %v11282_v0  ;;  %v6876_v38 = vld [vmem:[%s11266_s1 + $0xcc] ss:$16 sps:$4 sm:$0xff]   ;;  %v6878_v41 = vld [vmem:[%s11266_s1 + $0xc8] ss:$16 sps:$4 sm:$0xff]   ;;  %v6881_v43 = vld [vmem:[%s11266_s1 + $0xe0] ss:$16 sps:$4 sm:$0xff]  }
  0x2a   : > { %6650 = vmatprep.subr.bf16.mxu0 %v7825_v53  ;;  %v6885_v44 = vld [vmem:[%s11266_s1 + $0x104] ss:$16 sps:$4 sm:$0xff]   ;;  %v6884_v45 = vld [vmem:[%s11266_s1 + $0xe8] ss:$16 sps:$4 sm:$0xff]   ;;  %v6888_v46 = vld [vmem:[%s11266_s1 + $0x10c] ss:$16 sps:$4 sm:$0xff]  }
  0x2b   : > { %v6887_v47 = vld [vmem:[%s11266_s1 + $0x100] ss:$16 sps:$4 sm:$0xff]   ;;  %v6891_v48 = vld [vmem:[%s11266_s1 + $0x124] ss:$16 sps:$4 sm:$0xff]   ;;  %v6900_v54 = vld [vmem:[%s11266_s1 + $0x14c] ss:$16 sps:$4 sm:$0xff]  }
  0x2c   : > { %1061 = vmatpush1.bf16.msra.mxu1 %v7833_v58  ;;  %v6893_v51 = vld [vmem:[%s11266_s1 + $0x120] ss:$16 sps:$4 sm:$0xff]   ;;  %v6897_v52 = vld [vmem:[%s11266_s1 + $0x144] ss:$16 sps:$4 sm:$0xff]   ;;  %v6902_v57 = vld [vmem:[%s11266_s1 + $0x148] ss:$16 sps:$4 sm:$0xff]  }
  0x2d   : > { %6651 = vmatpush3.bf16.msra.mxu0 %v7835_v59  ;;  %1062 = vmatprep.subr.bf16.mxu1 %v11282_v0  ;;  %v6899_v55 = vld [vmem:[%s11266_s1 + $0x140] ss:$16 sps:$4 sm:$0xff]   ;;  %v6903_v56 = vld [vmem:[%s11266_s1 + $0x164] ss:$16 sps:$4 sm:$0xff]   ;;  %v6908_v61 = vld [vmem:[%s11266_s1 + $0x168] ss:$16 sps:$4 sm:$0xff]  }
  0x2e   : > { %6652 = vmatprep.subr.bf16.mxu0 %v7841_v62  ;;  %v6909_v60 = vld [vmem:[%s11266_s1 + $0x184] ss:$16 sps:$4 sm:$0xff]   ;;  %v6911_v63 = vld [vmem:[%s11266_s1 + $0x180] ss:$16 sps:$4 sm:$0xff]   ;;  %v6914_v2 = vld [vmem:[%s11266_s1 + $0x188] ss:$16 sps:$4 sm:$0xff]  }
  0x2f   : > { %v6917_v1 = vld [vmem:[%s11267_s2 + $0x4] ss:$16 sps:$4 sm:$0xff]   ;;  %v6918_v7 = vld [vmem:[%s11267_s2 + $0x8] ss:$16 sps:$4 sm:$0xff]   ;;  %v6923_v9 = vld [vmem:[%s11267_s2 + $0x20] ss:$16 sps:$4 sm:$0xff]  }
  0x30   : > { %1063 = vmatpush1.bf16.msra.mxu1 %v7848_v3  ;;  %v6921_v5 = vld [vmem:[%s11267_s2 + $0x24] ss:$16 sps:$4 sm:$0xff]   ;;  %v6929_v16 = vld [vmem:[%s11267_s2 + $0x40] ss:$16 sps:$4 sm:$0xff]  }
  0x31   : > { %6653 = vmatpush3.bf16.msra.mxu0 %v7850_v4  ;;  %1064 = vmatprep.subr.bf16.mxu1 %v11282_v0  ;;  %v6927_v12 = vld [vmem:[%s11267_s2 + $0x44] ss:$16 sps:$4 sm:$0xff]  }
  0x32   : > { %6654 = vmatprep.subr.bf16.mxu0 %v7856_v8  ;;  %v6933_v17 = vld [vmem:[%s11267_s2 + $0x64] ss:$16 sps:$4 sm:$0xff]  }
  0x34   : > { %1065 = vmatpush1.bf16.msra.mxu1 %v7862_v13 }
  0x35   : > { %6655 = vmatpush3.bf16.msra.mxu0 %v7864_v14  ;;  %1066 = vmatprep.subr.bf16.mxu1 %v11282_v0 }
  0x36   : > { %6734 = vmatprep.subr.bf16.mxu0 %v7746_v6  ;;  %v6845_v6 = vld [vmem:[%s11266_s1 + $0x20] ss:$16 sps:$4 sm:$0xff]  }
  0x38   : > { %946 = vmatmul.mubr.bf16.vlgmr.msra.gmra.mrb[0].mxu0 %v6837_v18  ;;  %1067 = vmatpush1.bf16.msra.mxu1 %v7875_v21  ;;  %v6932_v18 = vld [vmem:[%s11267_s2 + $0x48] ss:$16 sps:$4 sm:$0xff]  }
  0x39   : > { %6735 = vmatpush3.bf16.msra.mxu0 %v7753_v11  ;;  %953 = vmatprep.mubr.bf16.mxu0 %v6843_v22  ;;  %v6849_v11 = vld [vmem:[%s11266_s1 + $0x44] ss:$16 sps:$4 sm:$0xff]   ;;  %v6935_v22 = vld [vmem:[%s11267_s2 + $0x60] ss:$16 sps:$4 sm:$0xff]  }
  0x3a   : > { %1662 = vmatprep.subr.bf16.mxu1 %v11282_v0  ;;  %6736 = vmatprep.subr.bf16.mxu0 %v7759_v15  ;;  %v6848_v15 = vld [vmem:[%s11266_s1 + $0x28] ss:$16 sps:$4 sm:$0xff]  }
  0x3b   : > { %1083 = vmatmul.mubr.bf16.vlgmr.msra.gmra.mrb[0].mxu1 %v6840_v23  ;;  %v6939_v23 = vld [vmem:[%s11267_s2 + $0x84] ss:$16 sps:$4 sm:$0xff]  }
  0x3c   : > { %1663 = vmatpush1.bf16.msra.mxu1 %v7751_v10  ;;  %6357 = vmatprep.mubr.msk.bf16.mxu1 %vm873_vm0, %v6846_v25  ;;  %v6852_v10 = vld [vmem:[%s11266_s1 + $0x4c] ss:$16 sps:$4 sm:$0xff]   ;;  %v6938_v25 = vld [vmem:[%s11267_s2 + $0x68] ss:$16 sps:$4 sm:$0xff]  }
  0x3d   : > { %6737 = vmatpush3.bf16.msra.mxu0 %v7768_v20  ;;  %1664 = vmatprep.subr.bf16.mxu1 %v11282_v0  ;;  %v6851_v20 = vld [vmem:[%s11266_s1 + $0x40] ss:$16 sps:$4 sm:$0xff]  }
  0x3e   : > { %6738 = vmatprep.subr.bf16.mxu0 %v7775_v24  ;;  %v6855_v24 = vld [vmem:[%s11266_s1 + $0x64] ss:$16 sps:$4 sm:$0xff]  }
  0x40   : > { %954 = vmatmul.mubr.bf16.gmra.mrb[4].mxu0 %v6845_v6  ;;  %1665 = vmatpush1.bf16.msra.mxu1 %v7766_v19  ;;  %v6854_v19 = vld [vmem:[%s11266_s1 + $0x48] ss:$16 sps:$4 sm:$0xff]   ;;  %v6942_v6 = vld [vmem:[%s11267_s2 + $0x8c] ss:$16 sps:$4 sm:$0xff]  }
  0x41   : > { %961 = vmatprep.mubr.bf16.mxu0 %v6849_v11  ;;  %6739 = vmatpush3.bf16.msra.mxu0 %v7786_v31  ;;  %v6863_v31 = vld [vmem:[%s11266_s1 + $0x80] ss:$16 sps:$4 sm:$0xff]  }
  0x42   : > { %1666 = vmatprep.subr.bf16.mxu1 %v11282_v0  ;;  %6740 = vmatprep.subr.bf16.mxu0 %v7791_v33  ;;  %v6866_v33 = vld [vmem:[%s11266_s1 + $0x88] ss:$16 sps:$4 sm:$0xff]   ;;  %v6941_v11 = vld [vmem:[%s11267_s2 + $0x80] ss:$16 sps:$4 sm:$0xff]  }
  0x43   : > { %1091 = vmatmul.mubr.bf16.gmra.mrb[4].mxu1 %v6848_v15  ;;  %v6945_v15 = vld [vmem:[%s11267_s2 + $0xa4] ss:$16 sps:$4 sm:$0xff]  }
  0x44   : > { %6358 = vmatprep.mubr.msk.bf16.mxu1 %vm873_vm0, %v6852_v10  ;;  %1667 = vmatpush1.bf16.msra.mxu1 %v7784_v30  ;;  %v6864_v30 = vld [vmem:[%s11266_s1 + $0x8c] ss:$16 sps:$4 sm:$0xff]   ;;  %v6944_v10 = vld [vmem:[%s11267_s2 + $0x88] ss:$16 sps:$4 sm:$0xff]  }
  0x45   : > { %1668 = vmatprep.subr.bf16.mxu1 %v11282_v0  ;;  %6741 = vmatpush3.bf16.msra.mxu0 %v7802_v40  ;;  %v6879_v40 = vld [vmem:[%s11266_s1 + $0xe4] ss:$16 sps:$4 sm:$0xff]  }
  0x46   : > { %6742 = vmatprep.subr.bf16.mxu0 %v7807_v42  ;;  %v6882_v42 = vld [vmem:[%s11266_s1 + $0xec] ss:$16 sps:$4 sm:$0xff]  }
  0x48   : > { %962 = vmatmul.mubr.bf16.gmra.mrb[8].mxu0 %v6851_v20  ;;  %1669 = vmatpush1.bf16.msra.mxu1 %v7800_v39  ;;  %v6875_v39 = vld [vmem:[%s11266_s1 + $0xc0] ss:$16 sps:$4 sm:$0xff]   ;;  %v6948_v20 = vld [vmem:[%s11267_s2 + $0xac] ss:$16 sps:$4 sm:$0xff]  }
  0x49   : > { %969 = vmatprep.mubr.bf16.mxu0 %v6855_v24  ;;  %1670 = vmatprep.subr.bf16.mxu1 %v11282_v0  ;;  %v6947_v24 = vld [vmem:[%s11267_s2 + $0xa0] ss:$16 sps:$4 sm:$0xff]  }
  0x4a   : > { %6743 = vmatpush3.bf16.msra.mxu0 %v7819_v50  ;;  %v6894_v50 = vld [vmem:[%s11266_s1 + $0x12c] ss:$16 sps:$4 sm:$0xff]  }
  0x4b   : > { %6744 = vmatprep.subr.bf16.mxu0 %v7825_v53  ;;  %1099 = vmatmul.mubr.bf16.gmra.mrb[8].mxu1 %v6854_v19  ;;  %v6896_v53 = vld [vmem:[%s11266_s1 + $0x128] ss:$16 sps:$4 sm:$0xff]   ;;  %v6951_v19 = vld [vmem:[%s11267_s2 + $0xc4] ss:$16 sps:$4 sm:$0xff]  }
  0x4c   : > { %6359 = vmatprep.mubr.msk.bf16.mxu1 %vm873_vm0, %v6858_v26  ;;  %1671 = vmatpush1.bf16.msra.mxu1 %v7817_v49  ;;  %v6890_v49 = vld [vmem:[%s11266_s1 + $0x108] ss:$16 sps:$4 sm:$0xff]  }
  0x4d   : > { %1672 = vmatprep.subr.bf16.mxu1 %v11282_v0  ;;  %v6950_v26 = vld [vmem:[%s11267_s2 + $0xa8] ss:$16 sps:$4 sm:$0xff]  }
  0x4e   : > { %6745 = vmatpush3.bf16.msra.mxu0 %v7835_v59  ;;  %v6905_v59 = vld [vmem:[%s11266_s1 + $0x160] ss:$16 sps:$4 sm:$0xff]  }
  0x4f   : > { %6746 = vmatprep.subr.bf16.mxu0 %v7841_v62  ;;  %v6912_v62 = vld [vmem:[%s11266_s1 + $0x18c] ss:$16 sps:$4 sm:$0xff]  }
  0x50   : > { %970 = vmatmul.mubr.bf16.gmra.mrb[12].mxu0 %v6857_v27  ;;  %1673 = vmatpush1.bf16.msra.mxu1 %v7833_v58  ;;  %v6906_v58 = vld [vmem:[%s11266_s1 + $0x16c] ss:$16 sps:$4 sm:$0xff]  }
  0x51   : > { %977 = vmatprep.mubr.bf16.mxu0 %v6861_v28  ;;  %1674 = vmatprep.subr.bf16.mxu1 %v11282_v0  ;;  %v6954_v27 = vld [vmem:[%s11267_s2 + $0xcc] ss:$16 sps:$4 sm:$0xff]   ;;  %v6953_v28 = vld [vmem:[%s11267_s2 + $0xc0] ss:$16 sps:$4 sm:$0xff]  }
  0x52   : > { %6747 = vmatpush3.bf16.msra.mxu0 %v7850_v4  ;;  %v6915_v4 = vld [vmem:[%s11267_s2] ss:$16 sps:$4 sm:$0xff]  }
  0x53   : > { %6748 = vmatprep.subr.bf16.mxu0 %v7856_v8  ;;  %1107 = vmatmul.mubr.bf16.gmra.mrb[12].mxu1 %v6860_v29  ;;  %v6924_v8 = vld [vmem:[%s11267_s2 + $0x2c] ss:$16 sps:$4 sm:$0xff]   ;;  %v6957_v29 = vld [vmem:[%s11267_s2 + $0xe4] ss:$16 sps:$4 sm:$0xff]  }
  0x54   : > { %6360 = vmatprep.mubr.msk.bf16.mxu1 %vm873_vm0, %v6864_v30  ;;  %1675 = vmatpush1.bf16.msra.mxu1 %v7848_v3  ;;  %v6920_v3 = vld [vmem:[%s11267_s2 + $0xc] ss:$16 sps:$4 sm:$0xff]   ;;  %v6956_v30 = vld [vmem:[%s11267_s2 + $0xc8] ss:$16 sps:$4 sm:$0xff]  }
  0x55   : > { %1676 = vmatprep.subr.bf16.mxu1 %v11282_v0 }
  0x56   : > { %6749 = vmatpush3.bf16.msra.mxu0 %v7864_v14  ;;  %v6930_v14 = vld [vmem:[%s11267_s2 + $0x4c] ss:$16 sps:$4 sm:$0xff]  }
  0x57   : > { %2434 = vmatprep.subr.bf16.mxu0 %v11282_v0 }
  0x58   : > { %978 = vmatmul.mubr.bf16.gmra.mrb[16].mxu0 %v6863_v31  ;;  %1677 = vmatpush1.bf16.msra.mxu1 %v7862_v13  ;;  %v6926_v13 = vld [vmem:[%s11267_s2 + $0x28] ss:$16 sps:$4 sm:$0xff]   ;;  %v6960_v31 = vld [vmem:[%s11267_s2 + $0xec] ss:$16 sps:$4 sm:$0xff]  }
  0x59   : > { %985 = vmatprep.mubr.bf16.mxu0 %v6867_v32  ;;  %1678 = vmatprep.subr.bf16.mxu1 %v11282_v0  ;;  %v6959_v32 = vld [vmem:[%s11267_s2 + $0xe0] ss:$16 sps:$4 sm:$0xff]  }
  0x5b   : > { %1115 = vmatmul.mubr.bf16.gmra.mrb[16].mxu1 %v6866_v33  ;;  %v6963_v33 = vld [vmem:[%s11267_s2 + $0x104] ss:$16 sps:$4 sm:$0xff]  }
  0x5c   : > { %6361 = vmatprep.mubr.msk.bf16.mxu1 %vm873_vm0, %v6870_v34  ;;  %1679 = vmatpush1.bf16.msra.mxu1 %v7875_v21  ;;  %v6936_v21 = vld [vmem:[%s11267_s2 + $0x6c] ss:$16 sps:$4 sm:$0xff]   ;;  %v6962_v34 = vld [vmem:[%s11267_s2 + $0xe8] ss:$16 sps:$4 sm:$0xff]  }
  0x5d   : > { %2967 = vmatprep.subr.bf16.mxu1 %v11282_v0 }
  0x60   : > { %986 = vmatmul.mubr.bf16.gmra.mrb[20].mxu0 %v6869_v35  ;;  %v6966_v35 = vld [vmem:[%s11267_s2 + $0x10c] ss:$16 sps:$4 sm:$0xff]  }
  0x61   : > { %993 = vmatprep.mubr.bf16.mxu0 %v6873_v36  ;;  %v6965_v36 = vld [vmem:[%s11267_s2 + $0x100] ss:$16 sps:$4 sm:$0xff]  }
  0x63   : > { %1123 = vmatmul.mubr.bf16.gmra.mrb[20].mxu1 %v6872_v37  ;;  %v6969_v37 = vld [vmem:[%s11267_s2 + $0x124] ss:$16 sps:$4 sm:$0xff]  }
  0x64   : > { %6362 = vmatprep.mubr.msk.bf16.mxu1 %vm873_vm0, %v6876_v38  ;;  %v6968_v38 = vld [vmem:[%s11267_s2 + $0x108] ss:$16 sps:$4 sm:$0xff]  }
  0x68   : > { %994 = vmatmul.mubr.bf16.gmra.mrb[24].mxu0 %v6875_v39  ;;  %v6972_v39 = vld [vmem:[%s11267_s2 + $0x12c] ss:$16 sps:$4 sm:$0xff]  }
  0x69   : > { %1001 = vmatprep.mubr.bf16.mxu0 %v6879_v40  ;;  %v6971_v40 = vld [vmem:[%s11267_s2 + $0x120] ss:$16 sps:$4 sm:$0xff]  }
  0x6b   : > { %1131 = vmatmul.mubr.bf16.gmra.mrb[24].mxu1 %v6878_v41  ;;  %v6975_v41 = vld [vmem:[%s11267_s2 + $0x144] ss:$16 sps:$4 sm:$0xff]  }
  0x6c   : > { %6363 = vmatprep.mubr.msk.bf16.mxu1 %vm873_vm0, %v6882_v42  ;;  %v6974_v42 = vld [vmem:[%s11267_s2 + $0x128] ss:$16 sps:$4 sm:$0xff]  }
  0x70   : > { %1002 = vmatmul.mubr.bf16.gmra.mrb[28].mxu0 %v6881_v43  ;;  %v6978_v43 = vld [vmem:[%s11267_s2 + $0x14c] ss:$16 sps:$4 sm:$0xff]  }
  0x71   : > { %1009 = vmatprep.mubr.bf16.mxu0 %v6885_v44  ;;  %v6977_v44 = vld [vmem:[%s11267_s2 + $0x140] ss:$16 sps:$4 sm:$0xff]  }
  0x73   : > { %1139 = vmatmul.mubr.bf16.gmra.mrb[28].mxu1 %v6884_v45  ;;  %v6981_v45 = vld [vmem:[%s11267_s2 + $0x164] ss:$16 sps:$4 sm:$0xff]  }
  0x74   : > { %6364 = vmatprep.mubr.msk.bf16.mxu1 %vm873_vm0, %v6888_v46  ;;  %v6980_v46 = vld [vmem:[%s11267_s2 + $0x148] ss:$16 sps:$4 sm:$0xff]  }
  0x78   : > { %1010 = vmatmul.mubr.bf16.gmra.mrb[32].mxu0 %v6887_v47  ;;  %v6984_v47 = vld [vmem:[%s11267_s2 + $0x16c] ss:$16 sps:$4 sm:$0xff]  }
  0x79   : > { %1017 = vmatprep.mubr.bf16.mxu0 %v6891_v48  ;;  %v6983_v48 = vld [vmem:[%s11267_s2 + $0x160] ss:$16 sps:$4 sm:$0xff]  }
  0x7b   : > { %1147 = vmatmul.mubr.bf16.gmra.mrb[32].mxu1 %v6890_v49  ;;  %v6987_v49 = vld [vmem:[%s11267_s2 + $0x184] ss:$16 sps:$4 sm:$0xff]  }
  0x7c   : > { %6365 = vmatprep.mubr.msk.bf16.mxu1 %vm873_vm0, %v6894_v50  ;;  %v6986_v50 = vld [vmem:[%s11267_s2 + $0x168] ss:$16 sps:$4 sm:$0xff]  }
  0x80   : > { %1018 = vmatmul.mubr.bf16.gmra.mrb[36].mxu0 %v6893_v51  ;;  %v6990_v51 = vld [vmem:[%s11267_s2 + $0x18c] ss:$16 sps:$4 sm:$0xff]  }
  0x81   : > { %1025 = vmatprep.mubr.bf16.mxu0 %v6897_v52  ;;  %v6989_v52 = vld [vmem:[%s11267_s2 + $0x180] ss:$16 sps:$4 sm:$0xff]  }
  0x83   : > { %1155 = vmatmul.mubr.bf16.gmra.mrb[36].mxu1 %v6896_v53  ;;  %v6992_v53 = vld [vmem:[%s11267_s2 + $0x188] ss:$16 sps:$4 sm:$0xff]  }
  0x84   : > { %6366 = vmatprep.mubr.msk.bf16.mxu1 %vm873_vm0, %v6900_v54 }
  0x88   : > { %1026 = vmatmul.mubr.bf16.gmra.mrb[40].mxu0 %v6899_v55 }
  0x89   : > { %1033 = vmatprep.mubr.bf16.mxu0 %v6903_v56 }
  0x8b   : > { %1163 = vmatmul.mubr.bf16.gmra.mrb[40].mxu1 %v6902_v57 }
  0x8c   : > { %6367 = vmatprep.mubr.msk.bf16.mxu1 %vm873_vm0, %v6906_v58 }
  0x90   : > { %1034 = vmatmul.mubr.bf16.gmra.mrb[44].mxu0 %v6905_v59 }
  0x91   : > { %1041 = vmatprep.mubr.bf16.mxu0 %v6909_v60 }
  0x93   : > { %1171 = vmatmul.mubr.bf16.gmra.mrb[44].mxu1 %v6908_v61 }
  0x94   : > { %6368 = vmatprep.mubr.msk.bf16.mxu1 %vm873_vm0, %v6912_v62 }
  0x98   : > { %1042 = vmatmul.mubr.bf16.gmra.mrb[48].mxu0 %v6911_v63 }
  0x99   : > { %1557 = vmatprep.mubr.bf16.mxu0 %v6917_v1 }
  0x9b   : > { %1179 = vmatmul.mubr.bf16.gmra.mrb[48].mxu1 %v6914_v2 }
  0x9c   : > { %6421 = vmatprep.mubr.msk.bf16.mxu1 %vm873_vm0, %v6920_v3 }
  0xa0   : > { %1558 = vmatmul.mubr.bf16.vlgmr.msra.gmra.mrb[52].mxu0 %v6915_v4 }
  0xa1   : > { %1565 = vmatprep.mubr.bf16.mxu0 %v6921_v5 }
  0xa3   : > { %1695 = vmatmul.mubr.bf16.vlgmr.msra.gmra.mrb[52].mxu1 %v6918_v7 }
  0xa4   : > { %6422 = vmatprep.mubr.msk.bf16.mxu1 %vm873_vm0, %v6924_v8 }
  0xa8   : > { %1566 = vmatmul.mubr.bf16.gmra.mrb[56].mxu0 %v6923_v9 }
  0xa9   : > { %1573 = vmatprep.mubr.bf16.mxu0 %v6927_v12 }
  0xab   : > { %1703 = vmatmul.mubr.bf16.gmra.mrb[56].mxu1 %v6926_v13 }
  0xac   : > { %6423 = vmatprep.mubr.msk.bf16.mxu1 %vm873_vm0, %v6930_v14 }
  0xb0   : > { %1574 = vmatmul.mubr.bf16.gmra.mrb[60].mxu0 %v6929_v16 }
  0xb1   : > { %1581 = vmatprep.mubr.bf16.mxu0 %v6933_v17 }
  0xb3   : > { %1711 = vmatmul.mubr.bf16.gmra.mrb[60].mxu1 %v6932_v18 }
  0xb4   : > { %6424 = vmatprep.mubr.msk.bf16.mxu1 %vm873_vm0, %v6936_v21 }
  0xb8   : > { %1582 = vmatmul.mubr.bf16.gmra.mrb[64].mxu0 %v6935_v22 }
  0xb9   : > { %1589 = vmatprep.mubr.bf16.mxu0 %v6939_v23 }
  0xbb   : > { %1719 = vmatmul.mubr.bf16.gmra.mrb[64].mxu1 %v6938_v25 }
  0xbc   : > { %6425 = vmatprep.mubr.msk.bf16.mxu1 %vm873_vm0, %v6942_v6 }
  0xc0   : > { %1590 = vmatmul.mubr.bf16.gmra.mrb[68].mxu0 %v6941_v11 }
  0xc1   : > { %1597 = vmatprep.mubr.bf16.mxu0 %v6945_v15 }
  0xc3   : > { %1727 = vmatmul.mubr.bf16.gmra.mrb[68].mxu1 %v6944_v10 }
  0xc4   : > { %6426 = vmatprep.mubr.msk.bf16.mxu1 %vm873_vm0, %v6948_v20 }
  0xc8   : > { %1598 = vmatmul.mubr.bf16.gmra.mrb[72].mxu0 %v6947_v24 }
  0xc9   : > { %1605 = vmatprep.mubr.bf16.mxu0 %v6951_v19 }
  0xcb   : > { %1735 = vmatmul.mubr.bf16.gmra.mrb[72].mxu1 %v6950_v26 }
  0xcc   : > { %6427 = vmatprep.mubr.msk.bf16.mxu1 %vm873_vm0, %v6954_v27 }
  0xd0   : > { %1606 = vmatmul.mubr.bf16.gmra.mrb[76].mxu0 %v6953_v28 }
  0xd1   : > { %1613 = vmatprep.mubr.bf16.mxu0 %v6957_v29 }
  0xd3   : > { %1743 = vmatmul.mubr.bf16.gmra.mrb[76].mxu1 %v6956_v30 }
  0xd4   : > { %6428 = vmatprep.mubr.msk.bf16.mxu1 %vm873_vm0, %v6960_v31 }
  0xd8   : > { %1614 = vmatmul.mubr.bf16.gmra.mrb[80].mxu0 %v6959_v32 }
  0xd9   : > { %1621 = vmatprep.mubr.bf16.mxu0 %v6963_v33 }
  0xdb   : > { %1751 = vmatmul.mubr.bf16.gmra.mrb[80].mxu1 %v6962_v34 }
  0xdc   : > { %6429 = vmatprep.mubr.msk.bf16.mxu1 %vm873_vm0, %v6966_v35 }
  0xe0   : > { %1622 = vmatmul.mubr.bf16.gmra.mrb[84].mxu0 %v6965_v36 }
  0xe1   : > { %1629 = vmatprep.mubr.bf16.mxu0 %v6969_v37 }
  0xe3   : > { %1759 = vmatmul.mubr.bf16.gmra.mrb[84].mxu1 %v6968_v38 }
  0xe4   : > { %6430 = vmatprep.mubr.msk.bf16.mxu1 %vm873_vm0, %v6972_v39 }
  0xe8   : > { %1630 = vmatmul.mubr.bf16.gmra.mrb[88].mxu0 %v6971_v40 }
  0xe9   : > { %1637 = vmatprep.mubr.bf16.mxu0 %v6975_v41 }
  0xeb   : > { %1767 = vmatmul.mubr.bf16.gmra.mrb[88].mxu1 %v6974_v42 }
  0xec   : > { %6431 = vmatprep.mubr.msk.bf16.mxu1 %vm873_vm0, %v6978_v43 }
  0xf0   : > { %1638 = vmatmul.mubr.bf16.gmra.mrb[92].mxu0 %v6977_v44 }
  0xf1   : > { %1645 = vmatprep.mubr.bf16.mxu0 %v6981_v45 }
  0xf3   : > { %1775 = vmatmul.mubr.bf16.gmra.mrb[92].mxu1 %v6980_v46 }
  0xf4   : > { %6432 = vmatprep.mubr.msk.bf16.mxu1 %vm873_vm0, %v6984_v47 }
  0xf8   : > { %1646 = vmatmul.mubr.bf16.gmra.mrb[96].mxu0 %v6983_v48 }
  0xf9   : > { %1653 = vmatprep.mubr.bf16.mxu0 %v6987_v49 }
  0xfb   : > { %1783 = vmatmul.mubr.bf16.gmra.mrb[96].mxu1 %v6986_v50 }
  0xfc   : > { %6433 = vmatprep.mubr.msk.bf16.mxu1 %vm873_vm0, %v6990_v51 }
 0x100   : > { %1654 = vmatmul.mubr.bf16.gmra.mrb[100].mxu0 %v6989_v52 }
 0x103   : > { %1791 = vmatmul.mubr.bf16.gmra.mrb[100].mxu1 %v6992_v53 }
 0x10b   : > { %v6656_v54 = vpop.f32.mrb[0].mxu0 }
 0x10c   : > { %v6657_v55 = vpop.f32.mrb[1].mxu0 }
 0x10d   : > { %v6658_v56 = vadd.f32 %v6657_v55, %v6656_v54  ;;  %v6659_v57 = vpop.f32.mrb[2].mxu0 }
 0x10e   : > { %v6660_v58 = vpop.f32.mrb[3].mxu0  ;;  %v1084_v60 = vpop.f32.mrb[0].mxu1 }
 0x10f   : > { %v6661_v59 = vadd.f32 %v6660_v58, %v6659_v57  ;;  %v8243_v61 = vadd.f32 %v6658_v56, %v1084_v60  ;;  %v1086_v62 = vpop.f32.mrb[1].mxu1 }
 0x110   : > { %v1087_v63 = vpop.f32.mrb[2].mxu1 }
 0x111   : > { %v8245_v1 = vadd.f32 %v6661_v59, %v1087_v63  ;;  %v1089_v2 = vpop.f32.mrb[3].mxu1 }
 0x113   : > { %v6662_v3 = vpop.f32.mrb[4].mxu0 }
 0x114   : > { %v6663_v4 = vpop.f32.mrb[5].mxu0 }
 0x115   : > { %v6664_v5 = vadd.f32 %v6663_v4, %v6662_v3  ;;  %v6665_v7 = vpop.f32.mrb[6].mxu0 }
 0x116   : > { %v6666_v8 = vpop.f32.mrb[7].mxu0  ;;  %v1092_v12 = vpop.f32.mrb[4].mxu1 }
 0x117   : > { %v6667_v9 = vadd.f32 %v6666_v8, %v6665_v7  ;;  %v8247_v13 = vadd.f32 %v6664_v5, %v1092_v12  ;;  %v1094_v14 = vpop.f32.mrb[5].mxu1 }
 0x118   : > { %v1095_v16 = vpop.f32.mrb[6].mxu1 }
 0x119   : > { %v8249_v17 = vadd.f32 %v6667_v9, %v1095_v16  ;;  %v1097_v18 = vpop.f32.mrb[7].mxu1 }
 0x11b   : > { %v6668_v21 = vpop.f32.mrb[8].mxu0 }
 0x11c   : > { %v6669_v22 = vpop.f32.mrb[9].mxu0 }
 0x11d   : > { %v6670_v23 = vadd.f32 %v6669_v22, %v6668_v21  ;;  %v6671_v25 = vpop.f32.mrb[10].mxu0 }
 0x11e   : > { %v6672_v6 = vpop.f32.mrb[11].mxu0  ;;  %v1100_v15 = vpop.f32.mrb[8].mxu1 }
 0x11f   : > { %v6673_v11 = vadd.f32 %v6672_v6, %v6671_v25  ;;  %v8251_v10 = vadd.f32 %v6670_v23, %v1100_v15  ;;  %v1102_v20 = vpop.f32.mrb[9].mxu1 }
 0x120   : > { %v1103_v24 = vpop.f32.mrb[10].mxu1 }
 0x121   : > { %v8253_v19 = vadd.f32 %v6673_v11, %v1103_v24  ;;  %v1105_v26 = vpop.f32.mrb[11].mxu1 }
 0x123   : > { %v6674_v27 = vpop.f32.mrb[12].mxu0 }
 0x124   : > { %v6675_v28 = vpop.f32.mrb[13].mxu0 }
 0x125   : > { %v6676_v29 = vadd.f32 %v6675_v28, %v6674_v27  ;;  %v6677_v30 = vpop.f32.mrb[14].mxu0 }
 0x126   : > { %v6678_v31 = vpop.f32.mrb[15].mxu0  ;;  %v1108_v33 = vpop.f32.mrb[12].mxu1 }
 0x127   : > { %v6679_v32 = vadd.f32 %v6678_v31, %v6677_v30  ;;  %v8255_v34 = vadd.f32 %v6676_v29, %v1108_v33  ;;  %v1110_v35 = vpop.f32.mrb[13].mxu1 }
 0x128   : > { %v1111_v36 = vpop.f32.mrb[14].mxu1 }
 0x129   : > { %v8257_v37 = vadd.f32 %v6679_v32, %v1111_v36  ;;  %v1113_v38 = vpop.f32.mrb[15].mxu1 }
 0x12b   : > { %v6680_v39 = vpop.f32.mrb[16].mxu0 }
 0x12c   : > { %v6681_v40 = vpop.f32.mrb[17].mxu0 }
 0x12d   : > { %v6682_v41 = vadd.f32 %v6681_v40, %v6680_v39  ;;  %v6683_v42 = vpop.f32.mrb[18].mxu0 }
 0x12e   : > { %v6684_v43 = vpop.f32.mrb[19].mxu0  ;;  %v1116_v45 = vpop.f32.mrb[16].mxu1 }
 0x12f   : > { %v6685_v44 = vadd.f32 %v6684_v43, %v6683_v42  ;;  %v8259_v46 = vadd.f32 %v6682_v41, %v1116_v45  ;;  %v1118_v47 = vpop.f32.mrb[17].mxu1 }
 0x130   : > { %v1119_v48 = vpop.f32.mrb[18].mxu1 }
 0x131   : > { %v8261_v49 = vadd.f32 %v6685_v44, %v1119_v48  ;;  %v1121_v50 = vpop.f32.mrb[19].mxu1 }
 0x133   : > { %v6686_v51 = vpop.f32.mrb[20].mxu0 }
 0x134   : > { %v6687_v52 = vpop.f32.mrb[21].mxu0 }
 0x135   : > { %v6688_v53 = vadd.f32 %v6687_v52, %v6686_v51  ;;  %v6689_v54 = vpop.f32.mrb[22].mxu0 }
 0x136   : > { %v6690_v55 = vpop.f32.mrb[23].mxu0  ;;  %v1124_v57 = vpop.f32.mrb[20].mxu1 }
 0x137   : > { %v6691_v56 = vadd.f32 %v6690_v55, %v6689_v54  ;;  %v8263_v58 = vadd.f32 %v6688_v53, %v1124_v57  ;;  %v1126_v59 = vpop.f32.mrb[21].mxu1 }
 0x138   : > { %v1127_v60 = vpop.f32.mrb[22].mxu1 }
 0x139   : > { %v8265_v62 = vadd.f32 %v6691_v56, %v1127_v60  ;;  %v1129_v63 = vpop.f32.mrb[23].mxu1 }
 0x13b   : > { %v6692_v2 = vpop.f32.mrb[24].mxu0 }
 0x13c   : > { %v6693_v3 = vpop.f32.mrb[25].mxu0 }
 0x13d   : > { %v6694_v4 = vadd.f32 %v6693_v3, %v6692_v2  ;;  %v6695_v5 = vpop.f32.mrb[26].mxu0 }
 0x13e   : > { %v6696_v7 = vpop.f32.mrb[27].mxu0  ;;  %v1132_v9 = vpop.f32.mrb[24].mxu1 }
 0x13f   : > { %v6697_v8 = vadd.f32 %v6696_v7, %v6695_v5  ;;  %v8267_v12 = vadd.f32 %v6694_v4, %v1132_v9  ;;  %v1134_v14 = vpop.f32.mrb[25].mxu1 }
 0x140   : > { %v1135_v16 = vpop.f32.mrb[26].mxu1 }
 0x141   : > { %v8269_v18 = vadd.f32 %v6697_v8, %v1135_v16  ;;  %v1137_v21 = vpop.f32.mrb[27].mxu1 }
 0x142   : > { %v6995_v21 = vld [vmem:[%s11269_s4 + $0x4] ss:$8 sps:$4 sm:$0xff]  }
 0x143   : > { %v6698_v22 = vpop.f32.mrb[28].mxu0  ;;  %6484 = vmatprep.mubr.msk.bf16.mxu0 %vm2358_vm1, %v6995_v21 }
 0x144   : > { %v6699_v23 = vpop.f32.mrb[29].mxu0 }
 0x145   : > { %v6700_v25 = vadd.f32 %v6699_v23, %v6698_v22  ;;  %v6701_v6 = vpop.f32.mrb[30].mxu0  ;;  %v6998_v23 = vld [vmem:[%s11268_s3 + $0x4] ss:$8 sps:$4 sm:$0xff]  }
 0x146   : > { %v6702_v11 = vpop.f32.mrb[31].mxu0  ;;  %v1140_v20 = vpop.f32.mrb[28].mxu1  ;;  %6559 = vmatprep.mubr.msk.bf16.mxu1 %vm2358_vm1, %v6998_v23 }
 0x147   : > { %v6703_v15 = vadd.f32 %v6702_v11, %v6701_v6  ;;  %v8271_v24 = vadd.f32 %v6700_v25, %v1140_v20  ;;  %v1142_v26 = vpop.f32.mrb[29].mxu1 }
 0x148   : > { %v1143_v27 = vpop.f32.mrb[30].mxu1 }
 0x149   : > { %v8273_v28 = vadd.f32 %v6703_v15, %v1143_v27  ;;  %v1145_v29 = vpop.f32.mrb[31].mxu1 }
 0x14b   : > { %v6704_v30 = vpop.f32.mrb[32].mxu0 }
 0x14c   : > { %v6705_v31 = vpop.f32.mrb[33].mxu0 }
 0x14d   : > { %v6706_v32 = vadd.f32 %v6705_v31, %v6704_v30  ;;  %v6707_v33 = vpop.f32.mrb[34].mxu0 }
 0x14e   : > { %v6708_v35 = vpop.f32.mrb[35].mxu0  ;;  %v1148_v38 = vpop.f32.mrb[32].mxu1 }
 0x14f   : > { %v6709_v36 = vadd.f32 %v6708_v35, %v6707_v33  ;;  %v8275_v39 = vadd.f32 %v6706_v32, %v1148_v38  ;;  %v1150_v40 = vpop.f32.mrb[33].mxu1 }
 0x150   : > { %v1151_v41 = vpop.f32.mrb[34].mxu1 }
 0x151   : > { %v8277_v42 = vadd.f32 %v6709_v36, %v1151_v41  ;;  %v1153_v43 = vpop.f32.mrb[35].mxu1 }
 0x153   : > { %v6710_v44 = vpop.f32.mrb[36].mxu0 }
 0x154   : > { %v6711_v45 = vpop.f32.mrb[37].mxu0 }
 0x155   : > { %v6712_v47 = vadd.f32 %v6711_v45, %v6710_v44  ;;  %v6713_v48 = vpop.f32.mrb[38].mxu0 }
 0x156   : > { %v6714_v50 = vpop.f32.mrb[39].mxu0  ;;  %v1156_v52 = vpop.f32.mrb[36].mxu1 }
 0x157   : > { %v6715_v51 = vadd.f32 %v6714_v50, %v6713_v48  ;;  %v8279_v53 = vadd.f32 %v6712_v47, %v1156_v52  ;;  %v1158_v54 = vpop.f32.mrb[37].mxu1 }
 0x158   : > { %v1159_v55 = vpop.f32.mrb[38].mxu1 }
 0x159   : > { %v8281_v56 = vadd.f32 %v6715_v51, %v1159_v55  ;;  %v1161_v57 = vpop.f32.mrb[39].mxu1 }
 0x15b   : > { %v6716_v59 = vpop.f32.mrb[40].mxu0 }
 0x15c   : > { %v6717_v60 = vpop.f32.mrb[41].mxu0 }
 0x15d   : > { %v6718_v63 = vadd.f32 %v6717_v60, %v6716_v59  ;;  %v6719_v2 = vpop.f32.mrb[42].mxu0  ;;  %v1799_v59 = vld [vmem:[%s11270_s5] sm:$0xff] }
 0x15e   : > { %v6720_v3 = vpop.f32.mrb[43].mxu0  ;;  %v1164_v5 = vpop.f32.mrb[40].mxu1 }
 0x15f   : > { %v6721_v4 = vadd.f32 %v6720_v3, %v6719_v2  ;;  %v8283_v7 = vadd.f32 %v6718_v63, %v1164_v5  ;;  %v1166_v8 = vpop.f32.mrb[41].mxu1  ;;  %v1825_v2 = vld [vmem:[%s11271_s6] sm:$0xff]  ;;  %v1800_v5 = vld [vmem:[%s11270_s5 + $0x8] sm:$0xff] }
 0x160   : > { %v1167_v9 = vpop.f32.mrb[42].mxu1  ;;  %v1826_v8 = vld [vmem:[%s11271_s6 + $0x8] sm:$0xff] }
 0x161   : > { %v8285_v14 = vadd.f32 %v6721_v4, %v1167_v9  ;;  %v1169_v16 = vpop.f32.mrb[43].mxu1  ;;  %v1851_v9 = vmul.f32 %v1799_v59, %v8243_v61 }
 0x163   : > { %v6722_v22 = vpop.f32.mrb[44].mxu0 }
 0x164   : > { %v6723_v25 = vpop.f32.mrb[45].mxu0 }
 0x165   : > { %v6724_v6 = vadd.f32 %v6723_v25, %v6722_v22  ;;  %v6725_v11 = vpop.f32.mrb[46].mxu0  ;;  %v1942_v22 = vmul.f32 %v1825_v2, %v8243_v61  ;;  %v1801_v61 = vld [vmem:[%s11270_s5 + $0x10] sm:$0xff] }
 0x166   : > { %v6726_v15 = vpop.f32.mrb[47].mxu0  ;;  %v1172_v26 = vpop.f32.mrb[44].mxu1 }
 0x167   : > { %v6727_v20 = vadd.f32 %v6726_v15, %v6725_v11  ;;  %v8295_v27 = vadd.f32 %v6724_v6, %v1172_v26  ;;  %v1174_v29 = vpop.f32.mrb[45].mxu1  ;;  %v1852_v11 = vmul.f32 %v1800_v5, %v8245_v1  ;;  %v1943_v15 = vmul.f32 %v1826_v8, %v8245_v1 }
 0x168   : > { %v1175_v30 = vpop.f32.mrb[46].mxu1 }
 0x169   : > { %v8297_v31 = vadd.f32 %v6727_v20, %v1175_v30  ;;  %v1177_v32 = vpop.f32.mrb[47].mxu1 }
 0x16b   : > { %v6728_v33 = vpop.f32.mrb[48].mxu0 }
 0x16c   : > { %v6729_v35 = vpop.f32.mrb[49].mxu0 }
 0x16d   : > { %v6730_v36 = vadd.f32 %v6729_v35, %v6728_v33  ;;  %v6731_v38 = vpop.f32.mrb[50].mxu0 }
 0x16e   : > { %v6732_v40 = vpop.f32.mrb[51].mxu0  ;;  %v1180_v43 = vpop.f32.mrb[48].mxu1 }
 0x16f   : > { %v6733_v41 = vadd.f32 %v6732_v40, %v6731_v38  ;;  %v8299_v44 = vadd.f32 %v6730_v36, %v1180_v43  ;;  %v1182_v45 = vpop.f32.mrb[49].mxu1  ;;  %v1827_v43 = vld [vmem:[%s11271_s6 + $0x10] sm:$0xff] }
 0x170   : > { %v1183_v47 = vpop.f32.mrb[50].mxu1 }
 0x171   : > { %v8301_v48 = vadd.f32 %v6733_v41, %v1183_v47  ;;  %v1185_v50 = vpop.f32.mrb[51].mxu1 }
 0x173   : > { %v6750_v51 = vpop.f32.mrb[52].mxu0 }
 0x174   : > { %v6751_v52 = vpop.f32.mrb[53].mxu0 }
 0x175   : > { %v6752_v54 = vadd.f32 %v6751_v52, %v6750_v51  ;;  %v6753_v55 = vpop.f32.mrb[54].mxu0 }
 0x176   : > { %v6754_v57 = vpop.f32.mrb[55].mxu0  ;;  %v1696_v63 = vpop.f32.mrb[52].mxu1 }
 0x177   : > { %v6755_v60 = vadd.f32 %v6754_v57, %v6753_v55  ;;  %v1697_v3 = vadd.f32 %v6752_v54, %v1696_v63  ;;  %v1698_v4 = vpop.f32.mrb[53].mxu1  ;;  %v1802_v54 = vld [vmem:[%s11270_s5 + $0x18] sm:$0xff]  ;;  %v1853_v57 = vmul.f32 %v1801_v61, %v8247_v13 }
 0x178   : > { %v1699_v16 = vpop.f32.mrb[54].mxu1  ;;  %v1828_v55 = vld [vmem:[%s11271_s6 + $0x18] sm:$0xff] }
 0x179   : > { %v1877_v21 = vmul.f32 %v1825_v2, %v1697_v3  ;;  %v1968_v23 = vmul.f32 %v1799_v59, %v1697_v3  ;;  %v1700_v25 = vadd.f32 %v6755_v60, %v1699_v16  ;;  %v1701_v6 = vpop.f32.mrb[55].mxu1  ;;  %v1944_v59 = vmul.f32 %v1827_v43, %v8247_v13 }
 0x17b   : > { %v6756_v20 = vpop.f32.mrb[56].mxu0  ;;  %v1903_v26 = vsub.f32 %v1851_v9, %v1877_v21  ;;  %v1994_v29 = vadd.f32 %v1968_v23, %v1942_v22  ;;  %v1878_v30 = vmul.f32 %v1826_v8, %v1700_v25  ;;  %v1969_v32 = vmul.f32 %v1800_v5, %v1700_v25 }
 0x17c   : > { %v6757_v33 = vpop.f32.mrb[57].mxu0  ;;  %v1854_v5 = vmul.f32 %v1802_v54, %v8249_v17  ;;  %v1945_v8 = vmul.f32 %v1828_v55, %v8249_v17  ;;  %v1829_v17 = vld [vmem:[%s11271_s6 + $0x20] sm:$0xff] }
 0x17d   : > { %v6758_v35 = vadd.f32 %v6757_v33, %v6756_v20  ;;  %v6759_v36 = vpop.f32.mrb[58].mxu0  ;;  %v1904_v38 = vsub.f32 %v1852_v11, %v1878_v30  ;;  %v1995_v40 = vadd.f32 %v1969_v32, %v1943_v15 }
 0x17e   : > { %v6760_v41 = vpop.f32.mrb[59].mxu0  ;;  %v1704_v45 = vpop.f32.mrb[56].mxu1 }
 0x17f   : > { %v6761_v1 = vadd.f32 %v6760_v41, %v6759_v36  ;;  %v1929_v47 = vpack.c.bf16 %v1904_v38, %v1903_v26  ;;  %v2020_v50 = vpack.c.bf16 %v1995_v40, %v1994_v29  ;;  %v1705_v51 = vadd.f32 %v6758_v35, %v1704_v45  ;;  %v1706_v52 = vpop.f32.mrb[57].mxu1  ;;  %v1803_v26 = vld [vmem:[%s11270_s5 + $0x20] sm:$0xff]  ;;  %v1804_v38 = vld [vmem:[%s11270_s5 + $0x28] sm:$0xff] }
 0x180   : > { %v1707_v60 = vpop.f32.mrb[58].mxu1  ;;  %v1830_v40 = vld [vmem:[%s11271_s6 + $0x28] sm:$0xff]  ;;  %v1855_v41 = vmul.f32 %v1803_v26, %v8251_v10 }
 0x181   : > { %v1879_v63 = vmul.f32 %v1827_v43, %v1705_v51  ;;  %v1970_v2 = vmul.f32 %v1801_v61, %v1705_v51  ;;  %v1708_v3 = vadd.f32 %v6761_v1, %v1707_v60  ;;  %v1709_v4 = vpop.f32.mrb[59].mxu1  ;;  %2435 = vmatpush1.bf16.msra.mxu0 %v2020_v50  ;;  %2968 = vmatpush1.bf16.msra.mxu1 %v1929_v47 }
 0x182   : > { %2436 = vmatprep.subr.bf16.mxu0 %v11282_v0  ;;  %2969 = vmatprep.subr.bf16.mxu1 %v11282_v0  ;;  %v1946_v61 = vmul.f32 %v1829_v17, %v8251_v10  ;;  %v1856_v51 = vmul.f32 %v1804_v38, %v8253_v19  ;;  %v1947_v52 = vmul.f32 %v1830_v40, %v8253_v19  ;;  %v1831_v19 = vld [vmem:[%s11271_s6 + $0x30] sm:$0xff] }
 0x183   : > { %v6762_v9 = vpop.f32.mrb[60].mxu0  ;;  %v1905_v16 = vsub.f32 %v1853_v57, %v1879_v63  ;;  %v1996_v21 = vadd.f32 %v1970_v2, %v1944_v59  ;;  %v1880_v22 = vmul.f32 %v1828_v55, %v1708_v3  ;;  %v1971_v13 = vmul.f32 %v1802_v54, %v1708_v3 }
 0x184   : > { %v6763_v23 = vpop.f32.mrb[61].mxu0 }
 0x185   : > { %v6764_v25 = vadd.f32 %v6763_v23, %v6762_v9  ;;  %v6765_v6 = vpop.f32.mrb[62].mxu0  ;;  %v1906_v11 = vsub.f32 %v1854_v5, %v1880_v22  ;;  %v1997_v15 = vadd.f32 %v1971_v13, %v1945_v8  ;;  %v1805_v8 = vld [vmem:[%s11270_s5 + $0x30] sm:$0xff] }
 0x186   : > { %v6766_v20 = vpop.f32.mrb[63].mxu0  ;;  %v1712_v30 = vpop.f32.mrb[60].mxu1 }
 0x187   : > { %v6767_v29 = vadd.f32 %v6766_v20, %v6765_v6  ;;  %v1930_v32 = vpack.c.bf16 %v1906_v11, %v1905_v16  ;;  %v2021_v33 = vpack.c.bf16 %v1997_v15, %v1996_v21  ;;  %v1713_v35 = vadd.f32 %v6764_v25, %v1712_v30  ;;  %v1714_v36 = vpop.f32.mrb[61].mxu1  ;;  %v1806_v25 = vld [vmem:[%s11270_s5 + $0x38] sm:$0xff] }
 0x188   : > { %v1715_v43 = vpop.f32.mrb[62].mxu1  ;;  %v1832_v6 = vld [vmem:[%s11271_s6 + $0x38] sm:$0xff]  ;;  %v1857_v11 = vmul.f32 %v1805_v8, %v8255_v34  ;;  %v1948_v15 = vmul.f32 %v1831_v19, %v8255_v34 }
 0x189   : > { %v1881_v1 = vmul.f32 %v1829_v17, %v1713_v35  ;;  %v1972_v45 = vmul.f32 %v1803_v26, %v1713_v35  ;;  %v1716_v47 = vadd.f32 %v6767_v29, %v1715_v43  ;;  %v1717_v50 = vpop.f32.mrb[63].mxu1  ;;  %2437 = vmatpush1.bf16.msra.mxu0 %v2021_v33  ;;  %2970 = vmatpush1.bf16.msra.mxu1 %v1930_v32 }
 0x18a   : > { %2438 = vmatprep.subr.bf16.mxu0 %v11282_v0  ;;  %2971 = vmatprep.subr.bf16.mxu1 %v11282_v0  ;;  %v1858_v32 = vmul.f32 %v1806_v25, %v8257_v37  ;;  %v1949_v33 = vmul.f32 %v1832_v6, %v8257_v37  ;;  %v1807_v50 = vld [vmem:[%s11270_s5 + $0x40] sm:$0xff] }
 0x18b   : > { %v6768_v54 = vpop.f32.mrb[64].mxu0  ;;  %v1907_v55 = vsub.f32 %v1855_v41, %v1881_v1  ;;  %v1998_v57 = vadd.f32 %v1972_v45, %v1946_v61  ;;  %v1882_v59 = vmul.f32 %v1830_v40, %v1716_v47  ;;  %v1973_v10 = vmul.f32 %v1804_v38, %v1716_v47  ;;  %v1833_v37 = vld [vmem:[%s11271_s6 + $0x40] sm:$0xff] }
 0x18c   : > { %v6769_v60 = vpop.f32.mrb[65].mxu0 }
 0x18d   : > { %v6770_v63 = vadd.f32 %v6769_v60, %v6768_v54  ;;  %v6771_v2 = vpop.f32.mrb[66].mxu0  ;;  %v1908_v3 = vsub.f32 %v1856_v51, %v1882_v59  ;;  %v1999_v4 = vadd.f32 %v1973_v10, %v1947_v52  ;;  %v1808_v10 = vld [vmem:[%s11270_s5 + $0x48] sm:$0xff] }
 0x18e   : > { %v6772_v5 = vpop.f32.mrb[67].mxu0  ;;  %v1720_v16 = vpop.f32.mrb[64].mxu1  ;;  %v1834_v60 = vld [vmem:[%s11271_s6 + $0x48] sm:$0xff] }
 0x18f   : > { %v6773_v9 = vadd.f32 %v6772_v5, %v6771_v2  ;;  %v1931_v21 = vpack.c.bf16 %v1908_v3, %v1907_v55  ;;  %v2022_v22 = vpack.c.bf16 %v1999_v4, %v1998_v57  ;;  %v1721_v13 = vadd.f32 %v6770_v63, %v1720_v16  ;;  %v1722_v23 = vpop.f32.mrb[65].mxu1 }
 0x190   : > { %v1723_v20 = vpop.f32.mrb[66].mxu1  ;;  %v1859_v63 = vmul.f32 %v1807_v50, %v8259_v46  ;;  %v1950_v2 = vmul.f32 %v1833_v37, %v8259_v46  ;;  %v1951_v16 = vmul.f32 %v1834_v60, %v8261_v49 }
 0x191   : > { %v1883_v26 = vmul.f32 %v1831_v19, %v1721_v13  ;;  %v1974_v17 = vmul.f32 %v1805_v8, %v1721_v13  ;;  %v1724_v29 = vadd.f32 %v6773_v9, %v1723_v20  ;;  %v1725_v30 = vpop.f32.mrb[67].mxu1  ;;  %2439 = vmatpush1.bf16.msra.mxu0 %v2022_v22  ;;  %2972 = vmatpush1.bf16.msra.mxu1 %v1931_v21 }
 0x192   : > { %2440 = vmatprep.subr.bf16.mxu0 %v11282_v0  ;;  %2973 = vmatprep.subr.bf16.mxu1 %v11282_v0  ;;  %v1860_v9 = vmul.f32 %v1808_v10, %v8261_v49  ;;  %v1835_v49 = vld [vmem:[%s11271_s6 + $0x50] sm:$0xff] }
 0x193   : > { %v6774_v35 = vpop.f32.mrb[68].mxu0  ;;  %v1909_v36 = vsub.f32 %v1857_v11, %v1883_v26  ;;  %v2000_v38 = vadd.f32 %v1974_v17, %v1948_v15  ;;  %v1884_v40 = vmul.f32 %v1832_v6, %v1724_v29  ;;  %v1975_v34 = vmul.f32 %v1806_v25, %v1724_v29  ;;  %v1809_v17 = vld [vmem:[%s11270_s5 + $0x50] sm:$0xff] }
 0x194   : > { %v6775_v41 = vpop.f32.mrb[69].mxu0 }
 0x195   : > { %v6776_v61 = vadd.f32 %v6775_v41, %v6774_v35  ;;  %v6777_v43 = vpop.f32.mrb[70].mxu0  ;;  %v1910_v1 = vsub.f32 %v1858_v32, %v1884_v40  ;;  %v2001_v45 = vadd.f32 %v1975_v34, %v1949_v33  ;;  %v1836_v40 = vld [vmem:[%s11271_s6 + $0x58] sm:$0xff]  ;;  %v1861_v34 = vmul.f32 %v1809_v17, %v8263_v58 }
 0x196   : > { %v6778_v47 = vpop.f32.mrb[71].mxu0  ;;  %v1728_v52 = vpop.f32.mrb[68].mxu1  ;;  %v1952_v41 = vmul.f32 %v1835_v49, %v8263_v58 }
 0x197   : > { %v6779_v51 = vadd.f32 %v6778_v47, %v6777_v43  ;;  %v1932_v54 = vpack.c.bf16 %v1910_v1, %v1909_v36  ;;  %v2023_v55 = vpack.c.bf16 %v2001_v45, %v2000_v38  ;;  %v1729_v57 = vadd.f32 %v6776_v61, %v1728_v52  ;;  %v1730_v59 = vpop.f32.mrb[69].mxu1  ;;  %v1810_v38 = vld [vmem:[%s11270_s5 + $0x58] sm:$0xff] }
 0x198   : > { %v1731_v3 = vpop.f32.mrb[70].mxu1 }
 0x199   : > { %v1885_v4 = vmul.f32 %v1833_v37, %v1729_v57  ;;  %v1976_v5 = vmul.f32 %v1807_v50, %v1729_v57  ;;  %v1732_v8 = vadd.f32 %v6779_v51, %v1731_v3  ;;  %v1733_v19 = vpop.f32.mrb[71].mxu1  ;;  %2441 = vmatpush1.bf16.msra.mxu0 %v2023_v55  ;;  %2974 = vmatpush1.bf16.msra.mxu1 %v1932_v54  ;;  %v1811_v3 = vld [vmem:[%s11270_s5 + $0x60] sm:$0xff] }
 0x19a   : > { %2442 = vmatprep.subr.bf16.mxu0 %v11282_v0  ;;  %2975 = vmatprep.subr.bf16.mxu1 %v11282_v0  ;;  %v1862_v50 = vmul.f32 %v1810_v38, %v8265_v62  ;;  %v1953_v37 = vmul.f32 %v1836_v40, %v8265_v62  ;;  %v1837_v62 = vld [vmem:[%s11271_s6 + $0x60] sm:$0xff] }
 0x19b   : > { %v6780_v21 = vpop.f32.mrb[72].mxu0  ;;  %v1911_v22 = vsub.f32 %v1859_v63, %v1885_v4  ;;  %v2002_v13 = vadd.f32 %v1976_v5, %v1950_v2  ;;  %v1886_v23 = vmul.f32 %v1834_v60, %v1732_v8  ;;  %v1977_v46 = vmul.f32 %v1808_v10, %v1732_v8 }
 0x19c   : > { %v6781_v25 = vpop.f32.mrb[73].mxu0 }
 0x19d   : > { %v6782_v6 = vadd.f32 %v6781_v25, %v6780_v21  ;;  %v6783_v11 = vpop.f32.mrb[74].mxu0  ;;  %v1912_v15 = vsub.f32 %v1860_v9, %v1886_v23  ;;  %v2003_v20 = vadd.f32 %v1977_v46, %v1951_v16  ;;  %v1812_v21 = vld [vmem:[%s11270_s5 + $0x68] sm:$0xff]  ;;  %v1954_v23 = vmul.f32 %v1837_v62, %v8267_v12 }
 0x19e   : > { %v6784_v26 = vpop.f32.mrb[75].mxu0  ;;  %v1736_v30 = vpop.f32.mrb[72].mxu1 }
 0x19f   : > { %v6785_v29 = vadd.f32 %v6784_v26, %v6783_v11  ;;  %v1933_v32 = vpack.c.bf16 %v1912_v15, %v1911_v22  ;;  %v2024_v33 = vpack.c.bf16 %v2003_v20, %v2002_v13  ;;  %v1737_v35 = vadd.f32 %v6782_v6, %v1736_v30  ;;  %v1738_v36 = vpop.f32.mrb[73].mxu1  ;;  %v1838_v22 = vld [vmem:[%s11271_s6 + $0x68] sm:$0xff] }
 0x1a0   : > { %v1739_v61 = vpop.f32.mrb[74].mxu1  ;;  %v1863_v13 = vmul.f32 %v1811_v3, %v8267_v12  ;;  %v1864_v20 = vmul.f32 %v1812_v21, %v8269_v18  ;;  %v1955_v26 = vmul.f32 %v1838_v22, %v8269_v18  ;;  %v1839_v18 = vld [vmem:[%s11271_s6 + $0x70] sm:$0xff] }
 0x1a1   : > { %v1887_v43 = vmul.f32 %v1835_v49, %v1737_v35  ;;  %v1978_v1 = vmul.f32 %v1809_v17, %v1737_v35  ;;  %v1740_v45 = vadd.f32 %v6785_v29, %v1739_v61  ;;  %v1741_v47 = vpop.f32.mrb[75].mxu1  ;;  %2443 = vmatpush1.bf16.msra.mxu0 %v2024_v33  ;;  %2976 = vmatpush1.bf16.msra.mxu1 %v1933_v32 }
 0x1a2   : > { %2444 = vmatprep.subr.bf16.mxu0 %v11282_v0  ;;  %2977 = vmatprep.subr.bf16.mxu1 %v11282_v0 }
 0x1a3   : > { %v6786_v51 = vpop.f32.mrb[76].mxu0  ;;  %v1913_v52 = vsub.f32 %v1861_v34, %v1887_v43  ;;  %v2004_v54 = vadd.f32 %v1978_v1, %v1952_v41  ;;  %v1888_v55 = vmul.f32 %v1836_v40, %v1740_v45  ;;  %v1979_v58 = vmul.f32 %v1810_v38, %v1740_v45  ;;  %v1813_v34 = vld [vmem:[%s11270_s5 + $0x70] sm:$0xff] }
 0x1a4   : > { %v6787_v57 = vpop.f32.mrb[77].mxu0 }
 0x1a5   : > { %v6788_v59 = vadd.f32 %v6787_v57, %v6786_v51  ;;  %v6789_v10 = vpop.f32.mrb[78].mxu0  ;;  %v1914_v60 = vsub.f32 %v1862_v50, %v1888_v55  ;;  %v2005_v63 = vadd.f32 %v1979_v58, %v1953_v37  ;;  %v1814_v50 = vld [vmem:[%s11270_s5 + $0x78] sm:$0xff]  ;;  %v1865_v51 = vmul.f32 %v1813_v34, %v8271_v24 }
 0x1a6   : > { %v6790_v2 = vpop.f32.mrb[79].mxu0  ;;  %v1744_v5 = vpop.f32.mrb[76].mxu1  ;;  %v1840_v37 = vld [vmem:[%s11271_s6 + $0x78] sm:$0xff] }
 0x1a7   : > { %v6791_v4 = vadd.f32 %v6790_v2, %v6789_v10  ;;  %v1934_v8 = vpack.c.bf16 %v1914_v60, %v1913_v52  ;;  %v2025_v19 = vpack.c.bf16 %v2005_v63, %v2004_v54  ;;  %v1745_v9 = vadd.f32 %v6788_v59, %v1744_v5  ;;  %v1746_v16 = vpop.f32.mrb[77].mxu1 }
 0x1a8   : > { %v1747_v46 = vpop.f32.mrb[78].mxu1  ;;  %v1956_v52 = vmul.f32 %v1839_v18, %v8271_v24  ;;  %v1866_v10 = vmul.f32 %v1814_v50, %v8273_v28  ;;  %v1957_v60 = vmul.f32 %v1840_v37, %v8273_v28  ;;  %v1841_v28 = vld [vmem:[%s11271_s6 + $0x80] sm:$0xff] }
 0x1a9   : > { %v1889_v25 = vmul.f32 %v1837_v62, %v1745_v9  ;;  %v1980_v6 = vmul.f32 %v1811_v3, %v1745_v9  ;;  %v1748_v11 = vadd.f32 %v6791_v4, %v1747_v46  ;;  %v1749_v15 = vpop.f32.mrb[79].mxu1  ;;  %2445 = vmatpush1.bf16.msra.mxu0 %v2025_v19  ;;  %2978 = vmatpush1.bf16.msra.mxu1 %v1934_v8 }
 0x1aa   : > { %2446 = vmatprep.subr.bf16.mxu0 %v11282_v0  ;;  %2979 = vmatprep.subr.bf16.mxu1 %v11282_v0  ;;  %v1842_v15 = vld [vmem:[%s11271_s6 + $0x88] sm:$0xff] }
 0x1ab   : > { %v6792_v17 = vpop.f32.mrb[80].mxu0  ;;  %v1915_v49 = vsub.f32 %v1863_v13, %v1889_v25  ;;  %v2006_v29 = vadd.f32 %v1980_v6, %v1954_v23  ;;  %v1890_v30 = vmul.f32 %v1838_v22, %v1748_v11  ;;  %v1981_v12 = vmul.f32 %v1812_v21, %v1748_v11  ;;  %v1815_v21 = vld [vmem:[%s11270_s5 + $0x80] sm:$0xff]  ;;  %v1816_v11 = vld [vmem:[%s11270_s5 + $0x88] sm:$0xff] }
 0x1ac   : > { %v6793_v32 = vpop.f32.mrb[81].mxu0 }
 0x1ad   : > { %v6794_v33 = vadd.f32 %v6793_v32, %v6792_v17  ;;  %v6795_v35 = vpop.f32.mrb[82].mxu0  ;;  %v1916_v36 = vsub.f32 %v1864_v20, %v1890_v30  ;;  %v2007_v38 = vadd.f32 %v1981_v12, %v1955_v26  ;;  %v1867_v20 = vmul.f32 %v1815_v21, %v8275_v39 }
 0x1ae   : > { %v6796_v40 = vpop.f32.mrb[83].mxu0  ;;  %v1752_v61 = vpop.f32.mrb[80].mxu1  ;;  %v1958_v26 = vmul.f32 %v1841_v28, %v8275_v39  ;;  %v1868_v32 = vmul.f32 %v1816_v11, %v8277_v42 }
 0x1af   : > { %v6797_v41 = vadd.f32 %v6796_v40, %v6795_v35  ;;  %v1935_v43 = vpack.c.bf16 %v1916_v36, %v1915_v49  ;;  %v2026_v1 = vpack.c.bf16 %v2007_v38, %v2006_v29  ;;  %v1753_v45 = vadd.f32 %v6794_v33, %v1752_v61  ;;  %v1754_v47 = vpop.f32.mrb[81].mxu1 }
 0x1b0   : > { %v1755_v54 = vpop.f32.mrb[82].mxu1  ;;  %v1959_v33 = vmul.f32 %v1842_v15, %v8277_v42  ;;  %v1843_v42 = vld [vmem:[%s11271_s6 + $0x90] sm:$0xff] }
 0x1b1   : > { %v1891_v55 = vmul.f32 %v1839_v18, %v1753_v45  ;;  %v1982_v58 = vmul.f32 %v1813_v34, %v1753_v45  ;;  %v1756_v57 = vadd.f32 %v6797_v41, %v1755_v54  ;;  %v1757_v59 = vpop.f32.mrb[83].mxu1  ;;  %2447 = vmatpush1.bf16.msra.mxu0 %v2026_v1  ;;  %2980 = vmatpush1.bf16.msra.mxu1 %v1935_v43  ;;  %v1817_v45 = vld [vmem:[%s11270_s5 + $0x90] sm:$0xff] }
 0x1b2   : > { %2448 = vmatprep.subr.bf16.mxu0 %v11282_v0  ;;  %2981 = vmatprep.subr.bf16.mxu1 %v11282_v0  ;;  %v1960_v59 = vmul.f32 %v1843_v42, %v8279_v53 }
 0x1b3   : > { %v6798_v63 = vpop.f32.mrb[84].mxu0  ;;  %v1917_v2 = vsub.f32 %v1865_v51, %v1891_v55  ;;  %v2008_v3 = vadd.f32 %v1982_v58, %v1956_v52  ;;  %v1892_v62 = vmul.f32 %v1840_v37, %v1756_v57  ;;  %v1983_v24 = vmul.f32 %v1814_v50, %v1756_v57  ;;  %v1818_v55 = vld [vmem:[%s11270_s5 + $0x98] sm:$0xff] }
 0x1b4   : > { %v6799_v4 = vpop.f32.mrb[85].mxu0  ;;  %v1844_v58 = vld [vmem:[%s11271_s6 + $0x98] sm:$0xff]  ;;  %v1869_v57 = vmul.f32 %v1817_v45, %v8279_v53 }
 0x1b5   : > { %v6800_v5 = vadd.f32 %v6799_v4, %v6798_v63  ;;  %v6801_v8 = vpop.f32.mrb[86].mxu0  ;;  %v1918_v19 = vsub.f32 %v1866_v10, %v1892_v62  ;;  %v2009_v9 = vadd.f32 %v1983_v24, %v1957_v60  ;;  %v1870_v62 = vmul.f32 %v1818_v55, %v8281_v56 }
 0x1b6   : > { %v6802_v16 = vpop.f32.mrb[87].mxu0  ;;  %v1760_v13 = vpop.f32.mrb[84].mxu1  ;;  %v1961_v24 = vmul.f32 %v1844_v58, %v8281_v56  ;;  %v1845_v56 = vld [vmem:[%s11271_s6 + $0xa0] sm:$0xff] }
 0x1b7   : > { %v6803_v22 = vadd.f32 %v6802_v16, %v6801_v8  ;;  %v1936_v23 = vpack.c.bf16 %v1918_v19, %v1917_v2  ;;  %v2027_v46 = vpack.c.bf16 %v2009_v9, %v2008_v3  ;;  %v1761_v25 = vadd.f32 %v6800_v5, %v1760_v13  ;;  %v1762_v6 = vpop.f32.mrb[85].mxu1 }
 0x1b8   : > { %v1763_v17 = vpop.f32.mrb[86].mxu1 }
 0x1b9   : > { %v1893_v49 = vmul.f32 %v1841_v28, %v1761_v25  ;;  %v1984_v29 = vmul.f32 %v1815_v21, %v1761_v25  ;;  %v1764_v30 = vadd.f32 %v6803_v22, %v1763_v17  ;;  %v1765_v12 = vpop.f32.mrb[87].mxu1  ;;  %2449 = vmatpush1.bf16.msra.mxu0 %v2027_v46  ;;  %2982 = vmatpush1.bf16.msra.mxu1 %v1936_v23  ;;  %v1819_v23 = vld [vmem:[%s11270_s5 + $0xa0] sm:$0xff]  ;;  %v1846_v17 = vld [vmem:[%s11271_s6 + $0xa8] sm:$0xff] }
 0x1ba   : > { %2450 = vmatprep.subr.bf16.mxu0 %v11282_v0  ;;  %2983 = vmatprep.subr.bf16.mxu1 %v11282_v0 }
 0x1bb   : > { %v6804_v35 = vpop.f32.mrb[88].mxu0  ;;  %v1919_v36 = vsub.f32 %v1867_v20, %v1893_v49  ;;  %v2010_v38 = vadd.f32 %v1984_v29, %v1958_v26  ;;  %v1894_v40 = vmul.f32 %v1842_v15, %v1764_v30  ;;  %v1985_v39 = vmul.f32 %v1816_v11, %v1764_v30  ;;  %v1820_v26 = vld [vmem:[%s11270_s5 + $0xa8] sm:$0xff] }
 0x1bc   : > { %v6805_v34 = vpop.f32.mrb[89].mxu0  ;;  %v1871_v49 = vmul.f32 %v1819_v23, %v8283_v7  ;;  %v1962_v29 = vmul.f32 %v1845_v56, %v8283_v7 }
 0x1bd   : > { %v6806_v18 = vadd.f32 %v6805_v34, %v6804_v35  ;;  %v6807_v41 = vpop.f32.mrb[90].mxu0  ;;  %v1920_v61 = vsub.f32 %v1868_v32, %v1894_v40  ;;  %v2011_v43 = vadd.f32 %v1985_v39, %v1959_v33 }
 0x1be   : > { %v6808_v1 = vpop.f32.mrb[91].mxu0  ;;  %v1768_v50 = vpop.f32.mrb[88].mxu1 }
 0x1bf   : > { %v6809_v47 = vadd.f32 %v6808_v1, %v6807_v41  ;;  %v1937_v37 = vpack.c.bf16 %v1920_v61, %v1919_v36  ;;  %v2028_v51 = vpack.c.bf16 %v2011_v43, %v2010_v38  ;;  %v1769_v52 = vadd.f32 %v6806_v18, %v1768_v50  ;;  %v1770_v54 = vpop.f32.mrb[89].mxu1 }
 0x1c0   : > { %v1771_v10 = vpop.f32.mrb[90].mxu1  ;;  %v1872_v36 = vmul.f32 %v1820_v26, %v8285_v14  ;;  %v1963_v38 = vmul.f32 %v1846_v17, %v8285_v14  ;;  %v1847_v14 = vld [vmem:[%s11271_s6 + $0xb0] sm:$0xff] }
 0x1c1   : > { %v1895_v60 = vmul.f32 %v1843_v42, %v1769_v52  ;;  %v1986_v63 = vmul.f32 %v1817_v45, %v1769_v52  ;;  %v1772_v2 = vadd.f32 %v6809_v47, %v1771_v10  ;;  %v1773_v3 = vpop.f32.mrb[91].mxu1  ;;  %2451 = vmatpush1.bf16.msra.mxu0 %v2028_v51  ;;  %2984 = vmatpush1.bf16.msra.mxu1 %v1937_v37  ;;  %v1821_v47 = vld [vmem:[%s11270_s5 + $0xb0] sm:$0xff] }
 0x1c2   : > { %2452 = vmatprep.subr.bf16.mxu0 %v11282_v0  ;;  %2985 = vmatprep.subr.bf16.mxu1 %v11282_v0  ;;  %v1964_v10 = vmul.f32 %v1847_v14, %v8295_v27 }
 0x1c3   : > { %v6810_v4 = vpop.f32.mrb[92].mxu0  ;;  %v1921_v5 = vsub.f32 %v1869_v57, %v1895_v60  ;;  %v2012_v8 = vadd.f32 %v1986_v63, %v1960_v59  ;;  %v1896_v19 = vmul.f32 %v1844_v58, %v1772_v2  ;;  %v1987_v53 = vmul.f32 %v1818_v55, %v1772_v2  ;;  %v1822_v58 = vld [vmem:[%s11270_s5 + $0xb8] sm:$0xff] }
 0x1c4   : > { %v6811_v9 = vpop.f32.mrb[93].mxu0  ;;  %v1848_v57 = vld [vmem:[%s11271_s6 + $0xb8] sm:$0xff]  ;;  %v1873_v59 = vmul.f32 %v1821_v47, %v8295_v27 }
 0x1c5   : > { %v6812_v16 = vadd.f32 %v6811_v9, %v6810_v4  ;;  %v6813_v21 = vpop.f32.mrb[94].mxu0  ;;  %v1922_v28 = vsub.f32 %v1870_v62, %v1896_v19  ;;  %v2013_v22 = vadd.f32 %v1987_v53, %v1961_v24  ;;  %v1874_v24 = vmul.f32 %v1822_v58, %v8297_v31 }
 0x1c6   : > { %v6814_v13 = vpop.f32.mrb[95].mxu0  ;;  %v1776_v25 = vpop.f32.mrb[92].mxu1  ;;  %v1965_v4 = vmul.f32 %v1848_v57, %v8297_v31  ;;  %v1849_v31 = vld [vmem:[%s11271_s6 + $0xc0] sm:$0xff] }
 0x1c7   : > { %v6815_v46 = vadd.f32 %v6814_v13, %v6813_v21  ;;  %v1938_v6 = vpack.c.bf16 %v1922_v28, %v1921_v5  ;;  %v2029_v11 = vpack.c.bf16 %v2013_v22, %v2012_v8  ;;  %v1777_v15 = vadd.f32 %v6812_v16, %v1776_v25  ;;  %v1778_v20 = vpop.f32.mrb[93].mxu1  ;;  %v1823_v28 = vld [vmem:[%s11270_s5 + $0xc0] sm:$0xff]  ;;  %v1824_v25 = vld [vmem:[%s11270_s5 + $0xc8] sm:$0xff] }
 0x1c8   : > { %v1779_v30 = vpop.f32.mrb[94].mxu1 }
 0x1c9   : > { %v1897_v12 = vmul.f32 %v1845_v56, %v1777_v15  ;;  %v1988_v32 = vmul.f32 %v1819_v23, %v1777_v15  ;;  %v1780_v33 = vadd.f32 %v6815_v46, %v1779_v30  ;;  %v1781_v35 = vpop.f32.mrb[95].mxu1  ;;  %2453 = vmatpush1.bf16.msra.mxu0 %v2029_v11  ;;  %2986 = vmatpush1.bf16.msra.mxu1 %v1938_v6  ;;  %v1850_v6 = vld [vmem:[%s11271_s6 + $0xc8] sm:$0xff] }
 0x1ca   : > { %2454 = vmatprep.subr.bf16.mxu0 %v11282_v0  ;;  %2987 = vmatprep.subr.bf16.mxu1 %v11282_v0  ;;  %v1876_v35 = vmul.f32 %v1824_v25, %v8301_v48 }
 0x1cb   : > { %v6816_v40 = vpop.f32.mrb[96].mxu0  ;;  %v1923_v39 = vsub.f32 %v1871_v49, %v1897_v12  ;;  %v2014_v34 = vadd.f32 %v1988_v32, %v1962_v29  ;;  %v1898_v18 = vmul.f32 %v1846_v17, %v1780_v33  ;;  %v1989_v7 = vmul.f32 %v1820_v26, %v1780_v33 }
 0x1cc   : > { %v6817_v41 = vpop.f32.mrb[97].mxu0  ;;  %v1875_v17 = vmul.f32 %v1823_v28, %v8299_v44  ;;  %v1966_v49 = vmul.f32 %v1849_v31, %v8299_v44 }
 0x1cd   : > { %v6818_v61 = vadd.f32 %v6817_v41, %v6816_v40  ;;  %v6819_v43 = vpop.f32.mrb[98].mxu0  ;;  %v1924_v1 = vsub.f32 %v1872_v36, %v1898_v18  ;;  %v2015_v45 = vadd.f32 %v1989_v7, %v1963_v38  ;;  %v1967_v36 = vmul.f32 %v1850_v6, %v8301_v48  ;;  %v6996_v48 = vld [vmem:[%s11268_s3] ss:$8 sps:$4 sm:$0xff]  }
 0x1ce   : > { %v6820_v42 = vpop.f32.mrb[99].mxu0  ;;  %v1784_v37 = vpop.f32.mrb[96].mxu1 }
 0x1cf   : > { %v6821_v50 = vadd.f32 %v6820_v42, %v6819_v43  ;;  %v1939_v51 = vpack.c.bf16 %v1924_v1, %v1923_v39  ;;  %v2030_v52 = vpack.c.bf16 %v2015_v45, %v2014_v34  ;;  %v1785_v54 = vadd.f32 %v6818_v61, %v1784_v37  ;;  %v1786_v55 = vpop.f32.mrb[97].mxu1  ;;  %v6993_v61 = vld [vmem:[%s11269_s4] ss:$8 sps:$4 sm:$0xff]   ;;  %v6999_v43 = vld [vmem:[%s11269_s4 + $0x14] ss:$8 sps:$4 sm:$0xff]  }
 0x1d0   : > { %v1787_v60 = vpop.f32.mrb[98].mxu1  ;;  %v7001_v1 = vld [vmem:[%s11268_s3 + $0x14] ss:$8 sps:$4 sm:$0xff]   ;;  %v7003_v45 = vld [vmem:[%s11269_s4 + $0x10] ss:$8 sps:$4 sm:$0xff]  }
 0x1d1   : > { %v1899_v63 = vmul.f32 %v1847_v14, %v1785_v54  ;;  %v1990_v2 = vmul.f32 %v1821_v47, %v1785_v54  ;;  %v1788_v3 = vadd.f32 %v6821_v50, %v1787_v60  ;;  %v1789_v62 = vpop.f32.mrb[99].mxu1  ;;  %2455 = vmatpush1.bf16.msra.mxu0 %v2030_v52  ;;  %2988 = vmatpush1.bf16.msra.mxu1 %v1939_v51  ;;  %v7004_v42 = vld [vmem:[%s11268_s3 + $0x10] ss:$8 sps:$4 sm:$0xff]   ;;  %v7005_v47 = vld [vmem:[%s11269_s4 + $0x24] ss:$8 sps:$4 sm:$0xff]  }
 0x1d2   : > { %2456 = vmatprep.subr.bf16.mxu0 %v11282_v0  ;;  %2989 = vmatprep.subr.bf16.mxu1 %v11282_v0  ;;  %v7007_v14 = vld [vmem:[%s11268_s3 + $0x24] ss:$8 sps:$4 sm:$0xff]   ;;  %v7009_v50 = vld [vmem:[%s11269_s4 + $0x20] ss:$8 sps:$4 sm:$0xff]   ;;  %v7011_v51 = vld [vmem:[%s11269_s4 + $0x34] ss:$8 sps:$4 sm:$0xff]  }
 0x1d3   : > { %v6822_v5 = vpop.f32.mrb[100].mxu0  ;;  %v1925_v8 = vsub.f32 %v1873_v59, %v1899_v63  ;;  %v2016_v19 = vadd.f32 %v1990_v2, %v1964_v10  ;;  %v1900_v53 = vmul.f32 %v1848_v57, %v1788_v3  ;;  %v1991_v27 = vmul.f32 %v1822_v58, %v1788_v3  ;;  %v7010_v37 = vld [vmem:[%s11268_s3 + $0x20] ss:$8 sps:$4 sm:$0xff]   ;;  %v7013_v52 = vld [vmem:[%s11268_s3 + $0x34] ss:$8 sps:$4 sm:$0xff]  }
 0x1d4   : > { %v6823_v9 = vpop.f32.mrb[101].mxu0  ;;  %v7015_v54 = vld [vmem:[%s11269_s4 + $0x30] ss:$8 sps:$4 sm:$0xff]   ;;  %v7017_v58 = vld [vmem:[%s11269_s4 + $0x44] ss:$8 sps:$4 sm:$0xff]  }
 0x1d5   : > { %v6824_v16 = vadd.f32 %v6823_v9, %v6822_v5  ;;  %v6825_v21 = vpop.f32.mrb[102].mxu0  ;;  %v1926_v22 = vsub.f32 %v1874_v24, %v1900_v53  ;;  %v2017_v13 = vadd.f32 %v1991_v27, %v1965_v4  ;;  %v7016_v55 = vld [vmem:[%s11268_s3 + $0x30] ss:$8 sps:$4 sm:$0xff]   ;;  %v7019_v57 = vld [vmem:[%s11268_s3 + $0x44] ss:$8 sps:$4 sm:$0xff]  }
 0x1d6   : > { %v6826_v23 = vpop.f32.mrb[103].mxu0  ;;  %v1792_v46 = vpop.f32.mrb[100].mxu1  ;;  %v7021_v59 = vld [vmem:[%s11269_s4 + $0x40] ss:$8 sps:$4 sm:$0xff]   ;;  %v7023_v60 = vld [vmem:[%s11269_s4 + $0x54] ss:$8 sps:$4 sm:$0xff]  }
 0x1d7   : > { %v6827_v56 = vadd.f32 %v6826_v23, %v6825_v21  ;;  %v1940_v11 = vpack.c.bf16 %v1926_v22, %v1925_v8  ;;  %v2031_v15 = vpack.c.bf16 %v2017_v13, %v2016_v19  ;;  %v1793_v20 = vadd.f32 %v6824_v16, %v1792_v46  ;;  %v1794_v26 = vpop.f32.mrb[101].mxu1  ;;  %v7022_v10 = vld [vmem:[%s11268_s3 + $0x40] ss:$8 sps:$4 sm:$0xff]   ;;  %v7025_v63 = vld [vmem:[%s11268_s3 + $0x54] ss:$8 sps:$4 sm:$0xff]  }
 0x1d8   : > { %v1795_v29 = vpop.f32.mrb[102].mxu1  ;;  %v7027_v2 = vld [vmem:[%s11269_s4 + $0x50] ss:$8 sps:$4 sm:$0xff]   ;;  %v7029_v62 = vld [vmem:[%s11269_s4 + $0x64] ss:$8 sps:$4 sm:$0xff]  }
 0x1d9   : > { %v1901_v30 = vmul.f32 %v1849_v31, %v1793_v20  ;;  %v1992_v12 = vmul.f32 %v1823_v28, %v1793_v20  ;;  %v1796_v32 = vadd.f32 %v6827_v56, %v1795_v29  ;;  %v1797_v33 = vpop.f32.mrb[103].mxu1  ;;  %2457 = vmatpush1.bf16.msra.mxu0 %v2031_v15  ;;  %2990 = vmatpush1.bf16.msra.mxu1 %v1940_v11  ;;  %v7028_v3 = vld [vmem:[%s11268_s3 + $0x50] ss:$8 sps:$4 sm:$0xff]   ;;  %v7031_v24 = vld [vmem:[%s11268_s3 + $0x64] ss:$8 sps:$4 sm:$0xff]  }
 0x1da   : > { %2458 = vmatprep.subr.bf16.mxu0 %v11282_v0  ;;  %2991 = vmatprep.subr.bf16.mxu1 %v11282_v0  ;;  %v7033_v4 = vld [vmem:[%s11269_s4 + $0x60] ss:$8 sps:$4 sm:$0xff]   ;;  %v7035_v8 = vld [vmem:[%s11269_s4 + $0x74] ss:$8 sps:$4 sm:$0xff]   ;;  %v7039_v53 = vld [vmem:[%s11269_s4 + $0x70] ss:$8 sps:$4 sm:$0xff]  }
 0x1db   : > { %v1927_v38 = vsub.f32 %v1875_v17, %v1901_v30  ;;  %v2018_v40 = vadd.f32 %v1992_v12, %v1966_v49  ;;  %v1902_v39 = vmul.f32 %v1850_v6, %v1796_v32  ;;  %v1993_v34 = vmul.f32 %v1824_v25, %v1796_v32  ;;  %v7034_v5 = vld [vmem:[%s11268_s3 + $0x60] ss:$8 sps:$4 sm:$0xff]   ;;  %v7037_v19 = vld [vmem:[%s11268_s3 + $0x74] ss:$8 sps:$4 sm:$0xff]   ;;  %v7040_v27 = vld [vmem:[%s11268_s3 + $0x70] ss:$8 sps:$4 sm:$0xff]  }
 0x1dc   : > { %v7041_v9 = vld [vmem:[%s11269_s4 + $0x84] ss:$8 sps:$4 sm:$0xff]   ;;  %v7045_v21 = vld [vmem:[%s11269_s4 + $0x80] ss:$8 sps:$4 sm:$0xff]   ;;  %v7047_v31 = vld [vmem:[%s11269_s4 + $0x94] ss:$8 sps:$4 sm:$0xff]  }
 0x1dd   : > { %v1928_v44 = vsub.f32 %v1876_v35, %v1902_v39  ;;  %v2019_v18 = vadd.f32 %v1993_v34, %v1967_v36  ;;  %v7043_v16 = vld [vmem:[%s11268_s3 + $0x84] ss:$8 sps:$4 sm:$0xff]   ;;  %v7046_v28 = vld [vmem:[%s11268_s3 + $0x80] ss:$8 sps:$4 sm:$0xff]   ;;  %v7049_v22 = vld [vmem:[%s11268_s3 + $0x94] ss:$8 sps:$4 sm:$0xff]  }
 0x1de   : > { %v7051_v13 = vld [vmem:[%s11269_s4 + $0x90] ss:$8 sps:$4 sm:$0xff]   ;;  %v7053_v56 = vld [vmem:[%s11269_s4 + $0xa4] ss:$8 sps:$4 sm:$0xff]   ;;  %v7057_v25 = vld [vmem:[%s11269_s4 + $0xa0] ss:$8 sps:$4 sm:$0xff]  }
 0x1df   : > { %v1941_v7 = vpack.c.bf16 %v1928_v44, %v1927_v38  ;;  %v2032_v41 = vpack.c.bf16 %v2019_v18, %v2018_v40  ;;  %v7052_v23 = vld [vmem:[%s11268_s3 + $0x90] ss:$8 sps:$4 sm:$0xff]   ;;  %v7055_v46 = vld [vmem:[%s11268_s3 + $0xa4] ss:$8 sps:$4 sm:$0xff]   ;;  %v7058_v6 = vld [vmem:[%s11268_s3 + $0xa0] ss:$8 sps:$4 sm:$0xff]  }
 0x1e0   : > { %v7059_v11 = vld [vmem:[%s11269_s4 + $0xb4] ss:$8 sps:$4 sm:$0xff]   ;;  %v7063_v20 = vld [vmem:[%s11269_s4 + $0xb0] ss:$8 sps:$4 sm:$0xff]   ;;  %v7065_v17 = vld [vmem:[%s11269_s4 + $0xc4] ss:$8 sps:$4 sm:$0xff]  }
 0x1e1   : > { %2459 = vmatpush1.bf16.msra.mxu0 %v2032_v41  ;;  %2992 = vmatpush1.bf16.msra.mxu1 %v1941_v7  ;;  %v7061_v15 = vld [vmem:[%s11268_s3 + $0xb4] ss:$8 sps:$4 sm:$0xff]   ;;  %v7064_v26 = vld [vmem:[%s11268_s3 + $0xb0] ss:$8 sps:$4 sm:$0xff]   ;;  %v7067_v49 = vld [vmem:[%s11268_s3 + $0xc4] ss:$8 sps:$4 sm:$0xff]  }
 0x1e2   : > { %5144 = vmatprep.subr.bf16.mxu1 %v11282_v0  ;;  %v7069_v29 = vld [vmem:[%s11269_s4 + $0xc0] ss:$8 sps:$4 sm:$0xff]   ;;  %v7071_v12 = vld [vmem:[%s11269_s4 + $0xd4] ss:$8 sps:$4 sm:$0xff]   ;;  %v7075_v33 = vld [vmem:[%s11269_s4 + $0xd0] ss:$8 sps:$4 sm:$0xff]  }
 0x1e3   : > { %v7070_v30 = vld [vmem:[%s11268_s3 + $0xc0] ss:$8 sps:$4 sm:$0xff]   ;;  %v7073_v32 = vld [vmem:[%s11268_s3 + $0xd4] ss:$8 sps:$4 sm:$0xff]   ;;  %v7076_v35 = vld [vmem:[%s11268_s3 + $0xd0] ss:$8 sps:$4 sm:$0xff]  }
 0x1e4   : > { %2467 = vmatmul.mubr.bf16.vlgmr.msra.gmra.mrb[104].mxu0 %v6993_v61  ;;  %3000 = vmatmul.mubr.bf16.vlgmr.msra.gmra.mrb[104].mxu1 %v6996_v48  ;;  %v7077_v36 = vld [vmem:[%s11269_s4 + $0xe4] ss:$8 sps:$4 sm:$0xff]   ;;  %v7081_v40 = vld [vmem:[%s11269_s4 + $0xe0] ss:$8 sps:$4 sm:$0xff]   ;;  %v7083_v34 = vld [vmem:[%s11269_s4 + $0xf4] ss:$8 sps:$4 sm:$0xff]  }
 0x1e5   : > { %6485 = vmatprep.mubr.msk.bf16.mxu0 %vm2358_vm1, %v6999_v43  ;;  %6560 = vmatprep.mubr.msk.bf16.mxu1 %vm2358_vm1, %v7001_v1  ;;  %v7079_v38 = vld [vmem:[%s11268_s3 + $0xe4] ss:$8 sps:$4 sm:$0xff]   ;;  %v7082_v39 = vld [vmem:[%s11268_s3 + $0xe0] ss:$8 sps:$4 sm:$0xff]   ;;  %v7085_v44 = vld [vmem:[%s11268_s3 + $0xf4] ss:$8 sps:$4 sm:$0xff]  }
 0x1e6   : > { %v7087_v18 = vld [vmem:[%s11269_s4 + $0xf0] ss:$8 sps:$4 sm:$0xff]   ;;  %v7089_v41 = vld [vmem:[%s11269_s4 + $0x104] ss:$8 sps:$4 sm:$0xff]   ;;  %v7093_v48 = vld [vmem:[%s11269_s4 + $0x100] ss:$8 sps:$4 sm:$0xff]  }
 0x1e7   : > { %v7088_v7 = vld [vmem:[%s11268_s3 + $0xf0] ss:$8 sps:$4 sm:$0xff]   ;;  %v7091_v61 = vld [vmem:[%s11268_s3 + $0x104] ss:$8 sps:$4 sm:$0xff]   ;;  %v7094_v43 = vld [vmem:[%s11268_s3 + $0x100] ss:$8 sps:$4 sm:$0xff]  }
 0x1e8   : > { %v7095_v1 = vld [vmem:[%s11269_s4 + $0x114] ss:$8 sps:$4 sm:$0xff]  }
 0x1ec   : > { %2475 = vmatmul.mubr.bf16.gmra.mrb[108].mxu0 %v7003_v45  ;;  %3008 = vmatmul.mubr.bf16.gmra.mrb[108].mxu1 %v7004_v42  ;;  %v7097_v45 = vld [vmem:[%s11268_s3 + $0x114] ss:$8 sps:$4 sm:$0xff]   ;;  %v7099_v42 = vld [vmem:[%s11269_s4 + $0x110] ss:$8 sps:$4 sm:$0xff]  }
 0x1ed   : > { %6486 = vmatprep.mubr.msk.bf16.mxu0 %vm2358_vm1, %v7005_v47  ;;  %6561 = vmatprep.mubr.msk.bf16.mxu1 %vm2358_vm1, %v7007_v14  ;;  %v7100_v47 = vld [vmem:[%s11268_s3 + $0x110] ss:$8 sps:$4 sm:$0xff]   ;;  %v7101_v14 = vld [vmem:[%s11269_s4 + $0x124] ss:$8 sps:$4 sm:$0xff]  }
 0x1f4   : > { %2483 = vmatmul.mubr.bf16.gmra.mrb[112].mxu0 %v7009_v50  ;;  %3016 = vmatmul.mubr.bf16.gmra.mrb[112].mxu1 %v7010_v37  ;;  %v7103_v50 = vld [vmem:[%s11268_s3 + $0x124] ss:$8 sps:$4 sm:$0xff]   ;;  %v7105_v37 = vld [vmem:[%s11269_s4 + $0x120] ss:$8 sps:$4 sm:$0xff]  }
 0x1f5   : > { %6487 = vmatprep.mubr.msk.bf16.mxu0 %vm2358_vm1, %v7011_v51  ;;  %6562 = vmatprep.mubr.msk.bf16.mxu1 %vm2358_vm1, %v7013_v52  ;;  %v7106_v51 = vld [vmem:[%s11268_s3 + $0x120] ss:$8 sps:$4 sm:$0xff]   ;;  %v7107_v52 = vld [vmem:[%s11269_s4 + $0x134] ss:$8 sps:$4 sm:$0xff]  }
 0x1fc   : > { %2491 = vmatmul.mubr.bf16.gmra.mrb[116].mxu0 %v7015_v54  ;;  %3024 = vmatmul.mubr.bf16.gmra.mrb[116].mxu1 %v7016_v55  ;;  %v7109_v54 = vld [vmem:[%s11268_s3 + $0x134] ss:$8 sps:$4 sm:$0xff]   ;;  %v7111_v55 = vld [vmem:[%s11269_s4 + $0x130] ss:$8 sps:$4 sm:$0xff]  }
 0x1fd   : > { %6488 = vmatprep.mubr.msk.bf16.mxu0 %vm2358_vm1, %v7017_v58  ;;  %6563 = vmatprep.mubr.msk.bf16.mxu1 %vm2358_vm1, %v7019_v57  ;;  %v7112_v58 = vld [vmem:[%s11268_s3 + $0x130] ss:$8 sps:$4 sm:$0xff]   ;;  %v7113_v57 = vld [vmem:[%s11269_s4 + $0x144] ss:$8 sps:$4 sm:$0xff]  }
 0x204   : > { %2499 = vmatmul.mubr.bf16.gmra.mrb[120].mxu0 %v7021_v59  ;;  %3032 = vmatmul.mubr.bf16.gmra.mrb[120].mxu1 %v7022_v10  ;;  %v7115_v59 = vld [vmem:[%s11268_s3 + $0x144] ss:$8 sps:$4 sm:$0xff]   ;;  %v7117_v10 = vld [vmem:[%s11269_s4 + $0x140] ss:$8 sps:$4 sm:$0xff]  }
 0x205   : > { %6489 = vmatprep.mubr.msk.bf16.mxu0 %vm2358_vm1, %v7023_v60  ;;  %6564 = vmatprep.mubr.msk.bf16.mxu1 %vm2358_vm1, %v7025_v63  ;;  %v7118_v60 = vld [vmem:[%s11268_s3 + $0x140] ss:$8 sps:$4 sm:$0xff]   ;;  %v7119_v63 = vld [vmem:[%s11269_s4 + $0x154] ss:$8 sps:$4 sm:$0xff]  }
 0x20c   : > { %2507 = vmatmul.mubr.bf16.gmra.mrb[124].mxu0 %v7027_v2  ;;  %3040 = vmatmul.mubr.bf16.gmra.mrb[124].mxu1 %v7028_v3  ;;  %v7121_v2 = vld [vmem:[%s11268_s3 + $0x154] ss:$8 sps:$4 sm:$0xff]   ;;  %v7123_v3 = vld [vmem:[%s11269_s4 + $0x150] ss:$8 sps:$4 sm:$0xff]  }
 0x20d   : > { %6490 = vmatprep.mubr.msk.bf16.mxu0 %vm2358_vm1, %v7029_v62  ;;  %6565 = vmatprep.mubr.msk.bf16.mxu1 %vm2358_vm1, %v7031_v24  ;;  %v7124_v62 = vld [vmem:[%s11268_s3 + $0x150] ss:$8 sps:$4 sm:$0xff]   ;;  %v7125_v24 = vld [vmem:[%s11269_s4 + $0x164] ss:$8 sps:$4 sm:$0xff]  }
 0x214   : > { %2515 = vmatmul.mubr.bf16.gmra.mrb[128].mxu0 %v7033_v4  ;;  %3048 = vmatmul.mubr.bf16.gmra.mrb[128].mxu1 %v7034_v5  ;;  %v7127_v4 = vld [vmem:[%s11268_s3 + $0x164] ss:$8 sps:$4 sm:$0xff]   ;;  %v7129_v5 = vld [vmem:[%s11269_s4 + $0x160] ss:$8 sps:$4 sm:$0xff]  }
 0x215   : > { %6491 = vmatprep.mubr.msk.bf16.mxu0 %vm2358_vm1, %v7035_v8  ;;  %6566 = vmatprep.mubr.msk.bf16.mxu1 %vm2358_vm1, %v7037_v19  ;;  %v7130_v8 = vld [vmem:[%s11268_s3 + $0x160] ss:$8 sps:$4 sm:$0xff]   ;;  %v7131_v19 = vld [vmem:[%s11269_s4 + $0x174] ss:$8 sps:$4 sm:$0xff]  }
 0x21c   : > { %2523 = vmatmul.mubr.bf16.gmra.mrb[132].mxu0 %v7039_v53  ;;  %3056 = vmatmul.mubr.bf16.gmra.mrb[132].mxu1 %v7040_v27  ;;  %v7133_v53 = vld [vmem:[%s11268_s3 + $0x174] ss:$8 sps:$4 sm:$0xff]   ;;  %v7135_v27 = vld [vmem:[%s11269_s4 + $0x170] ss:$8 sps:$4 sm:$0xff]  }
 0x21d   : > { %6492 = vmatprep.mubr.msk.bf16.mxu0 %vm2358_vm1, %v7041_v9  ;;  %6567 = vmatprep.mubr.msk.bf16.mxu1 %vm2358_vm1, %v7043_v16  ;;  %v7136_v9 = vld [vmem:[%s11268_s3 + $0x170] ss:$8 sps:$4 sm:$0xff]   ;;  %v7137_v16 = vld [vmem:[%s11269_s4 + $0x184] ss:$8 sps:$4 sm:$0xff]  }
 0x224   : > { %2531 = vmatmul.mubr.bf16.gmra.mrb[136].mxu0 %v7045_v21  ;;  %3064 = vmatmul.mubr.bf16.gmra.mrb[136].mxu1 %v7046_v28  ;;  %v7139_v21 = vld [vmem:[%s11268_s3 + $0x184] ss:$8 sps:$4 sm:$0xff]   ;;  %v7141_v28 = vld [vmem:[%s11269_s4 + $0x180] ss:$8 sps:$4 sm:$0xff]  }
 0x225   : > { %6493 = vmatprep.mubr.msk.bf16.mxu0 %vm2358_vm1, %v7047_v31  ;;  %6568 = vmatprep.mubr.msk.bf16.mxu1 %vm2358_vm1, %v7049_v22  ;;  %v7142_v31 = vld [vmem:[%s11268_s3 + $0x180] ss:$8 sps:$4 sm:$0xff]  }
 0x22c   : > { %2539 = vmatmul.mubr.bf16.gmra.mrb[140].mxu0 %v7051_v13  ;;  %3072 = vmatmul.mubr.bf16.gmra.mrb[140].mxu1 %v7052_v23 }
 0x22d   : > { %6494 = vmatprep.mubr.msk.bf16.mxu0 %vm2358_vm1, %v7053_v56  ;;  %6569 = vmatprep.mubr.msk.bf16.mxu1 %vm2358_vm1, %v7055_v46 }
 0x234   : > { %2547 = vmatmul.mubr.bf16.gmra.mrb[144].mxu0 %v7057_v25  ;;  %3080 = vmatmul.mubr.bf16.gmra.mrb[144].mxu1 %v7058_v6 }
 0x235   : > { %6495 = vmatprep.mubr.msk.bf16.mxu0 %vm2358_vm1, %v7059_v11  ;;  %6570 = vmatprep.mubr.msk.bf16.mxu1 %vm2358_vm1, %v7061_v15 }
 0x23c   : > { %2555 = vmatmul.mubr.bf16.gmra.mrb[148].mxu0 %v7063_v20  ;;  %3088 = vmatmul.mubr.bf16.gmra.mrb[148].mxu1 %v7064_v26  ;;  %v7571_v26 = vld [vmem:[%s7741_s28] sm:$0xff] }
 0x23d   : > { %6496 = vmatprep.mubr.msk.bf16.mxu0 %vm2358_vm1, %v7065_v17  ;;  %6571 = vmatprep.mubr.msk.bf16.mxu1 %vm2358_vm1, %v7067_v49 }
 0x244   : > { %2563 = vmatmul.mubr.bf16.gmra.mrb[152].mxu0 %v7069_v29  ;;  %3096 = vmatmul.mubr.bf16.gmra.mrb[152].mxu1 %v7070_v30  ;;  %v7572_v29 = vld [vmem:[%s7741_s28 + $0x8] sm:$0xff] }
 0x245   : > { %6497 = vmatprep.mubr.msk.bf16.mxu0 %vm2358_vm1, %v7071_v12  ;;  %6572 = vmatprep.mubr.msk.bf16.mxu1 %vm2358_vm1, %v7073_v32 }
 0x24c   : > { %2571 = vmatmul.mubr.bf16.gmra.mrb[156].mxu0 %v7075_v33  ;;  %3104 = vmatmul.mubr.bf16.gmra.mrb[156].mxu1 %v7076_v35 }
 0x24d   : > { %6498 = vmatprep.mubr.msk.bf16.mxu0 %vm2358_vm1, %v7077_v36  ;;  %6573 = vmatprep.mubr.msk.bf16.mxu1 %vm2358_vm1, %v7079_v38 }
 0x254   : > { %2579 = vmatmul.mubr.bf16.gmra.mrb[160].mxu0 %v7081_v40  ;;  %3112 = vmatmul.mubr.bf16.gmra.mrb[160].mxu1 %v7082_v39 }
 0x255   : > { %6499 = vmatprep.mubr.msk.bf16.mxu0 %vm2358_vm1, %v7083_v34  ;;  %6574 = vmatprep.mubr.msk.bf16.mxu1 %vm2358_vm1, %v7085_v44 }
 0x25c   : > { %2587 = vmatmul.mubr.bf16.gmra.mrb[164].mxu0 %v7087_v18  ;;  %3120 = vmatmul.mubr.bf16.gmra.mrb[164].mxu1 %v7088_v7  ;;  %v7573_v7 = vld [vmem:[%s7741_s28 + $0x10] sm:$0xff] }
 0x25d   : > { %6500 = vmatprep.mubr.msk.bf16.mxu0 %vm2358_vm1, %v7089_v41  ;;  %6575 = vmatprep.mubr.msk.bf16.mxu1 %vm2358_vm1, %v7091_v61 }
 0x264   : > { %2595 = vmatmul.mubr.bf16.gmra.mrb[168].mxu0 %v7093_v48  ;;  %3128 = vmatmul.mubr.bf16.gmra.mrb[168].mxu1 %v7094_v43  ;;  %v7574_v48 = vld [vmem:[%s7741_s28 + $0x18] sm:$0xff] }
 0x265   : > { %6501 = vmatprep.mubr.msk.bf16.mxu0 %vm2358_vm1, %v7095_v1  ;;  %6576 = vmatprep.mubr.msk.bf16.mxu1 %vm2358_vm1, %v7097_v45 }
 0x26c   : > { %2603 = vmatmul.mubr.bf16.gmra.mrb[172].mxu0 %v7099_v42  ;;  %3136 = vmatmul.mubr.bf16.gmra.mrb[172].mxu1 %v7100_v47 }
 0x26d   : > { %6502 = vmatprep.mubr.msk.bf16.mxu0 %vm2358_vm1, %v7101_v14  ;;  %6577 = vmatprep.mubr.msk.bf16.mxu1 %vm2358_vm1, %v7103_v50 }
 0x274   : > { %2611 = vmatmul.mubr.bf16.gmra.mrb[176].mxu0 %v7105_v37  ;;  %3144 = vmatmul.mubr.bf16.gmra.mrb[176].mxu1 %v7106_v51 }
 0x275   : > { %6503 = vmatprep.mubr.msk.bf16.mxu0 %vm2358_vm1, %v7107_v52  ;;  %6578 = vmatprep.mubr.msk.bf16.mxu1 %vm2358_vm1, %v7109_v54  ;;  %v7575_v54 = vld [vmem:[%s7741_s28 + $0x20] sm:$0xff] }
 0x27c   : > { %2619 = vmatmul.mubr.bf16.gmra.mrb[180].mxu0 %v7111_v55  ;;  %3152 = vmatmul.mubr.bf16.gmra.mrb[180].mxu1 %v7112_v58 }
 0x27d   : > { %6504 = vmatprep.mubr.msk.bf16.mxu0 %vm2358_vm1, %v7113_v57  ;;  %6579 = vmatprep.mubr.msk.bf16.mxu1 %vm2358_vm1, %v7115_v59 }
 0x284   : > { %2627 = vmatmul.mubr.bf16.gmra.mrb[184].mxu0 %v7117_v10  ;;  %3160 = vmatmul.mubr.bf16.gmra.mrb[184].mxu1 %v7118_v60  ;;  %v7576_v10 = vld [vmem:[%s7741_s28 + $0x28] sm:$0xff] }
 0x285   : > { %6505 = vmatprep.mubr.msk.bf16.mxu0 %vm2358_vm1, %v7119_v63  ;;  %6580 = vmatprep.mubr.msk.bf16.mxu1 %vm2358_vm1, %v7121_v2 }
 0x28c   : > { %2635 = vmatmul.mubr.bf16.gmra.mrb[188].mxu0 %v7123_v3  ;;  %3168 = vmatmul.mubr.bf16.gmra.mrb[188].mxu1 %v7124_v62 }
 0x28d   : > { %6506 = vmatprep.mubr.msk.bf16.mxu0 %vm2358_vm1, %v7125_v24  ;;  %6581 = vmatprep.mubr.msk.bf16.mxu1 %vm2358_vm1, %v7127_v4 }
 0x294   : > { %2643 = vmatmul.mubr.bf16.gmra.mrb[192].mxu0 %v7129_v5  ;;  %3176 = vmatmul.mubr.bf16.gmra.mrb[192].mxu1 %v7130_v8 }
 0x295   : > { %6507 = vmatprep.mubr.msk.bf16.mxu0 %vm2358_vm1, %v7131_v19  ;;  %6582 = vmatprep.mubr.msk.bf16.mxu1 %vm2358_vm1, %v7133_v53  ;;  %v7577_v53 = vld [vmem:[%s7741_s28 + $0x30] sm:$0xff] }
 0x29c   : > { %2651 = vmatmul.mubr.bf16.gmra.mrb[196].mxu0 %v7135_v27  ;;  %3184 = vmatmul.mubr.bf16.gmra.mrb[196].mxu1 %v7136_v9 }
 0x29d   : > { %6508 = vmatprep.mubr.msk.bf16.mxu0 %vm2358_vm1, %v7137_v16  ;;  %6583 = vmatprep.mubr.msk.bf16.mxu1 %vm2358_vm1, %v7139_v21 }
 0x2a4   : > { %2659 = vmatmul.mubr.bf16.gmra.mrb[200].mxu0 %v7141_v28  ;;  %3192 = vmatmul.mubr.bf16.gmra.mrb[200].mxu1 %v7142_v31  ;;  %v7578_v28 = vld [vmem:[%s7741_s28 + $0x38] sm:$0xff] }
 0x2a5   : > { %4208 = vmatprep.mubr.bf16.mxu0 %v11282_v0 }
 0x2b7   : > { %v2468_v22 = vpop.f32.mrb[104].mxu0  ;;  %v3001_v13 = vpop.f32.mrb[104].mxu1 }
 0x2b8   : > { %v3002_v23 = vadd.f32 %v3001_v13, %v2468_v22  ;;  %v2470_v56 = vpop.f32.mrb[105].mxu0  ;;  %v3003_v46 = vpop.f32.mrb[105].mxu1 }
 0x2b9   : > { %v2471_v25 = vpop.f32.mrb[106].mxu0  ;;  %v3004_v6 = vpop.f32.mrb[106].mxu1 }
 0x2ba   : > { %v3005_v11 = vadd.f32 %v3004_v6, %v2471_v25  ;;  %v2473_v15 = vpop.f32.mrb[107].mxu0  ;;  %v3006_v20 = vpop.f32.mrb[107].mxu1  ;;  %v8880_v17 = vadd.f32 %v7571_v26, %v3002_v23 }
 0x2bb   : > { %v7579_v20 = vld [vmem:[%s7741_s28 + $0x40] sm:$0xff] }
 0x2bc   : > { %v3253_v49 = vsel %vm3252_vm2, %v8880_v17, 0.0  ;;  %v8885_v30 = vadd.f32 %v7572_v29, %v3005_v11 }
 0x2bd   : > { %3254 = vadd.xlane.f32.xlu0 %v3253_v49 }
 0x2be   : > { %v3256_v35 = vsel %vm3252_vm2, %v8885_v30, 0.0 }
 0x2bf   : > { %v2476_v12 = vpop.f32.mrb[108].mxu0  ;;  %v3009_v32 = vpop.f32.mrb[108].mxu1 }
 0x2c0   : > { %v3010_v33 = vadd.f32 %v3009_v32, %v2476_v12  ;;  %v2478_v36 = vpop.f32.mrb[109].mxu0  ;;  %v3011_v38 = vpop.f32.mrb[109].mxu1  ;;  %v7580_v32 = vld [vmem:[%s7741_s28 + $0x48] sm:$0xff] }
 0x2c1   : > { %3257 = vadd.xlane.f32.xlu0 %v3256_v35  ;;  %v2479_v40 = vpop.f32.mrb[110].mxu0  ;;  %v3012_v39 = vpop.f32.mrb[110].mxu1 }
 0x2c2   : > { %v3013_v34 = vadd.f32 %v3012_v39, %v2479_v40  ;;  %v2481_v44 = vpop.f32.mrb[111].mxu0  ;;  %v3014_v18 = vpop.f32.mrb[111].mxu1  ;;  %v8890_v41 = vadd.f32 %v7573_v7, %v3010_v33 }
 0x2c4   : > { %v3259_v61 = vsel %vm3252_vm2, %v8890_v41, 0.0  ;;  %v8895_v43 = vadd.f32 %v7574_v48, %v3013_v34 }
 0x2c5   : > { %3260 = vadd.xlane.f32.xlu1 %v3259_v61  ;;  %v7581_v61 = vld [vmem:[%s7741_s28 + $0x50] sm:$0xff] }
 0x2c6   : > { %v3262_v50 = vsel %vm3252_vm2, %v8895_v43, 0.0 }
 0x2c7   : > { %v2484_v1 = vpop.f32.mrb[112].mxu0  ;;  %v3017_v45 = vpop.f32.mrb[112].mxu1 }
 0x2c8   : > { %v3018_v42 = vadd.f32 %v3017_v45, %v2484_v1  ;;  %v2486_v47 = vpop.f32.mrb[113].mxu0  ;;  %v3019_v14 = vpop.f32.mrb[113].mxu1 }
 0x2c9   : > { %v2487_v37 = vpop.f32.mrb[114].mxu0  ;;  %v3020_v51 = vpop.f32.mrb[114].mxu1  ;;  %3263 = vadd.xlane.f32.xlu1 %v3262_v50  ;;  %v7582_v47 = vld [vmem:[%s7741_s28 + $0x58] sm:$0xff] }
 0x2ca   : > { %v3021_v52 = vadd.f32 %v3020_v51, %v2487_v37  ;;  %v8900_v55 = vadd.f32 %v7575_v54, %v3018_v42  ;;  %v2489_v58 = vpop.f32.mrb[115].mxu0  ;;  %v3022_v57 = vpop.f32.mrb[115].mxu1 }
 0x2cc   : > { %v3265_v59 = vsel %vm3252_vm2, %v8900_v55, 0.0  ;;  %v8905_v60 = vadd.f32 %v7576_v10, %v3021_v52 }
 0x2cd   : > { %3266 = vadd.xlane.f32.xlu0 %v3265_v59 }
 0x2ce   : > { %v3268_v63 = vsel %vm3252_vm2, %v8905_v60, 0.0 }
 0x2cf   : > { %v2492_v2 = vpop.f32.mrb[116].mxu0  ;;  %v3025_v3 = vpop.f32.mrb[116].mxu1  ;;  %3269 = vadd.xlane.f32.xlu1 %v3268_v63  ;;  %v7583_v63 = vld [vmem:[%s7741_s28 + $0x60] sm:$0xff] }
 0x2d0   : > { %v3026_v62 = vadd.f32 %v3025_v3, %v2492_v2  ;;  %v2494_v24 = vpop.f32.mrb[117].mxu0  ;;  %v3027_v4 = vpop.f32.mrb[117].mxu1 }
 0x2d1   : > { %v2495_v5 = vpop.f32.mrb[118].mxu0  ;;  %v3028_v8 = vpop.f32.mrb[118].mxu1  ;;  %v7584_v4 = vld [vmem:[%s7741_s28 + $0x68] sm:$0xff] }
 0x2d2   : > { %v3029_v19 = vadd.f32 %v3028_v8, %v2495_v5  ;;  %v8910_v27 = vadd.f32 %v7577_v53, %v3026_v62  ;;  %v2497_v9 = vpop.f32.mrb[119].mxu0  ;;  %v3030_v16 = vpop.f32.mrb[119].mxu1 }
 0x2d4   : > { %v3271_v21 = vsel %vm3252_vm2, %v8910_v27, 0.0  ;;  %v8915_v31 = vadd.f32 %v7578_v28, %v3029_v19 }
 0x2d5   : > { %3272 = vadd.xlane.f32.xlu0 %v3271_v21 }
 0x2d6   : > { %v3274_v22 = vsel %vm3252_vm2, %v8915_v31, 0.0 }
 0x2d7   : > { %v2500_v13 = vpop.f32.mrb[120].mxu0  ;;  %v3033_v23 = vpop.f32.mrb[120].mxu1  ;;  %3275 = vadd.xlane.f32.xlu1 %v3274_v22 }
 0x2d8   : > { %v3034_v56 = vadd.f32 %v3033_v23, %v2500_v13  ;;  %v2502_v46 = vpop.f32.mrb[121].mxu0  ;;  %v3035_v25 = vpop.f32.mrb[121].mxu1  ;;  %v7585_v23 = vld [vmem:[%s7741_s28 + $0x70] sm:$0xff] }
 0x2d9   : > { %v2503_v6 = vpop.f32.mrb[122].mxu0  ;;  %v3036_v11 = vpop.f32.mrb[122].mxu1 }
 0x2da   : > { %v3037_v15 = vadd.f32 %v3036_v11, %v2503_v6  ;;  %v8920_v26 = vadd.f32 %v7579_v20, %v3034_v56  ;;  %v2505_v49 = vpop.f32.mrb[123].mxu0  ;;  %v3038_v29 = vpop.f32.mrb[123].mxu1  ;;  %v7586_v11 = vld [vmem:[%s7741_s28 + $0x78] sm:$0xff] }
 0x2dc   : > { %v3277_v12 = vsel %vm3252_vm2, %v8920_v26, 0.0  ;;  %v8925_v33 = vadd.f32 %v7580_v32, %v3037_v15 }
 0x2dd   : > { %3278 = vadd.xlane.f32.xlu0 %v3277_v12 }
 0x2de   : > { %v3280_v35 = vsel %vm3252_vm2, %v8925_v33, 0.0 }
 0x2df   : > { %v2508_v36 = vpop.f32.mrb[124].mxu0  ;;  %v3041_v38 = vpop.f32.mrb[124].mxu1  ;;  %3281 = vadd.xlane.f32.xlu1 %v3280_v35 }
 0x2e0   : > { %v3042_v40 = vadd.f32 %v3041_v38, %v2508_v36  ;;  %v2510_v39 = vpop.f32.mrb[125].mxu0  ;;  %v3043_v34 = vpop.f32.mrb[125].mxu1 }
 0x2e1   : > { %v2511_v44 = vpop.f32.mrb[126].mxu0  ;;  %v3044_v18 = vpop.f32.mrb[126].mxu1  ;;  %v7587_v39 = vld [vmem:[%s7741_s28 + $0x80] sm:$0xff] }
 0x2e2   : > { %v3045_v7 = vadd.f32 %v3044_v18, %v2511_v44  ;;  %v8930_v48 = vadd.f32 %v7581_v61, %v3042_v40  ;;  %v2513_v1 = vpop.f32.mrb[127].mxu0  ;;  %v3046_v45 = vpop.f32.mrb[127].mxu1  ;;  %v7588_v61 = vld [vmem:[%s7741_s28 + $0x88] sm:$0xff] }
 0x2e4   : > { %v3283_v42 = vsel %vm3252_vm2, %v8930_v48, 0.0  ;;  %v8935_v14 = vadd.f32 %v7582_v47, %v3045_v7 }
 0x2e5   : > { %3284 = vadd.xlane.f32.xlu0 %v3283_v42 }
 0x2e6   : > { %v3286_v50 = vsel %vm3252_vm2, %v8935_v14, 0.0 }
 0x2e7   : > { %v2516_v37 = vpop.f32.mrb[128].mxu0  ;;  %v3049_v51 = vpop.f32.mrb[128].mxu1  ;;  %3287 = vadd.xlane.f32.xlu1 %v3286_v50 }
 0x2e8   : > { %v3050_v52 = vadd.f32 %v3049_v51, %v2516_v37  ;;  %v2518_v54 = vpop.f32.mrb[129].mxu0  ;;  %v3051_v58 = vpop.f32.mrb[129].mxu1 }
 0x2e9   : > { %v2519_v57 = vpop.f32.mrb[130].mxu0  ;;  %v3052_v59 = vpop.f32.mrb[130].mxu1 }
 0x2ea   : > { %v3053_v10 = vadd.f32 %v3052_v59, %v2519_v57  ;;  %v8940_v2 = vadd.f32 %v7583_v63, %v3050_v52  ;;  %v2521_v3 = vpop.f32.mrb[131].mxu0  ;;  %v3054_v62 = vpop.f32.mrb[131].mxu1  ;;  %v7589_v57 = vld [vmem:[%s7741_s28 + $0x90] sm:$0xff] }
 0x2eb   : > { %v7590_v62 = vld [vmem:[%s7741_s28 + $0x98] sm:$0xff] }
 0x2ec   : > { %v3289_v24 = vsel %vm3252_vm2, %v8940_v2, 0.0  ;;  %v8945_v5 = vadd.f32 %v7584_v4, %v3053_v10 }
 0x2ed   : > { %3290 = vadd.xlane.f32.xlu0 %v3289_v24 }
 0x2ee   : > { %v3292_v8 = vsel %vm3252_vm2, %v8945_v5, 0.0 }
 0x2ef   : > { %v2524_v19 = vpop.f32.mrb[132].mxu0  ;;  %v3057_v53 = vpop.f32.mrb[132].mxu1  ;;  %3293 = vadd.xlane.f32.xlu1 %v3292_v8 }
 0x2f0   : > { %v3058_v9 = vadd.f32 %v3057_v53, %v2524_v19  ;;  %v2526_v16 = vpop.f32.mrb[133].mxu0  ;;  %v3059_v21 = vpop.f32.mrb[133].mxu1 }
 0x2f1   : > { %v2527_v28 = vpop.f32.mrb[134].mxu0  ;;  %v3060_v22 = vpop.f32.mrb[134].mxu1 }
 0x2f2   : > { %v3061_v13 = vadd.f32 %v3060_v22, %v2527_v28  ;;  %v8950_v56 = vadd.f32 %v7585_v23, %v3058_v9  ;;  %v2529_v46 = vpop.f32.mrb[135].mxu0  ;;  %v3062_v25 = vpop.f32.mrb[135].mxu1 }
 0x2f4   : > { %v3295_v6 = vsel %vm3252_vm2, %v8950_v56, 0.0  ;;  %v8955_v15 = vadd.f32 %v7586_v11, %v3061_v13 }
 0x2f5   : > { %3296 = vadd.xlane.f32.xlu0 %v3295_v6 }
 0x2f6   : > { %v3298_v20 = vsel %vm3252_vm2, %v8955_v15, 0.0 }
 0x2f7   : > { %v2532_v49 = vpop.f32.mrb[136].mxu0  ;;  %v3065_v29 = vpop.f32.mrb[136].mxu1  ;;  %3299 = vadd.xlane.f32.xlu1 %v3298_v20 }
 0x2f8   : > { %v3066_v12 = vadd.f32 %v3065_v29, %v2532_v49  ;;  %v2534_v32 = vpop.f32.mrb[137].mxu0  ;;  %v3067_v35 = vpop.f32.mrb[137].mxu1 }
 0x2f9   : > { %v2535_v36 = vpop.f32.mrb[138].mxu0  ;;  %v3068_v38 = vpop.f32.mrb[138].mxu1 }
 0x2fa   : > { %v3069_v40 = vadd.f32 %v3068_v38, %v2535_v36  ;;  %v8960_v34 = vadd.f32 %v7587_v39, %v3066_v12  ;;  %v2537_v44 = vpop.f32.mrb[139].mxu0  ;;  %v3070_v18 = vpop.f32.mrb[139].mxu1 }
 0x2fc   : > { %v3301_v7 = vsel %vm3252_vm2, %v8960_v34, 0.0  ;;  %v8965_v1 = vadd.f32 %v7588_v61, %v3069_v40 }
 0x2fd   : > { %3302 = vadd.xlane.f32.xlu0 %v3301_v7 }
 0x2fe   : > { %v3304_v45 = vsel %vm3252_vm2, %v8965_v1, 0.0 }
 0x2ff   : > { %v2540_v42 = vpop.f32.mrb[140].mxu0  ;;  %v3073_v47 = vpop.f32.mrb[140].mxu1  ;;  %3305 = vadd.xlane.f32.xlu1 %v3304_v45 }
 0x300   : > { %v3074_v50 = vadd.f32 %v3073_v47, %v2540_v42  ;;  %v2542_v37 = vpop.f32.mrb[141].mxu0  ;;  %v3075_v51 = vpop.f32.mrb[141].mxu1 }
 0x301   : > { %v2543_v52 = vpop.f32.mrb[142].mxu0  ;;  %v3076_v54 = vpop.f32.mrb[142].mxu1 }
 0x302   : > { %v3077_v58 = vadd.f32 %v3076_v54, %v2543_v52  ;;  %v8970_v59 = vadd.f32 %v7589_v57, %v3074_v50  ;;  %v2545_v10 = vpop.f32.mrb[143].mxu0  ;;  %v3078_v63 = vpop.f32.mrb[143].mxu1 }
 0x304   : > { %v3307_v3 = vsel %vm3252_vm2, %v8970_v59, 0.0  ;;  %v8975_v24 = vadd.f32 %v7590_v62, %v3077_v58  ;;  %v7145_v62 = vld [vmem:[%s11274_s9 + $0x4] ss:$8 sps:$4 sm:$0xff]  }
 0x305   : > { %3308 = vadd.xlane.f32.xlu0 %v3307_v3  ;;  %v7143_v3 = vld [vmem:[%s11274_s9] ss:$8 sps:$4 sm:$0xff]   ;;  %4176 = vmatprep.subr.bf16.mxu0 %v7145_v62 }
 0x306   : > { %v3310_v4 = vsel %vm3252_vm2, %v8975_v24, 0.0  ;;  %4177 = vmatpush1.bf16.msra.mxu0 %v7143_v3 }
 0x307   : > { %3311 = vadd.xlane.f32.xlu1 %v3310_v4  ;;  %v2548_v8 = vpop.f32.mrb[144].mxu0  ;;  %v3081_v19 = vpop.f32.mrb[144].mxu1 }
 0x308   : > { %v8979_v53 = vadd.f32 %v3081_v19, %v2548_v8  ;;  %v2550_v9 = vpop.f32.mrb[145].mxu0  ;;  %v3083_v16 = vpop.f32.mrb[145].mxu1 }
 0x309   : > { %v2551_v21 = vpop.f32.mrb[146].mxu0  ;;  %v3084_v28 = vpop.f32.mrb[146].mxu1 }
 0x30a   : > { %v8981_v22 = vadd.f32 %v3084_v28, %v2551_v21  ;;  %v2553_v13 = vpop.f32.mrb[147].mxu0  ;;  %v3086_v23 = vpop.f32.mrb[147].mxu1 }
 0x30f   : > { %v2556_v46 = vpop.f32.mrb[148].mxu0  ;;  %v3089_v25 = vpop.f32.mrb[148].mxu1 }
 0x310   : > { %v8983_v6 = vadd.f32 %v3089_v25, %v2556_v46  ;;  %v2558_v11 = vpop.f32.mrb[149].mxu0  ;;  %v3091_v20 = vpop.f32.mrb[149].mxu1 }
 0x311   : > { %v2559_v49 = vpop.f32.mrb[150].mxu0  ;;  %v3092_v29 = vpop.f32.mrb[150].mxu1 }
 0x312   : > { %v8985_v12 = vadd.f32 %v3092_v29, %v2559_v49  ;;  %v2561_v32 = vpop.f32.mrb[151].mxu0  ;;  %v3094_v35 = vpop.f32.mrb[151].mxu1 }
 0x317   : > { %v2564_v36 = vpop.f32.mrb[152].mxu0  ;;  %v3097_v38 = vpop.f32.mrb[152].mxu1 }
 0x318   : > { %v8987_v40 = vadd.f32 %v3097_v38, %v2564_v36  ;;  %v2566_v39 = vpop.f32.mrb[153].mxu0  ;;  %v3099_v44 = vpop.f32.mrb[153].mxu1 }
 0x319   : > { %v2567_v18 = vpop.f32.mrb[154].mxu0  ;;  %v3100_v7 = vpop.f32.mrb[154].mxu1 }
 0x31a   : > { %v8989_v61 = vadd.f32 %v3100_v7, %v2567_v18  ;;  %v2569_v45 = vpop.f32.mrb[155].mxu0  ;;  %v3102_v42 = vpop.f32.mrb[155].mxu1 }
 0x31f   : > { %v2572_v47 = vpop.f32.mrb[156].mxu0  ;;  %v3105_v50 = vpop.f32.mrb[156].mxu1 }
 0x320   : > { %v8991_v37 = vadd.f32 %v3105_v50, %v2572_v47  ;;  %v2574_v51 = vpop.f32.mrb[157].mxu0  ;;  %v3107_v52 = vpop.f32.mrb[157].mxu1 }
 0x321   : > { %v2575_v54 = vpop.f32.mrb[158].mxu0  ;;  %v3108_v58 = vpop.f32.mrb[158].mxu1 }
 0x322   : > { %v8993_v57 = vadd.f32 %v3108_v58, %v2575_v54  ;;  %v2577_v10 = vpop.f32.mrb[159].mxu0  ;;  %v3110_v63 = vpop.f32.mrb[159].mxu1 }
 0x327   : > { %v2580_v4 = vpop.f32.mrb[160].mxu0  ;;  %v3113_v8 = vpop.f32.mrb[160].mxu1 }
 0x328   : > { %v9001_v19 = vadd.f32 %v3113_v8, %v2580_v4  ;;  %v2582_v9 = vpop.f32.mrb[161].mxu0  ;;  %v3115_v16 = vpop.f32.mrb[161].mxu1 }
 0x329   : > { %v2583_v21 = vpop.f32.mrb[162].mxu0  ;;  %v3116_v28 = vpop.f32.mrb[162].mxu1 }
 0x32a   : > { %v9003_v13 = vadd.f32 %v3116_v28, %v2583_v21  ;;  %v2585_v23 = vpop.f32.mrb[163].mxu0  ;;  %v3118_v46 = vpop.f32.mrb[163].mxu1 }
 0x32f   : > { %v2588_v25 = vpop.f32.mrb[164].mxu0  ;;  %v3121_v11 = vpop.f32.mrb[164].mxu1 }
 0x330   : > { %v9005_v20 = vadd.f32 %v3121_v11, %v2588_v25  ;;  %v2590_v49 = vpop.f32.mrb[165].mxu0  ;;  %v3123_v29 = vpop.f32.mrb[165].mxu1 }
 0x331   : > { %v2591_v32 = vpop.f32.mrb[166].mxu0  ;;  %v3124_v35 = vpop.f32.mrb[166].mxu1 }
 0x332   : > { %v9007_v36 = vadd.f32 %v3124_v35, %v2591_v32  ;;  %v2593_v38 = vpop.f32.mrb[167].mxu0  ;;  %v3126_v39 = vpop.f32.mrb[167].mxu1 }
 0x337   : > { %v2596_v44 = vpop.f32.mrb[168].mxu0  ;;  %v3129_v18 = vpop.f32.mrb[168].mxu1 }
 0x338   : > { %v9009_v7 = vadd.f32 %v3129_v18, %v2596_v44  ;;  %v2598_v45 = vpop.f32.mrb[169].mxu0  ;;  %v3131_v42 = vpop.f32.mrb[169].mxu1 }
 0x339   : > { %v2599_v47 = vpop.f32.mrb[170].mxu0  ;;  %v3132_v50 = vpop.f32.mrb[170].mxu1 }
 0x33a   : > { %v9011_v51 = vadd.f32 %v3132_v50, %v2599_v47  ;;  %v2601_v52 = vpop.f32.mrb[171].mxu0  ;;  %v3134_v54 = vpop.f32.mrb[171].mxu1  ;;  %v7591_v50 = vld [vmem:[%s7741_s28 + $0xa0] sm:$0xff] }
 0x33b   : > { %v9028_v52 = vadd.f32 %v7591_v50, %v8979_v53 }
 0x33f   : > { %v2604_v58 = vpop.f32.mrb[172].mxu0  ;;  %v3137_v10 = vpop.f32.mrb[172].mxu1 }
 0x340   : > { %v9013_v63 = vadd.f32 %v3137_v10, %v2604_v58  ;;  %v2606_v3 = vpop.f32.mrb[173].mxu0  ;;  %v3139_v62 = vpop.f32.mrb[173].mxu1 }
 0x341   : > { %v2607_v4 = vpop.f32.mrb[174].mxu0  ;;  %v3140_v8 = vpop.f32.mrb[174].mxu1 }
 0x342   : > { %v9015_v9 = vadd.f32 %v3140_v8, %v2607_v4  ;;  %v2609_v16 = vpop.f32.mrb[175].mxu0  ;;  %v3142_v21 = vpop.f32.mrb[175].mxu1 }
 0x347   : > { %v2612_v28 = vpop.f32.mrb[176].mxu0  ;;  %v3145_v23 = vpop.f32.mrb[176].mxu1 }
 0x348   : > { %v9017_v46 = vadd.f32 %v3145_v23, %v2612_v28  ;;  %v2614_v25 = vpop.f32.mrb[177].mxu0  ;;  %v3147_v11 = vpop.f32.mrb[177].mxu1 }
 0x349   : > { %v2615_v49 = vpop.f32.mrb[178].mxu0  ;;  %v3148_v29 = vpop.f32.mrb[178].mxu1  ;;  %v3313_v25 = vsel %vm3252_vm2, %v9028_v52, 0.0 }
 0x34a   : > { %v3255_v32 = vpop.xlane.xlu0 %3254  ;;  %v9019_v35 = vadd.f32 %v3148_v29, %v2615_v49  ;;  %v2617_v38 = vpop.f32.mrb[179].mxu0 }
 0x34b   : > { %v3404_v39 = vmul.f32 0.015625, %v3255_v32  ;;  %v3150_v44 = vpop.f32.mrb[179].mxu1  ;;  %v7592_v32 = vld [vmem:[%s7741_s28 + $0xa8] sm:$0xff] }
 0x34c   : > { %v9048_v38 = vadd.f32 %v7592_v32, %v8981_v22 }
 0x34d   : > { %v9022_v18 = vsub.f32 %v8880_v17, %v3404_v39 }
 0x34e   : > { %v3258_v45 = vpop.xlane.xlu0 %3257  ;;  %v3316_v22 = vsel %vm3252_vm2, %v9048_v38, 0.0 }
 0x34f   : > { %v3405_v42 = vmul.f32 0.015625, %v3258_v45  ;;  %v3504_v47 = vmul.f32 %v9022_v18, %v9022_v18  ;;  %v2620_v54 = vpop.f32.mrb[180].mxu0  ;;  %v3153_v58 = vpop.f32.mrb[180].mxu1 }
 0x350   : > { %v9030_v10 = vadd.f32 %v3153_v58, %v2620_v54  ;;  %v2622_v3 = vpop.f32.mrb[181].mxu0  ;;  %v3155_v62 = vpop.f32.mrb[181].mxu1 }
 0x351   : > { %v9033_v4 = vsub.f32 %v8885_v30, %v3405_v42  ;;  %v3554_v17 = vsel %vm3252_vm2, %v3504_v47, 0.0  ;;  %v2623_v8 = vpop.f32.mrb[182].mxu0  ;;  %v3156_v16 = vpop.f32.mrb[182].mxu1  ;;  %v7593_v42 = vld [vmem:[%s7741_s28 + $0xb0] sm:$0xff] }
 0x352   : > { %v3261_v21 = vpop.xlane.xlu1 %3260  ;;  %3555 = vadd.xlane.f32.xlu0 %v3554_v17  ;;  %v9036_v28 = vadd.f32 %v3156_v16, %v2623_v8  ;;  %v2625_v53 = vpop.f32.mrb[183].mxu0  ;;  %v9054_v47 = vadd.f32 %v7593_v42, %v8983_v6  ;;  %v7594_v16 = vld [vmem:[%s7741_s28 + $0xb8] sm:$0xff]  ;;  %v7596_v42 = vld [vmem:[%s7741_s28 + $0xc8] sm:$0xff] }
 0x353   : > { %v3406_v23 = vmul.f32 0.015625, %v3261_v21  ;;  %v3505_v11 = vmul.f32 %v9033_v4, %v9033_v4  ;;  %v3158_v49 = vpop.f32.mrb[183].mxu1  ;;  %v9072_v21 = vadd.f32 %v7594_v16, %v8985_v12 }
 0x354   : > { %v3319_v3 = vsel %vm3252_vm2, %v9054_v47, 0.0 }
 0x355   : > { %v9043_v30 = vsub.f32 %v8890_v41, %v3406_v23  ;;  %v3557_v29 = vsel %vm3252_vm2, %v3505_v11, 0.0  ;;  %v3322_v11 = vsel %vm3252_vm2, %v9072_v21, 0.0 }
 0x356   : > { %v3264_v39 = vpop.xlane.xlu1 %3263  ;;  %3314 = vadd.xlane.f32.xlu0 %v3313_v25  ;;  %3558 = vadd.xlane.f32.xlu1 %v3557_v29  ;;  %v7595_v25 = vld [vmem:[%s7741_s28 + $0xc0] sm:$0xff] }
 0x357   : > { %v3407_v44 = vmul.f32 0.015625, %v3264_v39  ;;  %v3506_v45 = vmul.f32 %v9043_v30, %v9043_v30 }
 0x359   : > { %v9057_v41 = vsub.f32 %v8895_v43, %v3407_v44  ;;  %v3560_v50 = vsel %vm3252_vm2, %v3506_v45, 0.0 }
 0x35a   : > { %3561 = vadd.xlane.f32.xlu0 %v3560_v50  ;;  %3317 = vadd.xlane.f32.xlu1 %v3316_v22  ;;  %v3267_v54 = vpop.xlane.xlu0 %3266  ;;  %v9096_v50 = vadd.f32 %v7596_v42, %v8989_v61  ;;  %v7598_v42 = vld [vmem:[%s7741_s28 + $0xd8] sm:$0xff] }
 0x35b   : > { %v3408_v58 = vmul.f32 0.015625, %v3267_v54  ;;  %v3507_v6 = vmul.f32 %v9057_v41, %v9057_v41 }
 0x35c   : > { %v3270_v62 = vpop.xlane.xlu1 %3269 }
 0x35d   : > { %v9067_v43 = vsub.f32 %v8900_v55, %v3408_v58  ;;  %v3409_v17 = vmul.f32 0.015625, %v3270_v62  ;;  %v3563_v8 = vsel %vm3252_vm2, %v3507_v6, 0.0  ;;  %v9081_v55 = vadd.f32 %v7595_v25, %v8987_v40  ;;  %v7597_v58 = vld [vmem:[%s7741_s28 + $0xd0] sm:$0xff]  ;;  %v3161_v6 = vpop.f32.mrb[184].mxu1 }
 0x35e   : > { %3320 = vadd.xlane.f32.xlu0 %v3319_v3  ;;  %3564 = vadd.xlane.f32.xlu1 %v3563_v8  ;;  %v9105_v3 = vadd.f32 %v7597_v58, %v8991_v37  ;;  %v3328_v62 = vsel %vm3252_vm2, %v9096_v50, 0.0  ;;  %v7148_v58 = vld [vmem:[%s11274_s9 + $0x14] ss:$8 sps:$4 sm:$0xff]  }
 0x35f   : > { %v9075_v53 = vsub.f32 %v8905_v60, %v3409_v17  ;;  %v3508_v23 = vmul.f32 %v9067_v43, %v9067_v43  ;;  %v3325_v32 = vsel %vm3252_vm2, %v9081_v55, 0.0  ;;  %4178 = vmatprep.subr.bf16.mxu0 %v7148_v58 }
 0x361   : > { %v3566_v49 = vsel %vm3252_vm2, %v3508_v23, 0.0  ;;  %v3509_v12 = vmul.f32 %v9075_v53, %v9075_v53 }
 0x362   : > { %3323 = vadd.xlane.f32.xlu1 %v3322_v11  ;;  %3567 = vadd.xlane.f32.xlu0 %v3566_v49  ;;  %v3273_v60 = vpop.xlane.xlu0 %3272  ;;  %v3331_v11 = vsel %vm3252_vm2, %v9105_v3, 0.0 }
 0x363   : > { %v3410_v29 = vmul.f32 0.015625, %v3273_v60  ;;  %v3569_v45 = vsel %vm3252_vm2, %v3509_v12, 0.0 }
 0x364   : > { %v3276_v39 = vpop.xlane.xlu1 %3275 }
 0x365   : > { %v9091_v40 = vsub.f32 %v8910_v27, %v3410_v29  ;;  %v3411_v44 = vmul.f32 0.015625, %v3276_v39  ;;  %v2628_v27 = vpop.f32.mrb[184].mxu0 }
 0x366   : > { %3570 = vadd.xlane.f32.xlu1 %v3569_v45  ;;  %3326 = vadd.xlane.f32.xlu0 %v3325_v32  ;;  %v2630_v8 = vpop.f32.mrb[185].mxu0  ;;  %v9112_v23 = vadd.f32 %v3161_v6, %v2628_v27  ;;  %v7146_v27 = vld [vmem:[%s11274_s9 + $0x10] ss:$8 sps:$4 sm:$0xff]  }
 0x367   : > { %v9099_v22 = vsub.f32 %v8915_v31, %v3411_v44  ;;  %v3510_v54 = vmul.f32 %v9091_v40, %v9091_v40  ;;  %v3163_v31 = vpop.f32.mrb[185].mxu1  ;;  %v2631_v37 = vpop.f32.mrb[186].mxu0  ;;  %4179 = vmatpush1.bf16.msra.mxu0 %v7146_v27 }
 0x368   : > { %v3164_v49 = vpop.f32.mrb[186].mxu1  ;;  %v2633_v12 = vpop.f32.mrb[187].mxu0 }
 0x369   : > { %v3572_v61 = vsel %vm3252_vm2, %v3510_v54, 0.0  ;;  %v3511_v17 = vmul.f32 %v9099_v22, %v9099_v22  ;;  %v9116_v29 = vadd.f32 %v3164_v49, %v2631_v37  ;;  %v3166_v32 = vpop.f32.mrb[187].mxu1  ;;  %v9124_v54 = vadd.f32 %v7598_v42, %v8993_v57  ;;  %v7149_v49 = vld [vmem:[%s11274_s9 + $0x20] ss:$8 sps:$4 sm:$0xff]  }
 0x36a   : > { %3329 = vadd.xlane.f32.xlu1 %v3328_v62  ;;  %3573 = vadd.xlane.f32.xlu0 %v3572_v61  ;;  %v3279_v16 = vpop.xlane.xlu0 %3278  ;;  %v7599_v62 = vld [vmem:[%s7741_s28 + $0xe0] sm:$0xff]  ;;  %v2636_v61 = vpop.f32.mrb[188].mxu0 }
 0x36b   : > { %v3412_v25 = vmul.f32 0.015625, %v3279_v16  ;;  %v3575_v45 = vsel %vm3252_vm2, %v3511_v17, 0.0  ;;  %v9139_v57 = vadd.f32 %v7599_v62, %v9001_v19  ;;  %v3169_v17 = vpop.f32.mrb[188].mxu1  ;;  %v3334_v8 = vsel %vm3252_vm2, %v9124_v54, 0.0  ;;  %v7151_v16 = vld [vmem:[%s11274_s9 + $0x24] ss:$8 sps:$4 sm:$0xff]  }
 0x36c   : > { %v3282_v60 = vpop.xlane.xlu1 %3281  ;;  %v2638_v37 = vpop.f32.mrb[189].mxu0  ;;  %4180 = vmatprep.subr.bf16.mxu0 %v7151_v16  ;;  %v7152_v16 = vld [vmem:[%s11274_s9 + $0x30] ss:$8 sps:$4 sm:$0xff]  }
 0x36d   : > { %v9119_v39 = vsub.f32 %v8920_v26, %v3412_v25  ;;  %v3413_v44 = vmul.f32 0.015625, %v3282_v60  ;;  %v3171_v25 = vpop.f32.mrb[189].mxu1  ;;  %v2639_v12 = vpop.f32.mrb[190].mxu0  ;;  %v3337_v32 = vsel %vm3252_vm2, %v9139_v57, 0.0  ;;  %4181 = vmatpush1.bf16.msra.mxu0 %v7149_v49  ;;  %v7601_v37 = vld [vmem:[%s7741_s28 + $0xf0] sm:$0xff] }
 0x36e   : > { %3576 = vadd.xlane.f32.xlu1 %v3575_v45  ;;  %3332 = vadd.xlane.f32.xlu0 %v3331_v11  ;;  %v9149_v11 = vadd.f32 %v3169_v17, %v2636_v61  ;;  %v2641_v45 = vpop.f32.mrb[191].mxu0  ;;  %v7600_v17 = vld [vmem:[%s7741_s28 + $0xe8] sm:$0xff] }
 0x36f   : > { %v9133_v26 = vsub.f32 %v8925_v33, %v3413_v44  ;;  %v3512_v6 = vmul.f32 %v9119_v39, %v9119_v39  ;;  %v3172_v44 = vpop.f32.mrb[190].mxu1  ;;  %v2644_v25 = vpop.f32.mrb[192].mxu0 }
 0x370   : > { %v9156_v58 = vadd.f32 %v3172_v44, %v2639_v12  ;;  %v3174_v27 = vpop.f32.mrb[191].mxu1 }
 0x371   : > { %v3578_v31 = vsel %vm3252_vm2, %v3512_v6, 0.0  ;;  %v3513_v33 = vmul.f32 %v9133_v26, %v9133_v26  ;;  %v7602_v27 = vld [vmem:[%s7741_s28 + $0xf8] sm:$0xff] }
 0x372   : > { %3335 = vadd.xlane.f32.xlu1 %v3334_v8  ;;  %3579 = vadd.xlane.f32.xlu0 %v3578_v31  ;;  %v3285_v19 = vpop.xlane.xlu0 %3284  ;;  %v9164_v8 = vadd.f32 %v7600_v17, %v9003_v13  ;;  %v7154_v31 = vld [vmem:[%s11274_s9 + $0x34] ss:$8 sps:$4 sm:$0xff]   ;;  %v9179_v13 = vadd.f32 %v7601_v37, %v9005_v20 }
 0x373   : > { %v3414_v60 = vmul.f32 0.015625, %v3285_v19  ;;  %v3581_v61 = vsel %vm3252_vm2, %v3513_v33, 0.0  ;;  %4182 = vmatprep.subr.bf16.mxu0 %v7154_v31  ;;  %v3177_v19 = vpop.f32.mrb[192].mxu1 }
 0x374   : > { %v3288_v42 = vpop.xlane.xlu1 %3287  ;;  %4183 = vmatpush1.bf16.msra.mxu0 %v7152_v16  ;;  %v3340_v49 = vsel %vm3252_vm2, %v9164_v8, 0.0  ;;  %v9186_v20 = vadd.f32 %v3177_v19, %v2644_v25 }
 0x375   : > { %v9159_v6 = vsub.f32 %v8930_v48, %v3414_v60  ;;  %v3415_v62 = vmul.f32 0.015625, %v3288_v42  ;;  %v2646_v60 = vpop.f32.mrb[193].mxu0  ;;  %v3343_v42 = vsel %vm3252_vm2, %v9179_v13, 0.0 }
 0x376   : > { %3582 = vadd.xlane.f32.xlu1 %v3581_v61  ;;  %3338 = vadd.xlane.f32.xlu0 %v3337_v32  ;;  %v3179_v32 = vpop.f32.mrb[193].mxu1  ;;  %v2647_v61 = vpop.f32.mrb[194].mxu0 }
 0x377   : > { %v9173_v48 = vsub.f32 %v8935_v14, %v3415_v62  ;;  %v3514_v33 = vmul.f32 %v9159_v6, %v9159_v6  ;;  %v9192_v62 = vadd.f32 %v7602_v27, %v9007_v36  ;;  %v3180_v17 = vpop.f32.mrb[194].mxu1  ;;  %v2649_v16 = vpop.f32.mrb[195].mxu0 }
 0x378   : > { %v9198_v19 = vadd.f32 %v3180_v17, %v2647_v61 }
 0x379   : > { %v3584_v12 = vsel %vm3252_vm2, %v3514_v33, 0.0  ;;  %v3515_v14 = vmul.f32 %v9173_v48, %v9173_v48  ;;  %v3346_v36 = vsel %vm3252_vm2, %v9192_v62, 0.0 }
 0x37a   : > { %3341 = vadd.xlane.f32.xlu1 %v3340_v49  ;;  %3585 = vadd.xlane.f32.xlu0 %v3584_v12  ;;  %v3291_v44 = vpop.xlane.xlu0 %3290  ;;  %v3182_v49 = vpop.f32.mrb[195].mxu1 }
 0x37b   : > { %v3416_v45 = vmul.f32 0.015625, %v3291_v44  ;;  %v3587_v25 = vsel %vm3252_vm2, %v3515_v14, 0.0 }
 0x37c   : > { %v3294_v31 = vpop.xlane.xlu1 %3293 }
 0x37d   : > { %v9195_v33 = vsub.f32 %v8940_v2, %v3416_v45  ;;  %v3417_v37 = vmul.f32 0.015625, %v3294_v31  ;;  %v7603_v2 = vld [vmem:[%s7741_s28 + $0x100] sm:$0xff]  ;;  %v2652_v45 = vpop.f32.mrb[196].mxu0  ;;  %v7604_v31 = vld [vmem:[%s7741_s28 + $0x108] sm:$0xff] }
 0x37e   : > { %3588 = vadd.xlane.f32.xlu1 %v3587_v25  ;;  %3344 = vadd.xlane.f32.xlu0 %v3343_v42  ;;  %v9209_v32 = vadd.f32 %v7603_v2, %v9009_v7  ;;  %v3185_v42 = vpop.f32.mrb[196].mxu1  ;;  %v2654_v27 = vpop.f32.mrb[197].mxu0  ;;  %v9218_v16 = vadd.f32 %v7604_v31, %v9011_v51 }
 0x37f   : > { %v9201_v12 = vsub.f32 %v8945_v5, %v3417_v37  ;;  %v3516_v60 = vmul.f32 %v9195_v33, %v9195_v33  ;;  %v9220_v7 = vadd.f32 %v3185_v42, %v2652_v45  ;;  %v3187_v37 = vpop.f32.mrb[197].mxu1  ;;  %v2655_v25 = vpop.f32.mrb[198].mxu0  ;;  %v7605_v42 = vld [vmem:[%s7741_s28 + $0x110] sm:$0xff] }
 0x380   : > { %v3349_v17 = vsel %vm3252_vm2, %v9209_v32, 0.0  ;;  %v2657_v27 = vpop.f32.mrb[199].mxu0  ;;  %v3352_v45 = vsel %vm3252_vm2, %v9218_v16, 0.0 }
 0x381   : > { %v3590_v14 = vsel %vm3252_vm2, %v3516_v60, 0.0  ;;  %v3517_v44 = vmul.f32 %v9201_v12, %v9201_v12  ;;  %v3188_v60 = vpop.f32.mrb[198].mxu1 }
 0x382   : > { %3347 = vadd.xlane.f32.xlu1 %v3346_v36  ;;  %3591 = vadd.xlane.f32.xlu0 %v3590_v14  ;;  %v3297_v5 = vpop.xlane.xlu0 %3296  ;;  %v3190_v0 = vpop.f32.mrb[199].mxu1 }
 0x383   : > { %v3418_v61 = vmul.f32 0.015625, %v3297_v5  ;;  %v3593_v14 = vsel %vm3252_vm2, %v3517_v44, 0.0  ;;  %v9226_v5 = vadd.f32 %v3188_v60, %v2655_v25  ;;  %v3193_v31 = vpop.f32.mrb[200].mxu1  ;;  %v7606_v60 = vld [vmem:[%s7741_s28 + $0x118] sm:$0xff] }
 0x384   : > { %v3300_v49 = vpop.xlane.xlu1 %3299 }
 0x385   : > { %v9223_v36 = vsub.f32 %v8950_v56, %v3418_v61  ;;  %v3419_v2 = vmul.f32 0.015625, %v3300_v49  ;;  %v9237_v61 = vadd.f32 %v7605_v42, %v9013_v63 }
 0x386   : > { %3594 = vadd.xlane.f32.xlu1 %v3593_v14  ;;  %3350 = vadd.xlane.f32.xlu0 %v3349_v17  ;;  %v2660_v17 = vpop.f32.mrb[200].mxu0  ;;  %v3195_v14 = vpop.f32.mrb[201].mxu1 }
 0x387   : > { %11324 = vst [vmem:[#allocation2_spill] sm:$0xff] %v9223_v36  ;;  %v9229_v51 = vsub.f32 %v8955_v15, %v3419_v2  ;;  %v3518_v56 = vmul.f32 %v9223_v36, %v9223_v36  ;;  %v2662_v37 = vpop.f32.mrb[201].mxu0  ;;  %v3355_v49 = vsel %vm3252_vm2, %v9237_v61, 0.0  ;;  %v9246_v2 = vadd.f32 %v7606_v60, %v9015_v9  ;;  %v3196_v42 = vpop.f32.mrb[202].mxu1  ;;  %v7608_v60 = vld [vmem:[%s7741_s28 + $0x128] sm:$0xff] }
 0x388   : > { %v9248_v63 = vadd.f32 %v3193_v31, %v2660_v17  ;;  %v2663_v27 = vpop.f32.mrb[202].mxu0  ;;  %v3198_v36 = vpop.f32.mrb[203].mxu1  ;;  %v7607_v31 = vld [vmem:[%s7741_s28 + $0x120] sm:$0xff]  ;;  %v9274_v14 = vadd.f32 %v7608_v60, %v9019_v35 }
 0x389   : > { %11325 = vst [vmem:[#allocation3_spill] sm:$0xff] %v9229_v51  ;;  %v3596_v44 = vsel %vm3252_vm2, %v3518_v56, 0.0  ;;  %v3519_v0 = vmul.f32 %v9229_v51, %v9229_v51  ;;  %v9254_v37 = vadd.f32 %v3196_v42, %v2663_v27  ;;  %v2665_v51 = vpop.f32.mrb[203].mxu0  ;;  %v3358_v17 = vsel %vm3252_vm2, %v9246_v2, 0.0 }
 0x38a   : > { %3353 = vadd.xlane.f32.xlu1 %v3352_v45  ;;  %3597 = vadd.xlane.f32.xlu0 %v3596_v44  ;;  %v3303_v15 = vpop.xlane.xlu0 %3302 }
 0x38b   : > { %v3420_v25 = vmul.f32 0.015625, %v3303_v15  ;;  %v3599_v15 = vsel %vm3252_vm2, %v3519_v0, 0.0 }
 0x38c   : > { %v3306_v56 = vpop.xlane.xlu1 %3305 }
 0x38d   : > { %v9251_v45 = vsub.f32 %v8960_v34, %v3420_v25  ;;  %v3421_v44 = vmul.f32 0.015625, %v3306_v56  ;;  %v9265_v25 = vadd.f32 %v7607_v31, %v9017_v46 }
 0x38e   : > { %3600 = vadd.xlane.f32.xlu1 %v3599_v15  ;;  %3356 = vadd.xlane.f32.xlu0 %v3355_v49  ;;  %v3364_v15 = vsel %vm3252_vm2, %v9274_v14, 0.0 }
 0x38f   : > { %v9257_v9 = vsub.f32 %v8965_v1, %v3421_v44  ;;  %v3520_v34 = vmul.f32 %v9251_v45, %v9251_v45  ;;  %v3361_v49 = vsel %vm3252_vm2, %v9265_v25, 0.0 }
 0x391   : > { %v3602_v0 = vsel %vm3252_vm2, %v3520_v34, 0.0  ;;  %v3521_v36 = vmul.f32 %v9257_v9, %v9257_v9 }
 0x392   : > { %3359 = vadd.xlane.f32.xlu1 %v3358_v17  ;;  %3603 = vadd.xlane.f32.xlu0 %v3602_v0  ;;  %v3309_v1 = vpop.xlane.xlu0 %3308  ;;  %v7609_v17 = vld [vmem:[%s7741_s28 + $0x130] sm:$0xff]  ;;  %v7610_v0 = vld [vmem:[%s7741_s28 + $0x138] sm:$0xff] }
 0x393   : > { %v3422_v51 = vmul.f32 0.015625, %v3309_v1  ;;  %v3605_v42 = vsel %vm3252_vm2, %v3521_v36, 0.0  ;;  %v9289_v34 = vadd.f32 %v7609_v17, %v9030_v10  ;;  %v9298_v36 = vadd.f32 %v7610_v0, %v9036_v28 }
 0x394   : > { %v3312_v27 = vpop.xlane.xlu1 %3311 }
 0x395   : > { %v9277_v46 = vsub.f32 %v8970_v59, %v3422_v51  ;;  %v3423_v56 = vmul.f32 0.015625, %v3312_v27  ;;  %v3370_v10 = vsel %vm3252_vm2, %v9298_v36, 0.0 }
 0x396   : > { %3606 = vadd.xlane.f32.xlu1 %v3605_v42  ;;  %3362 = vadd.xlane.f32.xlu0 %v3361_v49 }
 0x397   : > { %v9281_v44 = vsub.f32 %v8975_v24, %v3423_v56  ;;  %v3522_v35 = vmul.f32 %v9277_v46, %v9277_v46  ;;  %v3367_v24 = vsel %vm3252_vm2, %v9289_v34, 0.0 }
 0x399   : > { %v3608_v59 = vsel %vm3252_vm2, %v3522_v35, 0.0  ;;  %v3523_v31 = vmul.f32 %v9281_v44, %v9281_v44 }
 0x39a   : > { %3365 = vadd.xlane.f32.xlu1 %v3364_v15  ;;  %3609 = vadd.xlane.f32.xlu0 %v3608_v59 }
 0x39b   : > { %v3611_v1 = vsel %vm3252_vm2, %v3523_v31, 0.0  ;;  %v7611_v31 = vld [vmem:[%s7741_s28 + $0x140] sm:$0xff] }
 0x39e   : > { %3612 = vadd.xlane.f32.xlu1 %v3611_v1  ;;  %3368 = vadd.xlane.f32.xlu0 %v3367_v24  ;;  %v9308_v24 = vadd.f32 %v7611_v31, %v9112_v23  ;;  %v7612_v31 = vld [vmem:[%s7741_s28 + $0x148] sm:$0xff] }
 0x3a0   : > { %v3373_v23 = vsel %vm3252_vm2, %v9308_v24, 0.0 }
 0x3a2   : > { %3371 = vadd.xlane.f32.xlu1 %v3370_v10 }
 0x3df   : > { %v3556_v51 = vpop.xlane.xlu0 %3555 }
 0x3e0   : > { %v3704_v49 = vmul.f32 0.015625, %v3556_v51 }
 0x3e2   : > { %v3754_v60 = vadd.f32 1e-12, %v3704_v49 }
 0x3e3   : > { %v3559_v27 = vpop.xlane.xlu1 %3558  ;;  %v3315_v56 = vpop.xlane.xlu0 %3314 }
 0x3e4   : > { %7171 = vrsqrt.f32 %v3754_v60  ;;  %v3705_v42 = vmul.f32 0.015625, %v3559_v27  ;;  %v3424_v15 = vmul.f32 0.015625, %v3315_v56 }
 0x3e6   : > { %v3755_v35 = vadd.f32 1e-12, %v3705_v42  ;;  %v9304_v28 = vsub.f32 %v9028_v52, %v3424_v15 }
 0x3e7   : > { %v3318_v17 = vpop.xlane.xlu1 %3317  ;;  %v3562_v59 = vpop.xlane.xlu0 %3561 }
 0x3e8   : > { %7173 = vrsqrt.f32 %v3755_v35  ;;  %v3425_v0 = vmul.f32 0.015625, %v3318_v17  ;;  %v3706_v1 = vmul.f32 0.015625, %v3562_v59  ;;  %v3524_v10 = vmul.f32 %v9304_v28, %v9304_v28 }
 0x3ea   : > { %v9313_v51 = vsub.f32 %v9048_v38, %v3425_v0  ;;  %v3756_v49 = vadd.f32 1e-12, %v3706_v1  ;;  %v3614_v52 = vsel %vm3252_vm2, %v3524_v10, 0.0  ;;  %v9326_v0 = vadd.f32 %v7612_v31, %v9116_v29 }
 0x3eb   : > { %v3565_v60 = vpop.xlane.xlu1 %3564  ;;  %3615 = vadd.xlane.f32.xlu0 %v3614_v52  ;;  %v3321_v27 = vpop.xlane.xlu0 %3320  ;;  %v7613_v52 = vld [vmem:[%s7741_s28 + $0x150] sm:$0xff] }
 0x3ec   : > { %7175 = vrsqrt.f32 %v3756_v49  ;;  %v3707_v56 = vmul.f32 0.015625, %v3565_v60  ;;  %v3426_v42 = vmul.f32 0.015625, %v3321_v27  ;;  %v3525_v15 = vmul.f32 %v9313_v51, %v9313_v51 }
 0x3ed   : > { %v9331_v60 = vadd.f32 %v7613_v52, %v9149_v11  ;;  %v3376_v11 = vsel %vm3252_vm2, %v9326_v0, 0.0 }
 0x3ee   : > { %v7172_v35 = vpop.eup %7171  ;;  %v3757_v17 = vadd.f32 1e-12, %v3707_v56  ;;  %v9321_v38 = vsub.f32 %v9054_v47, %v3426_v42  ;;  %v3617_v59 = vsel %vm3252_vm2, %v3525_v15, 0.0  ;;  %v9336_v47 = vld [vmem:[%s11272_s7] ss:$0 sm:$0xff] }
 0x3ef   : > { %v3854_v1 = vmul.f32 %v7172_v35, %v9022_v18  ;;  %3618 = vadd.xlane.f32.xlu1 %v3617_v59  ;;  %v3324_v10 = vpop.xlane.xlu1 %3323  ;;  %3374 = vadd.xlane.f32.xlu0 %v3373_v23  ;;  %v3568_v49 = vpop.xlane.xlu0 %3567 }
 0x3f0   : > { %7177 = vrsqrt.f32 %v3757_v17  ;;  %v3427_v27 = vmul.f32 0.015625, %v3324_v10  ;;  %v3708_v56 = vmul.f32 0.015625, %v3568_v49  ;;  %v3526_v29 = vmul.f32 %v9321_v38, %v9321_v38 }
 0x3f1   : > { %v3910_v35 = vmul.f32 %v9336_v47, %v3854_v1  ;;  %v3379_v10 = vsel %vm3252_vm2, %v9331_v60, 0.0 }
 0x3f2   : > { %v7174_v18 = vpop.eup %7173  ;;  %v9341_v42 = vsub.f32 %v9072_v21, %v3427_v27  ;;  %v3758_v23 = vadd.f32 1e-12, %v3708_v56  ;;  %v3620_v15 = vsel %vm3252_vm2, %v3526_v29, 0.0  ;;  %v9353_v21 = vld [vmem:[%s11273_s8] ss:$0 sm:$0xff] }
 0x3f3   : > { %v3855_v59 = vmul.f32 %v7174_v18, %v9033_v4  ;;  %3377 = vadd.xlane.f32.xlu1 %v3376_v11  ;;  %v3571_v17 = vpop.xlane.xlu1 %3570  ;;  %3621 = vadd.xlane.f32.xlu0 %v3620_v15  ;;  %v3327_v31 = vpop.xlane.xlu0 %3326  ;;  %v7614_v11 = vld [vmem:[%s7741_s28 + $0x158] sm:$0xff] }
 0x3f4   : > { %7179 = vrsqrt.f32 %v3758_v23  ;;  %v3709_v49 = vmul.f32 0.015625, %v3571_v17  ;;  %v3428_v52 = vmul.f32 0.015625, %v3327_v31  ;;  %v3527_v1 = vmul.f32 %v9341_v42, %v9341_v42 }
 0x3f5   : > { %v3911_v4 = vmul.f32 %v9336_v47, %v3855_v59  ;;  %v9364_v15 = vadd.f32 %v7614_v11, %v9156_v58  ;;  %v9367_v23 = vadd.f32 %v9353_v21, %v3910_v35  ;;  %v7615_v35 = vld [vmem:[%s7741_s28 + $0x160] sm:$0xff] }
 0x3f6   : > { %v7176_v27 = vpop.eup %7175  ;;  %v3759_v56 = vadd.f32 1e-12, %v3709_v49  ;;  %v9359_v29 = vsub.f32 %v9081_v55, %v3428_v52  ;;  %v3623_v18 = vsel %vm3252_vm2, %v3527_v1, 0.0  ;;  %v9379_v11 = vadd.f32 %v7615_v35, %v9186_v20 }
 0x3f7   : > { %11326 = vst [vmem:[#allocation4_spill] sm:$0xff] %v9367_v23  ;;  %v9370_v17 = vadd.f32 %v9353_v21, %v3911_v4  ;;  %3624 = vadd.xlane.f32.xlu1 %v3623_v18  ;;  %v3330_v59 = vpop.xlane.xlu1 %3329  ;;  %3380 = vadd.xlane.f32.xlu0 %v3379_v10  ;;  %v3574_v31 = vpop.xlane.xlu0 %3573  ;;  %v3856_v55 = vmul.f32 %v7176_v27, %v9043_v30  ;;  %v3382_v30 = vsel %vm3252_vm2, %v9364_v15, 0.0 }
 0x3f8   : > { %7181 = vrsqrt.f32 %v3759_v56  ;;  %v3429_v49 = vmul.f32 0.015625, %v3330_v59  ;;  %v3710_v52 = vmul.f32 0.015625, %v3574_v31  ;;  %v3528_v1 = vmul.f32 %v9359_v29, %v9359_v29 }
 0x3f9   : > { %11327 = vst [vmem:[#allocation5_spill] sm:$0xff] %v9370_v17  ;;  %v4016_v58 = vpack.c.bf16 %v9370_v17, %v9367_v23  ;;  %v3912_v20 = vmul.f32 %v9336_v47, %v3856_v55 }
 0x3fa   : > { %v7178_v4 = vpop.eup %7177  ;;  %v9382_v18 = vsub.f32 %v9096_v50, %v3429_v49  ;;  %v3760_v10 = vadd.f32 1e-12, %v3710_v52  ;;  %v3626_v27 = vsel %vm3252_vm2, %v3528_v1, 0.0  ;;  %v11328_v52 = vmov 0  }
 0x3fb   : > { %3383 = vadd.xlane.f32.xlu1 %v3382_v30  ;;  %v3577_v56 = vpop.xlane.xlu1 %3576  ;;  %6594 = vmatmul.mubr.msk.bf16.vlgmr.msra.gmra.mrb[204].mxu0 %vm3252_vm2, %v4016_v58  ;;  %v3333_v59 = vpop.xlane.xlu0 %3332  ;;  %v3857_v31 = vmul.f32 %v7178_v4, %v9057_v41  ;;  %v3385_v1 = vsel %vm3252_vm2, %v9379_v11, 0.0  ;;  %v7616_v4 = vld [vmem:[%s7741_s28 + $0x168] sm:$0xff] }
 0x3fc   : > { %7183 = vrsqrt.f32 %v3760_v10  ;;  %v3711_v35 = vmul.f32 0.015625, %v3577_v56  ;;  %3627 = vadd.xlane.f32.xlu0 %v3626_v27  ;;  %v3430_v50 = vmul.f32 0.015625, %v3333_v59  ;;  %v3529_v49 = vmul.f32 %v9382_v18, %v9382_v18  ;;  %4218 = vmatprep.mubr.bf16.mxu0 %v11328_v52 }
 0x3fd   : > { %v3913_v58 = vmul.f32 %v9336_v47, %v3857_v31  ;;  %v9402_v10 = vadd.f32 %v7616_v4, %v9198_v19  ;;  %v9405_v59 = vadd.f32 %v9353_v21, %v3912_v20 }
 0x3fe   : > { %v7180_v30 = vpop.eup %7179  ;;  %v3761_v17 = vadd.f32 1e-12, %v3711_v35  ;;  %v9397_v41 = vsub.f32 %v9105_v3, %v3430_v50  ;;  %v3629_v55 = vsel %vm3252_vm2, %v3529_v49, 0.0 }
 0x3ff   : > { %3630 = vadd.xlane.f32.xlu1 %v3629_v55  ;;  %v3336_v27 = vpop.xlane.xlu1 %3335  ;;  %v3580_v56 = vpop.xlane.xlu0 %3579  ;;  %v9408_v31 = vadd.f32 %v9353_v21, %v3913_v58  ;;  %v3858_v35 = vmul.f32 %v7180_v30, %v9067_v43  ;;  %v7617_v55 = vld [vmem:[%s7741_s28 + $0x170] sm:$0xff]  ;;  %v3388_v43 = vsel %vm3252_vm2, %v9402_v10, 0.0 }
 0x400   : > { %7185 = vrsqrt.f32 %v3761_v17  ;;  %v3431_v3 = vmul.f32 0.015625, %v3336_v27  ;;  %3386 = vadd.xlane.f32.xlu0 %v3385_v1  ;;  %v3712_v50 = vmul.f32 0.015625, %v3580_v56  ;;  %v3530_v49 = vmul.f32 %v9397_v41, %v9397_v41 }
 0x401   : > { %v4017_v19 = vpack.c.bf16 %v9408_v31, %v9405_v59  ;;  %v9417_v4 = vadd.f32 %v7617_v55, %v9220_v7  ;;  %v3914_v7 = vmul.f32 %v9336_v47, %v3858_v35  ;;  %v7618_v35 = vld [vmem:[%s7741_s28 + $0x178] sm:$0xff] }
 0x402   : > { %v7182_v20 = vpop.eup %7181  ;;  %v9420_v58 = vsub.f32 %v9124_v54, %v3431_v3  ;;  %v3762_v23 = vadd.f32 1e-12, %v3712_v50  ;;  %v3632_v17 = vsel %vm3252_vm2, %v3530_v49, 0.0 }
 0x403   : > { %3389 = vadd.xlane.f32.xlu1 %v3388_v43  ;;  %v3583_v1 = vpop.xlane.xlu1 %3582  ;;  %6595 = vmatmul.mubr.msk.bf16.gmra.mrb[208].mxu0 %vm3252_vm2, %v4017_v19  ;;  %v3339_v30 = vpop.xlane.xlu0 %3338  ;;  %v3859_v27 = vmul.f32 %v7182_v20, %v9075_v53  ;;  %v3391_v50 = vsel %vm3252_vm2, %v9417_v4, 0.0  ;;  %v9440_v20 = vadd.f32 %v7618_v35, %v9226_v5 }
 0x404   : > { %7187 = vrsqrt.f32 %v3762_v23  ;;  %v3713_v56 = vmul.f32 0.015625, %v3583_v1  ;;  %3633 = vadd.xlane.f32.xlu0 %v3632_v17  ;;  %v3432_v54 = vmul.f32 0.015625, %v3339_v30  ;;  %v3531_v3 = vmul.f32 %v9420_v58, %v9420_v58  ;;  %4228 = vmatprep.mubr.bf16.mxu0 %v11328_v52 }
 0x405   : > { %v3915_v49 = vmul.f32 %v9336_v47, %v3859_v27  ;;  %v9443_v1 = vadd.f32 %v9353_v21, %v3914_v7 }
 0x406   : > { %v7184_v19 = vpop.eup %7183  ;;  %v3763_v55 = vadd.f32 1e-12, %v3713_v56  ;;  %v9435_v53 = vsub.f32 %v9139_v57, %v3432_v54  ;;  %v3635_v23 = vsel %vm3252_vm2, %v3531_v3, 0.0  ;;  %v7619_v3 = vld [vmem:[%s7741_s28 + $0x180] sm:$0xff] }
 0x407   : > { %3636 = vadd.xlane.f32.xlu1 %v3635_v23  ;;  %v3342_v43 = vpop.xlane.xlu1 %3341  ;;  %v3586_v17 = vpop.xlane.xlu0 %3585  ;;  %v9446_v30 = vadd.f32 %v9353_v21, %v3915_v49  ;;  %v3860_v27 = vmul.f32 %v7184_v19, %v9091_v40  ;;  %v9455_v23 = vadd.f32 %v7619_v3, %v9248_v63  ;;  %v3394_v40 = vsel %vm3252_vm2, %v9440_v20, 0.0 }
 0x408   : > { %7189 = vrsqrt.f32 %v3763_v55  ;;  %v3433_v57 = vmul.f32 0.015625, %v3342_v43  ;;  %3392 = vadd.xlane.f32.xlu0 %v3391_v50  ;;  %v3714_v56 = vmul.f32 0.015625, %v3586_v17  ;;  %v3532_v54 = vmul.f32 %v9435_v53, %v9435_v53 }
 0x409   : > { %v4018_v5 = vpack.c.bf16 %v9446_v30, %v9443_v1  ;;  %v3916_v63 = vmul.f32 %v9336_v47, %v3860_v27 }
 0x40a   : > { %v7186_v7 = vpop.eup %7185  ;;  %v9458_v49 = vsub.f32 %v9164_v8, %v3433_v57  ;;  %v3764_v35 = vadd.f32 1e-12, %v3714_v56  ;;  %v3638_v50 = vsel %vm3252_vm2, %v3532_v54, 0.0  ;;  %v3397_v56 = vsel %vm3252_vm2, %v9455_v23, 0.0 }
 0x40b   : > { %3395 = vadd.xlane.f32.xlu1 %v3394_v40  ;;  %v3589_v19 = vpop.xlane.xlu1 %3588  ;;  %6596 = vmatmul.mubr.msk.bf16.gmra.mrb[212].mxu0 %vm3252_vm2, %v4018_v5  ;;  %v3345_v55 = vpop.xlane.xlu0 %3344  ;;  %v3861_v43 = vmul.f32 %v7186_v7, %v9099_v22  ;;  %v7620_v7 = vld [vmem:[%s7741_s28 + $0x188] sm:$0xff] }
 0x40c   : > { %7191 = vrsqrt.f32 %v3764_v35  ;;  %v3715_v17 = vmul.f32 0.015625, %v3589_v19  ;;  %3639 = vadd.xlane.f32.xlu0 %v3638_v50  ;;  %v3434_v8 = vmul.f32 0.015625, %v3345_v55  ;;  %v3533_v57 = vmul.f32 %v9458_v49, %v9458_v49  ;;  %4238 = vmatprep.mubr.bf16.mxu0 %v11328_v52 }
 0x40d   : > { %v3917_v54 = vmul.f32 %v9336_v47, %v3861_v43  ;;  %v9478_v35 = vadd.f32 %v7620_v7, %v9254_v37  ;;  %v9481_v19 = vadd.f32 %v9353_v21, %v3916_v63 }
 0x40e   : > { %v7188_v5 = vpop.eup %7187  ;;  %v3765_v3 = vadd.f32 1e-12, %v3715_v17  ;;  %v9473_v22 = vsub.f32 %v9179_v13, %v3434_v8  ;;  %v3641_v27 = vsel %vm3252_vm2, %v3533_v57, 0.0 }
 0x40f   : > { %3642 = vadd.xlane.f32.xlu1 %v3641_v27  ;;  %v3348_v40 = vpop.xlane.xlu1 %3347  ;;  %v3592_v50 = vpop.xlane.xlu0 %3591  ;;  %v9484_v55 = vadd.f32 %v9353_v21, %v3917_v54  ;;  %v3862_v43 = vmul.f32 %v7188_v5, %v9119_v39  ;;  %v3400_v54 = vsel %vm3252_vm2, %v9478_v35, 0.0 }
 0x410   : > { %7193 = vrsqrt.f32 %v3765_v3  ;;  %v3435_v13 = vmul.f32 0.015625, %v3348_v40  ;;  %3398 = vadd.xlane.f32.xlu0 %v3397_v56  ;;  %v3716_v17 = vmul.f32 0.015625, %v3592_v50  ;;  %v3534_v8 = vmul.f32 %v9473_v22, %v9473_v22 }
 0x411   : > { %v4019_v37 = vpack.c.bf16 %v9484_v55, %v9481_v19  ;;  %v3918_v7 = vmul.f32 %v9336_v47, %v3862_v43 }
 0x412   : > { %v7190_v57 = vpop.eup %7189  ;;  %v9492_v27 = vsub.f32 %v9192_v62, %v3435_v13  ;;  %v3766_v63 = vadd.f32 1e-12, %v3716_v17  ;;  %v3644_v39 = vsel %vm3252_vm2, %v3534_v8, 0.0 }
 0x413   : > { %3401 = vadd.xlane.f32.xlu1 %v3400_v54  ;;  %v3595_v5 = vpop.xlane.xlu1 %3594  ;;  %6597 = vmatmul.mubr.msk.bf16.gmra.mrb[216].mxu0 %vm3252_vm2, %v4019_v37  ;;  %v3351_v56 = vpop.xlane.xlu0 %3350  ;;  %v3863_v3 = vmul.f32 %v7190_v57, %v9133_v26 }
 0x414   : > { %7195 = vrsqrt.f32 %v3766_v63  ;;  %v3717_v40 = vmul.f32 0.015625, %v3595_v5  ;;  %3645 = vadd.xlane.f32.xlu0 %v3644_v39  ;;  %v3436_v62 = vmul.f32 0.015625, %v3351_v56  ;;  %v3535_v50 = vmul.f32 %v9492_v27, %v9492_v27  ;;  %4248 = vmatprep.mubr.bf16.mxu0 %v11328_v52 }
 0x415   : > { %v3919_v13 = vmul.f32 %v9336_v47, %v3863_v3  ;;  %v9509_v63 = vadd.f32 %v9353_v21, %v3918_v7 }
 0x416   : > { %v7192_v17 = vpop.eup %7191  ;;  %v3767_v8 = vadd.f32 1e-12, %v3717_v40  ;;  %v9505_v37 = vsub.f32 %v9209_v32, %v3436_v62  ;;  %v3647_v26 = vsel %vm3252_vm2, %v3535_v50, 0.0 }
 0x417   : > { %3648 = vadd.xlane.f32.xlu1 %v3647_v26  ;;  %v3354_v43 = vpop.xlane.xlu1 %3353  ;;  %v3598_v57 = vpop.xlane.xlu0 %3597  ;;  %v9512_v54 = vadd.f32 %v9353_v21, %v3919_v13  ;;  %v3864_v39 = vmul.f32 %v7192_v17, %v9159_v6 }
 0x418   : > { %7197 = vrsqrt.f32 %v3767_v8  ;;  %v3437_v5 = vmul.f32 0.015625, %v3354_v43  ;;  %v3718_v56 = vmul.f32 0.015625, %v3598_v57  ;;  %v3536_v32 = vmul.f32 %v9505_v37, %v9505_v37 }
 0x419   : > { %v4020_v3 = vpack.c.bf16 %v9512_v54, %v9509_v63  ;;  %v3920_v8 = vmul.f32 %v9336_v47, %v3864_v39 }
 0x41a   : > { %v7194_v40 = vpop.eup %7193  ;;  %v9520_v62 = vsub.f32 %v9218_v16, %v3437_v5  ;;  %v3768_v7 = vadd.f32 1e-12, %v3718_v56  ;;  %v3650_v50 = vsel %vm3252_vm2, %v3536_v32, 0.0 }
 0x41b   : > { %v3601_v13 = vpop.xlane.xlu1 %3600  ;;  %6598 = vmatmul.mubr.msk.bf16.gmra.mrb[220].mxu0 %vm3252_vm2, %v4020_v3  ;;  %3651 = vadd.xlane.f32.xlu0 %v3650_v50  ;;  %v3357_v6 = vpop.xlane.xlu0 %3356  ;;  %v3865_v17 = vmul.f32 %v7194_v40, %v9173_v48  ;;  %v9535_v40 = vadd.f32 %v9353_v21, %v3920_v8 }
 0x41c   : > { %7199 = vrsqrt.f32 %v3768_v7  ;;  %v3719_v26 = vmul.f32 0.015625, %v3601_v13  ;;  %v3438_v43 = vmul.f32 0.015625, %v3357_v6  ;;  %v3537_v57 = vmul.f32 %v9520_v62, %v9520_v62  ;;  %4258 = vmatprep.mubr.bf16.mxu0 %v11328_v52 }
 0x41d   : > { %v3921_v16 = vmul.f32 %v9336_v47, %v3865_v17 }
 0x41e   : > { %v7196_v5 = vpop.eup %7195  ;;  %v3769_v56 = vadd.f32 1e-12, %v3719_v26  ;;  %v9531_v32 = vsub.f32 %v9237_v61, %v3438_v43  ;;  %v3653_v3 = vsel %vm3252_vm2, %v3537_v57, 0.0 }
 0x41f   : > { %3654 = vadd.xlane.f32.xlu1 %v3653_v3  ;;  %v3360_v48 = vpop.xlane.xlu1 %3359  ;;  %v3604_v39 = vpop.xlane.xlu0 %3603  ;;  %v9538_v7 = vadd.f32 %v9353_v21, %v3921_v16  ;;  %v3866_v50 = vmul.f32 %v7196_v5, %v9195_v33 }
 0x420   : > { %7201 = vrsqrt.f32 %v3769_v56  ;;  %v3439_v13 = vmul.f32 0.015625, %v3360_v48  ;;  %v3720_v6 = vmul.f32 0.015625, %v3604_v39  ;;  %v3538_v61 = vmul.f32 %v9531_v32, %v9531_v32 }
 0x421   : > { %11329 = vst [vmem:[#allocation6_spill] sm:$0xff] %v9538_v7  ;;  %v4021_v17 = vpack.c.bf16 %v9538_v7, %v9535_v40  ;;  %v3922_v56 = vmul.f32 %v9336_v47, %v3866_v50 }
 0x422   : > { %v7198_v26 = vpop.eup %7197  ;;  %v9546_v43 = vsub.f32 %v9246_v2, %v3439_v13  ;;  %v3770_v8 = vadd.f32 1e-12, %v3720_v6  ;;  %v3656_v57 = vsel %vm3252_vm2, %v3538_v61, 0.0 }
 0x423   : > { %v3607_v16 = vpop.xlane.xlu1 %3606  ;;  %6599 = vmatmul.mubr.msk.bf16.gmra.mrb[224].mxu0 %vm3252_vm2, %v4021_v17  ;;  %3657 = vadd.xlane.f32.xlu0 %v3656_v57  ;;  %v3363_v33 = vpop.xlane.xlu0 %3362  ;;  %v3867_v5 = vmul.f32 %v7198_v26, %v9201_v12  ;;  %v9561_v26 = vadd.f32 %v9353_v21, %v3922_v56  ;;  %v11331_v57 = vld [vmem:[#allocation2_spill] sm:$0xff] }
 0x424   : > { %7203 = vrsqrt.f32 %v3770_v8  ;;  %v3721_v3 = vmul.f32 0.015625, %v3607_v16  ;;  %v3440_v48 = vmul.f32 0.015625, %v3363_v33  ;;  %v3539_v39 = vmul.f32 %v9546_v43, %v9546_v43  ;;  %4268 = vmatprep.mubr.bf16.mxu0 %v11328_v52 }
 0x425   : > { %v3923_v2 = vmul.f32 %v9336_v47, %v3867_v5 }
 0x426   : > { %v7200_v13 = vpop.eup %7199  ;;  %v3771_v6 = vadd.f32 1e-12, %v3721_v3  ;;  %v9557_v61 = vsub.f32 %v9265_v25, %v3440_v48  ;;  %v3659_v17 = vsel %vm3252_vm2, %v3539_v39, 0.0  ;;  %v7155_v3 = vld [vmem:[%s11276_s11] sm:$0xff]  }
 0x427   : > { %3660 = vadd.xlane.f32.xlu1 %v3659_v17  ;;  %v3366_v12 = vpop.xlane.xlu1 %3365  ;;  %v3610_v50 = vpop.xlane.xlu0 %3609  ;;  %v9564_v8 = vadd.f32 %v9353_v21, %v3923_v2  ;;  %v3868_v16 = vmul.f32 %v7200_v13, %v11331_v57  ;;  %5145 = vmatpush1.bf16.msra.mxu1 %v7155_v3 }
 0x428   : > { %7205 = vrsqrt.f32 %v3771_v6  ;;  %v3441_v33 = vmul.f32 0.015625, %v3366_v12  ;;  %v3722_v5 = vmul.f32 0.015625, %v3610_v50  ;;  %v3540_v25 = vmul.f32 %v9557_v61, %v9557_v61  ;;  %v11332_v12 = vld [vmem:[#allocation3_spill] sm:$0xff]  ;;  %5146 = vmatprep.subr.bf16.mxu1 %v11328_v52 }
 0x429   : > { %11330 = vst [vmem:[#allocation7_spill] sm:$0xff] %v9564_v8  ;;  %v4022_v48 = vpack.c.bf16 %v9564_v8, %v9561_v26  ;;  %v3924_v57 = vmul.f32 %v9336_v47, %v3868_v16 }
 0x42a   : > { %v7202_v56 = vpop.eup %7201  ;;  %v9575_v39 = vsub.f32 %v9274_v14, %v3441_v33  ;;  %v3772_v2 = vadd.f32 1e-12, %v3722_v5  ;;  %v3662_v13 = vsel %vm3252_vm2, %v3540_v25, 0.0  ;;  %v7156_v33 = vld [vmem:[%s11276_s11 + $0x8] sm:$0xff]  }
 0x42b   : > { %v3613_v6 = vpop.xlane.xlu1 %3612  ;;  %6600 = vmatmul.mubr.msk.bf16.gmra.mrb[228].mxu0 %vm3252_vm2, %v4022_v48  ;;  %3663 = vadd.xlane.f32.xlu0 %v3662_v13  ;;  %v3369_v17 = vpop.xlane.xlu0 %3368  ;;  %v3869_v50 = vmul.f32 %v7202_v56, %v11332_v12 }
 0x42c   : > { %7207 = vrsqrt.f32 %v3772_v2  ;;  %v3723_v7 = vmul.f32 0.015625, %v3613_v6  ;;  %v3442_v8 = vmul.f32 0.015625, %v3369_v17  ;;  %v3541_v14 = vmul.f32 %v9575_v39, %v9575_v39  ;;  %4278 = vmatprep.mubr.bf16.mxu0 %v11328_v52  ;;  %5147 = vmatpush1.bf16.msra.mxu1 %v7156_v33 }
 0x42d   : > { %v3925_v5 = vmul.f32 %v9336_v47, %v3869_v50  ;;  %v9594_v2 = vadd.f32 %v9353_v21, %v3924_v57  ;;  %5148 = vmatprep.subr.bf16.mxu1 %v11328_v52 }
 0x42e   : > { %v7204_v25 = vpop.eup %7203  ;;  %v3773_v3 = vadd.f32 1e-12, %v3723_v7  ;;  %v9590_v16 = vsub.f32 %v9289_v34, %v3442_v8  ;;  %v3665_v48 = vsel %vm3252_vm2, %v3541_v14, 0.0  ;;  %v7157_v8 = vld [vmem:[%s11276_s11 + $0x10] sm:$0xff]  }
 0x42f   : > { %3666 = vadd.xlane.f32.xlu1 %v3665_v48  ;;  %v3372_v56 = vpop.xlane.xlu1 %3371  ;;  %v9597_v13 = vadd.f32 %v9353_v21, %v3925_v5  ;;  %v3870_v6 = vmul.f32 %v7204_v25, %v9251_v45 }
 0x430   : > { %7209 = vrsqrt.f32 %v3773_v3  ;;  %v3443_v7 = vmul.f32 0.015625, %v3372_v56  ;;  %v3542_v34 = vmul.f32 %v9590_v16, %v9590_v16  ;;  %5149 = vmatpush1.bf16.msra.mxu1 %v7157_v8 }
 0x431   : > { %v4023_v17 = vpack.c.bf16 %v9597_v13, %v9594_v2  ;;  %v3926_v14 = vmul.f32 %v9336_v47, %v3870_v6  ;;  %5150 = vmatprep.subr.bf16.mxu1 %v11328_v52  ;;  %v7159_v6 = vld [vmem:[%s11276_s11 + $0x20] sm:$0xff]  }
 0x432   : > { %v7206_v12 = vpop.eup %7205  ;;  %v9609_v50 = vsub.f32 %v9298_v36, %v3443_v7  ;;  %v3668_v45 = vsel %vm3252_vm2, %v3542_v34, 0.0  ;;  %v7158_v36 = vld [vmem:[%s11276_s11 + $0x18] sm:$0xff]  }
 0x433   : > { %6601 = vmatmul.mubr.msk.bf16.gmra.mrb[232].mxu0 %vm3252_vm2, %v4023_v17  ;;  %3669 = vadd.xlane.f32.xlu0 %v3668_v45  ;;  %v3871_v57 = vmul.f32 %v7206_v12, %v9257_v9  ;;  %v9625_v9 = vadd.f32 %v9353_v21, %v3926_v14 }
 0x434   : > { %v3543_v33 = vmul.f32 %v9609_v50, %v9609_v50  ;;  %4288 = vmatprep.mubr.bf16.mxu0 %v11328_v52  ;;  %5151 = vmatpush1.bf16.msra.mxu1 %v7158_v36  ;;  %v7163_v36 = vld [vmem:[%s11276_s11 + $0x40] sm:$0xff]  }
 0x435   : > { %v3927_v5 = vmul.f32 %v9336_v47, %v3871_v57  ;;  %5152 = vmatprep.subr.bf16.mxu1 %v11328_v52 }
 0x436   : > { %v7208_v25 = vpop.eup %7207  ;;  %v3671_v3 = vsel %vm3252_vm2, %v3543_v33, 0.0  ;;  %v7162_v33 = vld [vmem:[%s11276_s11 + $0x38] sm:$0xff]  }
 0x437   : > { %3672 = vadd.xlane.f32.xlu1 %v3671_v3  ;;  %v9628_v48 = vadd.f32 %v9353_v21, %v3927_v5  ;;  %v3872_v56 = vmul.f32 %v7208_v25, %v9277_v46  ;;  %v7160_v46 = vld [vmem:[%s11276_s11 + $0x28] sm:$0xff]   ;;  %v7165_v25 = vld [vmem:[%s11276_s11 + $0x50] sm:$0xff]   ;;  %v7166_v3 = vld [vmem:[%s11276_s11 + $0x58] sm:$0xff]  }
 0x438   : > { %5153 = vmatpush1.bf16.msra.mxu1 %v7159_v6  ;;  %v7164_v5 = vld [vmem:[%s11276_s11 + $0x48] sm:$0xff]  }
 0x439   : > { %v4024_v7 = vpack.c.bf16 %v9628_v48, %v9625_v9  ;;  %v3928_v17 = vmul.f32 %v9336_v47, %v3872_v56  ;;  %5154 = vmatprep.subr.bf16.mxu1 %v11328_v52  ;;  %v7167_v56 = vld [vmem:[%s11276_s11 + $0x60] sm:$0xff]   ;;  %v7168_v6 = vld [vmem:[%s11276_s11 + $0x68] sm:$0xff]  }
 0x43a   : > { %v7210_v34 = vpop.eup %7209 }
 0x43b   : > { %6602 = vmatmul.mubr.msk.bf16.gmra.mrb[236].mxu0 %vm3252_vm2, %v4024_v7  ;;  %v3873_v8 = vmul.f32 %v7210_v34, %v9281_v44  ;;  %v9647_v45 = vadd.f32 %v9353_v21, %v3928_v17  ;;  %v7161_v44 = vld [vmem:[%s11276_s11 + $0x30] sm:$0xff]   ;;  %v7170_v34 = vld [vmem:[%s11276_s11 + $0x78] sm:$0xff]  }
 0x43c   : > { %4298 = vmatprep.mubr.bf16.mxu0 %v11328_v52  ;;  %5155 = vmatpush1.bf16.msra.mxu1 %v7160_v46  ;;  %v7169_v7 = vld [vmem:[%s11276_s11 + $0x70] sm:$0xff]  }
 0x43d   : > { %v3929_v12 = vmul.f32 %v9336_v47, %v3873_v8  ;;  %5156 = vmatprep.subr.bf16.mxu1 %v11328_v52 }
 0x43f   : > { %v9650_v57 = vadd.f32 %v9353_v21, %v3929_v12 }
 0x440   : > { %5157 = vmatpush1.bf16.msra.mxu1 %v7161_v44 }
 0x441   : > { %v4025_v14 = vpack.c.bf16 %v9650_v57, %v9647_v45  ;;  %5158 = vmatprep.subr.bf16.mxu1 %v11328_v52 }
 0x443   : > { %6603 = vmatmul.mubr.msk.bf16.gmra.mrb[240].mxu0 %vm3252_vm2, %v4025_v14 }
 0x444   : > { %4308 = vmatprep.mubr.bf16.mxu0 %v11328_v52  ;;  %5159 = vmatpush1.bf16.msra.mxu1 %v7162_v33 }
 0x445   : > { %5160 = vmatprep.subr.bf16.mxu1 %v11328_v52 }
 0x448   : > { %5161 = vmatpush1.bf16.msra.mxu1 %v7163_v36 }
 0x449   : > { %5162 = vmatprep.subr.bf16.mxu1 %v11328_v52 }
 0x44c   : > { %5163 = vmatpush1.bf16.msra.mxu1 %v7164_v5 }
 0x44d   : > { %5164 = vmatprep.subr.bf16.mxu1 %v11328_v52 }
 0x450   : > { %5165 = vmatpush1.bf16.msra.mxu1 %v7165_v25 }
 0x451   : > { %5166 = vmatprep.subr.bf16.mxu1 %v11328_v52 }
 0x454   : > { %5167 = vmatpush1.bf16.msra.mxu1 %v7166_v3 }
 0x455   : > { %5168 = vmatprep.subr.bf16.mxu1 %v11328_v52 }
 0x458   : > { %5169 = vmatpush1.bf16.msra.mxu1 %v7167_v56 }
 0x459   : > { %5170 = vmatprep.subr.bf16.mxu1 %v11328_v52 }
 0x45c   : > { %5171 = vmatpush1.bf16.msra.mxu1 %v7168_v6 }
 0x45d   : > { %5172 = vmatprep.subr.bf16.mxu1 %v11328_v52 }
 0x460   : > { %5173 = vmatpush1.bf16.msra.mxu1 %v7169_v7 }
 0x461   : > { %5174 = vmatprep.subr.bf16.mxu1 %v11328_v52 }
 0x464   : > { %5175 = vmatpush1.bf16.msra.mxu1 %v7170_v34 }
 0x478   : > { %v3616_v8 = vpop.xlane.xlu0 %3615 }
 0x479   : > { %v3724_v17 = vmul.f32 0.015625, %v3616_v8 }
 0x47b   : > { %v3774_v46 = vadd.f32 1e-12, %v3724_v17 }
 0x47c   : > { %v3619_v12 = vpop.xlane.xlu1 %3618  ;;  %v3375_v44 = vpop.xlane.xlu0 %3374 }
 0x47d   : > { %7211 = vrsqrt.f32 %v3774_v46  ;;  %v3725_v14 = vmul.f32 0.015625, %v3619_v12  ;;  %v3444_v33 = vmul.f32 0.015625, %v3375_v44 }
 0x47f   : > { %v3775_v36 = vadd.f32 1e-12, %v3725_v14  ;;  %v9697_v5 = vsub.f32 %v9308_v24, %v3444_v33 }
 0x480   : > { %v3378_v25 = vpop.xlane.xlu1 %3377  ;;  %v3622_v3 = vpop.xlane.xlu0 %3621 }
 0x481   : > { %7213 = vrsqrt.f32 %v3775_v36  ;;  %v3445_v56 = vmul.f32 0.015625, %v3378_v25  ;;  %v3726_v6 = vmul.f32 0.015625, %v3622_v3  ;;  %v3544_v7 = vmul.f32 %v9697_v5, %v9697_v5 }
 0x483   : > { %v9702_v34 = vsub.f32 %v9326_v0, %v3445_v56  ;;  %v3776_v8 = vadd.f32 1e-12, %v3726_v6  ;;  %v3674_v17 = vsel %vm3252_vm2, %v3544_v7, 0.0 }
 0x484   : > { %v3625_v46 = vpop.xlane.xlu1 %3624  ;;  %3675 = vadd.xlane.f32.xlu0 %v3674_v17  ;;  %v3381_v12 = vpop.xlane.xlu0 %3380 }
 0x485   : > { %7215 = vrsqrt.f32 %v3776_v8  ;;  %v3727_v24 = vmul.f32 0.015625, %v3625_v46  ;;  %v3446_v44 = vmul.f32 0.015625, %v3381_v12  ;;  %v3545_v14 = vmul.f32 %v9702_v34, %v9702_v34 }
 0x487   : > { %v7212_v33 = vpop.eup %7211  ;;  %v3777_v36 = vadd.f32 1e-12, %v3727_v24  ;;  %v9708_v25 = vsub.f32 %v9331_v60, %v3446_v44  ;;  %v3677_v0 = vsel %vm3252_vm2, %v3545_v14, 0.0 }
 0x488   : > { %3678 = vadd.xlane.f32.xlu1 %v3677_v0  ;;  %v3384_v3 = vpop.xlane.xlu1 %3383  ;;  %v3874_v56 = vmul.f32 %v7212_v33, %v9304_v28 }
 0x489   : > { %7217 = vrsqrt.f32 %v3777_v36  ;;  %v3447_v6 = vmul.f32 0.015625, %v3384_v3  ;;  %v3628_v7 = vpop.xlane.xlu0 %3627  ;;  %v3546_v8 = vmul.f32 %v9708_v25, %v9708_v25 }
 0x48a   : > { %v3728_v17 = vmul.f32 0.015625, %v3628_v7  ;;  %v3930_v28 = vmul.f32 %v9336_v47, %v3874_v56 }
 0x48b   : > { %v7214_v46 = vpop.eup %7213  ;;  %v9715_v12 = vsub.f32 %v9364_v15, %v3447_v6  ;;  %v3680_v60 = vsel %vm3252_vm2, %v3546_v8, 0.0 }
 0x48c   : > { %v3778_v24 = vadd.f32 1e-12, %v3728_v17  ;;  %v3631_v44 = vpop.xlane.xlu1 %3630  ;;  %3681 = vadd.xlane.f32.xlu0 %v3680_v60  ;;  %v3875_v14 = vmul.f32 %v7214_v46, %v9313_v51  ;;  %v9728_v56 = vadd.f32 %v9353_v21, %v3930_v28 }
 0x48d   : > { %v3729_v33 = vmul.f32 0.015625, %v3631_v44  ;;  %v3387_v36 = vpop.xlane.xlu0 %3386  ;;  %v3547_v0 = vmul.f32 %v9715_v12, %v9715_v12 }
 0x48e   : > { %7219 = vrsqrt.f32 %v3778_v24  ;;  %v3448_v3 = vmul.f32 0.015625, %v3387_v36  ;;  %v3931_v7 = vmul.f32 %v9336_v47, %v3875_v14 }
 0x48f   : > { %v7216_v15 = vpop.eup %7215  ;;  %v3779_v6 = vadd.f32 1e-12, %v3729_v33  ;;  %v3683_v8 = vsel %vm3252_vm2, %v3547_v0, 0.0 }
 0x490   : > { %v9725_v17 = vsub.f32 %v9379_v11, %v3448_v3  ;;  %3684 = vadd.xlane.f32.xlu1 %v3683_v8  ;;  %v3390_v51 = vpop.xlane.xlu1 %3389  ;;  %v9731_v46 = vadd.f32 %v9353_v21, %v3931_v7  ;;  %v3876_v60 = vmul.f32 %v7216_v15, %v9321_v38 }
 0x491   : > { %7221 = vrsqrt.f32 %v3779_v6  ;;  %v3449_v24 = vmul.f32 0.015625, %v3390_v51  ;;  %v3634_v44 = vpop.xlane.xlu0 %3633 }
 0x492   : > { %11333 = vst [vmem:[#allocation2_spill] sm:$0xff] %v9731_v46  ;;  %v3730_v14 = vmul.f32 0.015625, %v3634_v44  ;;  %v4026_v33 = vpack.c.bf16 %v9731_v46, %v9728_v56  ;;  %v3548_v11 = vmul.f32 %v9725_v17, %v9725_v17  ;;  %v3932_v15 = vmul.f32 %v9336_v47, %v3876_v60 }
 0x493   : > { %v7218_v36 = vpop.eup %7217  ;;  %v9739_v0 = vsub.f32 %v9402_v10, %v3449_v24 }
 0x494   : > { %v3780_v28 = vadd.f32 1e-12, %v3730_v14  ;;  %v3637_v3 = vpop.xlane.xlu1 %3636  ;;  %6604 = vmatmul.mubr.msk.bf16.gmra.mrb[244].mxu0 %vm3252_vm2, %v4026_v33  ;;  %v3686_v38 = vsel %vm3252_vm2, %v3548_v11, 0.0  ;;  %v3877_v7 = vmul.f32 %v7218_v36, %v9341_v42  ;;  %v9754_v11 = vadd.f32 %v9353_v21, %v3932_v15 }
 0x495   : > { %v3731_v6 = vmul.f32 0.015625, %v3637_v3  ;;  %3687 = vadd.xlane.f32.xlu0 %v3686_v38  ;;  %v3393_v8 = vpop.xlane.xlu0 %3392  ;;  %v3549_v51 = vmul.f32 %v9739_v0, %v9739_v0  ;;  %4318 = vmatprep.mubr.bf16.mxu0 %v11328_v52 }
 0x496   : > { %7223 = vrsqrt.f32 %v3780_v28  ;;  %v3450_v10 = vmul.f32 0.015625, %v3393_v8  ;;  %v3933_v24 = vmul.f32 %v9336_v47, %v3877_v7  ;;  %11334 = vst [vmem:[#allocation3_spill] sm:$0xff] %v9754_v11 }
 0x497   : > { %v3781_v44 = vadd.f32 1e-12, %v3731_v6  ;;  %v3689_v14 = vsel %vm3252_vm2, %v3549_v51, 0.0 }
 0x498   : > { %v7220_v33 = vpop.eup %7219  ;;  %v9751_v42 = vsub.f32 %v9417_v4, %v3450_v10  ;;  %3690 = vadd.xlane.f32.xlu1 %v3689_v14  ;;  %v3396_v60 = vpop.xlane.xlu1 %3395  ;;  %v9757_v36 = vadd.f32 %v9353_v21, %v3933_v24 }
 0x499   : > { %7225 = vrsqrt.f32 %v3781_v44  ;;  %v3451_v28 = vmul.f32 0.015625, %v3396_v60  ;;  %v3640_v3 = vpop.xlane.xlu0 %3639  ;;  %v3878_v38 = vmul.f32 %v7220_v33, %v9359_v29 }
 0x49a   : > { %11335 = vst [vmem:[#allocation8_spill] sm:$0xff] %v9757_v36  ;;  %v3732_v7 = vmul.f32 0.015625, %v3640_v3  ;;  %v4027_v6 = vpack.c.bf16 %v9757_v36, %v9754_v11  ;;  %v3550_v4 = vmul.f32 %v9751_v42, %v9751_v42 }
 0x49b   : > { %v7222_v8 = vpop.eup %7221  ;;  %v9765_v51 = vsub.f32 %v9440_v20, %v3451_v28  ;;  %v3934_v29 = vmul.f32 %v9336_v47, %v3878_v38 }
 0x49c   : > { %v3782_v15 = vadd.f32 1e-12, %v3732_v7  ;;  %v3643_v10 = vpop.xlane.xlu1 %3642  ;;  %6605 = vmatmul.mubr.msk.bf16.gmra.mrb[248].mxu0 %vm3252_vm2, %v4027_v6  ;;  %v3692_v24 = vsel %vm3252_vm2, %v3550_v4, 0.0  ;;  %v3879_v44 = vmul.f32 %v7222_v8, %v9382_v18 }
 0x49d   : > { %v3733_v14 = vmul.f32 0.015625, %v3643_v10  ;;  %3693 = vadd.xlane.f32.xlu0 %v3692_v24  ;;  %v3399_v33 = vpop.xlane.xlu0 %3398  ;;  %v3551_v60 = vmul.f32 %v9765_v51, %v9765_v51  ;;  %4328 = vmatprep.mubr.bf16.mxu0 %v11328_v52  ;;  %v9780_v4 = vadd.f32 %v9353_v21, %v3934_v29 }
 0x49e   : > { %7227 = vrsqrt.f32 %v3782_v15  ;;  %v3452_v20 = vmul.f32 0.015625, %v3399_v33  ;;  %v3935_v28 = vmul.f32 %v9336_v47, %v3879_v44 }
 0x49f   : > { %v3783_v3 = vadd.f32 1e-12, %v3733_v14  ;;  %v3695_v7 = vsel %vm3252_vm2, %v3551_v60, 0.0  ;;  %11336 = vst [vmem:[#allocation9_spill] sm:$0xff] %v9780_v4 }
 0x4a0   : > { %v7224_v6 = vpop.eup %7223  ;;  %v9777_v18 = vsub.f32 %v9455_v23, %v3452_v20  ;;  %3696 = vadd.xlane.f32.xlu1 %v3695_v7  ;;  %v3402_v38 = vpop.xlane.xlu1 %3401  ;;  %v9783_v8 = vadd.f32 %v9353_v21, %v3935_v28 }
 0x4a1   : > { %v3880_v15 = vmul.f32 %v7224_v6, %v9397_v41  ;;  %7229 = vrsqrt.f32 %v3783_v3  ;;  %v3453_v10 = vmul.f32 0.015625, %v3402_v38  ;;  %v3646_v24 = vpop.xlane.xlu0 %3645 }
 0x4a2   : > { %11337 = vst [vmem:[#allocation10_spill] sm:$0xff] %v9783_v8  ;;  %v3734_v44 = vmul.f32 0.015625, %v3646_v24  ;;  %v4028_v14 = vpack.c.bf16 %v9783_v8, %v9780_v4  ;;  %v3552_v23 = vmul.f32 %v9777_v18, %v9777_v18 }
 0x4a3   : > { %v7226_v33 = vpop.eup %7225  ;;  %v9791_v60 = vsub.f32 %v9478_v35, %v3453_v10  ;;  %v3936_v29 = vmul.f32 %v9336_v47, %v3880_v15 }
 0x4a4   : > { %v3881_v20 = vmul.f32 %v7226_v33, %v9420_v58  ;;  %v3784_v28 = vadd.f32 1e-12, %v3734_v44  ;;  %v3649_v41 = vpop.xlane.xlu1 %3648  ;;  %6606 = vmatmul.mubr.msk.bf16.gmra.mrb[252].mxu0 %vm3252_vm2, %v4028_v14  ;;  %v3698_v3 = vsel %vm3252_vm2, %v3552_v23, 0.0 }
 0x4a5   : > { %v3735_v7 = vmul.f32 0.015625, %v3649_v41  ;;  %3699 = vadd.xlane.f32.xlu0 %v3698_v3  ;;  %v3553_v6 = vmul.f32 %v9791_v60, %v9791_v60  ;;  %4338 = vmatprep.mubr.bf16.mxu0 %v11328_v52  ;;  %v9803_v10 = vadd.f32 %v9353_v21, %v3936_v29 }
 0x4a6   : > { %v3937_v35 = vmul.f32 %v9336_v47, %v3881_v20  ;;  %7231 = vrsqrt.f32 %v3784_v28 }
 0x4a7   : > { %v3785_v38 = vadd.f32 1e-12, %v3735_v7  ;;  %v3701_v15 = vsel %vm3252_vm2, %v3553_v6, 0.0  ;;  %11338 = vst [vmem:[#allocation11_spill] sm:$0xff] %v9803_v10 }
 0x4a8   : > { %v7228_v58 = vpop.eup %7227  ;;  %v9806_v24 = vadd.f32 %v9353_v21, %v3937_v35  ;;  %3702 = vadd.xlane.f32.xlu1 %v3701_v15  ;;  %v3652_v44 = vpop.xlane.xlu0 %3651 }
 0x4a9   : > { %v3882_v14 = vmul.f32 %v7228_v58, %v9435_v53  ;;  %7233 = vrsqrt.f32 %v3785_v38  ;;  %v3736_v23 = vmul.f32 0.015625, %v3652_v44  ;;  %v9818_v53 = vld [vmem:[%s11272_s7] ss:$0 sm:$0xff] }
 0x4aa   : > { %11339 = vst [vmem:[#allocation12_spill] sm:$0xff] %v9806_v24  ;;  %v4029_v33 = vpack.c.bf16 %v9806_v24, %v9803_v10 }
 0x4ab   : > { %v7230_v20 = vpop.eup %7229  ;;  %v3786_v28 = vadd.f32 1e-12, %v3736_v23  ;;  %v3938_v41 = vmul.f32 %v9336_v47, %v3882_v14 }
 0x4ac   : > { %v3883_v3 = vmul.f32 %v7230_v20, %v9458_v49  ;;  %v3655_v29 = vpop.xlane.xlu1 %3654  ;;  %6607 = vmatmul.mubr.msk.bf16.gmra.mrb[0].mxu0 %vm3252_vm2, %v4029_v33 }
 0x4ad   : > { %7235 = vrsqrt.f32 %v3786_v28  ;;  %v3737_v7 = vmul.f32 0.015625, %v3655_v29  ;;  %4348 = vmatprep.mubr.bf16.mxu0 %v11328_v52  ;;  %v9822_v47 = vadd.f32 %v9353_v21, %v3938_v41 }
 0x4ae   : > { %v3939_v6 = vmul.f32 %v9818_v53, %v3883_v3 }
 0x4af   : > { %v3787_v35 = vadd.f32 1e-12, %v3737_v7  ;;  %11340 = vst [vmem:[#allocation13_spill] sm:$0xff] %v9822_v47  ;;  %v9838_v7 = vld [vmem:[%s11273_s8] ss:$0 sm:$0xff] }
 0x4b0   : > { %v7232_v38 = vpop.eup %7231  ;;  %v9825_v49 = vadd.f32 %v9353_v21, %v3939_v6  ;;  %v3658_v15 = vpop.xlane.xlu0 %3657 }
 0x4b1   : > { %v3884_v58 = vmul.f32 %v7232_v38, %v9473_v22  ;;  %7237 = vrsqrt.f32 %v3787_v35  ;;  %v3738_v44 = vmul.f32 0.015625, %v3658_v15 }
 0x4b2   : > { %11341 = vst [vmem:[#allocation14_spill] sm:$0xff] %v9825_v49  ;;  %v4030_v14 = vpack.c.bf16 %v9825_v49, %v9822_v47 }
 0x4b3   : > { %v7234_v23 = vpop.eup %7233  ;;  %v3788_v33 = vadd.f32 1e-12, %v3738_v44  ;;  %v3940_v20 = vmul.f32 %v9818_v53, %v3884_v58 }
 0x4b4   : > { %v3885_v28 = vmul.f32 %v7234_v23, %v9492_v27  ;;  %v3661_v3 = vpop.xlane.xlu1 %3660  ;;  %6608 = vmatmul.mubr.msk.bf16.gmra.mrb[4].mxu0 %vm3252_vm2, %v4030_v14 }
 0x4b5   : > { %7239 = vrsqrt.f32 %v3788_v33  ;;  %v3739_v21 = vmul.f32 0.015625, %v3661_v3  ;;  %4358 = vmatprep.mubr.bf16.mxu0 %v11328_v52  ;;  %v9841_v6 = vadd.f32 %v9838_v7, %v3940_v20 }
 0x4b6   : > { %v3941_v22 = vmul.f32 %v9818_v53, %v3885_v28 }
 0x4b7   : > { %v7236_v41 = vpop.eup %7235  ;;  %v3789_v29 = vadd.f32 1e-12, %v3739_v21  ;;  %11342 = vst [vmem:[#allocation15_spill] sm:$0xff] %v9841_v6 }
 0x4b8   : > { %v9844_v27 = vadd.f32 %v9838_v7, %v3941_v22  ;;  %v3886_v35 = vmul.f32 %v7236_v41, %v9505_v37  ;;  %v3664_v38 = vpop.xlane.xlu0 %3663  ;;  %v4051_v22 = vlaneseq }
 0x4b9   : > { %7241 = vrsqrt.f32 %v3789_v29  ;;  %v3740_v15 = vmul.f32 0.015625, %v3664_v38 }
 0x4ba   : > { %11343 = vst [vmem:[#allocation16_spill] sm:$0xff] %v9844_v27  ;;  %v4031_v58 = vpack.c.bf16 %v9844_v27, %v9841_v6  ;;  %v3942_v23 = vmul.f32 %v9818_v53, %v3886_v35 }
 0x4bb   : > { %v7238_v44 = vpop.eup %7237  ;;  %v3790_v14 = vadd.f32 1e-12, %v3740_v15 }
 0x4bc   : > { %v3887_v33 = vmul.f32 %v7238_v44, %v9520_v62  ;;  %v3667_v28 = vpop.xlane.xlu1 %3666  ;;  %6609 = vmatmul.mubr.msk.bf16.gmra.mrb[8].mxu0 %vm3252_vm2, %v4031_v58  ;;  %v9855_v41 = vadd.f32 %v9838_v7, %v3942_v23 }
 0x4bd   : > { %7243 = vrsqrt.f32 %v3790_v14  ;;  %v3741_v20 = vmul.f32 0.015625, %v3667_v28  ;;  %4368 = vmatprep.mubr.bf16.mxu0 %v11328_v52  ;;  %v4052_v14 = vshrl.u32 %v4051_v22, 7 }
 0x4be   : > { %v3943_v37 = vmul.f32 %v9818_v53, %v3887_v33  ;;  %11344 = vst [vmem:[#allocation17_spill] sm:$0xff] %v9855_v41 }
 0x4bf   : > { %v7240_v3 = vpop.eup %7239  ;;  %v3791_v21 = vadd.f32 1e-12, %v3741_v20 }
 0x4c0   : > { %v9858_v29 = vadd.f32 %v9838_v7, %v3943_v37  ;;  %v3888_v62 = vmul.f32 %v7240_v3, %v9531_v32  ;;  %v3670_v35 = vpop.xlane.xlu0 %3669 }
 0x4c1   : > { %7245 = vrsqrt.f32 %v3791_v21  ;;  %v3742_v38 = vmul.f32 0.015625, %v3670_v35  ;;  %v4053_v21 = vsub.s32 0, %v4052_v14 }
 0x4c2   : > { %11345 = vst [vmem:[#allocation18_spill] sm:$0xff] %v9858_v29  ;;  %v4032_v15 = vpack.c.bf16 %v9858_v29, %v9855_v41  ;;  %v3944_v33 = vmul.f32 %v9818_v53, %v3888_v62  ;;  %v4049_v62 = vld [vmem:[%s11275_s10] sm:$0x3] }
 0x4c3   : > { %v7242_v58 = vpop.eup %7241  ;;  %v3792_v44 = vadd.f32 1e-12, %v3742_v38  ;;  %v4057_v38 = vsub.s32 1, %v4052_v14 }
 0x4c4   : > { %v3889_v28 = vmul.f32 %v7242_v58, %v9546_v43  ;;  %v3673_v23 = vpop.xlane.xlu1 %3672  ;;  %6610 = vmatmul.mubr.msk.bf16.gmra.mrb[12].mxu0 %vm3252_vm2, %v4032_v15  ;;  %v9869_v35 = vadd.f32 %v9838_v7, %v3944_v33 }
 0x4c5   : > { %7247 = vrsqrt.f32 %v3792_v44  ;;  %v3743_v20 = vmul.f32 0.015625, %v3673_v23  ;;  %4378 = vmatprep.mubr.bf16.mxu0 %v11328_v52  ;;  %v9880_v44 = vrot.slane %v4049_v62, %v4053_v21  ;;  %v9885_v23 = vrot.slane %v4049_v62, %v4057_v38 }
 0x4c6   : > { %v3945_v32 = vmul.f32 %v9818_v53, %v3889_v28  ;;  %11346 = vst [vmem:[#allocation19_spill] sm:$0xff] %v9869_v35 }
 0x4c7   : > { %v7244_v37 = vpop.eup %7243  ;;  %v3793_v3 = vadd.f32 1e-12, %v3743_v20 }
 0x4c8   : > { %v9872_v22 = vadd.f32 %v9838_v7, %v3945_v32  ;;  %v3890_v43 = vmul.f32 %v7244_v37, %v9557_v61 }
 0x4c9   : > { %7249 = vrsqrt.f32 %v3793_v3 }
 0x4ca   : > { %11347 = vst [vmem:[#allocation20_spill] sm:$0xff] %v9872_v22  ;;  %v4033_v15 = vpack.c.bf16 %v9872_v22, %v9869_v35  ;;  %v3946_v33 = vmul.f32 %v9818_v53, %v3890_v43 }
 0x4cb   : > { %v7246_v58 = vpop.eup %7245 }
 0x4cc   : > { %v3891_v28 = vmul.f32 %v7246_v58, %v9575_v39  ;;  %6611 = vmatmul.mubr.msk.bf16.gmra.mrb[16].mxu0 %vm3252_vm2, %v4033_v15  ;;  %v9891_v3 = vadd.f32 %v9838_v7, %v3946_v33 }
 0x4cd   : > { %4388 = vmatprep.mubr.bf16.mxu0 %v11328_v52 }
 0x4ce   : > { %v3947_v61 = vmul.f32 %v9818_v53, %v3891_v28  ;;  %v4210_v14 = vpop.f32.mrb[204].mxu0  ;;  %11348 = vst [vmem:[#allocation21_spill] sm:$0xff] %v9891_v3 }
 0x4cf   : > { %v7248_v20 = vpop.eup %7247  ;;  %v4211_v32 = vadd.f32 %v4210_v14, %v9880_v44  ;;  %v4212_v37 = vpop.f32.mrb[205].mxu0 }
 0x4d0   : > { %v9894_v21 = vadd.f32 %v9838_v7, %v3947_v61  ;;  %v3892_v39 = vmul.f32 %v7248_v20, %v9590_v16  ;;  %v4213_v43 = vadd.f32 %v4212_v37, %v9885_v23  ;;  %v4214_v62 = vpop.f32.mrb[206].mxu0 }
 0x4d1   : > { %v4559_v38 = vmul.f32 0.70710677, %v4211_v32  ;;  %v4215_v15 = vadd.f32 %v4214_v62, %v9880_v44  ;;  %v4216_v58 = vpop.f32.mrb[207].mxu0 }
 0x4d2   : > { %11349 = vst [vmem:[#allocation22_spill] sm:$0xff] %v9894_v21  ;;  %v4034_v28 = vpack.c.bf16 %v9894_v21, %v9891_v3  ;;  %v4560_v14 = vmul.f32 0.70710677, %v4213_v43  ;;  %v4217_v35 = vadd.f32 %v4216_v58, %v9885_v23  ;;  %v3948_v61 = vmul.f32 %v9818_v53, %v3892_v39 }
 0x4d3   : > { %v7250_v22 = vpop.eup %7249  ;;  %7251 = verf.f32 %v4559_v38  ;;  %v4561_v33 = vmul.f32 0.70710677, %v4215_v15  ;;  %v4461_v27 = vmul.f32 0.5, %v4215_v15  ;;  %v4460_v49 = vmul.f32 0.5, %v4213_v43 }
 0x4d4   : > { %v3893_v16 = vmul.f32 %v7250_v22, %v9609_v50  ;;  %7253 = verf.f32 %v4560_v14  ;;  %6612 = vmatmul.mubr.msk.bf16.gmra.mrb[20].mxu0 %vm3252_vm2, %v4034_v28  ;;  %v4562_v20 = vmul.f32 0.70710677, %v4217_v35  ;;  %v9909_v58 = vadd.f32 %v9838_v7, %v3948_v61 }
 0x4d5   : > { %7255 = verf.f32 %v4561_v33  ;;  %4398 = vmatprep.mubr.bf16.mxu0 %v11328_v52  ;;  %v4462_v47 = vmul.f32 0.5, %v4217_v35 }
 0x4d6   : > { %v3949_v37 = vmul.f32 %v9818_v53, %v3893_v16  ;;  %v4220_v62 = vpop.f32.mrb[208].mxu0  ;;  %7257 = verf.f32 %v4562_v20  ;;  %11350 = vst [vmem:[#allocation23_spill] sm:$0xff] %v9909_v58 }
 0x4d7   : > { %v4221_v38 = vadd.f32 %v4220_v62, %v9880_v44  ;;  %v4222_v21 = vpop.f32.mrb[209].mxu0 }
 0x4d8   : > { %v9912_v39 = vadd.f32 %v9838_v7, %v3949_v37  ;;  %v9915_v50 = vadd.f32 %v4222_v21, %v9885_v23  ;;  %v4224_v22 = vpop.f32.mrb[210].mxu0 }
 0x4d9   : > { %v4563_v28 = vmul.f32 0.70710677, %v4221_v38  ;;  %v4225_v14 = vadd.f32 %v4224_v22, %v9880_v44  ;;  %v4226_v33 = vpop.f32.mrb[211].mxu0 }
 0x4da   : > { %11351 = vst [vmem:[#allocation24_spill] sm:$0xff] %v9912_v39  ;;  %v4035_v16 = vpack.c.bf16 %v9912_v39, %v9909_v58  ;;  %v4564_v20 = vmul.f32 0.70710677, %v9915_v50  ;;  %v4227_v62 = vadd.f32 %v4226_v33, %v9885_v23  ;;  %v4459_v39 = vmul.f32 0.5, %v4211_v32 }
 0x4db   : > { %7259 = verf.f32 %v4563_v28  ;;  %v4565_v61 = vmul.f32 0.70710677, %v4225_v14 }
 0x4dc   : > { %7261 = verf.f32 %v4564_v20  ;;  %v4566_v37 = vmul.f32 0.70710677, %v4227_v62  ;;  %6613 = vmatmul.mubr.msk.bf16.gmra.mrb[24].mxu0 %vm3252_vm2, %v4035_v16 }
 0x4dd   : > { %v7252_v21 = vpop.eup %7251  ;;  %7263 = verf.f32 %v4565_v61  ;;  %4408 = vmatprep.mubr.bf16.mxu0 %v11328_v52 }
 0x4de   : > { %v7254_v3 = vpop.eup %7253  ;;  %v4759_v22 = vadd.f32 1.0, %v7252_v21  ;;  %7265 = verf.f32 %v4566_v37  ;;  %v4230_v29 = vpop.f32.mrb[212].mxu0 }
 0x4df   : > { %v7256_v41 = vpop.eup %7255  ;;  %v9925_v58 = vadd.f32 %v4230_v29, %v9880_v44  ;;  %v4232_v33 = vpop.f32.mrb[213].mxu0  ;;  %v4760_v28 = vadd.f32 1.0, %v7254_v3 }
 0x4e0   : > { %v4761_v20 = vadd.f32 1.0, %v7256_v41  ;;  %v9928_v6 = vadd.f32 %v4232_v33, %v9885_v23  ;;  %v4234_v16 = vpop.f32.mrb[214].mxu0  ;;  %v7258_v61 = vpop.eup %7257  ;;  %v4859_v32 = vmul.f32 %v4759_v22, %v4459_v39 }
 0x4e1   : > { %v4567_v21 = vmul.f32 0.70710677, %v9925_v58  ;;  %v4235_v37 = vadd.f32 %v4234_v16, %v9880_v44  ;;  %v4236_v24 = vpop.f32.mrb[215].mxu0  ;;  %v4762_v29 = vadd.f32 1.0, %v7258_v61  ;;  %v4860_v15 = vmul.f32 %v4760_v28, %v4460_v49 }
 0x4e2   : > { %v4861_v10 = vmul.f32 %v4761_v20, %v4461_v27  ;;  %v4568_v8 = vmul.f32 0.70710677, %v9928_v6  ;;  %v4237_v41 = vadd.f32 %v4236_v24, %v9885_v23  ;;  %v4463_v24 = vmul.f32 0.5, %v4221_v38 }
 0x4e3   : > { %7267 = verf.f32 %v4567_v21  ;;  %v4569_v3 = vmul.f32 0.70710677, %v4235_v37  ;;  %v4862_v4 = vmul.f32 %v4762_v29, %v4462_v47  ;;  %v4465_v49 = vmul.f32 0.5, %v4225_v14 }
 0x4e4   : > { %v4959_v33 = vpack.c.bf16 %v4861_v10, %v4859_v32  ;;  %7269 = verf.f32 %v4568_v8  ;;  %v4570_v35 = vmul.f32 0.70710677, %v4237_v41  ;;  %v4464_v28 = vmul.f32 0.5, %v9915_v50 }
 0x4e5   : > { %v7260_v43 = vpop.eup %7259  ;;  %7271 = verf.f32 %v4569_v3  ;;  %v4960_v46 = vpack.c.bf16 %v4862_v4, %v4860_v15  ;;  %v4466_v21 = vmul.f32 0.5, %v4227_v62 }
 0x4e6   : > { %v7262_v36 = vpop.eup %7261  ;;  %v4763_v11 = vadd.f32 1.0, %v7260_v43  ;;  %v4240_v16 = vpop.f32.mrb[216].mxu0  ;;  %7273 = verf.f32 %v4570_v35 }
 0x4e7   : > { %v7264_v39 = vpop.eup %7263  ;;  %v4764_v27 = vadd.f32 1.0, %v7262_v36  ;;  %v9935_v22 = vadd.f32 %v4240_v16, %v9880_v44  ;;  %v4242_v20 = vpop.f32.mrb[217].mxu0  ;;  %5176 = vmatprep.mubr.bf16.mxu1 %v4960_v46 }
 0x4e8   : > { %v7266_v61 = vpop.eup %7265  ;;  %v4765_v10 = vadd.f32 1.0, %v7264_v39  ;;  %v9938_v8 = vadd.f32 %v4242_v20, %v9885_v23  ;;  %v4244_v47 = vpop.f32.mrb[218].mxu0  ;;  %5177 = vmatmul.mubr.bf16.vlgmr.msra.gmra.mrb[204].mxu1 %v4959_v33  ;;  %v4863_v29 = vmul.f32 %v4763_v11, %v4463_v24  ;;  %v4467_v24 = vmul.f32 0.5, %v9925_v58 }
 0x4e9   : > { %v4766_v4 = vadd.f32 1.0, %v7266_v61  ;;  %v4571_v36 = vmul.f32 0.70710677, %v9935_v22  ;;  %v4246_v32 = vpop.f32.mrb[219].mxu0  ;;  %v4245_v38 = vadd.f32 %v4244_v47, %v9880_v44  ;;  %v4864_v14 = vmul.f32 %v4764_v27, %v4464_v28 }
 0x4ea   : > { %v4865_v3 = vmul.f32 %v4765_v10, %v4465_v49  ;;  %v4572_v15 = vmul.f32 0.70710677, %v9938_v8  ;;  %v4247_v46 = vadd.f32 %v4246_v32, %v9885_v23  ;;  %v4469_v47 = vmul.f32 0.5, %v4235_v37 }
 0x4eb   : > { %v4866_v43 = vmul.f32 %v4766_v4, %v4466_v21  ;;  %7275 = verf.f32 %v4571_v36  ;;  %v4573_v35 = vmul.f32 0.70710677, %v4245_v38  ;;  %v4468_v32 = vmul.f32 0.5, %v9928_v6 }
 0x4ec   : > { %7277 = verf.f32 %v4572_v15  ;;  %v4961_v50 = vpack.c.bf16 %v4865_v3, %v4863_v29  ;;  %v4574_v16 = vmul.f32 0.70710677, %v4247_v46  ;;  %v4470_v29 = vmul.f32 0.5, %v4237_v41 }
 0x4ed   : > { %v7268_v62 = vpop.eup %7267  ;;  %v4962_v39 = vpack.c.bf16 %v4866_v43, %v4864_v14  ;;  %7279 = verf.f32 %v4573_v35 }
 0x4ee   : > { %v7270_v20 = vpop.eup %7269  ;;  %v4767_v33 = vadd.f32 1.0, %v7268_v62  ;;  %v4250_v11 = vpop.f32.mrb[220].mxu0  ;;  %7281 = verf.f32 %v4574_v16 }
 0x4ef   : > { %v7272_v61 = vpop.eup %7271  ;;  %v9947_v27 = vadd.f32 %v4250_v11, %v9880_v44  ;;  %v4252_v49 = vpop.f32.mrb[221].mxu0  ;;  %5184 = vmatprep.mubr.bf16.mxu1 %v4962_v39  ;;  %v4768_v10 = vadd.f32 1.0, %v7270_v20 }
 0x4f0   : > { %v4769_v28 = vadd.f32 1.0, %v7272_v61  ;;  %v9950_v21 = vadd.f32 %v4252_v49, %v9885_v23  ;;  %v4254_v4 = vpop.f32.mrb[222].mxu0  ;;  %v7274_v36 = vpop.eup %7273  ;;  %5185 = vmatmul.mubr.bf16.gmra.mrb[208].mxu1 %v4961_v50  ;;  %v4867_v14 = vmul.f32 %v4767_v33, %v4467_v24 }
 0x4f1   : > { %v4575_v3 = vmul.f32 0.70710677, %v9947_v27  ;;  %v4255_v58 = vadd.f32 %v4254_v4, %v9880_v44  ;;  %v4256_v15 = vpop.f32.mrb[223].mxu0  ;;  %v4770_v35 = vadd.f32 1.0, %v7274_v36  ;;  %v4868_v39 = vmul.f32 %v4768_v10, %v4468_v32 }
 0x4f2   : > { %v4869_v43 = vmul.f32 %v4769_v28, %v4469_v47  ;;  %v4576_v37 = vmul.f32 0.70710677, %v9950_v21  ;;  %v4257_v16 = vadd.f32 %v4256_v15, %v9885_v23  ;;  %v4471_v28 = vmul.f32 0.5, %v9935_v22 }
 0x4f3   : > { %7283 = verf.f32 %v4575_v3  ;;  %v4577_v62 = vmul.f32 0.70710677, %v4255_v58  ;;  %v4870_v20 = vmul.f32 %v4770_v35, %v4470_v29  ;;  %v4472_v3 = vmul.f32 0.5, %v9938_v8 }
 0x4f4   : > { %7285 = verf.f32 %v4576_v37  ;;  %v4963_v6 = vpack.c.bf16 %v4869_v43, %v4867_v14  ;;  %v4578_v11 = vmul.f32 0.70710677, %v4257_v16  ;;  %v4473_v15 = vmul.f32 0.5, %v4245_v38 }
 0x4f5   : > { %v7276_v41 = vpop.eup %7275  ;;  %7287 = verf.f32 %v4577_v62  ;;  %v4964_v50 = vpack.c.bf16 %v4870_v20, %v4868_v39  ;;  %v4474_v37 = vmul.f32 0.5, %v4247_v46 }
 0x4f6   : > { %v7278_v61 = vpop.eup %7277  ;;  %v4260_v49 = vpop.f32.mrb[224].mxu0  ;;  %v4771_v4 = vadd.f32 1.0, %v7276_v41  ;;  %7289 = verf.f32 %v4578_v11 }
 0x4f7   : > { %v9958_v33 = vadd.f32 %v4260_v49, %v9880_v44  ;;  %v4262_v24 = vpop.f32.mrb[225].mxu0  ;;  %v7280_v47 = vpop.eup %7279  ;;  %v4772_v36 = vadd.f32 1.0, %v7278_v61  ;;  %5192 = vmatprep.mubr.bf16.mxu1 %v4964_v50 }
 0x4f8   : > { %v9962_v10 = vadd.f32 %v4262_v24, %v9885_v23  ;;  %v4264_v32 = vpop.f32.mrb[226].mxu0  ;;  %v7282_v29 = vpop.eup %7281  ;;  %v4773_v14 = vadd.f32 1.0, %v7280_v47  ;;  %5193 = vmatmul.mubr.bf16.gmra.mrb[212].mxu1 %v4963_v6  ;;  %v4871_v20 = vmul.f32 %v4771_v4, %v4471_v28  ;;  %v4475_v28 = vmul.f32 0.5, %v9947_v27 }
 0x4f9   : > { %v4579_v43 = vmul.f32 0.70710677, %v9958_v33  ;;  %v4266_v35 = vpop.f32.mrb[227].mxu0  ;;  %v4774_v62 = vadd.f32 1.0, %v7282_v29  ;;  %v9968_v22 = vadd.f32 %v4264_v32, %v9880_v44  ;;  %v4872_v8 = vmul.f32 %v4772_v36, %v4472_v3 }
 0x4fa   : > { %v4580_v39 = vmul.f32 0.70710677, %v9962_v10  ;;  %v4873_v41 = vmul.f32 %v4773_v14, %v4473_v15  ;;  %v9971_v11 = vadd.f32 %v4266_v35, %v9885_v23  ;;  %v4477_v15 = vmul.f32 0.5, %v4255_v58 }
 0x4fb   : > { %7291 = verf.f32 %v4579_v43  ;;  %v4874_v38 = vmul.f32 %v4774_v62, %v4474_v37  ;;  %v4581_v61 = vmul.f32 0.70710677, %v9968_v22  ;;  %v4476_v62 = vmul.f32 0.5, %v9950_v21 }
 0x4fc   : > { %7293 = verf.f32 %v4580_v39  ;;  %v4582_v46 = vmul.f32 0.70710677, %v9971_v11  ;;  %v4965_v49 = vpack.c.bf16 %v4873_v41, %v4871_v20  ;;  %v4478_v39 = vmul.f32 0.5, %v4257_v16 }
 0x4fd   : > { %v7284_v6 = vpop.eup %7283  ;;  %7295 = verf.f32 %v4581_v61  ;;  %v4966_v32 = vpack.c.bf16 %v4874_v38, %v4872_v8 }
 0x4fe   : > { %v7286_v50 = vpop.eup %7285  ;;  %v4775_v24 = vadd.f32 1.0, %v7284_v6  ;;  %v4270_v47 = vpop.f32.mrb[228].mxu0  ;;  %7297 = verf.f32 %v4582_v46 }
 0x4ff   : > { %v7288_v4 = vpop.eup %7287  ;;  %v9977_v29 = vadd.f32 %v4270_v47, %v9880_v44  ;;  %v4272_v36 = vpop.f32.mrb[229].mxu0  ;;  %v4776_v3 = vadd.f32 1.0, %v7286_v50  ;;  %5200 = vmatprep.mubr.bf16.mxu1 %v4966_v32 }
 0x500   : > { %v4777_v14 = vadd.f32 1.0, %v7288_v4  ;;  %v9980_v43 = vadd.f32 %v4272_v36, %v9885_v23  ;;  %v4274_v35 = vpop.f32.mrb[230].mxu0  ;;  %v7290_v37 = vpop.eup %7289  ;;  %5201 = vmatmul.mubr.bf16.gmra.mrb[216].mxu1 %v4965_v49  ;;  %v4875_v8 = vmul.f32 %v4775_v24, %v4475_v28 }
 0x501   : > { %v4583_v20 = vmul.f32 0.70710677, %v9977_v29  ;;  %v4275_v27 = vadd.f32 %v4274_v35, %v9880_v44  ;;  %v4276_v41 = vpop.f32.mrb[231].mxu0  ;;  %v4778_v61 = vadd.f32 1.0, %v7290_v37  ;;  %v4876_v50 = vmul.f32 %v4776_v3, %v4476_v62 }
 0x502   : > { %v4877_v38 = vmul.f32 %v4777_v14, %v4477_v15  ;;  %v4584_v58 = vmul.f32 0.70710677, %v9980_v43  ;;  %v4277_v46 = vadd.f32 %v4276_v41, %v9885_v23  ;;  %v4479_v14 = vmul.f32 0.5, %v9958_v33 }
 0x503   : > { %7299 = verf.f32 %v4583_v20  ;;  %v4585_v6 = vmul.f32 0.70710677, %v4275_v27  ;;  %v4878_v47 = vmul.f32 %v4778_v61, %v4478_v39  ;;  %v4480_v20 = vmul.f32 0.5, %v9962_v10 }
 0x504   : > { %7301 = verf.f32 %v4584_v58  ;;  %v4967_v21 = vpack.c.bf16 %v4877_v38, %v4875_v8  ;;  %v4586_v32 = vmul.f32 0.70710677, %v4277_v46  ;;  %v4481_v41 = vmul.f32 0.5, %v9968_v22 }
 0x505   : > { %v7292_v16 = vpop.eup %7291  ;;  %7303 = verf.f32 %v4585_v6  ;;  %v4968_v49 = vpack.c.bf16 %v4878_v47, %v4876_v50  ;;  %v4482_v58 = vmul.f32 0.5, %v9971_v11 }
 0x506   : > { %v7294_v4 = vpop.eup %7293  ;;  %v4280_v36 = vpop.f32.mrb[232].mxu0  ;;  %v4779_v35 = vadd.f32 1.0, %v7292_v16  ;;  %7305 = verf.f32 %v4586_v32 }
 0x507   : > { %v9988_v24 = vadd.f32 %v4280_v36, %v9880_v44  ;;  %v4282_v28 = vpop.f32.mrb[233].mxu0  ;;  %v7296_v15 = vpop.eup %7295  ;;  %v4780_v37 = vadd.f32 1.0, %v7294_v4  ;;  %5208 = vmatprep.mubr.bf16.mxu1 %v4968_v49 }
 0x508   : > { %v9992_v3 = vadd.f32 %v4282_v28, %v9885_v23  ;;  %v4284_v62 = vpop.f32.mrb[234].mxu0  ;;  %v7298_v39 = vpop.eup %7297  ;;  %v4781_v8 = vadd.f32 1.0, %v7296_v15  ;;  %5209 = vmatmul.mubr.bf16.gmra.mrb[220].mxu1 %v4967_v21  ;;  %v4879_v47 = vmul.f32 %v4779_v35, %v4479_v14 }
 0x509   : > { %v4587_v38 = vmul.f32 0.70710677, %v9988_v24  ;;  %v4286_v61 = vpop.f32.mrb[235].mxu0  ;;  %v4782_v6 = vadd.f32 1.0, %v7298_v39  ;;  %v10000_v50 = vadd.f32 %v4284_v62, %v9880_v44  ;;  %v4880_v22 = vmul.f32 %v4780_v37, %v4480_v20 }
 0x50a   : > { %v4588_v33 = vmul.f32 0.70710677, %v9992_v3  ;;  %v4881_v16 = vmul.f32 %v4781_v8, %v4481_v41  ;;  %v10003_v10 = vadd.f32 %v4286_v61, %v9885_v23  ;;  %v4483_v20 = vmul.f32 0.5, %v9977_v29 }
 0x50b   : > { %7307 = verf.f32 %v4587_v38  ;;  %v4882_v32 = vmul.f32 %v4782_v6, %v4482_v58  ;;  %v4589_v21 = vmul.f32 0.70710677, %v10000_v50  ;;  %v4485_v41 = vmul.f32 0.5, %v4275_v27 }
 0x50c   : > { %7309 = verf.f32 %v4588_v33  ;;  %v4590_v11 = vmul.f32 0.70710677, %v10003_v10  ;;  %v4969_v36 = vpack.c.bf16 %v4881_v16, %v4879_v47  ;;  %v4484_v6 = vmul.f32 0.5, %v9980_v43 }
 0x50d   : > { %v7300_v4 = vpop.eup %7299  ;;  %7311 = verf.f32 %v4589_v21  ;;  %v4970_v62 = vpack.c.bf16 %v4882_v32, %v4880_v22  ;;  %v4486_v33 = vmul.f32 0.5, %v4277_v46 }
 0x50e   : > { %v7302_v49 = vpop.eup %7301  ;;  %v4783_v28 = vadd.f32 1.0, %v7300_v4  ;;  %v4290_v15 = vpop.f32.mrb[236].mxu0  ;;  %7313 = verf.f32 %v4590_v11 }
 0x50f   : > { %v7304_v35 = vpop.eup %7303  ;;  %v4784_v14 = vadd.f32 1.0, %v7302_v49  ;;  %v10008_v39 = vadd.f32 %v4290_v15, %v9880_v44  ;;  %v4292_v37 = vpop.f32.mrb[237].mxu0  ;;  %5216 = vmatprep.mubr.bf16.mxu1 %v4970_v62 }
 0x510   : > { %v4785_v8 = vadd.f32 1.0, %v7304_v35  ;;  %v10012_v38 = vadd.f32 %v4292_v37, %v9885_v23  ;;  %v4294_v61 = vpop.f32.mrb[238].mxu0  ;;  %v7306_v58 = vpop.eup %7305  ;;  %5217 = vmatmul.mubr.bf16.gmra.mrb[224].mxu1 %v4969_v36  ;;  %v4883_v29 = vmul.f32 %v4783_v28, %v4483_v20 }
 0x511   : > { %v4591_v47 = vmul.f32 0.70710677, %v10008_v39  ;;  %v10017_v16 = vadd.f32 %v4294_v61, %v9880_v44  ;;  %v4296_v22 = vpop.f32.mrb[239].mxu0  ;;  %v3676_v32 = vpop.xlane.xlu0 %3675  ;;  %v4786_v21 = vadd.f32 1.0, %v7306_v58  ;;  %v4884_v11 = vmul.f32 %v4784_v14, %v4484_v6 }
 0x512   : > { %v4885_v27 = vmul.f32 %v4785_v8, %v4485_v41  ;;  %v4592_v4 = vmul.f32 0.70710677, %v10012_v38  ;;  %v10022_v43 = vadd.f32 %v4296_v22, %v9885_v23  ;;  %v3744_v15 = vmul.f32 0.015625, %v3676_v32 }
 0x513   : > { %7315 = verf.f32 %v4591_v47  ;;  %v4593_v49 = vmul.f32 0.70710677, %v10017_v16  ;;  %v4886_v46 = vmul.f32 %v4786_v21, %v4486_v33  ;;  %v4487_v61 = vmul.f32 0.5, %v9988_v24 }
 0x514   : > { %7317 = verf.f32 %v4592_v4  ;;  %v4971_v62 = vpack.c.bf16 %v4885_v27, %v4883_v29  ;;  %v4594_v36 = vmul.f32 0.70710677, %v10022_v43  ;;  %v3794_v20 = vadd.f32 1e-12, %v3744_v15 }
 0x515   : > { %v7308_v35 = vpop.eup %7307  ;;  %7319 = verf.f32 %v4593_v49  ;;  %v3679_v28 = vpop.xlane.xlu1 %3678  ;;  %v4972_v14 = vpack.c.bf16 %v4886_v46, %v4884_v11  ;;  %v4488_v58 = vmul.f32 0.5, %v9992_v3  ;;  %v4489_v24 = vmul.f32 0.5, %v10000_v50 }
 0x516   : > { %v7310_v37 = vpop.eup %7309  ;;  %v3745_v41 = vmul.f32 0.015625, %v3679_v28  ;;  %v4300_v8 = vpop.f32.mrb[240].mxu0  ;;  %7321 = verf.f32 %v4594_v36  ;;  %v4787_v4 = vadd.f32 1.0, %v7308_v35  ;;  %v4490_v15 = vmul.f32 0.5, %v10003_v10 }
 0x517   : > { %v10028_v6 = vadd.f32 %v4300_v8, %v9880_v44  ;;  %v4302_v33 = vpop.f32.mrb[241].mxu0  ;;  %v7312_v47 = vpop.eup %7311  ;;  %v4788_v22 = vadd.f32 1.0, %v7310_v37  ;;  %7323 = vrsqrt.f32 %v3794_v20  ;;  %5224 = vmatprep.mubr.bf16.mxu1 %v4972_v14 }
 0x518   : > { %v3795_v32 = vadd.f32 1e-12, %v3745_v41  ;;  %v10031_v29 = vadd.f32 %v4302_v33, %v9885_v23  ;;  %v4304_v27 = vpop.f32.mrb[242].mxu0  ;;  %v7314_v21 = vpop.eup %7313  ;;  %v4789_v11 = vadd.f32 1.0, %v7312_v47  ;;  %5225 = vmatmul.mubr.bf16.gmra.mrb[228].mxu1 %v4971_v62  ;;  %v4887_v14 = vmul.f32 %v4787_v4, %v4487_v61 }
 0x519   : > { %v4595_v3 = vmul.f32 0.70710677, %v10028_v6  ;;  %v4306_v49 = vpop.f32.mrb[243].mxu0  ;;  %v3682_v46 = vpop.xlane.xlu0 %3681  ;;  %v4790_v36 = vadd.f32 1.0, %v7314_v21  ;;  %v10038_v20 = vadd.f32 %v4304_v27, %v9880_v44  ;;  %v4888_v50 = vmul.f32 %v4788_v22, %v4488_v58 }
 0x51a   : > { %7325 = vrsqrt.f32 %v3795_v32  ;;  %v4596_v28 = vmul.f32 0.70710677, %v10031_v29  ;;  %v4889_v37 = vmul.f32 %v4789_v11, %v4489_v24  ;;  %v10041_v35 = vadd.f32 %v4306_v49, %v9885_v23 }
 0x51b   : > { %7327 = verf.f32 %v4595_v3  ;;  %v4890_v41 = vmul.f32 %v4790_v36, %v4490_v15  ;;  %v3746_v62 = vmul.f32 0.015625, %v3682_v46  ;;  %v4597_v10 = vmul.f32 0.70710677, %v10038_v20 }
 0x51c   : > { %7329 = verf.f32 %v4596_v28  ;;  %v4598_v33 = vmul.f32 0.70710677, %v10041_v35  ;;  %v4491_v49 = vmul.f32 0.5, %v10008_v39  ;;  %v4493_v58 = vmul.f32 0.5, %v10017_v16 }
 0x51d   : > { %v7316_v8 = vpop.eup %7315  ;;  %v3685_v47 = vpop.xlane.xlu1 %3684  ;;  %v3796_v24 = vadd.f32 1e-12, %v3746_v62  ;;  %v4974_v27 = vpack.c.bf16 %v4890_v41, %v4888_v50  ;;  %7331 = verf.f32 %v4597_v10  ;;  %v4973_v22 = vpack.c.bf16 %v4889_v37, %v4887_v14 }
 0x51e   : > { %v7318_v32 = vpop.eup %7317  ;;  %v4791_v21 = vadd.f32 1.0, %v7316_v8  ;;  %v3747_v11 = vmul.f32 0.015625, %v3685_v47  ;;  %7333 = verf.f32 %v4598_v33  ;;  %v4492_v36 = vmul.f32 0.5, %v10012_v38 }
 0x51f   : > { %v7320_v3 = vpop.eup %7319  ;;  %v4792_v46 = vadd.f32 1.0, %v7318_v32  ;;  %5232 = vmatprep.mubr.bf16.mxu1 %v4974_v27  ;;  %v4494_v28 = vmul.f32 0.5, %v10022_v43  ;;  %7335 = vrsqrt.f32 %v3796_v24 }
 0x520   : > { %v4793_v15 = vadd.f32 1.0, %v7320_v3  ;;  %v3797_v61 = vadd.f32 1e-12, %v3747_v11  ;;  %v7322_v4 = vpop.eup %7321  ;;  %5233 = vmatmul.mubr.bf16.gmra.mrb[232].mxu1 %v4973_v22  ;;  %v4891_v41 = vmul.f32 %v4791_v21, %v4491_v49 }
 0x521   : > { %v7324_v50 = vpop.eup %7323  ;;  %v4794_v39 = vadd.f32 1.0, %v7322_v4  ;;  %v4892_v10 = vmul.f32 %v4792_v46, %v4492_v36  ;;  %v4496_v36 = vmul.f32 0.5, %v10031_v29 }
 0x522   : > { %v4893_v62 = vmul.f32 %v4793_v15, %v4493_v58  ;;  %7337 = vrsqrt.f32 %v3797_v61  ;;  %v3688_v16 = vpop.xlane.xlu0 %3687  ;;  %v3894_v37 = vmul.f32 %v7324_v50, %v9697_v5 }
 0x523   : > { %v3748_v8 = vmul.f32 0.015625, %v3688_v16  ;;  %v4894_v33 = vmul.f32 %v4794_v39, %v4494_v28  ;;  %v4497_v28 = vmul.f32 0.5, %v10038_v20  ;;  %v4498_v16 = vmul.f32 0.5, %v10041_v35 }
 0x524   : > { %v7326_v14 = vpop.eup %7325  ;;  %v4975_v47 = vpack.c.bf16 %v4893_v62, %v4891_v41  ;;  %v3950_v38 = vmul.f32 %v9818_v53, %v3894_v37 }
 0x525   : > { %v7328_v32 = vpop.eup %7327  ;;  %v3895_v43 = vmul.f32 %v7326_v14, %v9702_v34  ;;  %v3798_v24 = vadd.f32 1e-12, %v3748_v8  ;;  %v3691_v11 = vpop.xlane.xlu1 %3690  ;;  %v4976_v3 = vpack.c.bf16 %v4894_v33, %v4892_v10  ;;  %v4495_v34 = vmul.f32 0.5, %v10028_v6 }
 0x526   : > { %v7330_v27 = vpop.eup %7329  ;;  %v3749_v21 = vmul.f32 0.015625, %v3691_v11  ;;  %v4795_v58 = vadd.f32 1.0, %v7328_v32  ;;  %v10054_v46 = vadd.f32 %v9838_v7, %v3950_v38 }
 0x527   : > { %v3951_v49 = vmul.f32 %v9818_v53, %v3895_v43  ;;  %7339 = vrsqrt.f32 %v3798_v24  ;;  %5240 = vmatprep.mubr.bf16.mxu1 %v4976_v3  ;;  %v7332_v22 = vpop.eup %7331  ;;  %v4796_v61 = vadd.f32 1.0, %v7330_v27 }
 0x528   : > { %v3799_v5 = vadd.f32 1e-12, %v3749_v21  ;;  %5241 = vmatmul.mubr.bf16.gmra.mrb[236].mxu1 %v4975_v47  ;;  %v7334_v4 = vpop.eup %7333  ;;  %v4797_v50 = vadd.f32 1.0, %v7332_v22  ;;  %v4895_v6 = vmul.f32 %v4795_v58, %v4495_v34 }
 0x529   : > { %v10057_v15 = vadd.f32 %v9838_v7, %v3951_v49  ;;  %v7336_v62 = vpop.eup %7335  ;;  %v4798_v37 = vadd.f32 1.0, %v7334_v4  ;;  %v4896_v47 = vmul.f32 %v4796_v61, %v4496_v36 }
 0x52a   : > { %7341 = vrsqrt.f32 %v3799_v5  ;;  %v3694_v41 = vpop.xlane.xlu0 %3693  ;;  %v4897_v10 = vmul.f32 %v4797_v50, %v4497_v28  ;;  %v3896_v33 = vmul.f32 %v7336_v62, %v9708_v25 }
 0x52b   : > { %v4036_v39 = vpack.c.bf16 %v10057_v15, %v10054_v46  ;;  %v3750_v8 = vmul.f32 0.015625, %v3694_v41  ;;  %v4898_v29 = vmul.f32 %v4798_v37, %v4498_v16 }
 0x52c   : > { %v7338_v14 = vpop.eup %7337  ;;  %v3952_v43 = vmul.f32 %v9818_v53, %v3896_v33  ;;  %v4977_v11 = vpack.c.bf16 %v4897_v10, %v4895_v6 }
 0x52d   : > { %v3897_v20 = vmul.f32 %v7338_v14, %v9715_v12  ;;  %v3800_v32 = vadd.f32 1e-12, %v3750_v8  ;;  %v3697_v38 = vpop.xlane.xlu1 %3696  ;;  %6614 = vmatmul.mubr.msk.bf16.gmra.mrb[28].mxu0 %vm3252_vm2, %v4036_v39  ;;  %v4978_v27 = vpack.c.bf16 %v4898_v29, %v4896_v47 }
 0x52e   : > { %v3751_v24 = vmul.f32 0.015625, %v3697_v38  ;;  %4418 = vmatprep.mubr.bf16.mxu0 %v11328_v52  ;;  %v10072_v3 = vadd.f32 %v9838_v7, %v3952_v43 }
 0x52f   : > { %v3953_v35 = vmul.f32 %v9818_v53, %v3897_v20  ;;  %7343 = vrsqrt.f32 %v3800_v32  ;;  %5248 = vmatprep.mubr.bf16.mxu1 %v4978_v27 }
 0x530   : > { %v3801_v21 = vadd.f32 1e-12, %v3751_v24  ;;  %5249 = vmatmul.mubr.bf16.gmra.mrb[240].mxu1 %v4977_v11 }
 0x531   : > { %v7340_v25 = vpop.eup %7339  ;;  %v10075_v12 = vadd.f32 %v9838_v7, %v3953_v35 }
 0x532   : > { %v3898_v49 = vmul.f32 %v7340_v25, %v9725_v17  ;;  %7345 = vrsqrt.f32 %v3801_v21  ;;  %v3700_v58 = vpop.xlane.xlu0 %3699  ;;  %v7623_v17 = vld [vmem:[%s11272_s7] ss:$0 sm:$0xff] }
 0x533   : > { %v4037_v5 = vpack.c.bf16 %v10075_v12, %v10072_v3  ;;  %v3752_v22 = vmul.f32 0.015625, %v3700_v58 }
 0x534   : > { %v7342_v34 = vpop.eup %7341  ;;  %v3954_v61 = vmul.f32 %v9818_v53, %v3898_v49 }
 0x535   : > { %v3899_v4 = vmul.f32 %v7342_v34, %v9739_v0  ;;  %v3802_v36 = vadd.f32 1e-12, %v3752_v22  ;;  %v3703_v28 = vpop.xlane.xlu1 %3702  ;;  %6615 = vmatmul.mubr.msk.bf16.gmra.mrb[32].mxu0 %vm3252_vm2, %v4037_v5 }
 0x536   : > { %v3753_v50 = vmul.f32 0.015625, %v3703_v28  ;;  %4428 = vmatprep.mubr.bf16.mxu0 %v11328_v52  ;;  %v10088_v16 = vadd.f32 %v9838_v7, %v3954_v61 }
 0x537   : > { %v3955_v41 = vmul.f32 %v7623_v17, %v3899_v4  ;;  %7347 = vrsqrt.f32 %v3802_v36 }
 0x538   : > { %v3803_v62 = vadd.f32 1e-12, %v3753_v50 }
 0x539   : > { %v7344_v39 = vpop.eup %7343  ;;  %v10091_v0 = vadd.f32 %v9838_v7, %v3955_v41  ;;  %v7624_v7 = vld [vmem:[%s11273_s8] ss:$0 sm:$0xff] }
 0x53a   : > { %v3900_v53 = vmul.f32 %v7344_v39, %v9751_v42  ;;  %7349 = vrsqrt.f32 %v3803_v62 }
 0x53b   : > { %v4038_v37 = vpack.c.bf16 %v10091_v0, %v10088_v16 }
 0x53c   : > { %v7346_v8 = vpop.eup %7345  ;;  %v3956_v14 = vmul.f32 %v7623_v17, %v3900_v53 }
 0x53d   : > { %v3901_v6 = vmul.f32 %v7346_v8, %v9765_v51  ;;  %6616 = vmatmul.mubr.msk.bf16.gmra.mrb[36].mxu0 %vm3252_vm2, %v4038_v37 }
 0x53e   : > { %4438 = vmatprep.mubr.bf16.mxu0 %v11328_v52  ;;  %v10102_v47 = vadd.f32 %v7624_v7, %v3956_v14 }
 0x53f   : > { %v3957_v10 = vmul.f32 %v7623_v17, %v3901_v6 }
 0x541   : > { %v7348_v33 = vpop.eup %7347  ;;  %v10104_v42 = vadd.f32 %v7624_v7, %v3957_v10 }
 0x542   : > { %v3902_v29 = vmul.f32 %v7348_v33, %v9777_v18 }
 0x543   : > { %v4039_v20 = vpack.c.bf16 %v10104_v42, %v10102_v47 }
 0x544   : > { %v7350_v51 = vpop.eup %7349  ;;  %v3958_v32 = vmul.f32 %v7623_v17, %v3902_v29 }
 0x545   : > { %v3903_v38 = vmul.f32 %v7350_v51, %v9791_v60  ;;  %6617 = vmatmul.mubr.msk.bf16.gmra.mrb[40].mxu0 %vm3252_vm2, %v4039_v20 }
 0x546   : > { %4448 = vmatprep.mubr.bf16.mxu0 %v11328_v52  ;;  %v10112_v24 = vadd.f32 %v7624_v7, %v3958_v32 }
 0x547   : > { %v3959_v43 = vmul.f32 %v7623_v17, %v3903_v38 }
 0x549   : > { %v10114_v11 = vadd.f32 %v7624_v7, %v3959_v43 }
 0x54b   : > { %v4040_v35 = vpack.c.bf16 %v10114_v11, %v10112_v24 }
 0x54d   : > { %6618 = vmatmul.mubr.msk.bf16.gmra.mrb[44].mxu0 %vm3252_vm2, %v4040_v35 }
 0x567   : > { %v4310_v18 = vpop.f32.mrb[244].mxu0 }
 0x568   : > { %v4311_v27 = vadd.f32 %v4310_v18, %v9880_v44  ;;  %v4312_v21 = vpop.f32.mrb[245].mxu0 }
 0x569   : > { %v4313_v60 = vadd.f32 %v4312_v21, %v9885_v23  ;;  %v4314_v25 = vpop.f32.mrb[246].mxu0 }
 0x56a   : > { %v4599_v49 = vmul.f32 0.70710677, %v4311_v27  ;;  %v4315_v52 = vadd.f32 %v4314_v25, %v9880_v44  ;;  %v4316_v58 = vpop.f32.mrb[247].mxu0  ;;  %v4499_v43 = vmul.f32 0.5, %v4311_v27 }
 0x56b   : > { %v4600_v5 = vmul.f32 0.70710677, %v4313_v60  ;;  %v4317_v22 = vadd.f32 %v4316_v58, %v9885_v23 }
 0x56c   : > { %7351 = verf.f32 %v4599_v49  ;;  %v4601_v34 = vmul.f32 0.70710677, %v4315_v52  ;;  %v4501_v35 = vmul.f32 0.5, %v4315_v52  ;;  %v4500_v49 = vmul.f32 0.5, %v4313_v60 }
 0x56d   : > { %7353 = verf.f32 %v4600_v5  ;;  %v4602_v61 = vmul.f32 0.70710677, %v4317_v22  ;;  %v4502_v58 = vmul.f32 0.5, %v4317_v22 }
 0x56e   : > { %7355 = verf.f32 %v4601_v34 }
 0x56f   : > { %7357 = verf.f32 %v4602_v61  ;;  %v4320_v4 = vpop.f32.mrb[248].mxu0 }
 0x570   : > { %v4321_v36 = vadd.f32 %v4320_v4, %v9880_v44  ;;  %v4322_v28 = vpop.f32.mrb[249].mxu0 }
 0x571   : > { %v4323_v50 = vadd.f32 %v4322_v28, %v9885_v23  ;;  %v4324_v17 = vpop.f32.mrb[250].mxu0 }
 0x572   : > { %v4603_v41 = vmul.f32 0.70710677, %v4321_v36  ;;  %v4325_v62 = vadd.f32 %v4324_v17, %v9880_v44  ;;  %v4326_v39 = vpop.f32.mrb[251].mxu0 }
 0x573   : > { %v4604_v53 = vmul.f32 0.70710677, %v4323_v50  ;;  %v4327_v37 = vadd.f32 %v4326_v39, %v9885_v23 }
 0x574   : > { %7359 = verf.f32 %v4603_v41  ;;  %v4605_v8 = vmul.f32 0.70710677, %v4325_v62 }
 0x575   : > { %7361 = verf.f32 %v4604_v53  ;;  %v4606_v14 = vmul.f32 0.70710677, %v4327_v37 }
 0x576   : > { %v7352_v6 = vpop.eup %7351  ;;  %7363 = verf.f32 %v4605_v8 }
 0x577   : > { %v7354_v10 = vpop.eup %7353  ;;  %v4799_v33 = vadd.f32 1.0, %v7352_v6  ;;  %7365 = verf.f32 %v4606_v14  ;;  %v4330_v7 = vpop.f32.mrb[252].mxu0 }
 0x578   : > { %v7356_v29 = vpop.eup %7355  ;;  %v4800_v20 = vadd.f32 1.0, %v7354_v10  ;;  %v10128_v51 = vadd.f32 %v4330_v7, %v9880_v44  ;;  %v4332_v32 = vpop.f32.mrb[253].mxu0 }
 0x579   : > { %v7358_v38 = vpop.eup %7357  ;;  %v4801_v18 = vadd.f32 1.0, %v7356_v29  ;;  %v10131_v21 = vadd.f32 %v4332_v32, %v9885_v23  ;;  %v4334_v25 = vpop.f32.mrb[254].mxu0  ;;  %v4899_v4 = vmul.f32 %v4799_v33, %v4499_v43  ;;  %v4503_v43 = vmul.f32 0.5, %v4321_v36 }
 0x57a   : > { %v4802_v5 = vadd.f32 1.0, %v7358_v38  ;;  %v4607_v34 = vmul.f32 0.70710677, %v10128_v51  ;;  %v4336_v61 = vpop.f32.mrb[255].mxu0  ;;  %v4335_v41 = vadd.f32 %v4334_v25, %v9880_v44  ;;  %v4900_v39 = vmul.f32 %v4800_v20, %v4500_v49 }
 0x57b   : > { %v4901_v28 = vmul.f32 %v4801_v18, %v4501_v35  ;;  %v4608_v17 = vmul.f32 0.70710677, %v10131_v21  ;;  %v4337_v52 = vadd.f32 %v4336_v61, %v9885_v23  ;;  %v4505_v35 = vmul.f32 0.5, %v4325_v62 }
 0x57c   : > { %v4902_v27 = vmul.f32 %v4802_v5, %v4502_v58  ;;  %7367 = verf.f32 %v4607_v34  ;;  %v4609_v53 = vmul.f32 0.70710677, %v4335_v41  ;;  %v4504_v58 = vmul.f32 0.5, %v4323_v50 }
 0x57d   : > { %7369 = verf.f32 %v4608_v17  ;;  %v4979_v8 = vpack.c.bf16 %v4901_v28, %v4899_v4  ;;  %v4610_v22 = vmul.f32 0.70710677, %v4337_v52  ;;  %v4506_v5 = vmul.f32 0.5, %v4327_v37 }
 0x57e   : > { %v7360_v60 = vpop.eup %7359  ;;  %v4980_v14 = vpack.c.bf16 %v4902_v27, %v4900_v39  ;;  %7371 = verf.f32 %v4609_v53 }
 0x57f   : > { %v7362_v6 = vpop.eup %7361  ;;  %v4803_v10 = vadd.f32 1.0, %v7360_v60  ;;  %v4340_v33 = vpop.f32.mrb[0].mxu0  ;;  %7373 = verf.f32 %v4610_v22 }
 0x580   : > { %v7364_v7 = vpop.eup %7363  ;;  %v4804_v29 = vadd.f32 1.0, %v7362_v6  ;;  %v10138_v32 = vadd.f32 %v4340_v33, %v9880_v44  ;;  %v4342_v20 = vpop.f32.mrb[1].mxu0  ;;  %5256 = vmatprep.mubr.bf16.mxu1 %v4980_v14 }
 0x581   : > { %v7366_v38 = vpop.eup %7365  ;;  %v4805_v18 = vadd.f32 1.0, %v7364_v7  ;;  %v10141_v25 = vadd.f32 %v4342_v20, %v9885_v23  ;;  %v4344_v49 = vpop.f32.mrb[2].mxu0  ;;  %5257 = vmatmul.mubr.bf16.gmra.mrb[244].mxu1 %v4979_v8  ;;  %v4903_v28 = vmul.f32 %v4803_v10, %v4503_v43  ;;  %v4507_v20 = vmul.f32 0.5, %v10128_v51 }
 0x582   : > { %v4806_v34 = vadd.f32 1.0, %v7366_v38  ;;  %v4611_v61 = vmul.f32 0.70710677, %v10138_v32  ;;  %v4346_v4 = vpop.f32.mrb[3].mxu0  ;;  %v4345_v27 = vadd.f32 %v4344_v49, %v9880_v44  ;;  %v4904_v36 = vmul.f32 %v4804_v29, %v4504_v58 }
 0x583   : > { %v4905_v17 = vmul.f32 %v4805_v18, %v4505_v35  ;;  %v4612_v39 = vmul.f32 0.70710677, %v10141_v25  ;;  %v4347_v53 = vadd.f32 %v4346_v4, %v9885_v23  ;;  %v4508_v49 = vmul.f32 0.5, %v10131_v21 }
 0x584   : > { %v4906_v62 = vmul.f32 %v4806_v34, %v4506_v5  ;;  %7375 = verf.f32 %v4611_v61  ;;  %v4613_v60 = vmul.f32 0.70710677, %v4345_v27  ;;  %v4509_v58 = vmul.f32 0.5, %v4335_v41 }
 0x585   : > { %7377 = verf.f32 %v4612_v39  ;;  %v4981_v8 = vpack.c.bf16 %v4905_v17, %v4903_v28  ;;  %v4614_v37 = vmul.f32 0.70710677, %v4347_v53  ;;  %v4510_v4 = vmul.f32 0.5, %v4337_v52 }
 0x586   : > { %v7368_v50 = vpop.eup %7367  ;;  %v4982_v22 = vpack.c.bf16 %v4906_v62, %v4904_v36  ;;  %7379 = verf.f32 %v4613_v60 }
 0x587   : > { %v7370_v14 = vpop.eup %7369  ;;  %v4350_v6 = vpop.f32.mrb[4].mxu0  ;;  %v4807_v10 = vadd.f32 1.0, %v7368_v50  ;;  %7381 = verf.f32 %v4614_v37 }
 0x588   : > { %v10148_v33 = vadd.f32 %v4350_v6, %v9880_v44  ;;  %v4352_v7 = vpop.f32.mrb[5].mxu0  ;;  %5264 = vmatprep.mubr.bf16.mxu1 %v4982_v22  ;;  %v7372_v29 = vpop.eup %7371  ;;  %v4808_v38 = vadd.f32 1.0, %v7370_v14 }
 0x589   : > { %v10152_v43 = vadd.f32 %v4352_v7, %v9885_v23  ;;  %v4354_v35 = vpop.f32.mrb[6].mxu0  ;;  %5265 = vmatmul.mubr.bf16.gmra.mrb[248].mxu1 %v4981_v8  ;;  %v7374_v18 = vpop.eup %7373  ;;  %v4809_v5 = vadd.f32 1.0, %v7372_v29  ;;  %v4907_v39 = vmul.f32 %v4807_v10, %v4507_v20  ;;  %v4511_v20 = vmul.f32 0.5, %v10138_v32 }
 0x58a   : > { %v4615_v34 = vmul.f32 0.70710677, %v10148_v33  ;;  %v4356_v61 = vpop.f32.mrb[7].mxu0  ;;  %v4810_v28 = vadd.f32 1.0, %v7374_v18  ;;  %v10158_v51 = vadd.f32 %v4354_v35, %v9880_v44  ;;  %v4908_v60 = vmul.f32 %v4808_v38, %v4508_v49 }
 0x58b   : > { %v4616_v17 = vmul.f32 0.70710677, %v10152_v43  ;;  %v4909_v36 = vmul.f32 %v4809_v5, %v4509_v58  ;;  %v10161_v62 = vadd.f32 %v4356_v61, %v9885_v23  ;;  %v4512_v58 = vmul.f32 0.5, %v10141_v25 }
 0x58c   : > { %7383 = verf.f32 %v4615_v34  ;;  %v4910_v21 = vmul.f32 %v4810_v28, %v4510_v4  ;;  %v4617_v41 = vmul.f32 0.70710677, %v10158_v51  ;;  %v4513_v5 = vmul.f32 0.5, %v4345_v27 }
 0x58d   : > { %7385 = verf.f32 %v4616_v17  ;;  %v4618_v52 = vmul.f32 0.70710677, %v10161_v62  ;;  %v4983_v50 = vpack.c.bf16 %v4909_v36, %v4907_v39  ;;  %v4514_v28 = vmul.f32 0.5, %v4347_v53 }
 0x58e   : > { %v7376_v8 = vpop.eup %7375  ;;  %7387 = verf.f32 %v4617_v41  ;;  %v4984_v14 = vpack.c.bf16 %v4910_v21, %v4908_v60 }
 0x58f   : > { %v7378_v37 = vpop.eup %7377  ;;  %v4360_v22 = vpop.f32.mrb[8].mxu0  ;;  %v4811_v6 = vadd.f32 1.0, %v7376_v8  ;;  %7389 = verf.f32 %v4618_v52 }
 0x590   : > { %v10166_v10 = vadd.f32 %v4360_v22, %v9880_v44  ;;  %v4362_v7 = vpop.f32.mrb[9].mxu0  ;;  %v7380_v29 = vpop.eup %7379  ;;  %v4812_v38 = vadd.f32 1.0, %v7378_v37  ;;  %5272 = vmatprep.mubr.bf16.mxu1 %v4984_v14 }
 0x591   : > { %v10170_v35 = vadd.f32 %v4362_v7, %v9885_v23  ;;  %v4364_v18 = vpop.f32.mrb[10].mxu0  ;;  %v7382_v49 = vpop.eup %7381  ;;  %v4813_v34 = vadd.f32 1.0, %v7380_v29  ;;  %5273 = vmatmul.mubr.bf16.gmra.mrb[252].mxu1 %v4983_v50  ;;  %v4911_v36 = vmul.f32 %v4811_v6, %v4511_v20  ;;  %v4515_v20 = vmul.f32 0.5, %v10148_v33 }
 0x592   : > { %v4619_v61 = vmul.f32 0.70710677, %v10166_v10  ;;  %v4366_v4 = vpop.f32.mrb[11].mxu0  ;;  %v4814_v17 = vadd.f32 1.0, %v7382_v49  ;;  %v10176_v32 = vadd.f32 %v4364_v18, %v9880_v44  ;;  %v4912_v25 = vmul.f32 %v4812_v38, %v4512_v58 }
 0x593   : > { %v4620_v39 = vmul.f32 0.70710677, %v10170_v35  ;;  %v4913_v60 = vmul.f32 %v4813_v34, %v4513_v5  ;;  %v10179_v21 = vadd.f32 %v4366_v4, %v9885_v23  ;;  %v4516_v5 = vmul.f32 0.5, %v10152_v43 }
 0x594   : > { %7391 = verf.f32 %v4619_v61  ;;  %v4914_v27 = vmul.f32 %v4814_v17, %v4514_v28  ;;  %v4621_v41 = vmul.f32 0.70710677, %v10176_v32  ;;  %v4517_v34 = vmul.f32 0.5, %v10158_v51 }
 0x595   : > { %7393 = verf.f32 %v4620_v39  ;;  %v4985_v52 = vpack.c.bf16 %v4913_v60, %v4911_v36  ;;  %v4622_v53 = vmul.f32 0.70710677, %v10179_v21  ;;  %v4518_v17 = vmul.f32 0.5, %v10161_v62 }
 0x596   : > { %v7384_v8 = vpop.eup %7383  ;;  %7395 = verf.f32 %v4621_v41  ;;  %v4986_v22 = vpack.c.bf16 %v4914_v27, %v4912_v25 }
 0x597   : > { %v7386_v50 = vpop.eup %7385  ;;  %v4370_v37 = vpop.f32.mrb[12].mxu0  ;;  %v4815_v14 = vadd.f32 1.0, %v7384_v8  ;;  %7397 = verf.f32 %v4622_v53 }
 0x598   : > { %v10184_v6 = vadd.f32 %v4370_v37, %v9880_v44  ;;  %v4372_v7 = vpop.f32.mrb[13].mxu0  ;;  %v7388_v29 = vpop.eup %7387  ;;  %v4816_v38 = vadd.f32 1.0, %v7386_v50  ;;  %5280 = vmatprep.mubr.bf16.mxu1 %v4986_v22 }
 0x599   : > { %v10188_v18 = vadd.f32 %v4372_v7, %v9885_v23  ;;  %v4374_v49 = vpop.f32.mrb[14].mxu0  ;;  %v7390_v58 = vpop.eup %7389  ;;  %v4817_v61 = vadd.f32 1.0, %v7388_v29  ;;  %5281 = vmatmul.mubr.bf16.gmra.mrb[0].mxu1 %v4985_v52  ;;  %v4915_v60 = vmul.f32 %v4815_v14, %v4515_v20  ;;  %v4519_v20 = vmul.f32 0.5, %v10166_v10 }
 0x59a   : > { %v4623_v4 = vmul.f32 0.70710677, %v10184_v6  ;;  %v4376_v28 = vpop.f32.mrb[15].mxu0  ;;  %v4818_v39 = vadd.f32 1.0, %v7390_v58  ;;  %v10196_v36 = vadd.f32 %v4374_v49, %v9880_v44  ;;  %v4916_v51 = vmul.f32 %v4816_v38, %v4516_v5 }
 0x59b   : > { %v4624_v33 = vmul.f32 0.70710677, %v10188_v18  ;;  %v4917_v25 = vmul.f32 %v4817_v61, %v4517_v34  ;;  %v10199_v43 = vadd.f32 %v4376_v28, %v9885_v23  ;;  %v4520_v34 = vmul.f32 0.5, %v10170_v35 }
 0x59c   : > { %7399 = verf.f32 %v4623_v4  ;;  %v4918_v27 = vmul.f32 %v4818_v39, %v4518_v17  ;;  %v4625_v41 = vmul.f32 0.70710677, %v10196_v36  ;;  %v4521_v61 = vmul.f32 0.5, %v10176_v32 }
 0x59d   : > { %7401 = verf.f32 %v4624_v33  ;;  %v4987_v52 = vpack.c.bf16 %v4917_v25, %v4915_v60  ;;  %v4626_v62 = vmul.f32 0.70710677, %v10199_v43  ;;  %v4522_v39 = vmul.f32 0.5, %v10179_v21 }
 0x59e   : > { %v7392_v8 = vpop.eup %7391  ;;  %7403 = verf.f32 %v4625_v41  ;;  %v4988_v37 = vpack.c.bf16 %v4918_v27, %v4916_v51 }
 0x59f   : > { %v7394_v53 = vpop.eup %7393  ;;  %v4380_v50 = vpop.f32.mrb[16].mxu0  ;;  %v4819_v22 = vadd.f32 1.0, %v7392_v8  ;;  %7405 = verf.f32 %v4626_v62 }
 0x5a0   : > { %v10204_v14 = vadd.f32 %v4380_v50, %v9880_v44  ;;  %v4382_v7 = vpop.f32.mrb[17].mxu0  ;;  %v7396_v29 = vpop.eup %7395  ;;  %v4820_v38 = vadd.f32 1.0, %v7394_v53  ;;  %5288 = vmatprep.mubr.bf16.mxu1 %v4988_v37 }
 0x5a1   : > { %v10208_v49 = vadd.f32 %v4382_v7, %v9885_v23  ;;  %v4384_v58 = vpop.f32.mrb[18].mxu0  ;;  %v7398_v5 = vpop.eup %7397  ;;  %v4821_v4 = vadd.f32 1.0, %v7396_v29  ;;  %5289 = vmatmul.mubr.bf16.gmra.mrb[4].mxu1 %v4987_v52  ;;  %v4919_v25 = vmul.f32 %v4819_v22, %v4519_v20  ;;  %v4523_v20 = vmul.f32 0.5, %v10184_v6 }
 0x5a2   : > { %v4627_v28 = vmul.f32 0.70710677, %v10204_v14  ;;  %v4386_v17 = vpop.f32.mrb[19].mxu0  ;;  %v4822_v33 = vadd.f32 1.0, %v7398_v5  ;;  %v10216_v60 = vadd.f32 %v4384_v58, %v9880_v44  ;;  %v4920_v32 = vmul.f32 %v4820_v38, %v4520_v34 }
 0x5a3   : > { %v4628_v10 = vmul.f32 0.70710677, %v10208_v49  ;;  %v4921_v51 = vmul.f32 %v4821_v4, %v4521_v61  ;;  %v10219_v35 = vadd.f32 %v4386_v17, %v9885_v23  ;;  %v4524_v61 = vmul.f32 0.5, %v10188_v18 }
 0x5a4   : > { %7407 = verf.f32 %v4627_v28  ;;  %v4922_v27 = vmul.f32 %v4822_v33, %v4522_v39  ;;  %v4629_v41 = vmul.f32 0.70710677, %v10216_v60  ;;  %v4525_v4 = vmul.f32 0.5, %v10196_v36 }
 0x5a5   : > { %7409 = verf.f32 %v4628_v10  ;;  %v4989_v52 = vpack.c.bf16 %v4921_v51, %v4919_v25  ;;  %v4630_v21 = vmul.f32 0.70710677, %v10219_v35  ;;  %v4526_v33 = vmul.f32 0.5, %v10199_v43 }
 0x5a6   : > { %v7400_v8 = vpop.eup %7399  ;;  %7411 = verf.f32 %v4629_v41  ;;  %v4990_v50 = vpack.c.bf16 %v4922_v27, %v4920_v32 }
 0x5a7   : > { %v7402_v62 = vpop.eup %7401  ;;  %v4390_v53 = vpop.f32.mrb[20].mxu0  ;;  %v4823_v37 = vadd.f32 1.0, %v7400_v8  ;;  %7413 = verf.f32 %v4630_v21 }
 0x5a8   : > { %v10224_v22 = vadd.f32 %v4390_v53, %v9880_v44  ;;  %v4392_v7 = vpop.f32.mrb[21].mxu0  ;;  %v7404_v29 = vpop.eup %7403  ;;  %v4824_v38 = vadd.f32 1.0, %v7402_v62  ;;  %5296 = vmatprep.mubr.bf16.mxu1 %v4990_v50 }
 0x5a9   : > { %v10228_v58 = vadd.f32 %v4392_v7, %v9885_v23  ;;  %v4394_v5 = vpop.f32.mrb[22].mxu0  ;;  %v7406_v34 = vpop.eup %7405  ;;  %v4825_v28 = vadd.f32 1.0, %v7404_v29  ;;  %5297 = vmatmul.mubr.bf16.gmra.mrb[8].mxu1 %v4989_v52  ;;  %v4923_v51 = vmul.f32 %v4823_v37, %v4523_v20  ;;  %v4527_v20 = vmul.f32 0.5, %v10204_v14 }
 0x5aa   : > { %v4631_v17 = vmul.f32 0.70710677, %v10224_v22  ;;  %v4396_v39 = vpop.f32.mrb[23].mxu0  ;;  %v4826_v10 = vadd.f32 1.0, %v7406_v34  ;;  %v4395_v25 = vadd.f32 %v4394_v5, %v9880_v44  ;;  %v4924_v18 = vmul.f32 %v4824_v38, %v4524_v61 }
 0x5ab   : > { %v4632_v6 = vmul.f32 0.70710677, %v10228_v58  ;;  %v4925_v32 = vmul.f32 %v4825_v28, %v4525_v4  ;;  %v4397_v27 = vadd.f32 %v4396_v39, %v9885_v23  ;;  %v4528_v4 = vmul.f32 0.5, %v10208_v49 }
 0x5ac   : > { %7415 = verf.f32 %v4631_v17  ;;  %v4926_v41 = vmul.f32 %v4826_v10, %v4526_v33  ;;  %v4633_v36 = vmul.f32 0.70710677, %v4395_v25  ;;  %v4529_v28 = vmul.f32 0.5, %v10216_v60 }
 0x5ad   : > { %7417 = verf.f32 %v4632_v6  ;;  %v4991_v21 = vpack.c.bf16 %v4925_v32, %v4923_v51  ;;  %v4634_v52 = vmul.f32 0.70710677, %v4397_v27  ;;  %v4530_v10 = vmul.f32 0.5, %v10219_v35 }
 0x5ae   : > { %v7408_v8 = vpop.eup %7407  ;;  %7419 = verf.f32 %v4633_v36  ;;  %v4992_v53 = vpack.c.bf16 %v4926_v41, %v4924_v18 }
 0x5af   : > { %v7410_v62 = vpop.eup %7409  ;;  %v4400_v43 = vpop.f32.mrb[24].mxu0  ;;  %v4827_v50 = vadd.f32 1.0, %v7408_v8  ;;  %7421 = verf.f32 %v4634_v52 }
 0x5b0   : > { %v10238_v7 = vadd.f32 %v4400_v43, %v9880_v44  ;;  %v4402_v37 = vpop.f32.mrb[25].mxu0  ;;  %v7412_v29 = vpop.eup %7411  ;;  %v4828_v38 = vadd.f32 1.0, %v7410_v62  ;;  %5304 = vmatprep.mubr.bf16.mxu1 %v4992_v53 }
 0x5b1   : > { %v10242_v5 = vadd.f32 %v4402_v37, %v9885_v23  ;;  %v4404_v34 = vpop.f32.mrb[26].mxu0  ;;  %v7414_v61 = vpop.eup %7413  ;;  %v4829_v17 = vadd.f32 1.0, %v7412_v29  ;;  %5305 = vmatmul.mubr.bf16.gmra.mrb[12].mxu1 %v4991_v21  ;;  %v4927_v32 = vmul.f32 %v4827_v50, %v4527_v20  ;;  %v4531_v29 = vmul.f32 0.5, %v10224_v22 }
 0x5b2   : > { %v4635_v39 = vmul.f32 0.70710677, %v10238_v7  ;;  %v4406_v33 = vpop.f32.mrb[27].mxu0  ;;  %v4830_v6 = vadd.f32 1.0, %v7414_v61  ;;  %v4405_v51 = vadd.f32 %v4404_v34, %v9880_v44  ;;  %v4928_v49 = vmul.f32 %v4828_v38, %v4528_v4  ;;  %v10255_v38 = vld [vmem:[%s11277_s12] ss:$0 sm:$0xff] }
 0x5b3   : > { %v4636_v14 = vmul.f32 0.70710677, %v10242_v5  ;;  %v4929_v18 = vmul.f32 %v4829_v17, %v4529_v28  ;;  %v4407_v41 = vadd.f32 %v4406_v33, %v9885_v23  ;;  %v4533_v20 = vmul.f32 0.5, %v4395_v25 }
 0x5b4   : > { %7423 = verf.f32 %v4635_v39  ;;  %v4930_v36 = vmul.f32 %v4830_v6, %v4530_v10  ;;  %v4637_v60 = vmul.f32 0.70710677, %v4405_v51  ;;  %v4532_v61 = vmul.f32 0.5, %v10228_v58 }
 0x5b5   : > { %7425 = verf.f32 %v4636_v14  ;;  %v4993_v52 = vpack.c.bf16 %v4929_v18, %v4927_v32  ;;  %v4638_v21 = vmul.f32 0.70710677, %v4407_v41  ;;  %v4534_v4 = vmul.f32 0.5, %v4397_v27 }
 0x5b6   : > { %v7416_v8 = vpop.eup %7415  ;;  %7427 = verf.f32 %v4637_v60  ;;  %v4994_v35 = vpack.c.bf16 %v4930_v36, %v4928_v49  ;;  %v11352_v36 = vld [vmem:[#allocation4_spill] sm:$0xff] }
 0x5b7   : > { %v7418_v62 = vpop.eup %7417  ;;  %v4831_v43 = vadd.f32 1.0, %v7416_v8  ;;  %7429 = verf.f32 %v4638_v21 }
 0x5b8   : > { %v7420_v53 = vpop.eup %7419  ;;  %v4832_v37 = vadd.f32 1.0, %v7418_v62  ;;  %5312 = vmatprep.mubr.bf16.mxu1 %v4994_v35  ;;  %v11353_v35 = vld [vmem:[#allocation5_spill] sm:$0xff] }
 0x5b9   : > { %v7422_v50 = vpop.eup %7421  ;;  %v4833_v34 = vadd.f32 1.0, %v7420_v53  ;;  %5313 = vmatmul.mubr.bf16.gmra.mrb[16].mxu1 %v4993_v52  ;;  %v4931_v17 = vmul.f32 %v4831_v43, %v4531_v29  ;;  %v4537_v29 = vmul.f32 0.5, %v4405_v51 }
 0x5ba   : > { %v4834_v28 = vadd.f32 1.0, %v7422_v50  ;;  %v4932_v10 = vmul.f32 %v4832_v37, %v4532_v61  ;;  %v4535_v50 = vmul.f32 0.5, %v10238_v7  ;;  %v4538_v61 = vmul.f32 0.5, %v4407_v41 }
 0x5bb   : > { %v4933_v39 = vmul.f32 %v4833_v34, %v4533_v20  ;;  %v5178_v33 = vpop.f32.mrb[204].mxu1  ;;  %v4536_v34 = vmul.f32 0.5, %v10242_v5 }
 0x5bc   : > { %v4934_v6 = vmul.f32 %v4834_v28, %v4534_v4  ;;  %v5179_v14 = vadd.f32 %v10255_v38, %v5178_v33  ;;  %v5180_v22 = vpop.f32.mrb[205].mxu1 }
 0x5bd   : > { %v4995_v32 = vpack.c.bf16 %v4933_v39, %v4931_v17  ;;  %v5181_v18 = vpop.f32.mrb[206].mxu1 }
 0x5be   : > { %v7424_v25 = vpop.eup %7423  ;;  %v10260_v60 = vadd.f32 %v5179_v14, %v11352_v36  ;;  %v5182_v8 = vadd.f32 %v10255_v38, %v5181_v18  ;;  %v5183_v58 = vpop.f32.mrb[207].mxu1  ;;  %v4996_v27 = vpack.c.bf16 %v4934_v6, %v4932_v10 }
 0x5bf   : > { %v7426_v49 = vpop.eup %7425  ;;  %v4835_v52 = vadd.f32 1.0, %v7424_v25 }
 0x5c0   : > { %v7428_v21 = vpop.eup %7427  ;;  %v4836_v62 = vadd.f32 1.0, %v7426_v49  ;;  %v10264_v43 = vadd.f32 %v5182_v8, %v11353_v35  ;;  %5320 = vmatprep.mubr.bf16.mxu1 %v4996_v27  ;;  %v5429_v53 = vsel %vm3252_vm2, %v10260_v60, 0.0 }
 0x5c1   : > { %v7430_v37 = vpop.eup %7429  ;;  %v4837_v20 = vadd.f32 1.0, %v7428_v21  ;;  %5430 = vadd.xlane.f32.xlu0 %v5429_v53  ;;  %5321 = vmatmul.mubr.bf16.gmra.mrb[20].mxu1 %v4995_v32  ;;  %v4935_v17 = vmul.f32 %v4835_v52, %v4535_v50 }
 0x5c2   : > { %v4838_v4 = vadd.f32 1.0, %v7430_v37  ;;  %v5432_v28 = vsel %vm3252_vm2, %v10264_v43, 0.0  ;;  %v4936_v10 = vmul.f32 %v4836_v62, %v4536_v34 }
 0x5c3   : > { %v4937_v39 = vmul.f32 %v4837_v20, %v4537_v29  ;;  %5433 = vadd.xlane.f32.xlu1 %v5432_v28  ;;  %v5186_v33 = vpop.f32.mrb[208].mxu1 }
 0x5c4   : > { %v4938_v6 = vmul.f32 %v4838_v4, %v4538_v61  ;;  %v5187_v14 = vadd.f32 %v10255_v38, %v5186_v33  ;;  %v5188_v7 = vpop.f32.mrb[209].mxu1 }
 0x5c5   : > { %v4997_v51 = vpack.c.bf16 %v4937_v39, %v4935_v17  ;;  %v5189_v22 = vpop.f32.mrb[210].mxu1 }
 0x5c6   : > { %v10274_v25 = vadd.f32 %v5187_v14, %v9405_v59  ;;  %v5190_v5 = vadd.f32 %v10255_v38, %v5189_v22  ;;  %v5191_v41 = vpop.f32.mrb[211].mxu1  ;;  %v4998_v32 = vpack.c.bf16 %v4938_v6, %v4936_v10 }
 0x5c8   : > { %v10278_v18 = vadd.f32 %v5190_v5, %v9408_v31  ;;  %5328 = vmatprep.mubr.bf16.mxu1 %v4998_v32  ;;  %v5435_v49 = vsel %vm3252_vm2, %v10274_v25, 0.0 }
 0x5c9   : > { %5436 = vadd.xlane.f32.xlu0 %v5435_v49  ;;  %5329 = vmatmul.mubr.bf16.gmra.mrb[24].mxu1 %v4997_v51 }
 0x5ca   : > { %v5438_v36 = vsel %vm3252_vm2, %v10278_v18, 0.0 }
 0x5cb   : > { %5439 = vadd.xlane.f32.xlu1 %v5438_v36  ;;  %v5194_v8 = vpop.f32.mrb[212].mxu1  ;;  %v11354_v36 = vld [vmem:[#allocation6_spill] sm:$0xff] }
 0x5cc   : > { %v5195_v59 = vadd.f32 %v10255_v38, %v5194_v8  ;;  %v5196_v58 = vpop.f32.mrb[213].mxu1 }
 0x5cd   : > { %v5197_v27 = vpop.f32.mrb[214].mxu1 }
 0x5ce   : > { %v10286_v52 = vadd.f32 %v5195_v59, %v9443_v1  ;;  %v5198_v31 = vadd.f32 %v10255_v38, %v5197_v27  ;;  %v5199_v21 = vpop.f32.mrb[215].mxu1 }
 0x5d0   : > { %v10290_v62 = vadd.f32 %v5198_v31, %v9446_v30  ;;  %v5441_v35 = vsel %vm3252_vm2, %v10286_v52, 0.0 }
 0x5d1   : > { %5442 = vadd.xlane.f32.xlu0 %v5441_v35 }
 0x5d2   : > { %v5444_v53 = vsel %vm3252_vm2, %v10290_v62, 0.0 }
 0x5d3   : > { %5445 = vadd.xlane.f32.xlu1 %v5444_v53  ;;  %v5202_v37 = vpop.f32.mrb[216].mxu1 }
 0x5d4   : > { %v5203_v50 = vadd.f32 %v10255_v38, %v5202_v37  ;;  %v5204_v29 = vpop.f32.mrb[217].mxu1 }
 0x5d5   : > { %v5205_v1 = vpop.f32.mrb[218].mxu1 }
 0x5d6   : > { %v10298_v20 = vadd.f32 %v5203_v50, %v9481_v19  ;;  %v5206_v34 = vadd.f32 %v10255_v38, %v5205_v1  ;;  %v5207_v30 = vpop.f32.mrb[219].mxu1  ;;  %v11355_v50 = vld [vmem:[#allocation7_spill] sm:$0xff] }
 0x5d8   : > { %v10302_v61 = vadd.f32 %v5206_v34, %v9484_v55  ;;  %v5447_v4 = vsel %vm3252_vm2, %v10298_v20, 0.0 }
 0x5d9   : > { %5448 = vadd.xlane.f32.xlu0 %v5447_v4 }
 0x5da   : > { %v5450_v28 = vsel %vm3252_vm2, %v10302_v61, 0.0 }
 0x5db   : > { %5451 = vadd.xlane.f32.xlu1 %v5450_v28  ;;  %v5210_v17 = vpop.f32.mrb[220].mxu1 }
 0x5dc   : > { %v5211_v39 = vadd.f32 %v10255_v38, %v5210_v17  ;;  %v5212_v33 = vpop.f32.mrb[221].mxu1 }
 0x5dd   : > { %v5213_v19 = vpop.f32.mrb[222].mxu1 }
 0x5de   : > { %v10310_v10 = vadd.f32 %v5211_v39, %v9509_v63  ;;  %v5214_v6 = vadd.f32 %v10255_v38, %v5213_v19  ;;  %v5215_v55 = vpop.f32.mrb[223].mxu1 }
 0x5e0   : > { %v10314_v14 = vadd.f32 %v5214_v6, %v9512_v54  ;;  %v5453_v7 = vsel %vm3252_vm2, %v10310_v10, 0.0 }
 0x5e1   : > { %5454 = vadd.xlane.f32.xlu0 %v5453_v7 }
 0x5e2   : > { %v5456_v51 = vsel %vm3252_vm2, %v10314_v14, 0.0 }
 0x5e3   : > { %5457 = vadd.xlane.f32.xlu1 %v5456_v51  ;;  %v5218_v22 = vpop.f32.mrb[224].mxu1 }
 0x5e4   : > { %v5219_v5 = vadd.f32 %v10255_v38, %v5218_v22  ;;  %v5220_v41 = vpop.f32.mrb[225].mxu1 }
 0x5e5   : > { %v5221_v63 = vpop.f32.mrb[226].mxu1 }
 0x5e6   : > { %v10322_v32 = vadd.f32 %v5219_v5, %v9535_v40  ;;  %v5222_v49 = vadd.f32 %v10255_v38, %v5221_v63  ;;  %v5223_v54 = vpop.f32.mrb[227].mxu1 }
 0x5e8   : > { %v10326_v8 = vadd.f32 %v5222_v49, %v11354_v36  ;;  %v5459_v59 = vsel %vm3252_vm2, %v10322_v32, 0.0 }
 0x5e9   : > { %5460 = vadd.xlane.f32.xlu0 %v5459_v59 }
 0x5ea   : > { %v5462_v58 = vsel %vm3252_vm2, %v10326_v8, 0.0 }
 0x5eb   : > { %5463 = vadd.xlane.f32.xlu1 %v5462_v58  ;;  %v5226_v27 = vpop.f32.mrb[228].mxu1 }
 0x5ec   : > { %v5227_v31 = vadd.f32 %v10255_v38, %v5226_v27  ;;  %v5228_v21 = vpop.f32.mrb[229].mxu1 }
 0x5ed   : > { %v5229_v40 = vpop.f32.mrb[230].mxu1 }
 0x5ee   : > { %v10334_v35 = vadd.f32 %v5227_v31, %v9561_v26  ;;  %v5230_v53 = vadd.f32 %v10255_v38, %v5229_v40  ;;  %v5231_v37 = vpop.f32.mrb[231].mxu1 }
 0x5f0   : > { %v10338_v29 = vadd.f32 %v5230_v53, %v11355_v50  ;;  %v5465_v1 = vsel %vm3252_vm2, %v10334_v35, 0.0 }
 0x5f1   : > { %5466 = vadd.xlane.f32.xlu0 %v5465_v1 }
 0x5f2   : > { %v5468_v34 = vsel %vm3252_vm2, %v10338_v29, 0.0 }
 0x5f3   : > { %5469 = vadd.xlane.f32.xlu1 %v5468_v34  ;;  %v5234_v30 = vpop.f32.mrb[232].mxu1 }
 0x5f4   : > { %v5235_v4 = vadd.f32 %v10255_v38, %v5234_v30  ;;  %v5236_v28 = vpop.f32.mrb[233].mxu1 }
 0x5f5   : > { %v5237_v26 = vpop.f32.mrb[234].mxu1 }
 0x5f6   : > { %v10346_v17 = vadd.f32 %v5235_v4, %v9594_v2  ;;  %v5238_v39 = vadd.f32 %v10255_v38, %v5237_v26  ;;  %v5239_v33 = vpop.f32.mrb[235].mxu1 }
 0x5f8   : > { %v10350_v19 = vadd.f32 %v5238_v39, %v9597_v13  ;;  %v5471_v6 = vsel %vm3252_vm2, %v10346_v17, 0.0 }
 0x5f9   : > { %5472 = vadd.xlane.f32.xlu0 %v5471_v6 }
 0x5fa   : > { %v5474_v55 = vsel %vm3252_vm2, %v10350_v19, 0.0 }
 0x5fb   : > { %5475 = vadd.xlane.f32.xlu1 %v5474_v55  ;;  %v5242_v7 = vpop.f32.mrb[236].mxu1 }
 0x5fc   : > { %v5243_v51 = vadd.f32 %v10255_v38, %v5242_v7  ;;  %v5244_v22 = vpop.f32.mrb[237].mxu1 }
 0x5fd   : > { %v5245_v2 = vpop.f32.mrb[238].mxu1 }
 0x5fe   : > { %v10358_v5 = vadd.f32 %v5243_v51, %v9625_v9  ;;  %v5246_v41 = vadd.f32 %v10255_v38, %v5245_v2  ;;  %v5247_v13 = vpop.f32.mrb[239].mxu1 }
 0x600   : > { %v4410_v63 = vpop.f32.mrb[28].mxu0  ;;  %v10362_v49 = vadd.f32 %v5246_v41, %v9628_v48  ;;  %v5477_v36 = vsel %vm3252_vm2, %v10358_v5, 0.0 }
 0x601   : > { %v4411_v54 = vadd.f32 %v4410_v63, %v9880_v44  ;;  %v4412_v59 = vpop.f32.mrb[29].mxu0  ;;  %5478 = vadd.xlane.f32.xlu0 %v5477_v36 }
 0x602   : > { %11356 = vst [vmem:[#allocation4_spill] sm:$0xff] %v10362_v49  ;;  %v4413_v58 = vadd.f32 %v4412_v59, %v9885_v23  ;;  %v4414_v27 = vpop.f32.mrb[30].mxu0  ;;  %v5480_v21 = vsel %vm3252_vm2, %v10362_v49, 0.0 }
 0x603   : > { %v4639_v31 = vmul.f32 0.70710677, %v4411_v54  ;;  %v4415_v9 = vadd.f32 %v4414_v27, %v9880_v44  ;;  %v4416_v40 = vpop.f32.mrb[31].mxu0  ;;  %5481 = vadd.xlane.f32.xlu1 %v5480_v21  ;;  %v5250_v50 = vpop.f32.mrb[240].mxu1 }
 0x604   : > { %v4640_v53 = vmul.f32 0.70710677, %v4413_v58  ;;  %v4417_v48 = vadd.f32 %v4416_v40, %v9885_v23  ;;  %v5251_v34 = vadd.f32 %v10255_v38, %v5250_v50  ;;  %v5252_v30 = vpop.f32.mrb[241].mxu1 }
 0x605   : > { %7431 = verf.f32 %v4639_v31  ;;  %v4641_v37 = vmul.f32 0.70710677, %v4415_v9  ;;  %v5253_v4 = vpop.f32.mrb[242].mxu1 }
 0x606   : > { %7433 = verf.f32 %v4640_v53  ;;  %v4642_v1 = vmul.f32 0.70710677, %v4417_v48  ;;  %v10374_v28 = vadd.f32 %v5251_v34, %v9647_v45  ;;  %v5254_v26 = vadd.f32 %v10255_v38, %v5253_v4  ;;  %v5255_v39 = vpop.f32.mrb[243].mxu1 }
 0x607   : > { %7435 = verf.f32 %v4641_v37  ;;  %v4539_v4 = vmul.f32 0.5, %v4411_v54 }
 0x608   : > { %7437 = verf.f32 %v4642_v1  ;;  %11357 = vst [vmem:[#allocation5_spill] sm:$0xff] %v10374_v28  ;;  %v4420_v33 = vpop.f32.mrb[32].mxu0  ;;  %v10381_v7 = vadd.f32 %v5254_v26, %v9650_v57  ;;  %v5483_v51 = vsel %vm3252_vm2, %v10374_v28, 0.0  ;;  %v4541_v26 = vmul.f32 0.5, %v4415_v9 }
 0x609   : > { %v10378_v6 = vadd.f32 %v4420_v33, %v9880_v44  ;;  %v4422_v55 = vpop.f32.mrb[33].mxu0  ;;  %5484 = vadd.xlane.f32.xlu0 %v5483_v51  ;;  %v4540_v51 = vmul.f32 0.5, %v4413_v58 }
 0x60a   : > { %11358 = vst [vmem:[#allocation6_spill] sm:$0xff] %v10381_v7  ;;  %v10386_v22 = vadd.f32 %v4422_v55, %v9885_v23  ;;  %v4424_v2 = vpop.f32.mrb[34].mxu0  ;;  %v5486_v36 = vsel %vm3252_vm2, %v10381_v7, 0.0 }
 0x60b   : > { %v4643_v45 = vmul.f32 0.70710677, %v10378_v6  ;;  %v4425_v41 = vadd.f32 %v4424_v2, %v9880_v44  ;;  %v4426_v13 = vpop.f32.mrb[35].mxu0  ;;  %5487 = vadd.xlane.f32.xlu1 %v5486_v36  ;;  %v4542_v2 = vmul.f32 0.5, %v4417_v48 }
 0x60c   : > { %v4644_v63 = vmul.f32 0.70710677, %v10386_v22  ;;  %v4427_v57 = vadd.f32 %v4426_v13, %v9885_v23 }
 0x60d   : > { %7439 = verf.f32 %v4643_v45  ;;  %v4645_v59 = vmul.f32 0.70710677, %v4425_v41 }
 0x60e   : > { %7441 = verf.f32 %v4644_v63  ;;  %v4646_v27 = vmul.f32 0.70710677, %v4427_v57 }
 0x60f   : > { %v7432_v31 = vpop.eup %7431  ;;  %7443 = verf.f32 %v4645_v59 }
 0x610   : > { %v7434_v21 = vpop.eup %7433  ;;  %v4839_v40 = vadd.f32 1.0, %v7432_v31  ;;  %7445 = verf.f32 %v4646_v27  ;;  %v4430_v53 = vpop.f32.mrb[36].mxu0 }
 0x611   : > { %v7436_v37 = vpop.eup %7435  ;;  %v4840_v50 = vadd.f32 1.0, %v7434_v21  ;;  %v10395_v1 = vadd.f32 %v4430_v53, %v9880_v44  ;;  %v4432_v34 = vpop.f32.mrb[37].mxu0 }
 0x612   : > { %v7438_v30 = vpop.eup %7437  ;;  %v4841_v39 = vadd.f32 1.0, %v7436_v37  ;;  %v10398_v33 = vadd.f32 %v4432_v34, %v9885_v23  ;;  %v4434_v55 = vpop.f32.mrb[38].mxu0  ;;  %v4939_v36 = vmul.f32 %v4839_v40, %v4539_v4 }
 0x613   : > { %v4842_v45 = vadd.f32 1.0, %v7438_v30  ;;  %v4647_v13 = vmul.f32 0.70710677, %v10395_v1  ;;  %v4436_v63 = vpop.f32.mrb[39].mxu0  ;;  %v4435_v31 = vadd.f32 %v4434_v55, %v9880_v44  ;;  %v4940_v21 = vmul.f32 %v4840_v50, %v4540_v51 }
 0x614   : > { %v4941_v59 = vmul.f32 %v4841_v39, %v4541_v26  ;;  %v4648_v27 = vmul.f32 0.70710677, %v10398_v33  ;;  %v4437_v9 = vadd.f32 %v4436_v63, %v9885_v23  ;;  %v4543_v51 = vmul.f32 0.5, %v10378_v6 }
 0x615   : > { %v4942_v54 = vmul.f32 %v4842_v45, %v4542_v2  ;;  %7447 = verf.f32 %v4647_v13  ;;  %v4649_v37 = vmul.f32 0.70710677, %v4435_v31  ;;  %v4545_v2 = vmul.f32 0.5, %v4425_v41 }
 0x616   : > { %v4999_v53 = vpack.c.bf16 %v4941_v59, %v4939_v36  ;;  %7449 = verf.f32 %v4648_v27  ;;  %v4650_v48 = vmul.f32 0.70710677, %v4437_v9  ;;  %v4544_v36 = vmul.f32 0.5, %v10386_v22 }
 0x617   : > { %v7440_v58 = vpop.eup %7439  ;;  %v5000_v34 = vpack.c.bf16 %v4942_v54, %v4940_v21  ;;  %7451 = verf.f32 %v4649_v37  ;;  %v4546_v59 = vmul.f32 0.5, %v4427_v57 }
 0x618   : > { %v7442_v30 = vpop.eup %7441  ;;  %v4843_v7 = vadd.f32 1.0, %v7440_v58  ;;  %v4440_v40 = vpop.f32.mrb[40].mxu0  ;;  %7453 = verf.f32 %v4650_v48 }
 0x619   : > { %v7444_v4 = vpop.eup %7443  ;;  %v4844_v26 = vadd.f32 1.0, %v7442_v30  ;;  %v10405_v39 = vadd.f32 %v4440_v40, %v9880_v44  ;;  %v4442_v50 = vpop.f32.mrb[41].mxu0  ;;  %5336 = vmatprep.mubr.bf16.mxu1 %v5000_v34 }
 0x61a   : > { %v7446_v55 = vpop.eup %7445  ;;  %v4845_v45 = vadd.f32 1.0, %v7444_v4  ;;  %v10409_v13 = vadd.f32 %v4442_v50, %v9885_v23  ;;  %v4444_v63 = vpop.f32.mrb[42].mxu0  ;;  %5337 = vmatmul.mubr.bf16.gmra.mrb[28].mxu1 %v4999_v53  ;;  %v4943_v37 = vmul.f32 %v4843_v7, %v4543_v51 }
 0x61b   : > { %v4846_v27 = vadd.f32 1.0, %v7446_v55  ;;  %v4651_v21 = vmul.f32 0.70710677, %v10405_v39  ;;  %v4446_v54 = vpop.f32.mrb[43].mxu0  ;;  %v4445_v6 = vadd.f32 %v4444_v63, %v9880_v44  ;;  %v4944_v41 = vmul.f32 %v4844_v26, %v4544_v36 }
 0x61c   : > { %v4945_v58 = vmul.f32 %v4845_v45, %v4545_v2  ;;  %v4652_v48 = vmul.f32 0.70710677, %v10409_v13  ;;  %v4447_v30 = vadd.f32 %v4446_v54, %v9885_v23  ;;  %v4547_v45 = vmul.f32 0.5, %v10395_v1 }
 0x61d   : > { %v4946_v34 = vmul.f32 %v4846_v27, %v4546_v59  ;;  %7455 = verf.f32 %v4651_v21  ;;  %v4653_v53 = vmul.f32 0.70710677, %v4445_v6  ;;  %v4548_v21 = vmul.f32 0.5, %v10398_v33 }
 0x61e   : > { %v5001_v40 = vpack.c.bf16 %v4945_v58, %v4943_v37  ;;  %7457 = verf.f32 %v4652_v48  ;;  %v4654_v57 = vmul.f32 0.70710677, %v4447_v30  ;;  %v4549_v54 = vmul.f32 0.5, %v4435_v31 }
 0x61f   : > { %v7448_v22 = vpop.eup %7447  ;;  %v5002_v4 = vpack.c.bf16 %v4946_v34, %v4944_v41  ;;  %7459 = verf.f32 %v4653_v53  ;;  %v4550_v41 = vmul.f32 0.5, %v4437_v9 }
 0x620   : > { %v7450_v50 = vpop.eup %7449  ;;  %v4450_v55 = vpop.f32.mrb[44].mxu0  ;;  %v4847_v7 = vadd.f32 1.0, %v7448_v22  ;;  %7461 = verf.f32 %v4654_v57 }
 0x621   : > { %v4451_v51 = vadd.f32 %v4450_v55, %v9880_v44  ;;  %v4452_v2 = vpop.f32.mrb[45].mxu0  ;;  %5344 = vmatprep.mubr.bf16.mxu1 %v5002_v4  ;;  %v7452_v26 = vpop.eup %7451  ;;  %v4848_v63 = vadd.f32 1.0, %v7450_v50 }
 0x622   : > { %v4453_v36 = vadd.f32 %v4452_v2, %v9885_v23  ;;  %v4454_v59 = vpop.f32.mrb[46].mxu0  ;;  %5345 = vmatmul.mubr.bf16.gmra.mrb[32].mxu1 %v5001_v40  ;;  %v7454_v27 = vpop.eup %7453  ;;  %v4849_v37 = vadd.f32 1.0, %v7452_v26  ;;  %v4947_v57 = vmul.f32 %v4847_v7, %v4547_v45  ;;  %v4551_v7 = vmul.f32 0.5, %v10405_v39 }
 0x623   : > { %v4655_v58 = vmul.f32 0.70710677, %v4451_v51  ;;  %v4456_v48 = vpop.f32.mrb[47].mxu0  ;;  %v4850_v34 = vadd.f32 1.0, %v7454_v27  ;;  %v4455_v22 = vadd.f32 %v4454_v59, %v9880_v44  ;;  %v4948_v50 = vmul.f32 %v4848_v63, %v4548_v21 }
 0x624   : > { %v4656_v53 = vmul.f32 0.70710677, %v4453_v36  ;;  %v4949_v4 = vmul.f32 %v4849_v37, %v4549_v54  ;;  %v4457_v1 = vadd.f32 %v4456_v48, %v9885_v23  ;;  %v4553_v45 = vmul.f32 0.5, %v4445_v6 }
 0x625   : > { %7463 = verf.f32 %v4655_v58  ;;  %v4950_v55 = vmul.f32 %v4850_v34, %v4550_v41  ;;  %v4657_v40 = vmul.f32 0.70710677, %v4455_v22  ;;  %v4552_v63 = vmul.f32 0.5, %v10409_v13 }
 0x626   : > { %7465 = verf.f32 %v4656_v53  ;;  %v5003_v33 = vpack.c.bf16 %v4949_v4, %v4947_v57  ;;  %v4658_v31 = vmul.f32 0.70710677, %v4457_v1  ;;  %v4554_v59 = vmul.f32 0.5, %v4447_v30 }
 0x627   : > { %v7456_v2 = vpop.eup %7455  ;;  %7467 = verf.f32 %v4657_v40  ;;  %v5004_v28 = vpack.c.bf16 %v4950_v55, %v4948_v50  ;;  %v4555_v6 = vmul.f32 0.5, %v4451_v51  ;;  %v4557_v55 = vmul.f32 0.5, %v4455_v22 }
 0x628   : > { %v7458_v26 = vpop.eup %7457  ;;  %v4851_v9 = vadd.f32 1.0, %v7456_v2  ;;  %7469 = verf.f32 %v4658_v31  ;;  %v4556_v13 = vmul.f32 0.5, %v4453_v36  ;;  %v4558_v30 = vmul.f32 0.5, %v4457_v1  ;;  %v11359_v1 = vld [vmem:[#allocation2_spill] sm:$0xff] }
 0x629   : > { %v7460_v27 = vpop.eup %7459  ;;  %v4852_v49 = vadd.f32 1.0, %v7458_v26  ;;  %5352 = vmatprep.mubr.bf16.mxu1 %v5004_v28 }
 0x62a   : > { %v7462_v44 = vpop.eup %7461  ;;  %v4853_v23 = vadd.f32 1.0, %v7460_v27  ;;  %5353 = vmatmul.mubr.bf16.gmra.mrb[36].mxu1 %v5003_v33  ;;  %v4951_v54 = vmul.f32 %v4851_v9, %v4551_v7 }
 0x62b   : > { %v4854_v21 = vadd.f32 1.0, %v7462_v44  ;;  %v4952_v58 = vmul.f32 %v4852_v49, %v4552_v63 }
 0x62c   : > { %v4953_v37 = vmul.f32 %v4853_v23, %v4553_v45 }
 0x62d   : > { %v4954_v48 = vmul.f32 %v4854_v21, %v4554_v59 }
 0x62e   : > { %v5005_v34 = vpack.c.bf16 %v4953_v37, %v4951_v54 }
 0x62f   : > { %v7464_v41 = vpop.eup %7463  ;;  %v5006_v57 = vpack.c.bf16 %v4954_v48, %v4952_v58  ;;  %v11360_v48 = vld [vmem:[#allocation3_spill] sm:$0xff] }
 0x630   : > { %v7466_v53 = vpop.eup %7465  ;;  %v4855_v4 = vadd.f32 1.0, %v7464_v41 }
 0x631   : > { %v7468_v28 = vpop.eup %7467  ;;  %v4856_v50 = vadd.f32 1.0, %v7466_v53  ;;  %5360 = vmatprep.mubr.bf16.mxu1 %v5006_v57  ;;  %v11361_v57 = vld [vmem:[#allocation8_spill] sm:$0xff] }
 0x632   : > { %v7470_v39 = vpop.eup %7469  ;;  %v4857_v40 = vadd.f32 1.0, %v7468_v28  ;;  %5361 = vmatmul.mubr.bf16.gmra.mrb[40].mxu1 %v5005_v34  ;;  %v4955_v33 = vmul.f32 %v4855_v4, %v4555_v6 }
 0x633   : > { %v4858_v2 = vadd.f32 1.0, %v7470_v39  ;;  %v4956_v49 = vmul.f32 %v4856_v50, %v4556_v13  ;;  %v11362_v13 = vld [vmem:[#allocation9_spill] sm:$0xff] }
 0x634   : > { %v4957_v31 = vmul.f32 %v4857_v40, %v4557_v55 }
 0x635   : > { %v4958_v26 = vmul.f32 %v4858_v2, %v4558_v30 }
 0x636   : > { %v5007_v9 = vpack.c.bf16 %v4957_v31, %v4955_v33  ;;  %v11363_v31 = vld [vmem:[#allocation10_spill] sm:$0xff] }
 0x637   : > { %v5008_v27 = vpack.c.bf16 %v4958_v26, %v4956_v49 }
 0x639   : > { %5368 = vmatprep.mubr.bf16.mxu1 %v5008_v27 }
 0x63a   : > { %5369 = vmatmul.mubr.bf16.gmra.mrb[44].mxu1 %v5007_v9 }
 0x654   : > { %v5258_v44 = vpop.f32.mrb[244].mxu1 }
 0x655   : > { %v5259_v7 = vadd.f32 %v10255_v38, %v5258_v44  ;;  %v5260_v45 = vpop.f32.mrb[245].mxu1 }
 0x656   : > { %v5261_v23 = vpop.f32.mrb[246].mxu1 }
 0x657   : > { %v10426_v51 = vadd.f32 %v5259_v7, %v9728_v56  ;;  %v5262_v36 = vadd.f32 %v10255_v38, %v5261_v23  ;;  %v5263_v22 = vpop.f32.mrb[247].mxu1  ;;  %v11364_v23 = vld [vmem:[#allocation11_spill] sm:$0xff] }
 0x659   : > { %v10430_v63 = vadd.f32 %v5262_v36, %v11359_v1  ;;  %v5489_v59 = vsel %vm3252_vm2, %v10426_v51, 0.0 }
 0x65a   : > { %5490 = vadd.xlane.f32.xlu0 %v5489_v59  ;;  %v11365_v59 = vld [vmem:[#allocation12_spill] sm:$0xff] }
 0x65b   : > { %v5492_v21 = vsel %vm3252_vm2, %v10430_v63, 0.0 }
 0x65c   : > { %5493 = vadd.xlane.f32.xlu1 %v5492_v21  ;;  %v5266_v54 = vpop.f32.mrb[248].mxu1 }
 0x65d   : > { %v5267_v37 = vadd.f32 %v10255_v38, %v5266_v54  ;;  %v5268_v58 = vpop.f32.mrb[249].mxu1 }
 0x65e   : > { %v5269_v56 = vpop.f32.mrb[250].mxu1 }
 0x65f   : > { %v10438_v41 = vadd.f32 %v5267_v37, %v11360_v48  ;;  %v5270_v34 = vadd.f32 %v10255_v38, %v5269_v56  ;;  %v5271_v53 = vpop.f32.mrb[251].mxu1 }
 0x660   : > { %v11366_v53 = vld [vmem:[#allocation13_spill] sm:$0xff] }
 0x661   : > { %v10442_v4 = vadd.f32 %v5270_v34, %v11361_v57  ;;  %v5495_v28 = vsel %vm3252_vm2, %v10438_v41, 0.0 }
 0x662   : > { %5496 = vadd.xlane.f32.xlu0 %v5495_v28 }
 0x663   : > { %v5498_v50 = vsel %vm3252_vm2, %v10442_v4, 0.0 }
 0x664   : > { %5499 = vadd.xlane.f32.xlu1 %v5498_v50  ;;  %v5274_v39 = vpop.f32.mrb[252].mxu1 }
 0x665   : > { %v5275_v6 = vadd.f32 %v10255_v38, %v5274_v39  ;;  %v5276_v55 = vpop.f32.mrb[253].mxu1  ;;  %v11367_v39 = vld [vmem:[#allocation14_spill] sm:$0xff] }
 0x666   : > { %v5277_v40 = vpop.f32.mrb[254].mxu1 }
 0x667   : > { %v10450_v30 = vadd.f32 %v5275_v6, %v11362_v13  ;;  %v5278_v2 = vadd.f32 %v10255_v38, %v5277_v40  ;;  %v5279_v33 = vpop.f32.mrb[255].mxu1 }
 0x669   : > { %v10454_v49 = vadd.f32 %v5278_v2, %v11363_v31  ;;  %v5501_v26 = vsel %vm3252_vm2, %v10450_v30, 0.0 }
 0x66a   : > { %5502 = vadd.xlane.f32.xlu0 %v5501_v26  ;;  %v11368_v26 = vld [vmem:[#allocation15_spill] sm:$0xff] }
 0x66b   : > { %v5504_v9 = vsel %vm3252_vm2, %v10454_v49, 0.0 }
 0x66c   : > { %5505 = vadd.xlane.f32.xlu1 %v5504_v9  ;;  %v5282_v27 = vpop.f32.mrb[0].mxu1 }
 0x66d   : > { %v5283_v44 = vadd.f32 %v10255_v38, %v5282_v27  ;;  %v5284_v7 = vpop.f32.mrb[1].mxu1 }
 0x66e   : > { %v5285_v45 = vpop.f32.mrb[2].mxu1  ;;  %v11369_v7 = vld [vmem:[#allocation16_spill] sm:$0xff] }
 0x66f   : > { %v10462_v36 = vadd.f32 %v5283_v44, %v11364_v23  ;;  %v5286_v22 = vadd.f32 %v10255_v38, %v5285_v45  ;;  %v5287_v1 = vpop.f32.mrb[3].mxu1 }
 0x671   : > { %v10466_v21 = vadd.f32 %v5286_v22, %v11365_v59  ;;  %v5507_v54 = vsel %vm3252_vm2, %v10462_v36, 0.0 }
 0x672   : > { %5508 = vadd.xlane.f32.xlu0 %v5507_v54 }
 0x673   : > { %v5510_v37 = vsel %vm3252_vm2, %v10466_v21, 0.0 }
 0x674   : > { %5511 = vadd.xlane.f32.xlu1 %v5510_v37  ;;  %v5290_v58 = vpop.f32.mrb[4].mxu1 }
 0x675   : > { %v5291_v56 = vadd.f32 %v10255_v38, %v5290_v58  ;;  %v5292_v48 = vpop.f32.mrb[5].mxu1  ;;  %v11370_v58 = vld [vmem:[#allocation17_spill] sm:$0xff] }
 0x676   : > { %v5293_v34 = vpop.f32.mrb[6].mxu1 }
 0x677   : > { %v10474_v57 = vadd.f32 %v5291_v56, %v11366_v53  ;;  %v5294_v28 = vadd.f32 %v10255_v38, %v5293_v34  ;;  %v5295_v50 = vpop.f32.mrb[7].mxu1  ;;  %v11371_v53 = vld [vmem:[#allocation18_spill] sm:$0xff] }
 0x679   : > { %v10478_v6 = vadd.f32 %v5294_v28, %v11367_v39  ;;  %v5513_v55 = vsel %vm3252_vm2, %v10474_v57, 0.0 }
 0x67a   : > { %5514 = vadd.xlane.f32.xlu0 %v5513_v55 }
 0x67b   : > { %v5516_v40 = vsel %vm3252_vm2, %v10478_v6, 0.0 }
 0x67c   : > { %5517 = vadd.xlane.f32.xlu1 %v5516_v40  ;;  %v5298_v13 = vpop.f32.mrb[8].mxu1 }
 0x67d   : > { %v5299_v2 = vadd.f32 %v10255_v38, %v5298_v13  ;;  %v5300_v33 = vpop.f32.mrb[9].mxu1 }
 0x67e   : > { %v5301_v31 = vpop.f32.mrb[10].mxu1 }
 0x67f   : > { %v10486_v9 = vadd.f32 %v5299_v2, %v11368_v26  ;;  %v5302_v27 = vadd.f32 %v10255_v38, %v5301_v31  ;;  %v5303_v44 = vpop.f32.mrb[11].mxu1  ;;  %v5431_v2 = vpop.xlane.xlu0 %5430  ;;  %v11372_v31 = vld [vmem:[#allocation19_spill] sm:$0xff] }
 0x681   : > { %v10490_v45 = vadd.f32 %v5302_v27, %v11369_v7  ;;  %v5519_v23 = vsel %vm3252_vm2, %v10486_v9, 0.0  ;;  %v5434_v7 = vpop.xlane.xlu1 %5433 }
 0x682   : > { %5520 = vadd.xlane.f32.xlu0 %v5519_v23  ;;  %v5579_v23 = vmul.f32 0.015625, %v5431_v2 }
 0x683   : > { %v5522_v22 = vsel %vm3252_vm2, %v10490_v45, 0.0 }
 0x684   : > { %5523 = vadd.xlane.f32.xlu1 %v5522_v22  ;;  %v5306_v1 = vpop.f32.mrb[12].mxu1  ;;  %v11373_v22 = vld [vmem:[#allocation20_spill] sm:$0xff] }
 0x685   : > { %v5307_v59 = vadd.f32 %v10255_v38, %v5306_v1  ;;  %v5308_v54 = vpop.f32.mrb[13].mxu1 }
 0x686   : > { %v5309_v37 = vpop.f32.mrb[14].mxu1  ;;  %v5580_v54 = vmul.f32 0.015625, %v5434_v7 }
 0x687   : > { %v10498_v56 = vadd.f32 %v5307_v59, %v11370_v58  ;;  %v5310_v48 = vadd.f32 %v10255_v38, %v5309_v37  ;;  %v5311_v34 = vpop.f32.mrb[15].mxu1 }
 0x689   : > { %v10502_v28 = vadd.f32 %v5310_v48, %v11371_v53  ;;  %v5525_v50 = vsel %vm3252_vm2, %v10498_v56, 0.0  ;;  %v10521_v48 = vsub.f32 %v10260_v60, %v5579_v23 }
 0x68a   : > { %5526 = vadd.xlane.f32.xlu0 %v5525_v50  ;;  %v5437_v50 = vpop.xlane.xlu0 %5436 }
 0x68b   : > { %v5528_v39 = vsel %vm3252_vm2, %v10502_v28, 0.0  ;;  %v5679_v23 = vmul.f32 %v10521_v48, %v10521_v48 }
 0x68c   : > { %5529 = vadd.xlane.f32.xlu1 %v5528_v39  ;;  %v5314_v55 = vpop.f32.mrb[16].mxu1 }
 0x68d   : > { %v5315_v40 = vadd.f32 %v10255_v38, %v5314_v55  ;;  %v5316_v13 = vpop.f32.mrb[17].mxu1  ;;  %v10525_v55 = vsub.f32 %v10264_v43, %v5580_v54 }
 0x68e   : > { %v5317_v33 = vpop.f32.mrb[18].mxu1 }
 0x68f   : > { %v10510_v26 = vadd.f32 %v5315_v40, %v11372_v31  ;;  %v5318_v27 = vadd.f32 %v10255_v38, %v5317_v33  ;;  %v5319_v44 = vpop.f32.mrb[19].mxu1  ;;  %v11374_v40 = vld [vmem:[#allocation21_spill] sm:$0xff]  ;;  %v5440_v31 = vpop.xlane.xlu1 %5439 }
 0x690   : > { %v11375_v44 = vld [vmem:[#allocation22_spill] sm:$0xff]  ;;  %v5582_v43 = vmul.f32 0.015625, %v5440_v31 }
 0x691   : > { %v10514_v1 = vadd.f32 %v5318_v27, %v11373_v22  ;;  %v5531_v59 = vsel %vm3252_vm2, %v10510_v26, 0.0  ;;  %v5581_v27 = vmul.f32 0.015625, %v5437_v50 }
 0x692   : > { %5532 = vadd.xlane.f32.xlu0 %v5531_v59  ;;  %v5680_v59 = vmul.f32 %v10525_v55, %v10525_v55 }
 0x693   : > { %v5534_v37 = vsel %vm3252_vm2, %v10514_v1, 0.0 }
 0x694   : > { %5535 = vadd.xlane.f32.xlu1 %v5534_v37  ;;  %v5322_v58 = vpop.f32.mrb[20].mxu1  ;;  %v10543_v37 = vsub.f32 %v10274_v25, %v5581_v27  ;;  %v11377_v25 = vld [vmem:[#allocation24_spill] sm:$0xff] }
 0x695   : > { %v5323_v34 = vadd.f32 %v10255_v38, %v5322_v58  ;;  %v5324_v53 = vpop.f32.mrb[21].mxu1 }
 0x696   : > { %v5325_v39 = vpop.f32.mrb[22].mxu1  ;;  %v5729_v53 = vsel %vm3252_vm2, %v5679_v23, 0.0  ;;  %v5681_v23 = vmul.f32 %v10543_v37, %v10543_v37 }
 0x697   : > { %v10528_v13 = vadd.f32 %v5323_v34, %v11374_v40  ;;  %v5326_v2 = vadd.f32 %v10255_v38, %v5325_v39  ;;  %v5327_v33 = vpop.f32.mrb[23].mxu1  ;;  %v10548_v39 = vsub.f32 %v10278_v18, %v5582_v43  ;;  %v11376_v40 = vld [vmem:[#allocation23_spill] sm:$0xff] }
 0x699   : > { %v10532_v7 = vadd.f32 %v5326_v2, %v11375_v44  ;;  %v5537_v60 = vsel %vm3252_vm2, %v10528_v13, 0.0  ;;  %v5732_v44 = vsel %vm3252_vm2, %v5680_v59, 0.0  ;;  %v5682_v43 = vmul.f32 %v10548_v39, %v10548_v39 }
 0x69a   : > { %5538 = vadd.xlane.f32.xlu0 %v5537_v60 }
 0x69b   : > { %v5540_v22 = vsel %vm3252_vm2, %v10532_v7, 0.0  ;;  %v5738_v59 = vsel %vm3252_vm2, %v5682_v43, 0.0 }
 0x69c   : > { %5541 = vadd.xlane.f32.xlu1 %v5540_v22  ;;  %v5330_v54 = vpop.f32.mrb[24].mxu1  ;;  %v5735_v22 = vsel %vm3252_vm2, %v5681_v23, 0.0 }
 0x69d   : > { %v5331_v58 = vadd.f32 %v10255_v38, %v5330_v54  ;;  %v5332_v34 = vpop.f32.mrb[25].mxu1  ;;  %v5443_v54 = vpop.xlane.xlu0 %5442 }
 0x69e   : > { %v5333_v50 = vpop.f32.mrb[26].mxu1  ;;  %5730 = vadd.xlane.f32.xlu0 %v5729_v53  ;;  %v5583_v34 = vmul.f32 0.015625, %v5443_v54 }
 0x69f   : > { %v10551_v2 = vadd.f32 %v5331_v58, %v11376_v40  ;;  %v5334_v33 = vadd.f32 %v10255_v38, %v5333_v50  ;;  %v5335_v31 = vpop.f32.mrb[27].mxu1  ;;  %v5446_v58 = vpop.xlane.xlu1 %5445 }
 0x6a0   : > { %5733 = vadd.xlane.f32.xlu1 %v5732_v44  ;;  %v5584_v53 = vmul.f32 0.015625, %v5446_v58 }
 0x6a1   : > { %v10556_v27 = vadd.f32 %v5334_v33, %v11377_v25  ;;  %v5543_v60 = vsel %vm3252_vm2, %v10551_v2, 0.0  ;;  %v5449_v50 = vpop.xlane.xlu0 %5448  ;;  %v10569_v33 = vsub.f32 %v10286_v52, %v5583_v34 }
 0x6a2   : > { %5544 = vadd.xlane.f32.xlu0 %v5543_v60  ;;  %v10573_v23 = vsub.f32 %v10290_v62, %v5584_v53  ;;  %v5585_v54 = vmul.f32 0.015625, %v5449_v50 }
 0x6a3   : > { %v5546_v18 = vsel %vm3252_vm2, %v10556_v27, 0.0  ;;  %11378 = vst [vmem:[#allocation7_spill] sm:$0xff] %v10569_v33  ;;  %v5452_v31 = vpop.xlane.xlu1 %5451 }
 0x6a4   : > { %5547 = vadd.xlane.f32.xlu1 %v5546_v18  ;;  %11379 = vst [vmem:[#allocation2_spill] sm:$0xff] %v10573_v23  ;;  %v5586_v62 = vmul.f32 0.015625, %v5452_v31  ;;  %v5684_v50 = vmul.f32 %v10573_v23, %v10573_v23 }
 0x6a5   : > { %v5455_v18 = vpop.xlane.xlu0 %5454 }
 0x6a6   : > { %5736 = vadd.xlane.f32.xlu0 %v5735_v22 }
 0x6a7   : > { %v5458_v58 = vpop.xlane.xlu1 %5457 }
 0x6a8   : > { %5739 = vadd.xlane.f32.xlu1 %v5738_v59 }
 0x6a9   : > { %v10586_v53 = vpop.xlane.xlu0 %5460 }
 0x6ed   : > { %v5338_v40 = vpop.f32.mrb[28].mxu1 }
 0x6ee   : > { %v5339_v44 = vadd.f32 %v10255_v38, %v5338_v40  ;;  %v5340_v25 = vpop.f32.mrb[29].mxu1  ;;  %v5683_v40 = vmul.f32 %v10569_v33, %v10569_v33  ;;  %v10602_v33 = vpop.xlane.xlu0 %5466 }
 0x6ef   : > { %v5341_v60 = vpop.f32.mrb[30].mxu1  ;;  %v10595_v25 = vpop.xlane.xlu1 %5463 }
 0x6f0   : > { %v10576_v43 = vadd.f32 %v5339_v44, %v10054_v46  ;;  %v5342_v22 = vadd.f32 %v10255_v38, %v5341_v60  ;;  %v5343_v59 = vpop.f32.mrb[31].mxu1  ;;  %v5741_v31 = vsel %vm3252_vm2, %v5683_v40, 0.0  ;;  %v5744_v40 = vsel %vm3252_vm2, %v5684_v50, 0.0 }
 0x6f2   : > { %v10580_v52 = vadd.f32 %v5342_v22, %v10057_v15  ;;  %v5549_v34 = vsel %vm3252_vm2, %v10576_v43, 0.0  ;;  %v10593_v15 = vsub.f32 %v10298_v20, %v5585_v54  ;;  %v10610_v20 = vld [vmem:[%s11277_s12] ss:$0 sm:$0xff] }
 0x6f3   : > { %5550 = vadd.xlane.f32.xlu0 %v5549_v34  ;;  %v10600_v34 = vsub.f32 %v10302_v61, %v5586_v62 }
 0x6f4   : > { %v5552_v46 = vsel %vm3252_vm2, %v10580_v52, 0.0  ;;  %11380 = vst [vmem:[#allocation3_spill] sm:$0xff] %v10593_v15  ;;  %v5685_v62 = vmul.f32 %v10593_v15, %v10593_v15 }
 0x6f5   : > { %5553 = vadd.xlane.f32.xlu1 %v5552_v46  ;;  %v5346_v44 = vpop.f32.mrb[32].mxu1  ;;  %11381 = vst [vmem:[#allocation8_spill] sm:$0xff] %v10600_v34  ;;  %v5686_v50 = vmul.f32 %v10600_v34, %v10600_v34 }
 0x6f6   : > { %v5347_v60 = vadd.f32 %v10255_v38, %v5346_v44  ;;  %v5348_v22 = vpop.f32.mrb[33].mxu1  ;;  %v10614_v44 = vpop.xlane.xlu1 %5469 }
 0x6f7   : > { %v5349_v59 = vpop.f32.mrb[34].mxu1  ;;  %5742 = vadd.xlane.f32.xlu0 %v5741_v31  ;;  %v10623_v22 = vpop.xlane.xlu0 %5472 }
 0x6f8   : > { %v10605_v46 = vadd.f32 %v5347_v60, %v10072_v3  ;;  %v5350_v38 = vadd.f32 %v10610_v20, %v5349_v59  ;;  %v5351_v54 = vpop.f32.mrb[35].mxu1  ;;  %v5587_v60 = vmul.f32 0.015625, %v5455_v18  ;;  %v5588_v59 = vmul.f32 0.015625, %v5458_v58 }
 0x6f9   : > { %5745 = vadd.xlane.f32.xlu1 %v5744_v40  ;;  %v5747_v54 = vsel %vm3252_vm2, %v5685_v62, 0.0 }
 0x6fa   : > { %v10617_v61 = vadd.f32 %v5350_v38, %v10075_v12  ;;  %v5555_v3 = vsel %vm3252_vm2, %v10605_v46, 0.0  ;;  %v10629_v12 = vpop.xlane.xlu1 %5475  ;;  %v10633_v40 = vsub.f32 %v10310_v10, %v5587_v60  ;;  %v10640_v58 = vsub.f32 %v10314_v14, %v5588_v59 }
 0x6fb   : > { %5556 = vadd.xlane.f32.xlu0 %v5555_v3  ;;  %v10636_v15 = vpop.xlane.xlu0 %5478 }
 0x6fc   : > { %11382 = vst [vmem:[#allocation9_spill] sm:$0xff] %v10617_v61  ;;  %v5558_v31 = vsel %vm3252_vm2, %v10617_v61, 0.0  ;;  %11383 = vst [vmem:[#allocation10_spill] sm:$0xff] %v10633_v40  ;;  %v5750_v61 = vsel %vm3252_vm2, %v5686_v50, 0.0  ;;  %v5687_v50 = vmul.f32 %v10633_v40, %v10633_v40 }
 0x6fd   : > { %5559 = vadd.xlane.f32.xlu1 %v5558_v31  ;;  %v5354_v38 = vpop.f32.mrb[36].mxu1  ;;  %11384 = vst [vmem:[#allocation11_spill] sm:$0xff] %v10640_v58 }
 0x6fe   : > { %v5355_v18 = vadd.f32 %v10610_v20, %v5354_v38  ;;  %v5356_v3 = vpop.f32.mrb[37].mxu1  ;;  %v10646_v10 = vpop.xlane.xlu1 %5481 }
 0x6ff   : > { %5748 = vadd.xlane.f32.xlu0 %v5747_v54  ;;  %v5357_v23 = vpop.f32.mrb[38].mxu1  ;;  %v10655_v14 = vpop.xlane.xlu0 %5484  ;;  %v5753_v54 = vsel %vm3252_vm2, %v5687_v50, 0.0 }
 0x700   : > { %v10643_v31 = vadd.f32 %v5355_v18, %v10088_v16  ;;  %v5358_v62 = vadd.f32 %v10610_v20, %v5357_v23  ;;  %v5359_v34 = vpop.f32.mrb[39].mxu1  ;;  %v5688_v23 = vmul.f32 %v10640_v58, %v10640_v58 }
 0x701   : > { %5751 = vadd.xlane.f32.xlu1 %v5750_v61 }
 0x702   : > { %v10649_v60 = vadd.f32 %v5358_v62, %v10091_v0  ;;  %v5561_v38 = vsel %vm3252_vm2, %v10643_v31, 0.0  ;;  %v10661_v34 = vpop.xlane.xlu1 %5487  ;;  %v5756_v58 = vsel %vm3252_vm2, %v5688_v23, 0.0 }
 0x703   : > { %5562 = vadd.xlane.f32.xlu0 %v5561_v38  ;;  %v10665_v18 = vpop.xlane.xlu0 %5490 }
 0x704   : > { %11385 = vst [vmem:[#allocation12_spill] sm:$0xff] %v10649_v60  ;;  %v5564_v16 = vsel %vm3252_vm2, %v10649_v60, 0.0 }
 0x705   : > { %5565 = vadd.xlane.f32.xlu1 %v5564_v16  ;;  %v5362_v0 = vpop.f32.mrb[40].mxu1  ;;  %v5589_v16 = vmul.f32 0.015625, %v10586_v53 }
 0x706   : > { %v5363_v61 = vadd.f32 %v10610_v20, %v5362_v0  ;;  %v5364_v59 = vpop.f32.mrb[41].mxu1  ;;  %v10673_v60 = vpop.xlane.xlu1 %5493 }
 0x707   : > { %v5365_v3 = vpop.f32.mrb[42].mxu1  ;;  %5754 = vadd.xlane.f32.xlu0 %v5753_v54  ;;  %v10680_v59 = vpop.xlane.xlu0 %5496  ;;  %v10686_v23 = vsub.f32 %v10322_v32, %v5589_v16 }
 0x708   : > { %v10668_v62 = vadd.f32 %v5363_v61, %v10102_v47  ;;  %v5366_v38 = vadd.f32 %v10610_v20, %v5365_v3  ;;  %v5367_v40 = vpop.f32.mrb[43].mxu1  ;;  %v5590_v47 = vmul.f32 0.015625, %v10595_v25 }
 0x709   : > { %5757 = vadd.xlane.f32.xlu1 %v5756_v58 }
 0x70a   : > { %v10676_v0 = vadd.f32 %v5366_v38, %v10104_v42  ;;  %v5567_v50 = vsel %vm3252_vm2, %v10668_v62, 0.0  ;;  %v10688_v53 = vpop.xlane.xlu1 %5499  ;;  %v5591_v42 = vmul.f32 0.015625, %v10602_v33  ;;  %v10695_v25 = vsub.f32 %v10326_v8, %v5590_v47 }
 0x70b   : > { %5568 = vadd.xlane.f32.xlu0 %v5567_v50  ;;  %v10692_v3 = vpop.xlane.xlu0 %5502  ;;  %v5592_v50 = vmul.f32 0.015625, %v10614_v44  ;;  %v5689_v33 = vmul.f32 %v10686_v23, %v10686_v23  ;;  %v5594_v47 = vmul.f32 0.015625, %v10629_v12 }
 0x70c   : > { %11386 = vst [vmem:[#allocation13_spill] sm:$0xff] %v10676_v0  ;;  %v5570_v40 = vsel %vm3252_vm2, %v10676_v0, 0.0 }
 0x70d   : > { %5571 = vadd.xlane.f32.xlu1 %v5570_v40  ;;  %v5370_v58 = vpop.f32.mrb[44].mxu1 }
 0x70e   : > { %v5371_v61 = vadd.f32 %v10610_v20, %v5370_v58  ;;  %v5372_v54 = vpop.f32.mrb[45].mxu1  ;;  %v10702_v0 = vpop.xlane.xlu1 %5505  ;;  %v10707_v58 = vsub.f32 %v10334_v35, %v5591_v42 }
 0x70f   : > { %v5373_v38 = vpop.f32.mrb[46].mxu1  ;;  %v5593_v54 = vmul.f32 0.015625, %v10623_v22  ;;  %v10715_v44 = vpop.xlane.xlu0 %5508  ;;  %v5690_v22 = vmul.f32 %v10695_v25, %v10695_v25 }
 0x710   : > { %v10699_v32 = vadd.f32 %v5371_v61, %v10112_v24  ;;  %v5374_v16 = vadd.f32 %v10610_v20, %v5373_v38  ;;  %v5375_v40 = vpop.f32.mrb[47].mxu1  ;;  %v10718_v20 = vsub.f32 %v10338_v29, %v5592_v50  ;;  %v5595_v61 = vmul.f32 0.015625, %v10636_v15 }
 0x711   : > { %v5759_v38 = vsel %vm3252_vm2, %v5689_v33, 0.0  ;;  %v5691_v29 = vmul.f32 %v10707_v58, %v10707_v58  ;;  %v10737_v50 = vsub.f32 %v10350_v19, %v5594_v47  ;;  %v5762_v40 = vsel %vm3252_vm2, %v5690_v22, 0.0 }
 0x712   : > { %v10711_v8 = vadd.f32 %v5374_v16, %v10114_v11  ;;  %v5573_v24 = vsel %vm3252_vm2, %v10699_v32, 0.0  ;;  %v10725_v42 = vpop.xlane.xlu1 %5511  ;;  %v10728_v11 = vsub.f32 %v10346_v17, %v5593_v54  ;;  %v5596_v16 = vmul.f32 0.015625, %v10646_v10  ;;  %v11388_v10 = vld [vmem:[#allocation4_spill] sm:$0xff] }
 0x713   : > { %5574 = vadd.xlane.f32.xlu0 %v5573_v24  ;;  %v10734_v12 = vpop.xlane.xlu0 %5514  ;;  %11387 = vst [vmem:[#allocation14_spill] sm:$0xff] %v10737_v50  ;;  %v5692_v17 = vmul.f32 %v10718_v20, %v10718_v20  ;;  %v10746_v15 = vsub.f32 %v10358_v5, %v5595_v61  ;;  %v5597_v33 = vmul.f32 0.015625, %v10655_v14  ;;  %v5765_v24 = vsel %vm3252_vm2, %v5691_v29, 0.0  ;;  %v11389_v14 = vld [vmem:[#allocation5_spill] sm:$0xff] }
 0x714   : > { %v5576_v35 = vsel %vm3252_vm2, %v10711_v8, 0.0  ;;  %v5693_v19 = vmul.f32 %v10728_v11, %v10728_v11  ;;  %v5598_v22 = vmul.f32 0.015625, %v10661_v34  ;;  %v5694_v5 = vmul.f32 %v10737_v50, %v10737_v50  ;;  %v11390_v34 = vld [vmem:[#allocation6_spill] sm:$0xff] }
 0x715   : > { %5577 = vadd.xlane.f32.xlu1 %v5576_v35  ;;  %v10755_v35 = vsub.f32 %v11388_v10, %v5596_v16  ;;  %v10764_v29 = vsub.f32 %v11389_v14, %v5597_v33  ;;  %v5695_v16 = vmul.f32 %v10746_v15, %v10746_v15  ;;  %v5600_v50 = vmul.f32 0.015625, %v10673_v60 }
 0x716   : > { %v10743_v54 = vpop.xlane.xlu1 %5517 }
 0x717   : > { %5760 = vadd.xlane.f32.xlu0 %v5759_v38  ;;  %v10752_v47 = vpop.xlane.xlu0 %5520  ;;  %v5768_v38 = vsel %vm3252_vm2, %v5692_v17, 0.0  ;;  %v10773_v17 = vsub.f32 %v11390_v34, %v5598_v22  ;;  %v5696_v33 = vmul.f32 %v10755_v35, %v10755_v35  ;;  %v5697_v22 = vmul.f32 %v10764_v29, %v10764_v29 }
 0x718   : > { %v10791_v60 = vsub.f32 %v10430_v63, %v5600_v50 }
 0x719   : > { %5763 = vadd.xlane.f32.xlu1 %v5762_v40  ;;  %v5599_v40 = vmul.f32 0.015625, %v10665_v18 }
 0x71a   : > { %v10761_v61 = vpop.xlane.xlu1 %5523  ;;  %11391 = vst [vmem:[#allocation15_spill] sm:$0xff] %v10791_v60 }
 0x71b   : > { %5766 = vadd.xlane.f32.xlu0 %v5765_v24  ;;  %v5771_v24 = vsel %vm3252_vm2, %v5693_v19, 0.0  ;;  %v10770_v10 = vpop.xlane.xlu0 %5526  ;;  %v10782_v18 = vsub.f32 %v10426_v51, %v5599_v40  ;;  %v5601_v19 = vmul.f32 0.015625, %v10680_v59  ;;  %v5698_v51 = vmul.f32 %v10773_v17, %v10773_v17 }
 0x71d   : > { %5769 = vadd.xlane.f32.xlu1 %v5768_v38  ;;  %v5774_v38 = vsel %vm3252_vm2, %v5694_v5, 0.0  ;;  %v5602_v5 = vmul.f32 0.015625, %v10688_v53  ;;  %v10800_v59 = vsub.f32 %v10438_v41, %v5601_v19  ;;  %v5699_v63 = vmul.f32 %v10782_v18, %v10782_v18 }
 0x71e   : > { %v10779_v14 = vpop.xlane.xlu1 %5529  ;;  %v5700_v41 = vmul.f32 %v10791_v60, %v10791_v60 }
 0x71f   : > { %5772 = vadd.xlane.f32.xlu0 %v5771_v24  ;;  %v5777_v24 = vsel %vm3252_vm2, %v5695_v16, 0.0  ;;  %v10788_v34 = vpop.xlane.xlu0 %5532  ;;  %11392 = vst [vmem:[#allocation16_spill] sm:$0xff] %v10800_v59  ;;  %v5603_v16 = vmul.f32 0.015625, %v10692_v3  ;;  %v10809_v50 = vsub.f32 %v10442_v4, %v5602_v5  ;;  %v5605_v3 = vmul.f32 0.015625, %v10715_v44 }
 0x720   : > { %v5701_v4 = vmul.f32 %v10800_v59, %v10800_v59  ;;  %v5792_v44 = vsel %vm3252_vm2, %v5700_v41, 0.0  ;;  %v5608_v41 = vmul.f32 0.015625, %v10743_v54  ;;  %v5609_v54 = vmul.f32 0.015625, %v10752_v47 }
 0x721   : > { %5775 = vadd.xlane.f32.xlu1 %v5774_v38  ;;  %v5780_v38 = vsel %vm3252_vm2, %v5696_v33, 0.0  ;;  %v5604_v33 = vmul.f32 0.015625, %v10702_v0  ;;  %v5606_v0 = vmul.f32 0.015625, %v10725_v42 }
 0x722   : > { %v10797_v40 = vpop.xlane.xlu1 %5535 }
 0x723   : > { %5778 = vadd.xlane.f32.xlu0 %v5777_v24  ;;  %v5783_v24 = vsel %vm3252_vm2, %v5697_v22, 0.0  ;;  %v10819_v22 = vsub.f32 %v10450_v30, %v5603_v16  ;;  %v10832_v30 = vsub.f32 %v10462_v36, %v5605_v3  ;;  %v5607_v16 = vmul.f32 0.015625, %v10734_v12 }
 0x725   : > { %5781 = vadd.xlane.f32.xlu1 %v5780_v38  ;;  %v5786_v38 = vsel %vm3252_vm2, %v5698_v51, 0.0  ;;  %v10826_v51 = vsub.f32 %v10454_v49, %v5604_v33  ;;  %v5703_v49 = vmul.f32 %v10819_v22, %v10819_v22  ;;  %v10839_v33 = vsub.f32 %v10466_v21, %v5606_v0 }
 0x726   : > { %v10848_v3 = vsub.f32 %v10474_v57, %v5607_v16  ;;  %v5705_v21 = vmul.f32 %v10832_v30, %v10832_v30  ;;  %v10857_v0 = vsub.f32 %v10478_v6, %v5608_v41  ;;  %v10867_v6 = vsub.f32 %v10486_v9, %v5609_v54 }
 0x727   : > { %5784 = vadd.xlane.f32.xlu0 %v5783_v24  ;;  %v10806_v53 = vpop.xlane.xlu0 %5538  ;;  %v5789_v24 = vsel %vm3252_vm2, %v5699_v63, 0.0  ;;  %v5706_v57 = vmul.f32 %v10839_v33, %v10839_v33 }
 0x728   : > { %v5807_v47 = vsel %vm3252_vm2, %v5705_v21, 0.0  ;;  %v5612_v21 = vmul.f32 0.015625, %v10779_v14 }
 0x729   : > { %v10816_v19 = vpop.xlane.xlu1 %5541  ;;  %5787 = vadd.xlane.f32.xlu1 %v5786_v38  ;;  %v5702_v38 = vmul.f32 %v10809_v50, %v10809_v50 }
 0x72b   : > { %5790 = vadd.xlane.f32.xlu0 %v5789_v24  ;;  %v5731_v5 = vpop.xlane.xlu0 %5730  ;;  %v5795_v24 = vsel %vm3252_vm2, %v5701_v4, 0.0  ;;  %v5798_v12 = vsel %vm3252_vm2, %v5702_v38, 0.0  ;;  %v5610_v38 = vmul.f32 0.015625, %v10761_v61  ;;  %v5810_v61 = vsel %vm3252_vm2, %v5706_v57, 0.0  ;;  %v10885_v57 = vld [vmem:[%s11278_s13] ss:$0 sm:$0xff] }
 0x72c   : > { %v5879_v60 = vmul.f32 0.015625, %v5731_v5 }
 0x72d   : > { %v5734_v63 = vpop.xlane.xlu1 %5733  ;;  %5793 = vadd.xlane.f32.xlu1 %v5792_v44 }
 0x72e   : > { %v5929_v59 = vadd.f32 1e-12, %v5879_v60  ;;  %v5880_v42 = vmul.f32 0.015625, %v5734_v63  ;;  %v5704_v60 = vmul.f32 %v10826_v51, %v10826_v51 }
 0x72f   : > { %5796 = vadd.xlane.f32.xlu0 %v5795_v24  ;;  %v10842_v5 = vpop.xlane.xlu0 %5544  ;;  %v5707_v24 = vmul.f32 %v10848_v3, %v10848_v3 }
 0x730   : > { %7471 = vrsqrt.f32 %v5929_v59  ;;  %v5930_v36 = vadd.f32 1e-12, %v5880_v42  ;;  %v5801_v59 = vsel %vm3252_vm2, %v5703_v49, 0.0  ;;  %v5804_v63 = vsel %vm3252_vm2, %v5704_v60, 0.0 }
 0x731   : > { %v10850_v4 = vpop.xlane.xlu1 %5547  ;;  %5799 = vadd.xlane.f32.xlu1 %v5798_v12  ;;  %v5611_v49 = vmul.f32 0.015625, %v10770_v10  ;;  %v5708_v12 = vmul.f32 %v10857_v0, %v10857_v0  ;;  %v10874_v60 = vsub.f32 %v10490_v45, %v5610_v38  ;;  %v5813_v9 = vsel %vm3252_vm2, %v5707_v24, 0.0 }
 0x732   : > { %7473 = vrsqrt.f32 %v5930_v36  ;;  %v5709_v45 = vmul.f32 %v10867_v6, %v10867_v6 }
 0x733   : > { %5802 = vadd.xlane.f32.xlu0 %v5801_v59  ;;  %v5737_v44 = vpop.xlane.xlu0 %5736  ;;  %v10879_v10 = vsub.f32 %v10498_v56, %v5611_v49  ;;  %v5614_v56 = vmul.f32 0.015625, %v10797_v40  ;;  %v5615_v40 = vmul.f32 0.015625, %v10806_v53 }
 0x734   : > { %v5881_v16 = vmul.f32 0.015625, %v5737_v44  ;;  %v5613_v44 = vmul.f32 0.015625, %v10788_v34  ;;  %v10897_v34 = vld [vmem:[%s11279_s14] ss:$0 sm:$0xff]  ;;  %v5819_v24 = vsel %vm3252_vm2, %v5709_v45, 0.0 }
 0x735   : > { %v5740_v42 = vpop.xlane.xlu1 %5739  ;;  %5805 = vadd.xlane.f32.xlu1 %v5804_v63  ;;  %v5816_v63 = vsel %vm3252_vm2, %v5708_v12, 0.0  ;;  %v5711_v49 = vmul.f32 %v10879_v10, %v10879_v10  ;;  %v10921_v53 = vsub.f32 %v10514_v1, %v5614_v56 }
 0x736   : > { %v5931_v41 = vadd.f32 1e-12, %v5881_v16  ;;  %v5882_v36 = vmul.f32 0.015625, %v5740_v42  ;;  %v10891_v16 = vsub.f32 %v10502_v28, %v5612_v21  ;;  %v5710_v42 = vmul.f32 %v10874_v60, %v10874_v60 }
 0x737   : > { %5808 = vadd.xlane.f32.xlu0 %v5807_v47  ;;  %v10905_v28 = vsub.f32 %v10510_v26, %v5613_v44  ;;  %v5825_v1 = vsel %vm3252_vm2, %v5711_v49, 0.0 }
 0x738   : > { %7475 = vrsqrt.f32 %v5931_v41  ;;  %v5932_v59 = vadd.f32 1e-12, %v5882_v36  ;;  %v5616_v41 = vmul.f32 0.015625, %v10816_v19  ;;  %v5822_v36 = vsel %vm3252_vm2, %v5710_v42, 0.0 }
 0x739   : > { %5811 = vadd.xlane.f32.xlu1 %v5810_v61  ;;  %v5712_v61 = vmul.f32 %v10891_v16, %v10891_v16  ;;  %v5713_v19 = vmul.f32 %v10905_v28, %v10905_v28 }
 0x73a   : > { %v7472_v54 = vpop.eup %7471  ;;  %7477 = vrsqrt.f32 %v5932_v59  ;;  %v10931_v59 = vsub.f32 %v10528_v13, %v5615_v40  ;;  %v10941_v45 = vsub.f32 %v10532_v7, %v5616_v41  ;;  %v5618_v13 = vmul.f32 0.015625, %v10850_v4 }
 0x73b   : > { %v6029_v14 = vmul.f32 %v7472_v54, %v10521_v48  ;;  %5814 = vadd.xlane.f32.xlu0 %v5813_v9  ;;  %v5617_v9 = vmul.f32 0.015625, %v10842_v5  ;;  %v5714_v5 = vmul.f32 %v10921_v53, %v10921_v53  ;;  %v5831_v7 = vsel %vm3252_vm2, %v5713_v19, 0.0 }
 0x73c   : > { %v7474_v38 = vpop.eup %7473 }
 0x73d   : > { %v6085_v47 = vmul.f32 %v10885_v57, %v6029_v14  ;;  %v6030_v48 = vmul.f32 %v7474_v38, %v10525_v55  ;;  %5817 = vadd.xlane.f32.xlu1 %v5816_v63  ;;  %v5828_v14 = vsel %vm3252_vm2, %v5712_v61, 0.0  ;;  %v5715_v63 = vmul.f32 %v10931_v59, %v10931_v59 }
 0x73f   : > { %v6141_v55 = vadd.f32 %v10897_v34, %v6085_v47  ;;  %v6086_v26 = vmul.f32 %v10885_v57, %v6030_v48  ;;  %5820 = vadd.xlane.f32.xlu0 %v5819_v24  ;;  %v10958_v47 = vsub.f32 %v10556_v27, %v5618_v13  ;;  %v5716_v48 = vmul.f32 %v10941_v45, %v10941_v45 }
 0x740   : > { %v5837_v40 = vsel %vm3252_vm2, %v5715_v63, 0.0 }
 0x741   : > { %6191 = vst.msk [vmem:[%s10913_s22] sm:$0xff] %vm3252_vm2, %v6141_v55  ;;  %v6142_v12 = vadd.f32 %v10897_v34, %v6086_v26  ;;  %5823 = vadd.xlane.f32.xlu1 %v5822_v36  ;;  %v5840_v27 = vsel %vm3252_vm2, %v5716_v48, 0.0  ;;  %v5718_v49 = vmul.f32 %v10958_v47, %v10958_v47  ;;  %v11394_v48 = vld [vmem:[#allocation9_spill] sm:$0xff] }
 0x742   : > { %v7476_v21 = vpop.eup %7475 }
 0x743   : > { %6192 = vst.msk [vmem:[%s10913_s22 + $0x8] sm:$0xff] %vm3252_vm2, %v6142_v12  ;;  %v6031_v54 = vmul.f32 %v7476_v21, %v10543_v37  ;;  %5826 = vadd.xlane.f32.xlu0 %v5825_v1  ;;  %v10950_v37 = vsub.f32 %v10551_v2, %v5617_v9  ;;  %v5846_v26 = vsel %vm3252_vm2, %v5718_v49, 0.0 }
 0x744   : > { %v7478_v44 = vpop.eup %7477 }
 0x745   : > { %v6087_v38 = vmul.f32 %v10885_v57, %v6031_v54  ;;  %v6032_v56 = vmul.f32 %v7478_v44, %v10548_v39  ;;  %5829 = vadd.xlane.f32.xlu1 %v5828_v14  ;;  %v5834_v39 = vsel %vm3252_vm2, %v5714_v5, 0.0  ;;  %v5717_v24 = vmul.f32 %v10950_v37, %v10950_v37 }
 0x747   : > { %v6143_v4 = vadd.f32 %v10897_v34, %v6087_v38  ;;  %v6088_v42 = vmul.f32 %v10885_v57, %v6032_v56  ;;  %5832 = vadd.xlane.f32.xlu0 %v5831_v7  ;;  %v5843_v55 = vsel %vm3252_vm2, %v5717_v24, 0.0 }
 0x749   : > { %6193 = vst.msk [vmem:[%s10913_s22 + $0x10] sm:$0xff] %vm3252_vm2, %v6143_v4  ;;  %v6144_v2 = vadd.f32 %v10897_v34, %v6088_v42  ;;  %5835 = vadd.xlane.f32.xlu1 %v5834_v39 }
 0x74b   : > { %6194 = vst.msk [vmem:[%s10913_s22 + $0x18] sm:$0xff] %vm3252_vm2, %v6144_v2  ;;  %5838 = vadd.xlane.f32.xlu0 %v5837_v40 }
 0x74d   : > { %5841 = vadd.xlane.f32.xlu1 %v5840_v27 }
 0x74f   : > { %5844 = vadd.xlane.f32.xlu0 %v5843_v55 }
 0x751   : > { %5847 = vadd.xlane.f32.xlu1 %v5846_v26 }
 0x780   : > { %v5551_v41 = vpop.xlane.xlu0 %5550 }
 0x781   : > { %v5619_v36 = vmul.f32 0.015625, %v5551_v41 }
 0x782   : > { %v5554_v61 = vpop.xlane.xlu1 %5553 }
 0x783   : > { %v10977_v12 = vsub.f32 %v10576_v43, %v5619_v36  ;;  %v5620_v21 = vmul.f32 0.015625, %v5554_v61 }
 0x784   : > { %v5743_v9 = vpop.xlane.xlu0 %5742 }
 0x785   : > { %v10980_v1 = vsub.f32 %v10580_v52, %v5620_v21  ;;  %v5883_v19 = vmul.f32 0.015625, %v5743_v9  ;;  %v5719_v54 = vmul.f32 %v10977_v12, %v10977_v12 }
 0x786   : > { %v5746_v44 = vpop.xlane.xlu1 %5745 }
 0x787   : > { %v5933_v13 = vadd.f32 1e-12, %v5883_v19  ;;  %v5884_v14 = vmul.f32 0.015625, %v5746_v44  ;;  %v5849_v5 = vsel %vm3252_vm2, %v5719_v54, 0.0  ;;  %v5720_v38 = vmul.f32 %v10980_v1, %v10980_v1  ;;  %v11395_v54 = vld [vmem:[#allocation7_spill] sm:$0xff] }
 0x788   : > { %5850 = vadd.xlane.f32.xlu0 %v5849_v5  ;;  %v5557_v43 = vpop.xlane.xlu0 %5556 }
 0x789   : > { %7479 = vrsqrt.f32 %v5933_v13  ;;  %v5934_v56 = vadd.f32 1e-12, %v5884_v14  ;;  %v5621_v7 = vmul.f32 0.015625, %v5557_v43  ;;  %v5852_v52 = vsel %vm3252_vm2, %v5720_v38, 0.0 }
 0x78a   : > { %v5560_v63 = vpop.xlane.xlu1 %5559  ;;  %5853 = vadd.xlane.f32.xlu1 %v5852_v52  ;;  %v11397_v52 = vld [vmem:[#allocation12_spill] sm:$0xff] }
 0x78b   : > { %7481 = vrsqrt.f32 %v5934_v56  ;;  %v10989_v4 = vsub.f32 %v10605_v46, %v5621_v7  ;;  %v5622_v42 = vmul.f32 0.015625, %v5560_v63  ;;  %v11396_v56 = vld [vmem:[#allocation2_spill] sm:$0xff] }
 0x78c   : > { %v5749_v39 = vpop.xlane.xlu0 %5748 }
 0x78d   : > { %v10992_v2 = vsub.f32 %v11394_v48, %v5622_v42  ;;  %v5885_v40 = vmul.f32 0.015625, %v5749_v39  ;;  %v5721_v24 = vmul.f32 %v10989_v4, %v10989_v4 }
 0x78e   : > { %v5752_v27 = vpop.xlane.xlu1 %5751 }
 0x78f   : > { %v5935_v49 = vadd.f32 1e-12, %v5885_v40  ;;  %v5886_v55 = vmul.f32 0.015625, %v5752_v27  ;;  %v5855_v26 = vsel %vm3252_vm2, %v5721_v24, 0.0  ;;  %v5722_v41 = vmul.f32 %v10992_v2, %v10992_v2 }
 0x790   : > { %5856 = vadd.xlane.f32.xlu0 %v5855_v26  ;;  %v5563_v36 = vpop.xlane.xlu0 %5562 }
 0x791   : > { %7483 = vrsqrt.f32 %v5935_v49  ;;  %v5936_v46 = vadd.f32 1e-12, %v5886_v55  ;;  %v5858_v61 = vsel %vm3252_vm2, %v5722_v41, 0.0  ;;  %v5623_v21 = vmul.f32 0.015625, %v5563_v36 }
 0x792   : > { %5859 = vadd.xlane.f32.xlu1 %v5858_v61  ;;  %v5566_v19 = vpop.xlane.xlu1 %5565 }
 0x793   : > { %v7480_v9 = vpop.eup %7479  ;;  %7485 = vrsqrt.f32 %v5936_v46  ;;  %v11002_v13 = vsub.f32 %v10643_v31, %v5623_v21  ;;  %v5624_v14 = vmul.f32 0.015625, %v5566_v19  ;;  %v11398_v19 = vld [vmem:[#allocation3_spill] sm:$0xff] }
 0x794   : > { %v6033_v44 = vmul.f32 %v7480_v9, %v11395_v54  ;;  %v5755_v38 = vpop.xlane.xlu0 %5754 }
 0x795   : > { %v7482_v5 = vpop.eup %7481  ;;  %v11007_v63 = vsub.f32 %v11397_v52, %v5624_v14  ;;  %v5887_v42 = vmul.f32 0.015625, %v5755_v38  ;;  %v5723_v48 = vmul.f32 %v11002_v13, %v11002_v13 }
 0x796   : > { %v6089_v43 = vmul.f32 %v10885_v57, %v6033_v44  ;;  %v6034_v7 = vmul.f32 %v7482_v5, %v11396_v56  ;;  %v5758_v39 = vpop.xlane.xlu1 %5757 }
 0x797   : > { %v5937_v24 = vadd.f32 1e-12, %v5887_v42  ;;  %v5888_v27 = vmul.f32 0.015625, %v5758_v39  ;;  %v5861_v49 = vsel %vm3252_vm2, %v5723_v48, 0.0  ;;  %v5724_v26 = vmul.f32 %v11007_v63, %v11007_v63 }
 0x798   : > { %v6145_v40 = vadd.f32 %v10897_v34, %v6089_v43  ;;  %v6090_v31 = vmul.f32 %v10885_v57, %v6034_v7  ;;  %v5569_v55 = vpop.xlane.xlu0 %5568  ;;  %5862 = vadd.xlane.f32.xlu0 %v5861_v49  ;;  %v11399_v43 = vld [vmem:[#allocation8_spill] sm:$0xff]  ;;  %v11400_v7 = vld [vmem:[#allocation13_spill] sm:$0xff] }
 0x799   : > { %7487 = vrsqrt.f32 %v5937_v24  ;;  %v5938_v46 = vadd.f32 1e-12, %v5888_v27  ;;  %v5625_v36 = vmul.f32 0.015625, %v5569_v55  ;;  %v5864_v9 = vsel %vm3252_vm2, %v5724_v26, 0.0 }
 0x79a   : > { %6195 = vst.msk [vmem:[%s10913_s22 + $0x20] sm:$0xff] %vm3252_vm2, %v6145_v40  ;;  %v6146_v41 = vadd.f32 %v10897_v34, %v6090_v31  ;;  %v5572_v21 = vpop.xlane.xlu1 %5571  ;;  %5865 = vadd.xlane.f32.xlu1 %v5864_v9 }
 0x79b   : > { %v7484_v61 = vpop.eup %7483  ;;  %7489 = vrsqrt.f32 %v5938_v46  ;;  %v11024_v44 = vsub.f32 %v10668_v62, %v5625_v36  ;;  %v5626_v14 = vmul.f32 0.015625, %v5572_v21  ;;  %v11401_v36 = vld [vmem:[#allocation10_spill] sm:$0xff] }
 0x79c   : > { %6196 = vst.msk [vmem:[%s10913_s22 + $0x28] sm:$0xff] %vm3252_vm2, %v6146_v41  ;;  %v6035_v54 = vmul.f32 %v7484_v61, %v11398_v19 }
 0x79d   : > { %v7486_v5 = vpop.eup %7485  ;;  %v11029_v52 = vsub.f32 %v11400_v7, %v5626_v14  ;;  %v5725_v42 = vmul.f32 %v11024_v44, %v11024_v44 }
 0x79e   : > { %v6091_v38 = vmul.f32 %v10885_v57, %v6035_v54  ;;  %v6036_v56 = vmul.f32 %v7486_v5, %v11399_v43 }
 0x79f   : > { %v5867_v62 = vsel %vm3252_vm2, %v5725_v42, 0.0  ;;  %v5726_v40 = vmul.f32 %v11029_v52, %v11029_v52 }
 0x7a0   : > { %v6147_v39 = vadd.f32 %v10897_v34, %v6091_v38  ;;  %v6092_v48 = vmul.f32 %v10885_v57, %v6036_v56  ;;  %5868 = vadd.xlane.f32.xlu0 %v5867_v62  ;;  %v5575_v31 = vpop.xlane.xlu0 %5574  ;;  %v11402_v38 = vld [vmem:[#allocation11_spill] sm:$0xff] }
 0x7a1   : > { %v5627_v27 = vmul.f32 0.015625, %v5575_v31  ;;  %v5870_v49 = vsel %vm3252_vm2, %v5726_v40, 0.0 }
 0x7a2   : > { %6197 = vst.msk [vmem:[%s10913_s22 + $0x30] sm:$0xff] %vm3252_vm2, %v6147_v39  ;;  %v6148_v24 = vadd.f32 %v10897_v34, %v6092_v48  ;;  %5871 = vadd.xlane.f32.xlu1 %v5870_v49  ;;  %v5578_v55 = vpop.xlane.xlu1 %5577 }
 0x7a3   : > { %v7488_v26 = vpop.eup %7487  ;;  %v11045_v41 = vsub.f32 %v10699_v32, %v5627_v27  ;;  %v5628_v46 = vmul.f32 0.015625, %v5578_v55 }
 0x7a4   : > { %6198 = vst.msk [vmem:[%s10913_s22 + $0x38] sm:$0xff] %vm3252_vm2, %v6148_v24  ;;  %v6037_v61 = vmul.f32 %v7488_v26, %v11401_v36  ;;  %v5761_v21 = vpop.xlane.xlu0 %5760 }
 0x7a5   : > { %v7490_v9 = vpop.eup %7489  ;;  %v11049_v19 = vsub.f32 %v10711_v8, %v5628_v46  ;;  %v5889_v54 = vmul.f32 0.015625, %v5761_v21  ;;  %v5727_v14 = vmul.f32 %v11045_v41, %v11045_v41 }
 0x7a6   : > { %v6093_v5 = vmul.f32 %v10885_v57, %v6037_v61  ;;  %v6038_v43 = vmul.f32 %v7490_v9, %v11402_v38  ;;  %v5764_v56 = vpop.xlane.xlu1 %5763 }
 0x7a7   : > { %v5939_v32 = vadd.f32 1e-12, %v5889_v54  ;;  %v5890_v7 = vmul.f32 0.015625, %v5764_v56  ;;  %v5873_v42 = vsel %vm3252_vm2, %v5727_v14, 0.0  ;;  %v5728_v39 = vmul.f32 %v11049_v19, %v11049_v19 }
 0x7a8   : > { %v6149_v8 = vadd.f32 %v10897_v34, %v6093_v5  ;;  %v6094_v48 = vmul.f32 %v10885_v57, %v6038_v43  ;;  %5874 = vadd.xlane.f32.xlu0 %v5873_v42  ;;  %v5767_v62 = vpop.xlane.xlu0 %5766 }
 0x7a9   : > { %7491 = vrsqrt.f32 %v5939_v32  ;;  %v5940_v40 = vadd.f32 1e-12, %v5890_v7  ;;  %v5891_v31 = vmul.f32 0.015625, %v5767_v62  ;;  %v5876_v24 = vsel %vm3252_vm2, %v5728_v39, 0.0 }
 0x7aa   : > { %6199 = vst.msk [vmem:[%s10913_s22 + $0x40] sm:$0xff] %vm3252_vm2, %v6149_v8  ;;  %v6150_v27 = vadd.f32 %v10897_v34, %v6094_v48  ;;  %5877 = vadd.xlane.f32.xlu1 %v5876_v24  ;;  %v5770_v49 = vpop.xlane.xlu1 %5769 }
 0x7ab   : > { %7493 = vrsqrt.f32 %v5940_v40  ;;  %v5941_v55 = vadd.f32 1e-12, %v5891_v31  ;;  %v5892_v26 = vmul.f32 0.015625, %v5770_v49 }
 0x7ac   : > { %6200 = vst.msk [vmem:[%s10913_s22 + $0x48] sm:$0xff] %vm3252_vm2, %v6150_v27  ;;  %v5773_v46 = vpop.xlane.xlu0 %5772 }
 0x7ad   : > { %7495 = vrsqrt.f32 %v5941_v55  ;;  %v5942_v36 = vadd.f32 1e-12, %v5892_v26  ;;  %v5893_v61 = vmul.f32 0.015625, %v5773_v46 }
 0x7ae   : > { %v5776_v21 = vpop.xlane.xlu1 %5775 }
 0x7af   : > { %7497 = vrsqrt.f32 %v5942_v36  ;;  %v5943_v9 = vadd.f32 1e-12, %v5893_v61  ;;  %v5894_v54 = vmul.f32 0.015625, %v5776_v21 }
 0x7b0   : > { %v5779_v14 = vpop.xlane.xlu0 %5778 }
 0x7b1   : > { %7499 = vrsqrt.f32 %v5943_v9  ;;  %v5944_v5 = vadd.f32 1e-12, %v5894_v54  ;;  %v5895_v38 = vmul.f32 0.015625, %v5779_v14 }
 0x7b2   : > { %v5782_v43 = vpop.xlane.xlu1 %5781 }
 0x7b3   : > { %v7492_v56 = vpop.eup %7491  ;;  %7501 = vrsqrt.f32 %v5944_v5  ;;  %v5945_v32 = vadd.f32 1e-12, %v5895_v38  ;;  %v5896_v7 = vmul.f32 0.015625, %v5782_v43 }
 0x7b4   : > { %v6039_v42 = vmul.f32 %v7492_v56, %v10686_v23  ;;  %v5785_v39 = vpop.xlane.xlu0 %5784 }
 0x7b5   : > { %v7494_v8 = vpop.eup %7493  ;;  %7503 = vrsqrt.f32 %v5945_v32  ;;  %v5946_v48 = vadd.f32 1e-12, %v5896_v7  ;;  %v5897_v62 = vmul.f32 0.015625, %v5785_v39 }
 0x7b6   : > { %v6095_v40 = vmul.f32 %v10885_v57, %v6039_v42  ;;  %v6040_v31 = vmul.f32 %v7494_v8, %v10695_v25  ;;  %v5788_v24 = vpop.xlane.xlu1 %5787 }
 0x7b7   : > { %v7496_v27 = vpop.eup %7495  ;;  %7505 = vrsqrt.f32 %v5946_v48  ;;  %v5947_v49 = vadd.f32 1e-12, %v5897_v62  ;;  %v5898_v55 = vmul.f32 0.015625, %v5788_v24 }
 0x7b8   : > { %v6151_v26 = vadd.f32 %v10897_v34, %v6095_v40  ;;  %v6096_v46 = vmul.f32 %v10885_v57, %v6040_v31  ;;  %v6041_v23 = vmul.f32 %v7496_v27, %v10707_v58  ;;  %v5791_v36 = vpop.xlane.xlu0 %5790  ;;  %v11403_v40 = vld [vmem:[#allocation14_spill] sm:$0xff] }
 0x7b9   : > { %v7498_v61 = vpop.eup %7497  ;;  %7507 = vrsqrt.f32 %v5947_v49  ;;  %v5948_v21 = vadd.f32 1e-12, %v5898_v55  ;;  %v5899_v9 = vmul.f32 0.015625, %v5791_v36 }
 0x7ba   : > { %6201 = vst.msk [vmem:[%s10913_s22 + $0x50] sm:$0xff] %vm3252_vm2, %v6151_v26  ;;  %v6152_v25 = vadd.f32 %v10897_v34, %v6096_v46  ;;  %v6097_v54 = vmul.f32 %v10885_v57, %v6041_v23  ;;  %v6042_v14 = vmul.f32 %v7498_v61, %v10718_v20  ;;  %v5794_v5 = vpop.xlane.xlu1 %5793 }
 0x7bb   : > { %v7500_v38 = vpop.eup %7499  ;;  %7509 = vrsqrt.f32 %v5948_v21  ;;  %v5949_v43 = vadd.f32 1e-12, %v5899_v9  ;;  %v5900_v56 = vmul.f32 0.015625, %v5794_v5 }
 0x7bc   : > { %6202 = vst.msk [vmem:[%s10913_s22 + $0x58] sm:$0xff] %vm3252_vm2, %v6152_v25  ;;  %v6153_v58 = vadd.f32 %v10897_v34, %v6097_v54  ;;  %v6098_v32 = vmul.f32 %v10885_v57, %v6042_v14  ;;  %v6043_v7 = vmul.f32 %v7500_v38, %v10728_v11  ;;  %v5797_v42 = vpop.xlane.xlu0 %5796 }
 0x7bd   : > { %v7502_v39 = vpop.eup %7501  ;;  %7511 = vrsqrt.f32 %v5949_v43  ;;  %v5950_v8 = vadd.f32 1e-12, %v5900_v56  ;;  %v5901_v48 = vmul.f32 0.015625, %v5797_v42 }
 0x7be   : > { %6203 = vst.msk [vmem:[%s10913_s22 + $0x60] sm:$0xff] %vm3252_vm2, %v6153_v58  ;;  %v6154_v20 = vadd.f32 %v10897_v34, %v6098_v32  ;;  %v6099_v62 = vmul.f32 %v10885_v57, %v6043_v7  ;;  %v6044_v31 = vmul.f32 %v7502_v39, %v11403_v40  ;;  %v5800_v24 = vpop.xlane.xlu1 %5799 }
 0x7bf   : > { %v7504_v27 = vpop.eup %7503  ;;  %7513 = vrsqrt.f32 %v5950_v8  ;;  %v5951_v49 = vadd.f32 1e-12, %v5901_v48  ;;  %v5902_v55 = vmul.f32 0.015625, %v5800_v24 }
 0x7c0   : > { %6204 = vst.msk [vmem:[%s10913_s22 + $0x68] sm:$0xff] %vm3252_vm2, %v6154_v20  ;;  %v6155_v11 = vadd.f32 %v10897_v34, %v6099_v62  ;;  %v6100_v26 = vmul.f32 %v10885_v57, %v6044_v31  ;;  %v6045_v46 = vmul.f32 %v7504_v27, %v10746_v15  ;;  %v5803_v23 = vpop.xlane.xlu0 %5802 }
 0x7c1   : > { %v7506_v36 = vpop.eup %7505  ;;  %7515 = vrsqrt.f32 %v5951_v49  ;;  %v5952_v61 = vadd.f32 1e-12, %v5902_v55  ;;  %v5903_v21 = vmul.f32 0.015625, %v5803_v23  ;;  %v11404_v23 = vld [vmem:[#allocation15_spill] sm:$0xff] }
 0x7c2   : > { %6205 = vst.msk [vmem:[%s10913_s22 + $0x70] sm:$0xff] %vm3252_vm2, %v6155_v11  ;;  %v6156_v9 = vadd.f32 %v10897_v34, %v6100_v26  ;;  %v6101_v25 = vmul.f32 %v10885_v57, %v6045_v46  ;;  %v6046_v54 = vmul.f32 %v7506_v36, %v10755_v35  ;;  %v5806_v14 = vpop.xlane.xlu1 %5805 }
 0x7c3   : > { %v7508_v5 = vpop.eup %7507  ;;  %7517 = vrsqrt.f32 %v5952_v61  ;;  %v5953_v38 = vadd.f32 1e-12, %v5903_v21  ;;  %v5904_v43 = vmul.f32 0.015625, %v5806_v14  ;;  %v11405_v14 = vld [vmem:[#allocation16_spill] sm:$0xff] }
 0x7c4   : > { %6206 = vst.msk [vmem:[%s10913_s22 + $0x78] sm:$0xff] %vm3252_vm2, %v6156_v9  ;;  %v6157_v15 = vadd.f32 %v10897_v34, %v6101_v25  ;;  %v6102_v56 = vmul.f32 %v10885_v57, %v6046_v54  ;;  %v6047_v58 = vmul.f32 %v7508_v5, %v10764_v29  ;;  %v5809_v32 = vpop.xlane.xlu0 %5808 }
 0x7c5   : > { %v7510_v7 = vpop.eup %7509  ;;  %7519 = vrsqrt.f32 %v5953_v38  ;;  %v5954_v42 = vadd.f32 1e-12, %v5904_v43  ;;  %v5905_v39 = vmul.f32 0.015625, %v5809_v32 }
 0x7c6   : > { %6207 = vst.msk [vmem:[%s10913_s22 + $0x80] sm:$0xff] %vm3252_vm2, %v6157_v15  ;;  %v6158_v35 = vadd.f32 %v10897_v34, %v6102_v56  ;;  %v6103_v8 = vmul.f32 %v10885_v57, %v6047_v58  ;;  %v6048_v48 = vmul.f32 %v7510_v7, %v10773_v17  ;;  %v5812_v20 = vpop.xlane.xlu1 %5811 }
 0x7c7   : > { %v7512_v62 = vpop.eup %7511  ;;  %7521 = vrsqrt.f32 %v5954_v42  ;;  %v5955_v40 = vadd.f32 1e-12, %v5905_v39  ;;  %v5906_v31 = vmul.f32 0.015625, %v5812_v20 }
 0x7c8   : > { %6208 = vst.msk [vmem:[%s10913_s22 + $0x88] sm:$0xff] %vm3252_vm2, %v6158_v35  ;;  %v6159_v29 = vadd.f32 %v10897_v34, %v6103_v8  ;;  %v6104_v24 = vmul.f32 %v10885_v57, %v6048_v48  ;;  %v6049_v27 = vmul.f32 %v7512_v62, %v10782_v18  ;;  %v5815_v49 = vpop.xlane.xlu0 %5814 }
 0x7c9   : > { %v7514_v55 = vpop.eup %7513  ;;  %7523 = vrsqrt.f32 %v5955_v40  ;;  %v5956_v11 = vadd.f32 1e-12, %v5906_v31  ;;  %v5907_v26 = vmul.f32 0.015625, %v5815_v49 }
 0x7ca   : > { %6209 = vst.msk [vmem:[%s10913_s22 + $0x90] sm:$0xff] %vm3252_vm2, %v6159_v29  ;;  %v6160_v17 = vadd.f32 %v10897_v34, %v6104_v24  ;;  %v6105_v46 = vmul.f32 %v10885_v57, %v6049_v27  ;;  %v6050_v36 = vmul.f32 %v7514_v55, %v11404_v23  ;;  %v5818_v61 = vpop.xlane.xlu1 %5817 }
 0x7cb   : > { %v7516_v21 = vpop.eup %7515  ;;  %7525 = vrsqrt.f32 %v5956_v11  ;;  %v5957_v9 = vadd.f32 1e-12, %v5907_v26  ;;  %v5908_v25 = vmul.f32 0.015625, %v5818_v61 }
 0x7cc   : > { %6210 = vst.msk [vmem:[%s10913_s22 + $0x98] sm:$0xff] %vm3252_vm2, %v6160_v17  ;;  %v6161_v18 = vadd.f32 %v10897_v34, %v6105_v46  ;;  %v6106_v54 = vmul.f32 %v10885_v57, %v6050_v36  ;;  %v6051_v5 = vmul.f32 %v7516_v21, %v11405_v14  ;;  %v5821_v38 = vpop.xlane.xlu0 %5820 }
 0x7cd   : > { %v7518_v43 = vpop.eup %7517  ;;  %7527 = vrsqrt.f32 %v5957_v9  ;;  %v5958_v15 = vadd.f32 1e-12, %v5908_v25  ;;  %v5909_v56 = vmul.f32 0.015625, %v5821_v38 }
 0x7ce   : > { %6211 = vst.msk [vmem:[%s10913_s22 + $0xa0] sm:$0xff] %vm3252_vm2, %v6161_v18  ;;  %v6162_v58 = vadd.f32 %v10897_v34, %v6106_v54  ;;  %v6107_v32 = vmul.f32 %v10885_v57, %v6051_v5  ;;  %v6052_v7 = vmul.f32 %v7518_v43, %v10809_v50  ;;  %v5824_v42 = vpop.xlane.xlu1 %5823 }
 0x7cf   : > { %v7520_v39 = vpop.eup %7519  ;;  %7529 = vrsqrt.f32 %v5958_v15  ;;  %v5959_v35 = vadd.f32 1e-12, %v5909_v56  ;;  %v5910_v8 = vmul.f32 0.015625, %v5824_v42 }
 0x7d0   : > { %6212 = vst.msk [vmem:[%s10913_s22 + $0xa8] sm:$0xff] %vm3252_vm2, %v6162_v58  ;;  %v6163_v48 = vadd.f32 %v10897_v34, %v6107_v32  ;;  %v6108_v20 = vmul.f32 %v10885_v57, %v6052_v7  ;;  %v6053_v62 = vmul.f32 %v7520_v39, %v10819_v22  ;;  %v5827_v40 = vpop.xlane.xlu0 %5826 }
 0x7d1   : > { %v7522_v31 = vpop.eup %7521  ;;  %7531 = vrsqrt.f32 %v5959_v35  ;;  %v5960_v29 = vadd.f32 1e-12, %v5910_v8  ;;  %v5911_v24 = vmul.f32 0.015625, %v5827_v40 }
 0x7d2   : > { %6213 = vst.msk [vmem:[%s10913_s22 + $0xb0] sm:$0xff] %vm3252_vm2, %v6163_v48  ;;  %v6164_v50 = vadd.f32 %v10897_v34, %v6108_v20  ;;  %v6109_v27 = vmul.f32 %v10885_v57, %v6053_v62  ;;  %v6054_v49 = vmul.f32 %v7522_v31, %v10826_v51  ;;  %v5830_v55 = vpop.xlane.xlu1 %5829 }
 0x7d3   : > { %v7524_v11 = vpop.eup %7523  ;;  %7533 = vrsqrt.f32 %v5960_v29  ;;  %v5961_v26 = vadd.f32 1e-12, %v5911_v24  ;;  %v5912_v17 = vmul.f32 0.015625, %v5830_v55 }
 0x7d4   : > { %6214 = vst.msk [vmem:[%s10913_s22 + $0xb8] sm:$0xff] %vm3252_vm2, %v6164_v50  ;;  %v6165_v22 = vadd.f32 %v10897_v34, %v6109_v27  ;;  %v6110_v46 = vmul.f32 %v10885_v57, %v6054_v49  ;;  %v6055_v23 = vmul.f32 %v7524_v11, %v10832_v30  ;;  %v5833_v36 = vpop.xlane.xlu0 %5832 }
 0x7d5   : > { %v7526_v61 = vpop.eup %7525  ;;  %7535 = vrsqrt.f32 %v5961_v26  ;;  %v5962_v21 = vadd.f32 1e-12, %v5912_v17  ;;  %v5913_v9 = vmul.f32 0.015625, %v5833_v36 }
 0x7d6   : > { %6215 = vst.msk [vmem:[%s10913_s22 + $0xc0] sm:$0xff] %vm3252_vm2, %v6165_v22  ;;  %v6166_v51 = vadd.f32 %v10897_v34, %v6110_v46  ;;  %v6111_v25 = vmul.f32 %v10885_v57, %v6055_v23  ;;  %v6056_v18 = vmul.f32 %v7526_v61, %v10839_v33  ;;  %v5836_v54 = vpop.xlane.xlu1 %5835 }
 0x7d7   : > { %v7528_v14 = vpop.eup %7527  ;;  %7537 = vrsqrt.f32 %v5962_v21  ;;  %v5963_v5 = vadd.f32 1e-12, %v5913_v9  ;;  %v5914_v38 = vmul.f32 0.015625, %v5836_v54 }
 0x7d8   : > { %6216 = vst.msk [vmem:[%s10913_s22 + $0xc8] sm:$0xff] %vm3252_vm2, %v6166_v51  ;;  %v6167_v30 = vadd.f32 %v10897_v34, %v6111_v25  ;;  %v6112_v43 = vmul.f32 %v10885_v57, %v6056_v18  ;;  %v6057_v15 = vmul.f32 %v7528_v14, %v10848_v3  ;;  %v5839_v56 = vpop.xlane.xlu0 %5838 }
 0x7d9   : > { %v7530_v58 = vpop.eup %7529  ;;  %7539 = vrsqrt.f32 %v5963_v5  ;;  %v5964_v32 = vadd.f32 1e-12, %v5914_v38  ;;  %v5915_v7 = vmul.f32 0.015625, %v5839_v56 }
 0x7da   : > { %6217 = vst.msk [vmem:[%s10913_s22 + $0xd0] sm:$0xff] %vm3252_vm2, %v6167_v30  ;;  %v6168_v33 = vadd.f32 %v10897_v34, %v6112_v43  ;;  %v6113_v42 = vmul.f32 %v10885_v57, %v6057_v15  ;;  %v6058_v39 = vmul.f32 %v7530_v58, %v10857_v0  ;;  %v5842_v35 = vpop.xlane.xlu1 %5841 }
 0x7db   : > { %v7532_v8 = vpop.eup %7531  ;;  %7541 = vrsqrt.f32 %v5964_v32  ;;  %v5965_v48 = vadd.f32 1e-12, %v5915_v7  ;;  %v5916_v20 = vmul.f32 0.015625, %v5842_v35 }
 0x7dc   : > { %6218 = vst.msk [vmem:[%s10913_s22 + $0xd8] sm:$0xff] %vm3252_vm2, %v6168_v33  ;;  %v6169_v3 = vadd.f32 %v10897_v34, %v6113_v42  ;;  %v6114_v62 = vmul.f32 %v10885_v57, %v6058_v39  ;;  %v6059_v40 = vmul.f32 %v7532_v8, %v10867_v6  ;;  %v5845_v31 = vpop.xlane.xlu0 %5844 }
 0x7dd   : > { %v7534_v29 = vpop.eup %7533  ;;  %7543 = vrsqrt.f32 %v5965_v48  ;;  %v5966_v24 = vadd.f32 1e-12, %v5916_v20  ;;  %v5917_v50 = vmul.f32 0.015625, %v5845_v31 }
 0x7de   : > { %6219 = vst.msk [vmem:[%s10913_s22 + $0xe0] sm:$0xff] %vm3252_vm2, %v6169_v3  ;;  %v6170_v0 = vadd.f32 %v10897_v34, %v6114_v62  ;;  %v6115_v27 = vmul.f32 %v10885_v57, %v6059_v40  ;;  %v6060_v49 = vmul.f32 %v7534_v29, %v10874_v60  ;;  %v5848_v55 = vpop.xlane.xlu1 %5847 }
 0x7df   : > { %v7536_v11 = vpop.eup %7535  ;;  %7545 = vrsqrt.f32 %v5966_v24  ;;  %v5967_v26 = vadd.f32 1e-12, %v5917_v50  ;;  %v5918_v6 = vmul.f32 0.015625, %v5848_v55 }
 0x7e0   : > { %6220 = vst.msk [vmem:[%s10913_s22 + $0xe8] sm:$0xff] %vm3252_vm2, %v6170_v0  ;;  %v6171_v17 = vadd.f32 %v10897_v34, %v6115_v27  ;;  %v6116_v22 = vmul.f32 %v10885_v57, %v6060_v49  ;;  %v6061_v46 = vmul.f32 %v7536_v11, %v10879_v10 }
 0x7e1   : > { %v7538_v23 = vpop.eup %7537  ;;  %7547 = vrsqrt.f32 %v5967_v26  ;;  %v5968_v36 = vadd.f32 1e-12, %v5918_v6 }
 0x7e2   : > { %6221 = vst.msk [vmem:[%s10913_s22 + $0xf0] sm:$0xff] %vm3252_vm2, %v6171_v17  ;;  %v6172_v60 = vadd.f32 %v10897_v34, %v6116_v22  ;;  %v6117_v61 = vmul.f32 %v10885_v57, %v6061_v46  ;;  %v6062_v21 = vmul.f32 %v7538_v23, %v10891_v16 }
 0x7e3   : > { %v7540_v9 = vpop.eup %7539  ;;  %7549 = vrsqrt.f32 %v5968_v36 }
 0x7e4   : > { %6222 = vst.msk [vmem:[%s10913_s22 + $0xf8] sm:$0xff] %vm3252_vm2, %v6172_v60  ;;  %v6173_v51 = vadd.f32 %v10897_v34, %v6117_v61  ;;  %v6118_v10 = vmul.f32 %v10885_v57, %v6062_v21  ;;  %v6063_v25 = vmul.f32 %v7540_v9, %v10905_v28 }
 0x7e5   : > { %v7542_v18 = vpop.eup %7541 }
 0x7e6   : > { %6223 = vst.msk [vmem:[%s10913_s22 + $0x100] sm:$0xff] %vm3252_vm2, %v6173_v51  ;;  %v6174_v54 = vadd.f32 %v10897_v34, %v6118_v10  ;;  %v6119_v14 = vmul.f32 %v10885_v57, %v6063_v25  ;;  %v6064_v16 = vmul.f32 %v7542_v18, %v10921_v53 }
 0x7e7   : > { %v7544_v5 = vpop.eup %7543 }
 0x7e8   : > { %6224 = vst.msk [vmem:[%s10913_s22 + $0x108] sm:$0xff] %vm3252_vm2, %v6174_v54  ;;  %v6175_v38 = vadd.f32 %v10897_v34, %v6119_v14  ;;  %v6120_v30 = vmul.f32 %v10885_v57, %v6064_v16  ;;  %v6065_v28 = vmul.f32 %v7544_v5, %v10931_v59 }
 0x7e9   : > { %v7546_v43 = vpop.eup %7545 }
 0x7ea   : > { %6225 = vst.msk [vmem:[%s10913_s22 + $0x110] sm:$0xff] %vm3252_vm2, %v6175_v38  ;;  %v6176_v15 = vadd.f32 %v10897_v34, %v6120_v30  ;;  %v6121_v56 = vmul.f32 %v10885_v57, %v6065_v28  ;;  %v6066_v53 = vmul.f32 %v7546_v43, %v10941_v45 }
 0x7eb   : > { %v7548_v58 = vpop.eup %7547 }
 0x7ec   : > { %6226 = vst.msk [vmem:[%s10913_s22 + $0x118] sm:$0xff] %vm3252_vm2, %v6176_v15  ;;  %v6177_v32 = vadd.f32 %v10897_v34, %v6121_v56  ;;  %v6122_v7 = vmul.f32 %v10885_v57, %v6066_v53  ;;  %v6067_v59 = vmul.f32 %v7548_v58, %v10950_v37 }
 0x7ed   : > { %v7550_v33 = vpop.eup %7549 }
 0x7ee   : > { %6227 = vst.msk [vmem:[%s10913_s22 + $0x120] sm:$0xff] %vm3252_vm2, %v6177_v32  ;;  %v6178_v42 = vadd.f32 %v10897_v34, %v6122_v7  ;;  %v6123_v39 = vmul.f32 %v10885_v57, %v6067_v59  ;;  %v6068_v35 = vmul.f32 %v7550_v33, %v10958_v47 }
 0x7f0   : > { %6228 = vst.msk [vmem:[%s10913_s22 + $0x128] sm:$0xff] %vm3252_vm2, %v6178_v42  ;;  %v6179_v45 = vadd.f32 %v10897_v34, %v6123_v39  ;;  %v6124_v8 = vmul.f32 %v10885_v57, %v6068_v35  ;;  %v7626_v39 = vld [vmem:[%s11278_s13] ss:$0 sm:$0xff] }
 0x7f2   : > { %6229 = vst.msk [vmem:[%s10913_s22 + $0x130] sm:$0xff] %vm3252_vm2, %v6179_v45  ;;  %v6180_v48 = vadd.f32 %v10897_v34, %v6124_v8 }
 0x7f4   : > { %6230 = vst.msk [vmem:[%s10913_s22 + $0x138] sm:$0xff] %vm3252_vm2, %v6180_v48 }
 0x815   : > { %v5851_v37 = vpop.xlane.xlu0 %5850 }
 0x816   : > { %v5919_v20 = vmul.f32 0.015625, %v5851_v37 }
 0x817   : > { %v5854_v3 = vpop.xlane.xlu1 %5853 }
 0x818   : > { %v5969_v62 = vadd.f32 1e-12, %v5919_v20  ;;  %v5920_v40 = vmul.f32 0.015625, %v5854_v3 }
 0x81a   : > { %7551 = vrsqrt.f32 %v5969_v62  ;;  %v5970_v31 = vadd.f32 1e-12, %v5920_v40 }
 0x81c   : > { %7553 = vrsqrt.f32 %v5970_v31 }
 0x81d   : > { %v5857_v47 = vpop.xlane.xlu0 %5856 }
 0x81e   : > { %v5921_v29 = vmul.f32 0.015625, %v5857_v47 }
 0x81f   : > { %v5860_v24 = vpop.xlane.xlu1 %5859 }
 0x820   : > { %v5971_v50 = vadd.f32 1e-12, %v5921_v29  ;;  %v5922_v0 = vmul.f32 0.015625, %v5860_v24 }
 0x822   : > { %7555 = vrsqrt.f32 %v5971_v50  ;;  %v5972_v27 = vadd.f32 1e-12, %v5922_v0 }
 0x824   : > { %v7552_v49 = vpop.eup %7551  ;;  %7557 = vrsqrt.f32 %v5972_v27 }
 0x825   : > { %v6069_v55 = vmul.f32 %v7552_v49, %v10977_v12  ;;  %v5863_v17 = vpop.xlane.xlu0 %5862 }
 0x826   : > { %v7554_v11 = vpop.eup %7553  ;;  %v5923_v22 = vmul.f32 0.015625, %v5863_v17 }
 0x827   : > { %v6125_v26 = vmul.f32 %v10885_v57, %v6069_v55  ;;  %v6070_v6 = vmul.f32 %v7554_v11, %v10980_v1  ;;  %v5866_v36 = vpop.xlane.xlu1 %5865 }
 0x828   : > { %v5973_v60 = vadd.f32 1e-12, %v5923_v22  ;;  %v5924_v61 = vmul.f32 0.015625, %v5866_v36 }
 0x829   : > { %v6181_v46 = vadd.f32 %v10897_v34, %v6125_v26  ;;  %v6126_v23 = vmul.f32 %v10885_v57, %v6070_v6 }
 0x82a   : > { %7559 = vrsqrt.f32 %v5973_v60  ;;  %v5974_v9 = vadd.f32 1e-12, %v5924_v61 }
 0x82b   : > { %6231 = vst.msk [vmem:[%s10913_s22 + $0x140] sm:$0xff] %vm3252_vm2, %v6181_v46  ;;  %v6182_v21 = vadd.f32 %v10897_v34, %v6126_v23 }
 0x82c   : > { %v7556_v12 = vpop.eup %7555  ;;  %7561 = vrsqrt.f32 %v5974_v9 }
 0x82d   : > { %6232 = vst.msk [vmem:[%s10913_s22 + $0x148] sm:$0xff] %vm3252_vm2, %v6182_v21  ;;  %v6071_v1 = vmul.f32 %v7556_v12, %v10989_v4  ;;  %v5869_v10 = vpop.xlane.xlu0 %5868 }
 0x82e   : > { %v7558_v51 = vpop.eup %7557  ;;  %v5925_v54 = vmul.f32 0.015625, %v5869_v10 }
 0x82f   : > { %v6127_v25 = vmul.f32 %v10885_v57, %v6071_v1  ;;  %v6072_v18 = vmul.f32 %v7558_v51, %v10992_v2  ;;  %v5872_v14 = vpop.xlane.xlu1 %5871 }
 0x830   : > { %v5975_v38 = vadd.f32 1e-12, %v5925_v54  ;;  %v5926_v30 = vmul.f32 0.015625, %v5872_v14 }
 0x831   : > { %v6183_v16 = vadd.f32 %v10897_v34, %v6127_v25  ;;  %v6128_v5 = vmul.f32 %v10885_v57, %v6072_v18 }
 0x832   : > { %7563 = vrsqrt.f32 %v5975_v38  ;;  %v5976_v28 = vadd.f32 1e-12, %v5926_v30 }
 0x833   : > { %6233 = vst.msk [vmem:[%s10913_s22 + $0x150] sm:$0xff] %vm3252_vm2, %v6183_v16  ;;  %v6184_v4 = vadd.f32 %v10897_v34, %v6128_v5 }
 0x834   : > { %7565 = vrsqrt.f32 %v5976_v28  ;;  %v7560_v43 = vpop.eup %7559 }
 0x835   : > { %6234 = vst.msk [vmem:[%s10913_s22 + $0x158] sm:$0xff] %vm3252_vm2, %v6184_v4  ;;  %v5875_v2 = vpop.xlane.xlu0 %5874  ;;  %v6073_v15 = vmul.f32 %v7560_v43, %v11002_v13 }
 0x836   : > { %v5927_v56 = vmul.f32 0.015625, %v5875_v2  ;;  %v7562_v53 = vpop.eup %7561 }
 0x837   : > { %v5878_v58 = vpop.xlane.xlu1 %5877  ;;  %v6129_v32 = vmul.f32 %v10885_v57, %v6073_v15  ;;  %v6074_v7 = vmul.f32 %v7562_v53, %v11007_v63  ;;  %v7627_v57 = vld [vmem:[%s11279_s14] ss:$0 sm:$0xff] }
 0x838   : > { %v5977_v59 = vadd.f32 1e-12, %v5927_v56  ;;  %v5928_v33 = vmul.f32 0.015625, %v5878_v58 }
 0x839   : > { %v6185_v42 = vadd.f32 %v10897_v34, %v6129_v32  ;;  %v6130_v35 = vmul.f32 %v7626_v39, %v6074_v7 }
 0x83a   : > { %7567 = vrsqrt.f32 %v5977_v59  ;;  %v5978_v13 = vadd.f32 1e-12, %v5928_v33 }
 0x83b   : > { %6235 = vst.msk [vmem:[%s10913_s22 + $0x160] sm:$0xff] %vm3252_vm2, %v6185_v42  ;;  %v6186_v63 = vadd.f32 %v7627_v57, %v6130_v35 }
 0x83c   : > { %v7564_v45 = vpop.eup %7563  ;;  %7569 = vrsqrt.f32 %v5978_v13 }
 0x83d   : > { %v6075_v34 = vmul.f32 %v7564_v45, %v11024_v44  ;;  %6236 = vst.msk [vmem:[%s10913_s22 + $0x168] sm:$0xff] %vm3252_vm2, %v6186_v63 }
 0x83e   : > { %v7566_v8 = vpop.eup %7565 }
 0x83f   : > { %v6131_v48 = vmul.f32 %v7626_v39, %v6075_v34  ;;  %v6076_v37 = vmul.f32 %v7566_v8, %v11029_v52 }
 0x841   : > { %v6187_v20 = vadd.f32 %v7627_v57, %v6131_v48  ;;  %v6132_v3 = vmul.f32 %v7626_v39, %v6076_v37 }
 0x843   : > { %6237 = vst.msk [vmem:[%s10913_s22 + $0x170] sm:$0xff] %vm3252_vm2, %v6187_v20  ;;  %v6188_v62 = vadd.f32 %v7627_v57, %v6132_v3 }
 0x844   : > { %v7568_v40 = vpop.eup %7567 }
 0x845   : > { %6238 = vst.msk [vmem:[%s10913_s22 + $0x178] sm:$0xff] %vm3252_vm2, %v6188_v62  ;;  %v6077_v31 = vmul.f32 %v7568_v40, %v11045_v41 }
 0x846   : > { %v7570_v47 = vpop.eup %7569 }
 0x847   : > { %v6133_v44 = vmul.f32 %v7626_v39, %v6077_v31  ;;  %v6078_v29 = vmul.f32 %v7570_v47, %v11049_v19 }
 0x849   : > { %v6189_v24 = vadd.f32 %v7627_v57, %v6133_v44  ;;  %v6134_v50 = vmul.f32 %v7626_v39, %v6078_v29 }
 0x84b   : > { %6239 = vst.msk [vmem:[%s10913_s22 + $0x180] sm:$0xff] %vm3252_vm2, %v6189_v24  ;;  %v6190_v0 = vadd.f32 %v7627_v57, %v6134_v50 }
 0x84d   : > { %6240 = vst.msk [vmem:[%s10913_s22 + $0x188] sm:$0xff] %vm3252_vm2, %v6190_v0 }
 0x84e PF: > { %s25_s18 = sadd.s32 1, %s7634_s18  }
 0x84f   : > { %p22_p4 = scmp.ge.s32.totalorder %s25_s18, 4  }
 0x851   :  { %24 = sbr.rel (!%p22_p4) target bundleno = 1 (0x1), region = 110 }

</bundles_post_ra>
